<compile_context>
chip_gen: v7x
topology: tpu7x:2x2x1
jax: 0.10.0
libtpu: 0.0.40
codegen_flags: <defaults>
</compile_context>

<pallas_src>
import math

import jax
import jax.numpy as jnp
from jax.experimental import pallas as pl
from jax.experimental.pallas import tpu as pltpu

LANE = 128      # TPU lane width: channel / K axes padded to a multiple of this
BN_EPS = 1e-5


def _round_up(n, m):
    return ((n + m - 1) // m) * m


def _vmem_limit_bytes():
    """~3/4 of physical VMEM: 96 MiB on 128-MiB parts (v5e/v6e), 48 MiB on v7x."""
    cap = 64 * 1024 * 1024
    try:
        cap = int(getattr(pltpu.get_tpu_info(), "vmem_capacity_bytes", cap))
    except Exception:
        pass
    return int(min(cap * 3 // 4, 100 * 1024 * 1024))


def _const_spec(shape, single_buffer):
    """BlockSpec for a grid-invariant operand (weights / biases / BN affine)."""
    index_map = lambda b: (0,) * len(shape)
    if single_buffer:
        # Single-buffer: these blocks never change across grid steps, so the
        # default double-buffering is pure dead VMEM (matters most on v7x).
        return pl.BlockSpec(shape, index_map, pipeline_mode=pl.Buffered(1))
    return pl.BlockSpec(shape, index_map)


def _im2col_3x3_batch(x):
    """(B, H, W, C) -> (B, H*W, 9*C) zero-padded patches, tap order (kh, kw, c)."""
    B, H, W, C = x.shape
    xp = jnp.pad(x, ((0, 0), (1, 1), (1, 1), (0, 0)))
    taps = [xp[:, kh:kh + H, kw:kw + W, :] for kh in range(3) for kw in range(3)]
    return jnp.concatenate(taps, axis=-1).reshape(B, H * W, 9 * C)


def _zero_halo_rim(pad_ref, H, W, Cp):
    """Zero only the 1-px rim of the persistent halo-pad scratch (interior is
    fully overwritten each step)."""
    pad_ref[0:1, :, :] = jnp.zeros((1, W + 2, Cp), jnp.float32)
    pad_ref[H + 1:H + 2, :, :] = jnp.zeros((1, W + 2, Cp), jnp.float32)
    pad_ref[:, 0:1, :] = jnp.zeros((H + 2, 1, Cp), jnp.float32)
    pad_ref[:, W + 1:W + 2, :] = jnp.zeros((H + 2, 1, Cp), jnp.float32)


# ---------------------------------------------------------------------------
# Stage 1: conv1 (3x3, pad 1, via pre-built patches) + SiLU + time-embedding
#          add + conv2 (3x3, pad 1); also emits per-sample per-channel
#          sum / sum-of-squares for BatchNorm.  Grid: one step per sample.
# ---------------------------------------------------------------------------
def stage1_kernel(p1_ref, w1_ref, b1_ref, temb_ref, w2_ref, b2_ref,
                  h2_ref, ssum_ref, ssq_ref, pad_ref):
    _, H, W, Cp = h2_ref.shape

    # conv1: one matmul; K = 9*Cin was lane-padded ONCE in the wrapper, so no
    # per-tap Cin->128 padding waste.  bf16 operands, f32 MXU accumulation.
    h1 = jnp.dot(p1_ref[0], w1_ref[...], preferred_element_type=jnp.float32)
    h1 = jax.nn.silu(h1 + b1_ref[...]) + temb_ref[...].reshape(1, Cp)

    # conv2: halo-pad h1 in the persistent VMEM scratch (rim-zero only), then
    # build the im2col patch matrix in bf16 (cast per tap) -> one K=9*Cp matmul.
    _zero_halo_rim(pad_ref, H, W, Cp)
    pad_ref[1:H + 1, 1:W + 1, :] = h1.reshape(H, W, Cp)
    taps = [pad_ref[kh:kh + H, kw:kw + W, :].astype(jnp.bfloat16)
            for kh in range(3) for kw in range(3)]
    patches2 = jnp.concatenate(taps, axis=-1).reshape(H * W, 9 * Cp)
    h2 = jnp.dot(patches2, w2_ref[...], preferred_element_type=jnp.float32)
    h2 = h2 + b2_ref[...]

    # h2 goes back to HBM in bf16 (halves inter-stage traffic); BN partial
    # reductions are taken from the f32 values first.
    h2_ref[...] = h2.astype(h2_ref.dtype).reshape(1, H, W, Cp)
    # NOTE: one-pass E[x^2]-mean^2 can cancel if activations develop a large
    # mean; acceptable here, clamped to >= 0 in the wrapper.
    ssum_ref[...] = jnp.sum(h2, axis=0).reshape(1, 1, Cp)
    ssq_ref[...] = jnp.sum(h2 * h2, axis=0).reshape(1, 1, Cp)


# ---------------------------------------------------------------------------
# Stage 2: BatchNorm affine (precomputed scale/shift) + SiLU +
#          stride-2 3x3 conv (pad 1) + Dropout2d mask multiply.
# ---------------------------------------------------------------------------
def stage2_kernel(h2_ref, scale_ref, shift_ref, wd_ref, bd_ref, keep_ref,
                  o_ref, pad_ref):
    _, H, W, Cp = h2_ref.shape
    _, Ho, Wo, _ = o_ref.shape

    h = h2_ref[...].reshape(H * W, Cp).astype(jnp.float32)
    h = jax.nn.silu(h * scale_ref[...] + shift_ref[...])

    # halo-pad in the persistent VMEM scratch (rim-zero only)
    _zero_halo_rim(pad_ref, H, W, Cp)
    pad_ref[1:H + 1, 1:W + 1, :] = h.reshape(H, W, Cp)
    hp = pad_ref[...]

    # De-interleave the stride-2 grid ONCE into 4 parity planes (cast to bf16
    # immediately), then build the 9 im2col taps from contiguous slices of
    # those planes -> one bf16 patch matrix, one matmul.
    planes = [[hp[pr::2, pc::2, :].astype(jnp.bfloat16) for pc in range(2)]
              for pr in range(2)]
    taps = []
    for kh in range(3):
        pr, rh = kh % 2, kh // 2
        for kw in range(3):
            pc, rw = kw % 2, kw // 2
            taps.append(planes[pr][pc][rh:rh + Ho, rw:rw + Wo, :])
    patches = jnp.concatenate(taps, axis=-1).reshape(Ho * Wo, 9 * Cp)

    y = jnp.dot(patches, wd_ref[...], preferred_element_type=jnp.float32)
    y = (y + bd_ref[...]) * keep_ref[...].reshape(1, Cp)
    o_ref[...] = y.reshape(1, Ho, Wo, Cp)


# ---------------------------------------------------------------------------
# Wrapper
# ---------------------------------------------------------------------------
def down_block_forward(x_nchw, t, packed, out_ch, p_drop=0.3, dropout_key=None):
    x = jnp.transpose(x_nchw, (0, 2, 3, 1)).astype(jnp.float32)    # NCHW -> NHWC
    B, H, W, in_ch = x.shape
    assert H % 2 == 0 and W % 2 == 0, "stride-2 path assumes even spatial dims"
    Ho, Wo = H // 2, W // 2
    K1p = packed["w1"].shape[0]
    cp = packed["w1"].shape[1]
    assert 9 * in_ch <= K1p

    # conv1 im2col in plain XLA (tiny: O(B*H*W*9*Cin)); K padded once to the
    # lane width and cast to bf16 -> lane-dense, minimal DMA + MXU work.
    p1 = _im2col_3x3_batch(x)                                      # (B, H*W, 9*Cin)
    p1 = jnp.pad(p1, ((0, 0), (0, 0), (0, K1p - p1.shape[-1]))).astype(jnp.bfloat16)

    # time-embedding MLP: O(B*C), run in plain JAX (hoisted out of the kernel)
    z = jax.nn.silu(t.reshape(B, 1) * packed["wt1"] + packed["bt1"])
    temb = (jnp.dot(z, packed["wt2"]) + packed["bt2"]).reshape(B, 1, cp)

    # Dropout2d mask (training mode): per-(sample, channel), scaled by 1/(1-p)
    if dropout_key is None:
        dropout_key = jax.random.PRNGKey(0)
    if p_drop > 0.0:
        keep = jax.random.bernoulli(dropout_key, 1.0 - p_drop, (B, cp))
        keep = keep.astype(jnp.float32) / (1.0 - p_drop)
    else:
        keep = jnp.ones((B, cp), jnp.float32)
    keep = keep.reshape(B, 1, cp)

    cparams = pltpu.CompilerParams(
        dimension_semantics=("parallel",),      # shard batch over v7x's 2 TCs
        vmem_limit_bytes=_vmem_limit_bytes(),
    )

    def run(single_buffer):
        ws = lambda shape: _const_spec(shape, single_buffer)

        # ---- stage 1: conv1 + SiLU + temb + conv2 (+ BN partial sums) --------
        h2, ssum, ssq = pl.pallas_call(
            stage1_kernel,
            grid=(B,),
            in_specs=[
                pl.BlockSpec((1, H * W, K1p), lambda b: (b, 0, 0)),
                ws((K1p, cp)),
                ws((1, cp)),
                pl.BlockSpec((1, 1, cp), lambda b: (b, 0, 0)),
                ws((9 * cp, cp)),
                ws((1, cp)),
            ],
            out_specs=[
                pl.BlockSpec((1, H, W, cp), lambda b: (b, 0, 0, 0)),
                pl.BlockSpec((1, 1, cp), lambda b: (b, 0, 0)),
                pl.BlockSpec((1, 1, cp), lambda b: (b, 0, 0)),
            ],
            out_shape=[
                jax.ShapeDtypeStruct((B, H, W, cp), jnp.bfloat16),   # bf16 hop
                jax.ShapeDtypeStruct((B, 1, cp), jnp.float32),
                jax.ShapeDtypeStruct((B, 1, cp), jnp.float32),
            ],
            scratch_shapes=[pltpu.VMEM((H + 2, W + 2, cp), jnp.float32)],
            compiler_params=cparams,
        )(p1, packed["w1"], packed["b1"], temb, packed["w2"], packed["b2"])

        # ---- BatchNorm2d stats (training mode: batch mean, biased var) -------
        n = float(B * H * W)
        mean = jnp.sum(ssum, axis=0) / n                               # (1, cp)
        var = jnp.maximum(jnp.sum(ssq, axis=0) / n - mean * mean, 0.0)
        inv = jax.lax.rsqrt(var + BN_EPS)
        scale = packed["gamma"] * inv
        shift = packed["beta"] - mean * scale

        # ---- stage 2: BN affine + SiLU + stride-2 conv + dropout --------------
        out = pl.pallas_call(
            stage2_kernel,
            grid=(B,),
            in_specs=[
                pl.BlockSpec((1, H, W, cp), lambda b: (b, 0, 0, 0)),
                ws((1, cp)),
                ws((1, cp)),
                ws((9 * cp, cp)),
                ws((1, cp)),
                pl.BlockSpec((1, 1, cp), lambda b: (b, 0, 0)),
            ],
            out_specs=pl.BlockSpec((1, Ho, Wo, cp), lambda b: (b, 0, 0, 0)),
            out_shape=jax.ShapeDtypeStruct((B, Ho, Wo, cp), jnp.float32),
            scratch_shapes=[pltpu.VMEM((H + 2, W + 2, cp), jnp.float32)],
            compiler_params=cparams,
        )(h2, scale, shift, packed["wd"], packed["bd"], keep)
        return out

    try:
        out = run(single_buffer=True)
    except Exception:
        # This jax version rejected pipeline_mode=pl.Buffered(1); fall back to
        # the default (double-buffered) weight specs.
        out = run(single_buffer=False)

    out = out[..., :out_ch]                     # strip channel padding
    return jnp.transpose(out, (0, 3, 1, 2))     # NHWC -> NCHW


# ---------------------------------------------------------------------------
# Parameters: logical (PyTorch-shaped) init + lane-padded/flattened packing
# ---------------------------------------------------------------------------
def init_params(key, in_ch, out_ch):
    ks = jax.random.split(key, 8)

    def uni(k, shape, fan_in):
        bound = 1.0 / math.sqrt(fan_in)
        return jax.random.uniform(k, shape, jnp.float32, -bound, bound)

    return {
        # conv1: Conv2d(in_ch, out_ch, 3, padding=1)  weight as (kh, kw, Cin, Cout)
        "w1": uni(ks[0], (3, 3, in_ch, out_ch), in_ch * 9),
        "b1": uni(ks[1], (out_ch,), in_ch * 9),
        # conv2: Conv2d(out_ch, out_ch, 3, padding=1)
        "w2": uni(ks[2], (3, 3, out_ch, out_ch), out_ch * 9),
        "b2": uni(ks[3], (out_ch,), out_ch * 9),
        # BatchNorm2d(out_ch)
        "gamma": jnp.ones((out_ch,), jnp.float32),
        "beta": jnp.zeros((out_ch,), jnp.float32),
        # downsample: Conv2d(out_ch, out_ch, 3, stride=2, padding=1)
        "wd": uni(ks[4], (3, 3, out_ch, out_ch), out_ch * 9),
        "bd": uni(ks[5], (out_ch,), out_ch * 9),
        # time_embed: Linear(1, out_ch) -> SiLU -> Linear(out_ch, out_ch)
        "wt1": uni(ks[6], (1, out_ch), 1),
        "bt1": jnp.zeros((out_ch,), jnp.float32),
        "wt2": uni(ks[7], (out_ch, out_ch), out_ch),
        "bt2": jnp.zeros((out_ch,), jnp.float32),
    }


def pack_params(params):
    """Pad channel axes to the 128-lane width, flatten conv weights to the
    im2col layout, and cast matmul weights to bf16 (f32 accumulation).

    conv1's weight is packed as (round_up(9*Cin, 128), Cout_p): only the K
    axis is padded, matching the wrapper-built patch matrix (no per-tap
    Cin->128 padding).  NOTE: conv matmuls use bf16 operands -> results match
    the f32 PyTorch reference only to bf16 tolerance.
    """
    in_ch = params["w1"].shape[2]
    out_ch = params["w1"].shape[3]
    cp = _round_up(out_ch, LANE)
    k1 = 9 * in_ch
    k1p = _round_up(k1, LANE)

    def vec(v):
        return jnp.zeros((1, cp), jnp.float32).at[0, :out_ch].set(v.reshape(-1))

    def conv_w_full(w):   # (3, 3, out_ch, out_ch) -> (9*cp, cp), per-tap pad
        wp = jnp.zeros((3, 3, cp, cp), jnp.float32).at[:, :, :out_ch, :out_ch].set(w)
        return wp.reshape(9 * cp, cp).astype(jnp.bfloat16)

    w1 = (jnp.zeros((k1p, cp), jnp.float32)
          .at[:k1, :out_ch].set(params["w1"].reshape(k1, out_ch))
          .astype(jnp.bfloat16))

    return {
        "w1": w1,
        "b1": vec(params["b1"]),
        "w2": conv_w_full(params["w2"]),
        "b2": vec(params["b2"]),
        "wd": conv_w_full(params["wd"]),
        "bd": vec(params["bd"]),
        "gamma": vec(params["gamma"]),
        "beta": vec(params["beta"]),
        # time-embedding MLP (runs as tiny plain-JAX in the wrapper)
        "wt1": jnp.zeros((1, cp), jnp.float32).at[:, :out_ch].set(params["wt1"]),
        "bt1": vec(params["bt1"]),
        "wt2": jnp.zeros((cp, cp), jnp.float32).at[:out_ch, :out_ch].set(params["wt2"]),
        "bt2": vec(params["bt2"]),
    }


if __name__ == "__main__":
    B, in_ch, out_ch, H, W = 2, 4, 8, 16, 16
    key = jax.random.PRNGKey(0)
    kx, kt, kp, kd = jax.random.split(key, 4)

    x = jax.random.normal(kx, (B, in_ch, H, W), jnp.float32)   # NCHW, like PyTorch
    t = jax.random.normal(kt, (B,), jnp.float32)               # per-sample timestep
    params = init_params(kp, in_ch, out_ch)
    packed = pack_params(params)

    y = down_block_forward(x, t, packed, out_ch, p_drop=0.3, dropout_key=kd)
    y = jax.block_until_ready(y)

    assert y.shape == (B, out_ch, H // 2, W // 2), y.shape
    assert bool(jnp.all(jnp.isfinite(y)))
    print("KERNEL_OK")
</pallas_src>

<mosaic_0001>
module attributes {stable_mosaic.version = 11 : i64} {
  func.func @stage1_kernel(%arg0: i32, %arg1: memref<1x256x128xbf16, #tpu.memory_space<vmem>>, %arg2: memref<128x128xbf16, #tpu.memory_space<vmem>>, %arg3: memref<1x128xf32, #tpu.memory_space<vmem>>, %arg4: memref<1x1x128xf32, #tpu.memory_space<vmem>>, %arg5: memref<1152x128xbf16, #tpu.memory_space<vmem>>, %arg6: memref<1x128xf32, #tpu.memory_space<vmem>>, %arg7: memref<1x16x16x128xbf16, #tpu.memory_space<vmem>>, %arg8: memref<1x1x128xf32, #tpu.memory_space<vmem>>, %arg9: memref<1x1x128xf32, #tpu.memory_space<vmem>>, %arg10: memref<18x18x128xf32, #tpu.memory_space<vmem>>) attributes {dimension_semantics = [#tpu.dimension_semantics<parallel>], iteration_bounds = array<i64: 2>, scalar_prefetch = 0 : i64, scratch_operands = 1 : i64, tpu.core_type = #tpu.core_type<tc>, window_params = [{transform_indices = @transform_0, window_bounds = array<i64: 1, 256, 128>}, {pipeline_mode = #tpu.pipeline_mode<synchronous>, transform_indices = @transform_1, window_bounds = array<i64: 128, 128>}, {pipeline_mode = #tpu.pipeline_mode<synchronous>, transform_indices = @transform_2, window_bounds = array<i64: 1, 128>}, {transform_indices = @transform_3, window_bounds = array<i64: 1, 1, 128>}, {pipeline_mode = #tpu.pipeline_mode<synchronous>, transform_indices = @transform_4, window_bounds = array<i64: 1152, 128>}, {pipeline_mode = #tpu.pipeline_mode<synchronous>, transform_indices = @transform_5, window_bounds = array<i64: 1, 128>}, {transform_indices = @transform_6, window_bounds = array<i64: 1, 16, 16, 128>}, {transform_indices = @transform_7, window_bounds = array<i64: 1, 1, 128>}, {transform_indices = @transform_8, window_bounds = array<i64: 1, 1, 128>}]} {
    %c0 = arith.constant 0 : index
    %c0_0 = arith.constant 0 : index
    %c0_1 = arith.constant 0 : index
    %0 = vector.load %arg1[%c0, %c0_0, %c0_1] : memref<1x256x128xbf16, #tpu.memory_space<vmem>>, vector<1x256x128xbf16>
    %1 = vector.shape_cast %0 : vector<1x256x128xbf16> to vector<256x128xbf16>
    %c0_2 = arith.constant 0 : index
    %c0_3 = arith.constant 0 : index
    %2 = vector.load %arg2[%c0_2, %c0_3] : memref<128x128xbf16, #tpu.memory_space<vmem>>, vector<128x128xbf16>
    %cst = arith.constant dense<0.000000e+00> : vector<256x128xf32>
    %3 = tpu.matmul %1, %2, %cst {dimension_numbers = #tpu.dot_dimension_numbers<[1], [0], [0], [1], [0, 0, 1, 1], [], []>} : vector<256x128xbf16>, vector<128x128xbf16>, vector<256x128xf32> -> vector<256x128xf32>
    %c0_4 = arith.constant 0 : index
    %c0_5 = arith.constant 0 : index
    %4 = vector.load %arg3[%c0_4, %c0_5] : memref<1x128xf32, #tpu.memory_space<vmem>>, vector<1x128xf32>
    %5 = vector.broadcast %4 : vector<1x128xf32> to vector<256x128xf32>
    %6 = arith.addf %3, %5 : vector<256x128xf32>
    %7 = arith.negf %6 : vector<256x128xf32>
    %8 = math.exp %7 : vector<256x128xf32>
    %cst_6 = arith.constant 1.000000e+00 : f32
    %9 = vector.broadcast %cst_6 : f32 to vector<256x128xf32>
    %10 = arith.addf %9, %8 : vector<256x128xf32>
    %11 = arith.divf %9, %10 : vector<256x128xf32>
    %12 = arith.mulf %6, %11 : vector<256x128xf32>
    %c0_7 = arith.constant 0 : index
    %c0_8 = arith.constant 0 : index
    %c0_9 = arith.constant 0 : index
    %13 = vector.load %arg4[%c0_7, %c0_8, %c0_9] : memref<1x1x128xf32, #tpu.memory_space<vmem>>, vector<1x1x128xf32>
    %14 = vector.shape_cast %13 : vector<1x1x128xf32> to vector<1x128xf32>
    %15 = vector.broadcast %14 : vector<1x128xf32> to vector<256x128xf32>
    %16 = arith.addf %12, %15 : vector<256x128xf32>
    %cst_10 = arith.constant 0.000000e+00 : f32
    %17 = vector.broadcast %cst_10 : f32 to vector<1x18x128xf32>
    %c0_11 = arith.constant 0 : index
    %c0_12 = arith.constant 0 : index
    %c0_13 = arith.constant 0 : index
    %18 = vector.load %arg10[%c0_11, %c0_12, %c0_13] : memref<18x18x128xf32, #tpu.memory_space<vmem>>, vector<1x18x128xf32>
    tpu.vector_store %arg10[%c0_11, %c0_12, %c0_13], %17 {strides = array<i32>} : memref<18x18x128xf32, #tpu.memory_space<vmem>>, vector<1x18x128xf32>,
    %cst_14 = arith.constant 0.000000e+00 : f32
    %19 = vector.broadcast %cst_14 : f32 to vector<1x18x128xf32>
    %c17 = arith.constant 17 : index
    %c0_15 = arith.constant 0 : index
    %c0_16 = arith.constant 0 : index
    %20 = vector.load %arg10[%c17, %c0_15, %c0_16] : memref<18x18x128xf32, #tpu.memory_space<vmem>>, vector<1x18x128xf32>
    tpu.vector_store %arg10[%c17, %c0_15, %c0_16], %19 {strides = array<i32>} : memref<18x18x128xf32, #tpu.memory_space<vmem>>, vector<1x18x128xf32>,
    %cst_17 = arith.constant 0.000000e+00 : f32
    %21 = vector.broadcast %cst_17 : f32 to vector<18x1x128xf32>
    %c0_18 = arith.constant 0 : index
    %c0_19 = arith.constant 0 : index
    %c0_20 = arith.constant 0 : index
    %22 = vector.load %arg10[%c0_18, %c0_19, %c0_20] : memref<18x18x128xf32, #tpu.memory_space<vmem>>, vector<18x1x128xf32>
    tpu.vector_store %arg10[%c0_18, %c0_19, %c0_20], %21 {strides = array<i32>} : memref<18x18x128xf32, #tpu.memory_space<vmem>>, vector<18x1x128xf32>,
    %cst_21 = arith.constant 0.000000e+00 : f32
    %23 = vector.broadcast %cst_21 : f32 to vector<18x1x128xf32>
    %c0_22 = arith.constant 0 : index
    %c17_23 = arith.constant 17 : index
    %c0_24 = arith.constant 0 : index
    %24 = vector.load %arg10[%c0_22, %c17_23, %c0_24] : memref<18x18x128xf32, #tpu.memory_space<vmem>>, vector<18x1x128xf32>
    tpu.vector_store %arg10[%c0_22, %c17_23, %c0_24], %23 {strides = array<i32>} : memref<18x18x128xf32, #tpu.memory_space<vmem>>, vector<18x1x128xf32>,
    %25 = vector.shape_cast %16 : vector<256x128xf32> to vector<16x16x128xf32>
    %c1 = arith.constant 1 : index
    %c1_25 = arith.constant 1 : index
    %c0_26 = arith.constant 0 : index
    %26 = vector.load %arg10[%c1, %c1_25, %c0_26] : memref<18x18x128xf32, #tpu.memory_space<vmem>>, vector<16x16x128xf32>
    tpu.vector_store %arg10[%c1, %c1_25, %c0_26], %25 {strides = array<i32>} : memref<18x18x128xf32, #tpu.memory_space<vmem>>, vector<16x16x128xf32>,
    %c0_27 = arith.constant 0 : index
    %c0_28 = arith.constant 0 : index
    %c0_29 = arith.constant 0 : index
    %27 = vector.load %arg10[%c0_27, %c0_28, %c0_29] : memref<18x18x128xf32, #tpu.memory_space<vmem>>, vector<16x16x128xf32>
    %28 = arith.truncf %27 : vector<16x16x128xf32> to vector<16x16x128xbf16>
    %c0_30 = arith.constant 0 : index
    %c1_31 = arith.constant 1 : index
    %c0_32 = arith.constant 0 : index
    %29 = vector.load %arg10[%c0_30, %c1_31, %c0_32] : memref<18x18x128xf32, #tpu.memory_space<vmem>>, vector<16x16x128xf32>
    %30 = arith.truncf %29 : vector<16x16x128xf32> to vector<16x16x128xbf16>
    %c0_33 = arith.constant 0 : index
    %c2 = arith.constant 2 : index
    %c0_34 = arith.constant 0 : index
    %31 = vector.load %arg10[%c0_33, %c2, %c0_34] : memref<18x18x128xf32, #tpu.memory_space<vmem>>, vector<16x16x128xf32>
    %32 = arith.truncf %31 : vector<16x16x128xf32> to vector<16x16x128xbf16>
    %c1_35 = arith.constant 1 : index
    %c0_36 = arith.constant 0 : index
    %c0_37 = arith.constant 0 : index
    %33 = vector.load %arg10[%c1_35, %c0_36, %c0_37] : memref<18x18x128xf32, #tpu.memory_space<vmem>>, vector<16x16x128xf32>
    %34 = arith.truncf %33 : vector<16x16x128xf32> to vector<16x16x128xbf16>
    %c1_38 = arith.constant 1 : index
    %c1_39 = arith.constant 1 : index
    %c0_40 = arith.constant 0 : index
    %35 = vector.load %arg10[%c1_38, %c1_39, %c0_40] : memref<18x18x128xf32, #tpu.memory_space<vmem>>, vector<16x16x128xf32>
    %36 = arith.truncf %35 : vector<16x16x128xf32> to vector<16x16x128xbf16>
    %c1_41 = arith.constant 1 : index
    %c2_42 = arith.constant 2 : index
    %c0_43 = arith.constant 0 : index
    %37 = vector.load %arg10[%c1_41, %c2_42, %c0_43] : memref<18x18x128xf32, #tpu.memory_space<vmem>>, vector<16x16x128xf32>
    %38 = arith.truncf %37 : vector<16x16x128xf32> to vector<16x16x128xbf16>
    %c2_44 = arith.constant 2 : index
    %c0_45 = arith.constant 0 : index
    %c0_46 = arith.constant 0 : index
    %39 = vector.load %arg10[%c2_44, %c0_45, %c0_46] : memref<18x18x128xf32, #tpu.memory_space<vmem>>, vector<16x16x128xf32>
    %40 = arith.truncf %39 : vector<16x16x128xf32> to vector<16x16x128xbf16>
    %c2_47 = arith.constant 2 : index
    %c1_48 = arith.constant 1 : index
    %c0_49 = arith.constant 0 : index
    %41 = vector.load %arg10[%c2_47, %c1_48, %c0_49] : memref<18x18x128xf32, #tpu.memory_space<vmem>>, vector<16x16x128xf32>
    %42 = arith.truncf %41 : vector<16x16x128xf32> to vector<16x16x128xbf16>
    %c2_50 = arith.constant 2 : index
    %c2_51 = arith.constant 2 : index
    %c0_52 = arith.constant 0 : index
    %43 = vector.load %arg10[%c2_50, %c2_51, %c0_52] : memref<18x18x128xf32, #tpu.memory_space<vmem>>, vector<16x16x128xf32>
    %44 = arith.truncf %43 : vector<16x16x128xf32> to vector<16x16x128xbf16>
    %45 = tpu.concatenate %28, %30, %32, %34, %36, %38, %40, %42, %44 in 2 : vector<16x16x128xbf16>, vector<16x16x128xbf16>, vector<16x16x128xbf16>, vector<16x16x128xbf16>, vector<16x16x128xbf16>, vector<16x16x128xbf16>, vector<16x16x128xbf16>, vector<16x16x128xbf16>, vector<16x16x128xbf16> -> vector<16x16x1152xbf16>
    %46 = vector.shape_cast %45 : vector<16x16x1152xbf16> to vector<256x1152xbf16>
    %c0_53 = arith.constant 0 : index
    %c0_54 = arith.constant 0 : index
    %47 = vector.load %arg5[%c0_53, %c0_54] : memref<1152x128xbf16, #tpu.memory_space<vmem>>, vector<1152x128xbf16>
    %cst_55 = arith.constant dense<0.000000e+00> : vector<256x128xf32>
    %48 = tpu.matmul %46, %47, %cst_55 {dimension_numbers = #tpu.dot_dimension_numbers<[1], [0], [0], [1], [0, 0, 1, 1], [], []>} : vector<256x1152xbf16>, vector<1152x128xbf16>, vector<256x128xf32> -> vector<256x128xf32>
    %c0_56 = arith.constant 0 : index
    %c0_57 = arith.constant 0 : index
    %49 = vector.load %arg6[%c0_56, %c0_57] : memref<1x128xf32, #tpu.memory_space<vmem>>, vector<1x128xf32>
    %50 = vector.broadcast %49 : vector<1x128xf32> to vector<256x128xf32>
    %51 = arith.addf %48, %50 : vector<256x128xf32>
    %52 = arith.truncf %51 : vector<256x128xf32> to vector<256x128xbf16>
    %53 = vector.shape_cast %52 : vector<256x128xbf16> to vector<1x16x16x128xbf16>
    %c0_58 = arith.constant 0 : index
    %c0_59 = arith.constant 0 : index
    %c0_60 = arith.constant 0 : index
    %c0_61 = arith.constant 0 : index
    %54 = vector.load %arg7[%c0_58, %c0_59, %c0_60, %c0_61] : memref<1x16x16x128xbf16, #tpu.memory_space<vmem>>, vector<1x16x16x128xbf16>
    tpu.vector_store %arg7[%c0_58, %c0_59, %c0_60, %c0_61], %53 {strides = array<i32>} : memref<1x16x16x128xbf16, #tpu.memory_space<vmem>>, vector<1x16x16x128xbf16>,
    %cst_62 = arith.constant dense<0.000000e+00> : vector<128xf32>
    %55 = vector.multi_reduction <add>, %51, %cst_62 [0] : vector<256x128xf32> to vector<128xf32>
    %56 = vector.shape_cast %55 : vector<128xf32> to vector<1x1x128xf32>
    %c0_63 = arith.constant 0 : index
    %c0_64 = arith.constant 0 : index
    %c0_65 = arith.constant 0 : index
    %57 = vector.load %arg8[%c0_63, %c0_64, %c0_65] : memref<1x1x128xf32, #tpu.memory_space<vmem>>, vector<1x1x128xf32>
    tpu.vector_store %arg8[%c0_63, %c0_64, %c0_65], %56 {strides = array<i32>} : memref<1x1x128xf32, #tpu.memory_space<vmem>>, vector<1x1x128xf32>,
    %58 = arith.mulf %51, %51 : vector<256x128xf32>
    %cst_66 = arith.constant dense<0.000000e+00> : vector<128xf32>
    %59 = vector.multi_reduction <add>, %58, %cst_66 [0] : vector<256x128xf32> to vector<128xf32>
    %60 = vector.shape_cast %59 : vector<128xf32> to vector<1x1x128xf32>
    %c0_67 = arith.constant 0 : index
    %c0_68 = arith.constant 0 : index
    %c0_69 = arith.constant 0 : index
    %61 = vector.load %arg9[%c0_67, %c0_68, %c0_69] : memref<1x1x128xf32, #tpu.memory_space<vmem>>, vector<1x1x128xf32>
    tpu.vector_store %arg9[%c0_67, %c0_68, %c0_69], %60 {strides = array<i32>} : memref<1x1x128xf32, #tpu.memory_space<vmem>>, vector<1x1x128xf32>,
    return
  }
  func.func @transform_0(%arg0: i32) -> (i32, i32, i32) {
    %c0_i32 = arith.constant 0 : i32
    %c0_i32_0 = arith.constant 0 : i32
    %c0_i32_1 = arith.constant 0 : i32
    return %arg0, %c0_i32, %c0_i32_0 : i32, i32, i32
  }
  func.func @transform_1(%arg0: i32) -> (i32, i32) {
    %c0_i32 = arith.constant 0 : i32
    %c0_i32_0 = arith.constant 0 : i32
    %c0_i32_1 = arith.constant 0 : i32
    return %c0_i32, %c0_i32_0 : i32, i32
  }
  func.func @transform_2(%arg0: i32) -> (i32, i32) {
    %c0_i32 = arith.constant 0 : i32
    %c0_i32_0 = arith.constant 0 : i32
    %c0_i32_1 = arith.constant 0 : i32
    return %c0_i32, %c0_i32_0 : i32, i32
  }
  func.func @transform_3(%arg0: i32) -> (i32, i32, i32) {
    %c0_i32 = arith.constant 0 : i32
    %c0_i32_0 = arith.constant 0 : i32
    %c0_i32_1 = arith.constant 0 : i32
    return %arg0, %c0_i32, %c0_i32_0 : i32, i32, i32
  }
  func.func @transform_4(%arg0: i32) -> (i32, i32) {
    %c0_i32 = arith.constant 0 : i32
    %c0_i32_0 = arith.constant 0 : i32
    %c0_i32_1 = arith.constant 0 : i32
    return %c0_i32, %c0_i32_0 : i32, i32
  }
  func.func @transform_5(%arg0: i32) -> (i32, i32) {
    %c0_i32 = arith.constant 0 : i32
    %c0_i32_0 = arith.constant 0 : i32
    %c0_i32_1 = arith.constant 0 : i32
    return %c0_i32, %c0_i32_0 : i32, i32
  }
  func.func @transform_6(%arg0: i32) -> (i32, i32, i32, i32) {
    %c0_i32 = arith.constant 0 : i32
    %c0_i32_0 = arith.constant 0 : i32
    %c0_i32_1 = arith.constant 0 : i32
    %c0_i32_2 = arith.constant 0 : i32
    return %arg0, %c0_i32, %c0_i32_0, %c0_i32_1 : i32, i32, i32, i32
  }
  func.func @transform_7(%arg0: i32) -> (i32, i32, i32) {
    %c0_i32 = arith.constant 0 : i32
    %c0_i32_0 = arith.constant 0 : i32
    %c0_i32_1 = arith.constant 0 : i32
    return %arg0, %c0_i32, %c0_i32_0 : i32, i32, i32
  }
  func.func @transform_8(%arg0: i32) -> (i32, i32, i32) {
    %c0_i32 = arith.constant 0 : i32
    %c0_i32_0 = arith.constant 0 : i32
    %c0_i32_1 = arith.constant 0 : i32
    return %arg0, %c0_i32, %c0_i32_0 : i32, i32, i32
  }
}

module attributes {stable_mosaic.version = 11 : i64} {
  func.func @stage1_kernel(%arg0: i32, %arg1: memref<1x256x128xbf16, #tpu.memory_space<vmem>>, %arg2: memref<128x128xbf16, #tpu.memory_space<vmem>>, %arg3: memref<1x128xf32, #tpu.memory_space<vmem>>, %arg4: memref<1x1x128xf32, #tpu.memory_space<vmem>>, %arg5: memref<1152x128xbf16, #tpu.memory_space<vmem>>, %arg6: memref<1x128xf32, #tpu.memory_space<vmem>>, %arg7: memref<1x16x16x128xbf16, #tpu.memory_space<vmem>>, %arg8: memref<1x1x128xf32, #tpu.memory_space<vmem>>, %arg9: memref<1x1x128xf32, #tpu.memory_space<vmem>>, %arg10: memref<18x18x128xf32, #tpu.memory_space<vmem>>) attributes {dimension_semantics = [#tpu.dimension_semantics<parallel>], iteration_bounds = array<i64: 2>, scalar_prefetch = 0 : i64, scratch_operands = 1 : i64, tpu.core_type = #tpu.core_type<tc>, window_params = [{transform_indices = @transform_0, window_bounds = array<i64: 1, 256, 128>}, {pipeline_mode = #tpu.pipeline_mode<synchronous>, transform_indices = @transform_1, window_bounds = array<i64: 128, 128>}, {pipeline_mode = #tpu.pipeline_mode<synchronous>, transform_indices = @transform_2, window_bounds = array<i64: 1, 128>}, {transform_indices = @transform_3, window_bounds = array<i64: 1, 1, 128>}, {pipeline_mode = #tpu.pipeline_mode<synchronous>, transform_indices = @transform_4, window_bounds = array<i64: 1152, 128>}, {pipeline_mode = #tpu.pipeline_mode<synchronous>, transform_indices = @transform_5, window_bounds = array<i64: 1, 128>}, {transform_indices = @transform_6, window_bounds = array<i64: 1, 16, 16, 128>}, {transform_indices = @transform_7, window_bounds = array<i64: 1, 1, 128>}, {transform_indices = @transform_8, window_bounds = array<i64: 1, 1, 128>}]} {
    %c0 = arith.constant 0 : index
    %c0_0 = arith.constant 0 : index
    %c0_1 = arith.constant 0 : index
    %0 = vector.load %arg1[%c0, %c0_0, %c0_1] : memref<1x256x128xbf16, #tpu.memory_space<vmem>>, vector<1x256x128xbf16>
    %1 = vector.shape_cast %0 : vector<1x256x128xbf16> to vector<256x128xbf16>
    %c0_2 = arith.constant 0 : index
    %c0_3 = arith.constant 0 : index
    %2 = vector.load %arg2[%c0_2, %c0_3] : memref<128x128xbf16, #tpu.memory_space<vmem>>, vector<128x128xbf16>
    %cst = arith.constant dense<0.000000e+00> : vector<256x128xf32>
    %3 = tpu.matmul %1, %2, %cst {dimension_numbers = #tpu.dot_dimension_numbers<[1], [0], [0], [1], [0, 0, 1, 1], [], []>} : vector<256x128xbf16>, vector<128x128xbf16>, vector<256x128xf32> -> vector<256x128xf32>
    %c0_4 = arith.constant 0 : index
    %c0_5 = arith.constant 0 : index
    %4 = vector.load %arg3[%c0_4, %c0_5] : memref<1x128xf32, #tpu.memory_space<vmem>>, vector<1x128xf32>
    %5 = vector.broadcast %4 : vector<1x128xf32> to vector<256x128xf32>
    %6 = arith.addf %3, %5 : vector<256x128xf32>
    %7 = arith.negf %6 : vector<256x128xf32>
    %8 = math.exp %7 : vector<256x128xf32>
    %cst_6 = arith.constant 1.000000e+00 : f32
    %9 = vector.broadcast %cst_6 : f32 to vector<256x128xf32>
    %10 = arith.addf %9, %8 : vector<256x128xf32>
    %11 = arith.divf %9, %10 : vector<256x128xf32>
    %12 = arith.mulf %6, %11 : vector<256x128xf32>
    %c0_7 = arith.constant 0 : index
    %c0_8 = arith.constant 0 : index
    %c0_9 = arith.constant 0 : index
    %13 = vector.load %arg4[%c0_7, %c0_8, %c0_9] : memref<1x1x128xf32, #tpu.memory_space<vmem>>, vector<1x1x128xf32>
    %14 = vector.shape_cast %13 : vector<1x1x128xf32> to vector<1x128xf32>
    %15 = vector.broadcast %14 : vector<1x128xf32> to vector<256x128xf32>
    %16 = arith.addf %12, %15 : vector<256x128xf32>
    %cst_10 = arith.constant 0.000000e+00 : f32
    %17 = vector.broadcast %cst_10 : f32 to vector<1x18x128xf32>
    %c0_11 = arith.constant 0 : index
    %c0_12 = arith.constant 0 : index
    %c0_13 = arith.constant 0 : index
    %18 = vector.load %arg10[%c0_11, %c0_12, %c0_13] : memref<18x18x128xf32, #tpu.memory_space<vmem>>, vector<1x18x128xf32>
    tpu.vector_store %arg10[%c0_11, %c0_12, %c0_13], %17 {strides = array<i32>} : memref<18x18x128xf32, #tpu.memory_space<vmem>>, vector<1x18x128xf32>,
    %cst_14 = arith.constant 0.000000e+00 : f32
    %19 = vector.broadcast %cst_14 : f32 to vector<1x18x128xf32>
    %c17 = arith.constant 17 : index
    %c0_15 = arith.constant 0 : index
    %c0_16 = arith.constant 0 : index
    %20 = vector.load %arg10[%c17, %c0_15, %c0_16] : memref<18x18x128xf32, #tpu.memory_space<vmem>>, vector<1x18x128xf32>
    tpu.vector_store %arg10[%c17, %c0_15, %c0_16], %19 {strides = array<i32>} : memref<18x18x128xf32, #tpu.memory_space<vmem>>, vector<1x18x128xf32>,
    %cst_17 = arith.constant 0.000000e+00 : f32
    %21 = vector.broadcast %cst_17 : f32 to vector<18x1x128xf32>
    %c0_18 = arith.constant 0 : index
    %c0_19 = arith.constant 0 : index
    %c0_20 = arith.constant 0 : index
    %22 = vector.load %arg10[%c0_18, %c0_19, %c0_20] : memref<18x18x128xf32, #tpu.memory_space<vmem>>, vector<18x1x128xf32>
    tpu.vector_store %arg10[%c0_18, %c0_19, %c0_20], %21 {strides = array<i32>} : memref<18x18x128xf32, #tpu.memory_space<vmem>>, vector<18x1x128xf32>,
    %cst_21 = arith.constant 0.000000e+00 : f32
    %23 = vector.broadcast %cst_21 : f32 to vector<18x1x128xf32>
    %c0_22 = arith.constant 0 : index
    %c17_23 = arith.constant 17 : index
    %c0_24 = arith.constant 0 : index
    %24 = vector.load %arg10[%c0_22, %c17_23, %c0_24] : memref<18x18x128xf32, #tpu.memory_space<vmem>>, vector<18x1x128xf32>
    tpu.vector_store %arg10[%c0_22, %c17_23, %c0_24], %23 {strides = array<i32>} : memref<18x18x128xf32, #tpu.memory_space<vmem>>, vector<18x1x128xf32>,
    %25 = vector.shape_cast %16 : vector<256x128xf32> to vector<16x16x128xf32>
    %c1 = arith.constant 1 : index
    %c1_25 = arith.constant 1 : index
    %c0_26 = arith.constant 0 : index
    %26 = vector.load %arg10[%c1, %c1_25, %c0_26] : memref<18x18x128xf32, #tpu.memory_space<vmem>>, vector<16x16x128xf32>
    tpu.vector_store %arg10[%c1, %c1_25, %c0_26], %25 {strides = array<i32>} : memref<18x18x128xf32, #tpu.memory_space<vmem>>, vector<16x16x128xf32>,
    %c0_27 = arith.constant 0 : index
    %c0_28 = arith.constant 0 : index
    %c0_29 = arith.constant 0 : index
    %27 = vector.load %arg10[%c0_27, %c0_28, %c0_29] : memref<18x18x128xf32, #tpu.memory_space<vmem>>, vector<16x16x128xf32>
    %28 = arith.truncf %27 : vector<16x16x128xf32> to vector<16x16x128xbf16>
    %c0_30 = arith.constant 0 : index
    %c1_31 = arith.constant 1 : index
    %c0_32 = arith.constant 0 : index
    %29 = vector.load %arg10[%c0_30, %c1_31, %c0_32] : memref<18x18x128xf32, #tpu.memory_space<vmem>>, vector<16x16x128xf32>
    %30 = arith.truncf %29 : vector<16x16x128xf32> to vector<16x16x128xbf16>
    %c0_33 = arith.constant 0 : index
    %c2 = arith.constant 2 : index
    %c0_34 = arith.constant 0 : index
    %31 = vector.load %arg10[%c0_33, %c2, %c0_34] : memref<18x18x128xf32, #tpu.memory_space<vmem>>, vector<16x16x128xf32>
    %32 = arith.truncf %31 : vector<16x16x128xf32> to vector<16x16x128xbf16>
    %c1_35 = arith.constant 1 : index
    %c0_36 = arith.constant 0 : index
    %c0_37 = arith.constant 0 : index
    %33 = vector.load %arg10[%c1_35, %c0_36, %c0_37] : memref<18x18x128xf32, #tpu.memory_space<vmem>>, vector<16x16x128xf32>
    %34 = arith.truncf %33 : vector<16x16x128xf32> to vector<16x16x128xbf16>
    %c1_38 = arith.constant 1 : index
    %c1_39 = arith.constant 1 : index
    %c0_40 = arith.constant 0 : index
    %35 = vector.load %arg10[%c1_38, %c1_39, %c0_40] : memref<18x18x128xf32, #tpu.memory_space<vmem>>, vector<16x16x128xf32>
    %36 = arith.truncf %35 : vector<16x16x128xf32> to vector<16x16x128xbf16>
    %c1_41 = arith.constant 1 : index
    %c2_42 = arith.constant 2 : index
    %c0_43 = arith.constant 0 : index
    %37 = vector.load %arg10[%c1_41, %c2_42, %c0_43] : memref<18x18x128xf32, #tpu.memory_space<vmem>>, vector<16x16x128xf32>
    %38 = arith.truncf %37 : vector<16x16x128xf32> to vector<16x16x128xbf16>
    %c2_44 = arith.constant 2 : index
    %c0_45 = arith.constant 0 : index
    %c0_46 = arith.constant 0 : index
    %39 = vector.load %arg10[%c2_44, %c0_45, %c0_46] : memref<18x18x128xf32, #tpu.memory_space<vmem>>, vector<16x16x128xf32>
    %40 = arith.truncf %39 : vector<16x16x128xf32> to vector<16x16x128xbf16>
    %c2_47 = arith.constant 2 : index
    %c1_48 = arith.constant 1 : index
    %c0_49 = arith.constant 0 : index
    %41 = vector.load %arg10[%c2_47, %c1_48, %c0_49] : memref<18x18x128xf32, #tpu.memory_space<vmem>>, vector<16x16x128xf32>
    %42 = arith.truncf %41 : vector<16x16x128xf32> to vector<16x16x128xbf16>
    %c2_50 = arith.constant 2 : index
    %c2_51 = arith.constant 2 : index
    %c0_52 = arith.constant 0 : index
    %43 = vector.load %arg10[%c2_50, %c2_51, %c0_52] : memref<18x18x128xf32, #tpu.memory_space<vmem>>, vector<16x16x128xf32>
    %44 = arith.truncf %43 : vector<16x16x128xf32> to vector<16x16x128xbf16>
    %45 = tpu.concatenate %28, %30, %32, %34, %36, %38, %40, %42, %44 in 2 : vector<16x16x128xbf16>, vector<16x16x128xbf16>, vector<16x16x128xbf16>, vector<16x16x128xbf16>, vector<16x16x128xbf16>, vector<16x16x128xbf16>, vector<16x16x128xbf16>, vector<16x16x128xbf16>, vector<16x16x128xbf16> -> vector<16x16x1152xbf16>
    %46 = vector.shape_cast %45 : vector<16x16x1152xbf16> to vector<256x1152xbf16>
    %c0_53 = arith.constant 0 : index
    %c0_54 = arith.constant 0 : index
    %47 = vector.load %arg5[%c0_53, %c0_54] : memref<1152x128xbf16, #tpu.memory_space<vmem>>, vector<1152x128xbf16>
    %cst_55 = arith.constant dense<0.000000e+00> : vector<256x128xf32>
    %48 = tpu.matmul %46, %47, %cst_55 {dimension_numbers = #tpu.dot_dimension_numbers<[1], [0], [0], [1], [0, 0, 1, 1], [], []>} : vector<256x1152xbf16>, vector<1152x128xbf16>, vector<256x128xf32> -> vector<256x128xf32>
    %c0_56 = arith.constant 0 : index
    %c0_57 = arith.constant 0 : index
    %49 = vector.load %arg6[%c0_56, %c0_57] : memref<1x128xf32, #tpu.memory_space<vmem>>, vector<1x128xf32>
    %50 = vector.broadcast %49 : vector<1x128xf32> to vector<256x128xf32>
    %51 = arith.addf %48, %50 : vector<256x128xf32>
    %52 = arith.truncf %51 : vector<256x128xf32> to vector<256x128xbf16>
    %53 = vector.shape_cast %52 : vector<256x128xbf16> to vector<1x16x16x128xbf16>
    %c0_58 = arith.constant 0 : index
    %c0_59 = arith.constant 0 : index
    %c0_60 = arith.constant 0 : index
    %c0_61 = arith.constant 0 : index
    %54 = vector.load %arg7[%c0_58, %c0_59, %c0_60, %c0_61] : memref<1x16x16x128xbf16, #tpu.memory_space<vmem>>, vector<1x16x16x128xbf16>
    tpu.vector_store %arg7[%c0_58, %c0_59, %c0_60, %c0_61], %53 {strides = array<i32>} : memref<1x16x16x128xbf16, #tpu.memory_space<vmem>>, vector<1x16x16x128xbf16>,
    %cst_62 = arith.constant dense<0.000000e+00> : vector<128xf32>
    %55 = vector.multi_reduction <add>, %51, %cst_62 [0] : vector<256x128xf32> to vector<128xf32>
    %56 = vector.shape_cast %55 : vector<128xf32> to vector<1x1x128xf32>
    %c0_63 = arith.constant 0 : index
    %c0_64 = arith.constant 0 : index
    %c0_65 = arith.constant 0 : index
    %57 = vector.load %arg8[%c0_63, %c0_64, %c0_65] : memref<1x1x128xf32, #tpu.memory_space<vmem>>, vector<1x1x128xf32>
    tpu.vector_store %arg8[%c0_63, %c0_64, %c0_65], %56 {strides = array<i32>} : memref<1x1x128xf32, #tpu.memory_space<vmem>>, vector<1x1x128xf32>,
    %58 = arith.mulf %51, %51 : vector<256x128xf32>
    %cst_66 = arith.constant dense<0.000000e+00> : vector<128xf32>
    %59 = vector.multi_reduction <add>, %58, %cst_66 [0] : vector<256x128xf32> to vector<128xf32>
    %60 = vector.shape_cast %59 : vector<128xf32> to vector<1x1x128xf32>
    %c0_67 = arith.constant 0 : index
    %c0_68 = arith.constant 0 : index
    %c0_69 = arith.constant 0 : index
    %61 = vector.load %arg9[%c0_67, %c0_68, %c0_69] : memref<1x1x128xf32, #tpu.memory_space<vmem>>, vector<1x1x128xf32>
    tpu.vector_store %arg9[%c0_67, %c0_68, %c0_69], %60 {strides = array<i32>} : memref<1x1x128xf32, #tpu.memory_space<vmem>>, vector<1x1x128xf32>,
    return
  }
  func.func @transform_0(%arg0: i32) -> (i32, i32, i32) {
    %c0_i32 = arith.constant 0 : i32
    %c0_i32_0 = arith.constant 0 : i32
    %c0_i32_1 = arith.constant 0 : i32
    return %arg0, %c0_i32, %c0_i32_0 : i32, i32, i32
  }
  func.func @transform_1(%arg0: i32) -> (i32, i32) {
    %c0_i32 = arith.constant 0 : i32
    %c0_i32_0 = arith.constant 0 : i32
    %c0_i32_1 = arith.constant 0 : i32
    return %c0_i32, %c0_i32_0 : i32, i32
  }
  func.func @transform_2(%arg0: i32) -> (i32, i32) {
    %c0_i32 = arith.constant 0 : i32
    %c0_i32_0 = arith.constant 0 : i32
    %c0_i32_1 = arith.constant 0 : i32
    return %c0_i32, %c0_i32_0 : i32, i32
  }
  func.func @transform_3(%arg0: i32) -> (i32, i32, i32) {
    %c0_i32 = arith.constant 0 : i32
    %c0_i32_0 = arith.constant 0 : i32
    %c0_i32_1 = arith.constant 0 : i32
    return %arg0, %c0_i32, %c0_i32_0 : i32, i32, i32
  }
  func.func @transform_4(%arg0: i32) -> (i32, i32) {
    %c0_i32 = arith.constant 0 : i32
    %c0_i32_0 = arith.constant 0 : i32
    %c0_i32_1 = arith.constant 0 : i32
    return %c0_i32, %c0_i32_0 : i32, i32
  }
  func.func @transform_5(%arg0: i32) -> (i32, i32) {
    %c0_i32 = arith.constant 0 : i32
    %c0_i32_0 = arith.constant 0 : i32
    %c0_i32_1 = arith.constant 0 : i32
    return %c0_i32, %c0_i32_0 : i32, i32
  }
  func.func @transform_6(%arg0: i32) -> (i32, i32, i32, i32) {
    %c0_i32 = arith.constant 0 : i32
    %c0_i32_0 = arith.constant 0 : i32
    %c0_i32_1 = arith.constant 0 : i32
    %c0_i32_2 = arith.constant 0 : i32
    return %arg0, %c0_i32, %c0_i32_0, %c0_i32_1 : i32, i32, i32, i32
  }
  func.func @transform_7(%arg0: i32) -> (i32, i32, i32) {
    %c0_i32 = arith.constant 0 : i32
    %c0_i32_0 = arith.constant 0 : i32
    %c0_i32_1 = arith.constant 0 : i32
    return %arg0, %c0_i32, %c0_i32_0 : i32, i32, i32
  }
  func.func @transform_8(%arg0: i32) -> (i32, i32, i32) {
    %c0_i32 = arith.constant 0 : i32
    %c0_i32_0 = arith.constant 0 : i32
    %c0_i32_1 = arith.constant 0 : i32
    return %arg0, %c0_i32, %c0_i32_0 : i32, i32, i32
  }
}

</mosaic_0001>

<bundles_post_ra>
// kernel: tpu_custom_call.1
= control target key start
LH: loop header
LB: loop body
LE: loop exit
PB: predicated region body
PF: predicated region fallthrough
CT: control target
= control target key end

     0   :  { %s5995_s0 = inlined_call_operand.hbm [shape: bf16[2,256,128], index: 0, kind: input, shape index: {}]   ;;  %s5996_s1 = inlined_call_operand.hbm [shape: bf16[128,128], index: 1, kind: input, shape index: {}]   ;;  %s5997_s2 = inlined_call_operand.vmem [shape: f32[1,128], index: 2, kind: input, shape index: {}]   ;;  %s5998_s3 = inlined_call_operand.vmem [shape: f32[2,1,128], index: 3, kind: input, shape index: {}]   ;;  %s5999_s4 = inlined_call_operand.hbm [shape: bf16[1152,128], index: 4, kind: input, shape index: {}]   ;;  %s6000_s5 = inlined_call_operand.vmem [shape: f32[1,128], index: 5, kind: input, shape index: {}]   ;;  %s6001_s6 = inlined_call_operand.hbm [shape: bf16[2,16,16,128], index: 6, kind: output, shape index: {0}]   ;;  %s6002_s7 = inlined_call_operand.hbm [shape: f32[2,1,128], index: 7, kind: output, shape index: {1}]   ;;  %s6003_s8 = inlined_call_operand.hbm [shape: f32[2,1,128], index: 8, kind: output, shape index: {2}]  }
   0x1   :  { %6011 = sst [smem:[#allocation17_spill]] %s5995_s0 }
   0x2   :  { %14 = vsyncpa [#allocation4], 0 }
   0x3   :  { %16 = vsyncpa [#allocation4 + $0x1], 0 }
   0x4   :  { %17 = vsyncpa [#allocation7], 0 }
   0x5   :  { %18 = vsyncpa [#allocation5], 0 }
   0x6   :  { %20 = vsyncpa [#allocation5 + $0x1], 0 }
   0x7   :  { %21 = vsyncpa [#allocation11], 0 }
   0x8   :  { %23 = vsyncpa [#allocation11 + $0x1], 0  ;;  %s4859_s27 = smov 0   ;;  %s4861_s28 = smov 0  }
   0x9   :  { %s4863_s29 = smov 0   ;;  %s4865_s30 = smov 0  }
   0xa LB: > { %s4880_s9 = sadd.s32 4294967295, %s4801_s30   ;;  %s6005_s10 = sadd.s32 4294967294, %s4801_s30   ;;  %s4801_s30 = sphi %s4865_s30, %s6033_s30   ;;  %s4797_s29 = sphi %s4863_s29, %s6032_s29   ;;  %s4793_s28 = sphi %s4861_s28, %s6031_s28   ;;  %s4789_s27 = sphi %s4859_s27, %s6030_s27  }
   0xb   : > { %p49_p0 = scmp.ne.s32.totalorder %s4793_s28, %s4789_s27  ;;  %p6004_p1 = scmp.eq.s32.totalorder %s4880_s9, 0 }
   0xc   : > { %p189_p3 = scmp.eq.s32.totalorder %s6005_s10, 1  ;;  %p3375_p5 = scmp.ge.s32.totalorder %s4801_s30, 1 }
   0xd   : > { %p4891_p4 = por %p6004_p1, %p49_p0  ;;  %p248_p7 = scmp.lt.s32.totalorder %s4801_s30, 3 }
   0xe   : > { %p4896_p6 = por %p189_p3, %p49_p0  ;;  %s4803_s14 = smov [#allocation6]  }
   0xf   : > { %s6012_s11 = scalar_select %p4891_p4, 1, 0 }
  0x10   : > { %s6013_s12 = scalar_select %p4896_p6, 1, 0 }
  0x11   : > { %p4901_p8 = pnand %p3375_p5, %p248_p7  ;;  %s260_s15 = sshll.u32 %s4803_s14, 4  ;;  %s4905_s15 = int_to_ptr.vmem [resolvable:$true] %s260_s15 }
  0x12   : > { %s4804_s17 = smov [#allocation8]   ;;  %s4585_s21 = scalar_lea.hbm %s5996_s1, 1024 }
  0x13   : > { %p4294_p9 = pneg %p4901_p8  ;;  %s276_s18 = sshll.u32 %s4804_s17, 4  ;;  %s4916_s18 = int_to_ptr.vmem [resolvable:$true] %s276_s18 }
  0x14   : > { %p4586_p12 = scmp.ne.s32.totalorder %s5996_s1, %s4585_s21  ;;  %p4592_p5 = scmp.lt.u32.totalorder %s4585_s21, %s5996_s1 }
  0x15   : > { %p4912_p11 = pnand %p4294_p9, %p6004_p1 }
  0x17   : > { %p4587_p13 = pneg %p4912_p11 }
  0x19   : > { %p4588_p0 = pnand %p4587_p13, %p4586_p12 }
  0x1b   : > { %p4589_p3 = pneg %p4588_p0 }
  0x1d   : > { %p4594_p7 = pnand %p4592_p5, %p4589_p3 }
  0x1f   : > { %4597 = shalt.err (!%p4594_p7)
}
  0x20   : > { %s4598_s26 = scalar_lea.vmem %s4905_s15, 1024  ;;  %p4606_p2 = scmp.lt.s32.totalorder %s4905_s15, %s4905_s15 }
  0x21   : > { %p4599_p9 = scmp.ne.s32.totalorder %s4905_s15, %s4598_s26  ;;  %p4607_p12 = scmp.lt.s32.totalorder %s4598_s26, %s4598_s26 }
  0x23   : > { %p4601_p10 = pnand %p4599_p9, %p4587_p13  ;;  %p4608_p0 = por %p4607_p12, %p4606_p2 }
  0x25   : > { %p4602_p1 = pneg %p4601_p10 }
  0x27   : > { %p4609_p6 = pnand %p4608_p0, %p4602_p1 }
  0x29   : > { %4612 = shalt.err (!%p4609_p6)
}
  0x2a   : > { %s6006_s14 = smov 64   ;;  %s6007_s17 = smov 4  }
  0x2b   : > { %4297 = dma.hbm_to_vmem [thread:$0]  (!%p4912_p11), %s5996_s1, 1024, %s4905_s15, [#allocation7], %s6006_s14, %s6006_s14, %s6007_s17  }
  0x2c   : > { %s4613_s23 = scalar_lea.hbm %s5999_s4, 9216 }
  0x2d   : > { %p4614_p1 = scmp.ne.s32.totalorder %s5999_s4, %s4613_s23  ;;  %p4620_p10 = scmp.lt.u32.totalorder %s4613_s23, %s5999_s4 }
  0x2f   : > { %p4616_p2 = pnand %p4614_p1, %p4587_p13 }
  0x31   : > { %p4617_p6 = pneg %p4616_p2 }
  0x33   : > { %p4622_p3 = pnand %p4620_p10, %p4617_p6 }
  0x35   : > { %4625 = shalt.err (!%p4622_p3)
}
  0x36   : > { %s4626_s15 = scalar_lea.vmem %s4916_s18, 9216  ;;  %p4634_p12 = scmp.lt.s32.totalorder %s4916_s18, %s4916_s18 }
  0x37   : > { %p4627_p5 = scmp.ne.s32.totalorder %s4916_s18, %s4626_s15  ;;  %p4635_p0 = scmp.lt.s32.totalorder %s4626_s15, %s4626_s15 }
  0x39   : > { %p4629_p7 = pnand %p4627_p5, %p4587_p13  ;;  %p4636_p1 = por %p4635_p0, %p4634_p12 }
  0x3b   : > { %p4630_p9 = pneg %p4629_p7 }
  0x3d   : > { %p4637_p2 = pnand %p4636_p1, %p4630_p9 }
  0x3f   : > { %4640 = shalt.err (!%p4637_p2)
}
  0x40   : > { %4300 = dma.hbm_to_vmem [thread:$0]  (!%p4912_p11), %s5999_s4, 9216, %s4916_s18, [#allocation7], %s6006_s14, %s6006_s14, %s6007_s17  }
  0x41   : > { %s4977_s16 = sadd.s32 1, %s4801_s30   ;;  %s36_s20 = sadd.s32 1, %s4797_s29 }
  0x42   : > { %s33_s21 = ssub.s32 %s4801_s30, %s4977_s16  ;;  %p43_p13 = scmp.ne.s32.totalorder %s4797_s29, %s4793_s28 }
  0x43   : > { %p34_p6 = scmp.eq.s32.totalorder %s33_s21, 0  ;;  %p44_p10 = scmp.eq.s32.totalorder %s4801_s30, 0 }
  0x44   : > { %p6016_p3 = scmp.eq.s32.totalorder %s4880_s9, 1  ;;  %p4317_p7 = scmp.lt.s32.totalorder %s4801_s30, 2 }
  0x45   : > { %s4993_s23 = scalar_select %p34_p6, %s4797_s29, %s36_s20  }
  0x46   : > { %p4987_p5 = por %p6016_p3, %p43_p13  ;;  %p45_p9 = por %p44_p10, %p43_p13 }
  0x47   : > { %s293_s24 = sand.u32 1, %s4797_s29   ;;  %s3557_s18 = sshll.u32 %s4801_s30, 11 }
  0x48   : > { %s6017_s22 = scalar_select %p4987_p5, 1, 0 }
  0x49   : > { %s3379_s25 = sshll.u32 %s293_s24, 7  ;;  %s6018_s0 = sld [smem:[#allocation17_spill]] }
  0x4a   : > { %s297_s19 = scalar_lea.vmem [#allocation3], %s3379_s25  ;;  %p5004_p11 = pnand %p4317_p7, %p45_p9 }
  0x4b   : > { %s304_s21 = sshll.u32 %s297_s19, 4  ;;  %s5008_s14 = scalar_lea.sflag [#allocation4], %s293_s24  ;;  %s5002_s21 = int_to_ptr.vmem [resolvable:$true] %s304_s21 }
  0x4c   : > { %p4643_p0 = pneg %p5004_p11 }
  0x4f   : > { %s5000_s10 = scalar_lea.hbm %s6018_s0, %s3557_s18  ;;  %s4646_s26 = scalar_lea.hbm %s6018_s0, 4096 }
  0x50   : > { %s4641_s17 = scalar_lea.hbm %s5000_s10, 2048  ;;  %p4647_p13 = scmp.lt.u32.totalorder %s5000_s10, %s6018_s0 }
  0x51   : > { %p4642_p12 = scmp.ne.s32.totalorder %s5000_s10, %s4641_s17  ;;  %p4648_p6 = scmp.lt.u32.totalorder %s4646_s26, %s4641_s17 }
  0x52   : > { %p4650_p3 = scmp.lt.u32.totalorder %s4641_s17, %s5000_s10 }
  0x53   : > { %p4644_p1 = pnand %p4643_p0, %p4642_p12  ;;  %p4649_p10 = por %p4648_p6, %p4647_p13 }
  0x55   : > { %p4645_p2 = pneg %p4644_p1  ;;  %p4651_p7 = por %p4650_p3, %p4649_p10 }
  0x57   : > { %p4652_p9 = pnand %p4651_p7, %p4645_p2 }
  0x59   : > { %4655 = shalt.err (!%p4652_p9)
}
  0x5a   : > { %s4656_s24 = scalar_lea.vmem %s5002_s21, 2048  ;;  %s4807_s25 = smov [#allocation3]  }
  0x5b   : > { %p4657_p12 = scmp.ne.s32.totalorder %s5002_s21, %s4656_s24  ;;  %s4661_s18 = sshll.u32 %s4807_s25, 4  ;;  %s4662_s18 = int_to_ptr.vmem [resolvable:$false] %s4661_s18 }
  0x5c   : > { %s4663_s15 = scalar_lea.vmem %s4662_s18, 4096  ;;  %p4664_p4 = scmp.lt.s32.totalorder %s5002_s21, %s4662_s18 }
  0x5d   : > { %p4659_p1 = pnand %p4657_p12, %p4643_p0  ;;  %p4665_p13 = scmp.lt.s32.totalorder %s4663_s15, %s4656_s24 }
  0x5f   : > { %p4660_p5 = pneg %p4659_p1  ;;  %p4666_p6 = por %p4665_p13, %p4664_p4 }
  0x61   : > { %p4667_p10 = pnand %p4666_p6, %p4660_p5 }
  0x63   : > { %4670 = shalt.err (!%p4667_p10)
}
  0x64   : > { %s6020_s17 = smov 4   ;;  %s6021_s26 = smov 64  }
  0x65   : > { %4304 = dma.hbm_to_vmem [thread:$0]  (!%p5004_p11), %s5000_s10, 2048, %s5002_s21, %s5008_s14, %s6021_s26, %s6021_s26, %s6020_s17  }
  0x66   : > { %322 = sbr.rel (%p4901_p8) target bundleno = 991 (0x3df), region = 44  ;;  %s5042_s19 = sand.u32 (!%p4901_p8), 1, %s4793_s28  }
  0x67   : > { %s3383_s24 = sshll.u32 (!%p4901_p8), %s5042_s19, 7  ;;  %s325_s25 = scalar_lea.sflag (!%p4901_p8), [#allocation4], %s5042_s19 }
  0x68   : > { %s5048_s20 = scalar_lea.vmem (!%p4901_p8), [#allocation3], %s3383_s24  ;;  %p6022_p4 = scmp.ne.s32.totalorder (!%p4901_p8), %s6012_s11, 0 }
  0x6d   : > { %4772 = dma.done.wait (%p6022_p4), %s325_s25, 2048  }
  0x6e   : > { %4774 = vsyncadd (%p6022_p4), %s325_s25, 4294965248  ;;  %p6023_p5 = scmp.eq.s32.totalorder %s4880_s9, 0 }
  0x70   : > { %4776 = dma.done.wait (%p6023_p5), [#allocation7], 10240   ;;  %p6024_p8 = pmov %p6023_p5 }
  0x71   : > { %v4360_v0 = vld [vmem:[#allocation6] sm:$0xff]   ;;  %v4361_v1 = vld [vmem:[#allocation6 + $0x8] sm:$0xff]   ;;  %v4362_v2 = vld [vmem:[#allocation6 + $0x10] sm:$0xff]   ;;  %v4808_v42 = vmov 0.0   ;;  %p380_p11 = scmp.lt.s32.totalorder %s4880_s9, 1  ;;  %s5826_s26 = scalar_lea.vmem [#allocation9], %s3383_s24 }
  0x72   : > { %4778 = vsyncadd (%p6024_p8), [#allocation7], 4294957056  ;;  %4182 = vmatprep.subr.bf16.mxu0 %v4360_v0  ;;  %v4363_v3 = vld [vmem:[#allocation6 + $0x18] sm:$0xff]   ;;  %v4368_v4 = vld [vmem:[%s5048_s20] sm:$0xff]   ;;  %1007 = vst [vmem:[#allocation2] sm:$0xff] %v4808_v42  ;;  %s3590_s24 = sshll.u32 %s4880_s9, 11 }
  0x73   : > { %4183 = vmatpush3.bf16.msra.mxu0 %v4360_v0  ;;  %4198 = vmatprep.mubr.bf16.mxu0 %v4368_v4  ;;  %v4364_v5 = vld [vmem:[#allocation6 + $0x20] sm:$0xff]   ;;  %v4365_v6 = vld [vmem:[#allocation6 + $0x28] sm:$0xff]   ;;  %v4366_v7 = vld [vmem:[#allocation6 + $0x30] sm:$0xff]   ;;  %1008 = vst [vmem:[#allocation2 + $0x8] sm:$0xff] %v4808_v42  ;;  %s5172_s14 = scalar_select %p380_p11, %s4880_s9, 1 }
  0x74   : > { %4184 = vmatprep.subr.bf16.mxu0 %v4361_v1  ;;  %v4367_v8 = vld [vmem:[#allocation6 + $0x38] sm:$0xff]   ;;  %v4369_v9 = vld [vmem:[%s5048_s20 + $0x8] sm:$0xff]   ;;  %v4370_v10 = vld [vmem:[%s5048_s20 + $0x10] sm:$0xff]   ;;  %1009 = vst [vmem:[#allocation2 + $0x10] sm:$0x3] %v4808_v42  ;;  %s3194_s25 = sshll.u32 %s5826_s26, 4  ;;  %s5877_s13 = scalar_lea.hbm %s6001_s6, %s3590_s24  ;;  %s5879_s25 = int_to_ptr.vmem [resolvable:$true] %s3194_s25 }
  0x75   : > { %v4371_v11 = vld [vmem:[%s5048_s20 + $0x18] sm:$0xff]   ;;  %v4372_v12 = vld [vmem:[%s5048_s20 + $0x20] sm:$0xff]   ;;  %v4373_v13 = vld [vmem:[%s5048_s20 + $0x28] sm:$0xff]   ;;  %1011 = vst [vmem:[#allocation2 + $0x198] sm:$0xff] %v4808_v42  ;;  %s382_s18 = scalar_lea.vmem %s5998_s3, %s5172_s14  ;;  %s3173_s14 = scalar_lea.sflag [#allocation5], %s5042_s19 }
  0x76   : > { %v4374_v14 = vld [vmem:[%s5048_s20 + $0x30] sm:$0xff]   ;;  %v4375_v15 = vld [vmem:[%s5048_s20 + $0x38] sm:$0xff]   ;;  %v4376_v16 = vld [vmem:[%s5048_s20 + $0x40] sm:$0xff]   ;;  %1012 = vst [vmem:[#allocation2 + $0x1a0] sm:$0xff] %v4808_v42  ;;  %s4671_s10 = scalar_lea.vmem %s5879_s25, 2048  ;;  %p6025_p2 = scmp.ne.s32.totalorder %s6017_s22, 0 }
  0x77   : > { %4185 = vmatpush3.bf16.msra.mxu0 %v4361_v1  ;;  %v4377_v17 = vld [vmem:[%s5048_s20 + $0x48] sm:$0xff]   ;;  %v4378_v18 = vld [vmem:[%s5048_s20 + $0x50] sm:$0xff]   ;;  %v4379_v19 = vld [vmem:[%s5048_s20 + $0x58] sm:$0xff]   ;;  %1013 = vst [vmem:[#allocation2 + $0x1a8] sm:$0x3] %v4808_v42  ;;  %p4672_p0 = scmp.ne.s32.totalorder %s5879_s25, %s4671_s10  ;;  %s4809_s21 = smov [#allocation9]  }
  0x78   : > { %4186 = vmatprep.subr.bf16.mxu0 %v4362_v2  ;;  %v4380_v20 = vld [vmem:[%s5048_s20 + $0x60] sm:$0xff]   ;;  %v4381_v21 = vld [vmem:[%s5048_s20 + $0x68] sm:$0xff]   ;;  %v4382_v22 = vld [vmem:[%s5048_s20 + $0x70] sm:$0xff]   ;;  %1015 = vst [vmem:[#allocation2 + $0x18] sm:$0x1] %v4808_v42 }
  0x79   : > { %v4383_v23 = vld [vmem:[%s5048_s20 + $0x78] sm:$0xff]   ;;  %v4384_v24 = vld [vmem:[#allocation8 + $0x40] sm:$0xff]   ;;  %v4386_v26 = vld [vmem:[#allocation8 + $0x48] sm:$0xff]   ;;  %1016 = vst [vmem:[#allocation2 + $0x30] sm:$0x1] %v4808_v42  ;;  %p4673_p3 = pnand %p4672_p0, %p6025_p2 }
  0x7a   : > { %v4385_v25 = vld [vmem:[#allocation8] sm:$0xff]   ;;  %3710 = vmatprep.subr.bf16.mxu1 %v4384_v24  ;;  %v4387_v27 = vld [vmem:[#allocation8 + $0x8] sm:$0xff]   ;;  %v4388_v28 = vld [vmem:[#allocation8 + $0x50] sm:$0xff]   ;;  %1017 = vst [vmem:[#allocation2 + $0x48] sm:$0x1] %v4808_v42 }
  0x7b   : > { %4187 = vmatpush3.bf16.msra.mxu0 %v4362_v2  ;;  %3711 = vmatpush3.bf16.msra.mxu1 %v4385_v25  ;;  %v4389_v29 = vld [vmem:[#allocation8 + $0x10] sm:$0xff]   ;;  %v4390_v30 = vld [vmem:[#allocation8 + $0xc0] sm:$0xff]   ;;  %v4391_v31 = vld [vmem:[#allocation8 + $0x58] sm:$0xff]   ;;  %1018 = vst [vmem:[#allocation2 + $0x60] sm:$0x1] %v4808_v42  ;;  %p4674_p7 = pneg %p4673_p3 }
  0x7c   : > { %4188 = vmatprep.subr.bf16.mxu0 %v4363_v3  ;;  %3712 = vmatprep.subr.bf16.mxu1 %v4386_v26  ;;  %v4392_v32 = vld [vmem:[#allocation8 + $0x80] sm:$0xff]   ;;  %v4393_v33 = vld [vmem:[#allocation8 + $0x18] sm:$0xff]   ;;  %v4394_v34 = vld [vmem:[#allocation8 + $0xc8] sm:$0xff]   ;;  %1019 = vst [vmem:[#allocation2 + $0x78] sm:$0x1] %v4808_v42 }
  0x7d   : > { %v4395_v35 = vld [vmem:[#allocation8 + $0x60] sm:$0xff]   ;;  %v4396_v36 = vld [vmem:[#allocation8 + $0x88] sm:$0xff]   ;;  %v4398_v38 = vld [vmem:[#allocation8 + $0xd0] sm:$0xff]   ;;  %1020 = vst [vmem:[#allocation2 + $0x90] sm:$0x1] %v4808_v42 }
  0x7e   : > { %v4397_v37 = vld [vmem:[#allocation8 + $0x20] sm:$0xff]   ;;  %v4399_v39 = vld [vmem:[#allocation8 + $0x68] sm:$0xff]   ;;  %v4400_v40 = vld [vmem:[#allocation8 + $0x90] sm:$0xff]   ;;  %1021 = vst [vmem:[#allocation2 + $0xa8] sm:$0x1] %v4808_v42 }
  0x7f   : > { %4189 = vmatpush3.bf16.msra.mxu0 %v4363_v3  ;;  %3713 = vmatpush3.bf16.msra.mxu1 %v4387_v27  ;;  %v4401_v41 = vld [vmem:[#allocation8 + $0x28] sm:$0xff]   ;;  %1022 = vst [vmem:[#allocation2 + $0xc0] sm:$0x1] %v4808_v42  ;;  %1023 = vst [vmem:[#allocation2 + $0xd8] sm:$0x1] %v4808_v42  ;;  %v4402_v43 = vld [vmem:[#allocation8 + $0xd8] sm:$0xff]  }
  0x80   : > { %4190 = vmatprep.subr.bf16.mxu0 %v4364_v5  ;;  %3714 = vmatprep.subr.bf16.mxu1 %v4388_v28  ;;  %1024 = vst [vmem:[#allocation2 + $0xf0] sm:$0x1] %v4808_v42  ;;  %1025 = vst [vmem:[#allocation2 + $0x108] sm:$0x1] %v4808_v42  ;;  %v4403_v44 = vld [vmem:[#allocation8 + $0x70] sm:$0xff]   ;;  %v4404_v45 = vld [vmem:[#allocation8 + $0x98] sm:$0xff]  }
  0x81   : > { %1026 = vst [vmem:[#allocation2 + $0x120] sm:$0x1] %v4808_v42  ;;  %1027 = vst [vmem:[#allocation2 + $0x138] sm:$0x1] %v4808_v42  ;;  %v4405_v46 = vld [vmem:[#allocation8 + $0x30] sm:$0xff]   ;;  %v4406_v47 = vld [vmem:[#allocation8 + $0xe0] sm:$0xff]  }
  0x82   : > { %1028 = vst [vmem:[#allocation2 + $0x150] sm:$0x1] %v4808_v42  ;;  %1029 = vst [vmem:[#allocation2 + $0x168] sm:$0x1] %v4808_v42  ;;  %v4407_v48 = vld [vmem:[#allocation8 + $0x78] sm:$0xff]   ;;  %v4408_v49 = vld [vmem:[#allocation8 + $0xa0] sm:$0xff]  }
  0x83   : > { %4191 = vmatpush3.bf16.msra.mxu0 %v4364_v5  ;;  %3715 = vmatpush3.bf16.msra.mxu1 %v4389_v29  ;;  %1030 = vst [vmem:[#allocation2 + $0x180] sm:$0x1] %v4808_v42  ;;  %1033 = vst [vmem:[#allocation2 + $0x29] sm:$0x1] %v4808_v42  ;;  %v4409_v50 = vld [vmem:[#allocation8 + $0x38] sm:$0xff]   ;;  %v4410_v55 = vld [vmem:[#allocation8 + $0xe8] sm:$0xff]  }
  0x84   : > { %4192 = vmatprep.subr.bf16.mxu0 %v4365_v6  ;;  %3716 = vmatprep.subr.bf16.mxu1 %v4391_v31  ;;  %1034 = vst [vmem:[#allocation2 + $0x41] sm:$0x1] %v4808_v42  ;;  %1035 = vst [vmem:[#allocation2 + $0x59] sm:$0x1] %v4808_v42  ;;  %v1131_v51 = vld [vmem:[#allocation2 + $0x1] sm:$0xff]  ;;  %v1132_v52 = vld [vmem:[#allocation2 + $0x9] sm:$0xff] }
  0x85   : > { %1036 = vst [vmem:[#allocation2 + $0x71] sm:$0x1] %v4808_v42  ;;  %1037 = vst [vmem:[#allocation2 + $0x89] sm:$0x1] %v4808_v42  ;;  %v1163_v53 = vpack.c.bf16 %v1132_v52, %v1131_v51  ;;  %v4411_v57 = vld [vmem:[#allocation8 + $0xa8] sm:$0xff]   ;;  %v4413_v58 = vld [vmem:[#allocation8 + $0xf0] sm:$0xff]  }
  0x86   : > { %1038 = vst [vmem:[#allocation2 + $0xa1] sm:$0x1] %v4808_v42  ;;  %1039 = vst [vmem:[#allocation2 + $0xb9] sm:$0x1] %v4808_v42  ;;  %v4415_v59 = vld [vmem:[#allocation8 + $0xb0] sm:$0xff]   ;;  %v4416_v60 = vld [vmem:[#allocation8 + $0xf8] sm:$0xff]  }
  0x87   : > { %4193 = vmatpush3.bf16.msra.mxu0 %v4365_v6  ;;  %3717 = vmatpush3.bf16.msra.mxu1 %v4393_v33  ;;  %1040 = vst [vmem:[#allocation2 + $0xd1] sm:$0x1] %v4808_v42  ;;  %1041 = vst [vmem:[#allocation2 + $0xe9] sm:$0x1] %v4808_v42  ;;  %v4417_v61 = vld [vmem:[#allocation8 + $0xb8] sm:$0xff]   ;;  %v4412_v62 = vld [vmem:[#allocation8 + $0x140] sm:$0xff]  }
  0x88   : > { %4194 = vmatprep.subr.bf16.mxu0 %v4366_v7  ;;  %3718 = vmatprep.subr.bf16.mxu1 %v4395_v35  ;;  %1042 = vst [vmem:[#allocation2 + $0x101] sm:$0x1] %v4808_v42  ;;  %1043 = vst [vmem:[#allocation2 + $0x119] sm:$0x1] %v4808_v42  ;;  %v4414_v63 = vld [vmem:[#allocation8 + $0x100] sm:$0xff]   ;;  %v4418_v0 = vld [vmem:[#allocation8 + $0x148] sm:$0xff]  }
  0x89   : > { %1044 = vst [vmem:[#allocation2 + $0x131] sm:$0x1] %v4808_v42  ;;  %1045 = vst [vmem:[#allocation2 + $0x149] sm:$0x1] %v4808_v42  ;;  %2131 = vmatprep.mubr.bf16.mxu1 %v1163_v53  ;;  %v4419_v1 = vld [vmem:[#allocation8 + $0x108] sm:$0xff]   ;;  %v4420_v2 = vld [vmem:[#allocation8 + $0x150] sm:$0xff]  }
  0x8a   : > { %1046 = vst [vmem:[#allocation2 + $0x161] sm:$0x1] %v4808_v42  ;;  %1047 = vst [vmem:[#allocation2 + $0x179] sm:$0x1] %v4808_v42  ;;  %v4421_v3 = vld [vmem:[#allocation8 + $0x110] sm:$0xff]   ;;  %v4422_v4 = vld [vmem:[#allocation8 + $0x158] sm:$0xff]  }
  0x8b   : > { %4195 = vmatpush3.bf16.msra.mxu0 %v4366_v7  ;;  %3719 = vmatpush3.bf16.msra.mxu1 %v4397_v37  ;;  %1048 = vst [vmem:[#allocation2 + $0x191] sm:$0x1] %v4808_v42  ;;  %1032 = vst [vmem:[#allocation2 + $0x11] sm:$0x1] %v4808_v42  ;;  %v4423_v5 = vld [vmem:[#allocation8 + $0x118] sm:$0xff]   ;;  %v4424_v6 = vld [vmem:[#allocation8 + $0x160] sm:$0xff]  }
  0x8c   : > { %4196 = vmatprep.subr.bf16.mxu0 %v4367_v8  ;;  %3720 = vmatprep.subr.bf16.mxu1 %v4399_v39  ;;  %1014 = vst [vmem:[#allocation2] sm:$0x1] %v4808_v42  ;;  %1031 = vst [vmem:[#allocation2 + $0x198] sm:$0x1] %v4808_v42  ;;  %v4425_v7 = vld [vmem:[#allocation8 + $0x1c0] sm:$0xff]   ;;  %v4434_v25 = vld [vmem:[#allocation8 + $0x130] sm:$0xff]  }
  0x8d   : > { %1049 = vst [vmem:[#allocation2 + $0x1a9] sm:$0x1] %v4808_v42 }
  0x8f   : > { %4197 = vmatpush3.bf16.msra.mxu0 %v4367_v8  ;;  %3721 = vmatpush3.bf16.msra.mxu1 %v4401_v41  ;;  %v4426_v8 = vld [vmem:[#allocation8 + $0x120] sm:$0xff]  }
  0x90   : > { %3822 = vmatprep.subr.bf16.mxu0 %v4390_v30  ;;  %3722 = vmatprep.subr.bf16.mxu1 %v4403_v44 }
  0x92   : > { %4199 = vmatmul.mubr.bf16.vlgmr.msra.gmra.mrb[0].mxu0 %v4369_v9  ;;  %v4428_v9 = vld [vmem:[#allocation8 + $0x168] sm:$0xff]  }
  0x93   : > { %4202 = vmatprep.mubr.bf16.mxu0 %v4370_v10  ;;  %3823 = vmatpush3.bf16.msra.mxu0 %v4392_v32  ;;  %v1083_v54 = vld [vmem:[#allocation2] sm:$0xff]  ;;  %v4430_v10 = vld [vmem:[#allocation8 + $0x128] sm:$0xff]  }
  0x94   : > { %3824 = vmatprep.subr.bf16.mxu0 %v4394_v34  ;;  %3723 = vmatpush3.bf16.msra.mxu1 %v4405_v46  ;;  %v1115_v56 = vpack.c.bf16 %v4808_v42, %v1083_v54  ;;  %v4436_v42 = vld [vmem:[#allocation8 + $0x178] sm:$0xff]  }
  0x95   : > { %3724 = vmatprep.subr.bf16.mxu1 %v4407_v48 }
  0x97   : > { %3825 = vmatpush3.bf16.msra.mxu0 %v4396_v36 }
  0x98   : > { %3826 = vmatprep.subr.bf16.mxu0 %v4398_v38  ;;  %3725 = vmatpush3.bf16.msra.mxu1 %v4409_v50 }
  0x99   : > { %3934 = vmatprep.subr.bf16.mxu1 %v4412_v62 }
  0x9a   : > { %4203 = vmatmul.mubr.bf16.gmra.mrb[4].mxu0 %v4371_v11  ;;  %v5120_v11 = vld [vmem:[%s5997_s2] ss:$0 sm:$0xff] }
  0x9b   : > { %4206 = vmatprep.mubr.bf16.mxu0 %v4372_v12  ;;  %3827 = vmatpush3.bf16.msra.mxu0 %v4400_v40 }
  0x9c   : > { %3828 = vmatprep.subr.bf16.mxu0 %v4402_v43  ;;  %2132 = vmatmul.mubr.bf16.vlgmr.msra.gmra.mrb[0].mxu1 %v1115_v56 }
  0x9d   : > { %3935 = vmatpush3.bf16.msra.mxu1 %v4414_v63 }
  0x9e   : > { %3936 = vmatprep.subr.bf16.mxu1 %v4418_v0 }
  0x9f   : > { %3829 = vmatpush3.bf16.msra.mxu0 %v4404_v45 }
  0xa0   : > { %3830 = vmatprep.subr.bf16.mxu0 %v4406_v47 }
  0xa1   : > { %3937 = vmatpush3.bf16.msra.mxu1 %v4419_v1 }
  0xa2   : > { %4207 = vmatmul.mubr.bf16.gmra.mrb[8].mxu0 %v4373_v13  ;;  %3938 = vmatprep.subr.bf16.mxu1 %v4420_v2  ;;  %v4432_v13 = vld [vmem:[#allocation8 + $0x170] sm:$0xff]  }
  0xa3   : > { %4210 = vmatprep.mubr.bf16.mxu0 %v4374_v14  ;;  %3831 = vmatpush3.bf16.msra.mxu0 %v4408_v49 }
  0xa4   : > { %3832 = vmatprep.subr.bf16.mxu0 %v4410_v55 }
  0xa5   : > { %3939 = vmatpush3.bf16.msra.mxu1 %v4421_v3 }
  0xa6   : > { %3940 = vmatprep.subr.bf16.mxu1 %v4422_v4 }
  0xa7   : > { %3833 = vmatpush3.bf16.msra.mxu0 %v4411_v57 }
  0xa8   : > { %3834 = vmatprep.subr.bf16.mxu0 %v4413_v58 }
  0xa9   : > { %3941 = vmatpush3.bf16.msra.mxu1 %v4423_v5 }
  0xaa   : > { %4211 = vmatmul.mubr.bf16.gmra.mrb[12].mxu0 %v4375_v15  ;;  %3942 = vmatprep.subr.bf16.mxu1 %v4424_v6 }
  0xab   : > { %4214 = vmatprep.mubr.bf16.mxu0 %v4376_v16  ;;  %3835 = vmatpush3.bf16.msra.mxu0 %v4415_v59 }
  0xac   : > { %3836 = vmatprep.subr.bf16.mxu0 %v4416_v60  ;;  %v4438_v60 = vld [vmem:[#allocation8 + $0x138] sm:$0xff]  }
  0xad   : > { %3943 = vmatpush3.bf16.msra.mxu1 %v4426_v8 }
  0xae   : > { %3944 = vmatprep.subr.bf16.mxu1 %v4428_v9 }
  0xaf   : > { %3837 = vmatpush3.bf16.msra.mxu0 %v4417_v61 }
  0xb0   : > { %4046 = vmatprep.subr.bf16.mxu0 %v4425_v7 }
  0xb1   : > { %3945 = vmatpush3.bf16.msra.mxu1 %v4430_v10 }
  0xb2   : > { %4215 = vmatmul.mubr.bf16.gmra.mrb[16].mxu0 %v4377_v17  ;;  %3946 = vmatprep.subr.bf16.mxu1 %v4432_v13 }
  0xb3   : > { %4218 = vmatprep.mubr.bf16.mxu0 %v4378_v18 }
  0xb5   : > { %3947 = vmatpush3.bf16.msra.mxu1 %v4434_v25 }
  0xb6   : > { %3948 = vmatprep.subr.bf16.mxu1 %v4436_v42 }
  0xb9   : > { %3949 = vmatpush3.bf16.msra.mxu1 %v4438_v60 }
  0xba   : > { %4219 = vmatmul.mubr.bf16.gmra.mrb[20].mxu0 %v4379_v19 }
  0xbb   : > { %4222 = vmatprep.mubr.bf16.mxu0 %v4380_v20 }
  0xc2   : > { %4223 = vmatmul.mubr.bf16.gmra.mrb[24].mxu0 %v4381_v21 }
  0xc3   : > { %4226 = vmatprep.mubr.bf16.mxu0 %v4382_v22 }
  0xca   : > { %4227 = vmatmul.mubr.bf16.gmra.mrb[28].mxu0 %v4383_v23 }
 0x165   : > { %v4200_v12 = vpop.f32.mrb[0].mxu0 }
 0x166   : > { %v5123_v14 = vadd.f32 %v4200_v12, %v5120_v11  ;;  %v617_v15 = vpop.f32.mrb[1].mxu0 }
 0x167   : > { %v5126_v16 = vadd.f32 %v5120_v11, %v617_v15  ;;  %v4201_v17 = vpop.f32.mrb[2].mxu0  ;;  %v5190_v15 = vld [vmem:[%s382_s18] ss:$0 sm:$0xff]  ;;  %s4675_s18 = sshll.u32 %s4809_s21, 4  ;;  %s4676_s18 = int_to_ptr.vmem [resolvable:$false] %s4675_s18 }
 0x168   : > { %v3414_v18 = vmul.f32 -1.442695, %v5123_v14  ;;  %v5130_v19 = vadd.f32 %v4201_v17, %v5120_v11  ;;  %v620_v20 = vpop.f32.mrb[3].mxu0  ;;  %s4677_s15 = scalar_lea.vmem %s4676_s18, 4096  ;;  %p4678_p9 = scmp.lt.s32.totalorder %s5879_s25, %s4676_s18 }
 0x169   : > { %v3412_v21 = vmul.f32 -1.442695, %v5126_v16  ;;  %v5134_v22 = vadd.f32 %v5120_v11, %v620_v20  ;;  %p4679_p12 = scmp.lt.s32.totalorder %s4677_s15, %s4671_s10 }
 0x16a   : > { %4456 = vpow2.f32 %v3414_v18  ;;  %v3415_v23 = vmul.f32 -1.442695, %v5130_v19 }
 0x16b   : > { %4458 = vpow2.f32 %v3412_v21  ;;  %v3413_v24 = vmul.f32 -1.442695, %v5134_v22  ;;  %p4680_p1 = por %p4679_p12, %p4678_p9 }
 0x16c   : > { %4460 = vpow2.f32 %v3415_v23 }
 0x16d   : > { %4462 = vpow2.f32 %v3413_v24  ;;  %v4204_v26 = vpop.f32.mrb[4].mxu0  ;;  %p4681_p13 = pnand %p4680_p1, %p4674_p7 }
 0x16e   : > { %v5139_v27 = vadd.f32 %v4204_v26, %v5120_v11  ;;  %v633_v28 = vpop.f32.mrb[5].mxu0 }
 0x16f   : > { %v5142_v29 = vadd.f32 %v5120_v11, %v633_v28  ;;  %v4205_v30 = vpop.f32.mrb[6].mxu0 }
 0x170   : > { %v3418_v31 = vmul.f32 -1.442695, %v5139_v27  ;;  %v5146_v32 = vadd.f32 %v4205_v30, %v5120_v11  ;;  %v636_v33 = vpop.f32.mrb[7].mxu0 }
 0x171   : > { %v3416_v34 = vmul.f32 -1.442695, %v5142_v29  ;;  %v5150_v35 = vadd.f32 %v5120_v11, %v636_v33 }
 0x172   : > { %4464 = vpow2.f32 %v3418_v31  ;;  %v3419_v36 = vmul.f32 -1.442695, %v5146_v32 }
 0x173   : > { %4466 = vpow2.f32 %v3416_v34  ;;  %v3417_v37 = vmul.f32 -1.442695, %v5150_v35 }
 0x174   : > { %v4457_v38 = vpop.eup %4456  ;;  %4468 = vpow2.f32 %v3419_v36 }
 0x175   : > { %v4459_v39 = vpop.eup %4458  ;;  %v842_v40 = vadd.f32 1.0, %v4457_v38  ;;  %4470 = vpow2.f32 %v3417_v37  ;;  %v4208_v41 = vpop.f32.mrb[8].mxu0 }
 0x176   : > { %v4461_v43 = vpop.eup %4460  ;;  %v840_v44 = vadd.f32 1.0, %v4459_v39  ;;  %v5156_v45 = vadd.f32 %v4208_v41, %v5120_v11  ;;  %v649_v46 = vpop.f32.mrb[9].mxu0 }
 0x177   : > { %v4463_v47 = vpop.eup %4462  ;;  %4472 = vrcp.f32 %v842_v40  ;;  %v843_v48 = vadd.f32 1.0, %v4461_v43  ;;  %v5159_v49 = vadd.f32 %v5120_v11, %v649_v46  ;;  %v4209_v50 = vpop.f32.mrb[10].mxu0  ;;  %v5213_v40 = vld [vmem:[#allocation8 + $0x200] sm:$0xff]  }
 0x178   : > { %4474 = vrcp.f32 %v840_v44  ;;  %v841_v51 = vadd.f32 1.0, %v4463_v47  ;;  %v3422_v52 = vmul.f32 -1.442695, %v5156_v45  ;;  %v5163_v53 = vadd.f32 %v4209_v50, %v5120_v11  ;;  %v652_v54 = vpop.f32.mrb[11].mxu0  ;;  %4230 = vmatprep.subr.bf16.mxu1 %v5213_v40 }
 0x179   : > { %4476 = vrcp.f32 %v843_v48  ;;  %v3420_v55 = vmul.f32 -1.442695, %v5159_v49  ;;  %v5167_v56 = vadd.f32 %v5120_v11, %v652_v54 }
 0x17a   : > { %4478 = vrcp.f32 %v841_v51  ;;  %v3423_v57 = vmul.f32 -1.442695, %v5163_v53 }
 0x17b   : > { %4480 = vpow2.f32 %v3422_v52  ;;  %v3421_v58 = vmul.f32 -1.442695, %v5167_v56 }
 0x17c   : > { %v4465_v59 = vpop.eup %4464  ;;  %4482 = vpow2.f32 %v3420_v55 }
 0x17d   : > { %v4467_v61 = vpop.eup %4466  ;;  %v846_v62 = vadd.f32 1.0, %v4465_v59  ;;  %4484 = vpow2.f32 %v3423_v57  ;;  %v4212_v63 = vpop.f32.mrb[12].mxu0 }
 0x17e   : > { %v4469_v0 = vpop.eup %4468  ;;  %v844_v1 = vadd.f32 1.0, %v4467_v61  ;;  %4486 = vpow2.f32 %v3421_v58  ;;  %v5181_v2 = vadd.f32 %v4212_v63, %v5120_v11  ;;  %v665_v3 = vpop.f32.mrb[13].mxu0 }
 0x17f   : > { %v4471_v4 = vpop.eup %4470  ;;  %4488 = vrcp.f32 %v846_v62  ;;  %v847_v5 = vadd.f32 1.0, %v4469_v0  ;;  %v5184_v6 = vadd.f32 %v5120_v11, %v665_v3  ;;  %v4213_v7 = vpop.f32.mrb[14].mxu0 }
 0x180   : > { %4490 = vrcp.f32 %v844_v1  ;;  %v845_v8 = vadd.f32 1.0, %v4471_v4  ;;  %v3426_v9 = vmul.f32 -1.442695, %v5181_v2  ;;  %v5188_v10 = vadd.f32 %v4213_v7, %v5120_v11  ;;  %v668_v12 = vpop.f32.mrb[15].mxu0 }
 0x181   : > { %v4473_v13 = vpop.eup %4472  ;;  %4492 = vrcp.f32 %v847_v5  ;;  %v3424_v17 = vmul.f32 -1.442695, %v5184_v6  ;;  %v5194_v18 = vadd.f32 %v5120_v11, %v668_v12 }
 0x182   : > { %v4475_v20 = vpop.eup %4474  ;;  %v938_v21 = vmul.f32 %v4473_v13, %v5123_v14  ;;  %4494 = vrcp.f32 %v845_v8  ;;  %v3427_v23 = vmul.f32 -1.442695, %v5188_v10  ;;  %v1179_v8 = vld [vmem:[#allocation2 + $0x2] sm:$0xff] }
 0x183   : > { %v4477_v24 = vpop.eup %4476  ;;  %v936_v25 = vmul.f32 %v4475_v20, %v5126_v16  ;;  %4496 = vpow2.f32 %v3426_v9  ;;  %v3425_v26 = vmul.f32 -1.442695, %v5194_v18  ;;  %v1180_v9 = vld [vmem:[#allocation2 + $0xa] sm:$0xff] }
 0x184   : > { %v4479_v28 = vpop.eup %4478  ;;  %v5201_v30 = vadd.f32 %v5190_v15, %v938_v21  ;;  %v939_v31 = vmul.f32 %v4477_v24, %v5130_v19  ;;  %4498 = vpow2.f32 %v3424_v17 }
 0x185   : > { %v4481_v33 = vpop.eup %4480  ;;  %v975_v34 = vadd.f32 %v5190_v15, %v936_v25  ;;  %v937_v14 = vmul.f32 %v4479_v28, %v5134_v22  ;;  %4500 = vpow2.f32 %v3427_v23  ;;  %v4216_v36 = vpop.f32.mrb[16].mxu0 }
 0x186   : > { %v4483_v37 = vpop.eup %4482  ;;  %1053 = vst [vmem:[#allocation2 + $0x31] sm:$0xff] %v5201_v30  ;;  %v5208_v16 = vadd.f32 %v5190_v15, %v939_v31  ;;  %v850_v38 = vadd.f32 1.0, %v4481_v33  ;;  %4502 = vpow2.f32 %v3425_v26  ;;  %v5211_v39 = vadd.f32 %v4216_v36, %v5120_v11  ;;  %v681_v19 = vpop.f32.mrb[17].mxu0 }
 0x187   : > { %v4485_v41 = vpop.eup %4484  ;;  %1051 = vst [vmem:[#allocation2 + $0x19] sm:$0xff] %v975_v34  ;;  %v976_v22 = vadd.f32 %v5190_v15, %v937_v14  ;;  %v848_v42 = vadd.f32 1.0, %v4483_v37  ;;  %v5217_v43 = vadd.f32 %v5120_v11, %v681_v19  ;;  %v4217_v44 = vpop.f32.mrb[18].mxu0 }
 0x188   : > { %v4487_v46 = vpop.eup %4486  ;;  %1054 = vst [vmem:[#allocation2 + $0x39] sm:$0xff] %v5208_v16  ;;  %4504 = vrcp.f32 %v850_v38  ;;  %v851_v47 = vadd.f32 1.0, %v4485_v41  ;;  %v3430_v48 = vmul.f32 -1.442695, %v5211_v39  ;;  %v5222_v50 = vadd.f32 %v4217_v44, %v5120_v11  ;;  %v684_v51 = vpop.f32.mrb[19].mxu0  ;;  %v4427_v41 = vld [vmem:[#allocation8 + $0x180] sm:$0xff]  }
 0x189   : > { %v4489_v52 = vpop.eup %4488  ;;  %1052 = vst [vmem:[#allocation2 + $0x21] sm:$0xff] %v976_v22  ;;  %4506 = vrcp.f32 %v848_v42  ;;  %v849_v54 = vadd.f32 1.0, %v4487_v46  ;;  %v3428_v55 = vmul.f32 -1.442695, %v5217_v43  ;;  %v5227_v57 = vadd.f32 %v5120_v11, %v684_v51 }
 0x18a   : > { %v4491_v58 = vpop.eup %4490  ;;  %v942_v59 = vmul.f32 %v4489_v52, %v5139_v27  ;;  %4508 = vrcp.f32 %v851_v47  ;;  %v3431_v60 = vmul.f32 -1.442695, %v5222_v50  ;;  %v1164_v61 = vpack.c.bf16 %v976_v22, %v975_v34  ;;  %v4429_v47 = vld [vmem:[#allocation8 + $0x1c8] sm:$0xff]  }
 0x18b   : > { %v4493_v62 = vpop.eup %4492  ;;  %v940_v63 = vmul.f32 %v4491_v58, %v5142_v29  ;;  %4510 = vrcp.f32 %v849_v54  ;;  %v3429_v0 = vmul.f32 -1.442695, %v5227_v57  ;;  %v1165_v1 = vpack.c.bf16 %v5208_v16, %v5201_v30 }
 0x18c   : > { %v4495_v3 = vpop.eup %4494  ;;  %v5236_v4 = vadd.f32 %v5190_v15, %v942_v59  ;;  %v943_v5 = vmul.f32 %v4493_v62, %v5146_v32  ;;  %4512 = vpow2.f32 %v3430_v48  ;;  %2139 = vmatprep.mubr.bf16.mxu1 %v1164_v61  ;;  %v1211_v34 = vpack.c.bf16 %v1180_v9, %v1179_v8  ;;  %v4433_v9 = vld [vmem:[#allocation8 + $0x1d0] sm:$0xff]  }
 0x18d   : > { %v4497_v27 = vpop.eup %4496  ;;  %v5240_v7 = vadd.f32 %v5190_v15, %v940_v63  ;;  %v941_v29 = vmul.f32 %v4495_v3, %v5150_v35  ;;  %4514 = vpow2.f32 %v3428_v55  ;;  %v4220_v12 = vpop.f32.mrb[20].mxu0  ;;  %v1229_v42 = vld [vmem:[#allocation2 + $0x30] sm:$0xff]  ;;  %v4431_v3 = vld [vmem:[#allocation8 + $0x188] sm:$0xff]  }
 0x18e   : > { %v4499_v13 = vpop.eup %4498  ;;  %1057 = vst [vmem:[#allocation2 + $0x61] sm:$0xff] %v5236_v4  ;;  %v5245_v17 = vadd.f32 %v5190_v15, %v943_v5  ;;  %v854_v20 = vadd.f32 1.0, %v4497_v27  ;;  %4516 = vpow2.f32 %v3431_v60  ;;  %v5248_v32 = vadd.f32 %v4220_v12, %v5120_v11  ;;  %v697_v21 = vpop.f32.mrb[21].mxu0  ;;  %v1227_v25 = vld [vmem:[#allocation2 + $0x18] sm:$0xff] }
 0x18f   : > { %v4501_v23 = vpop.eup %4500  ;;  %1055 = vst [vmem:[#allocation2 + $0x49] sm:$0xff] %v5240_v7  ;;  %v5252_v35 = vadd.f32 %v5190_v15, %v941_v29  ;;  %v852_v24 = vadd.f32 1.0, %v4499_v13  ;;  %4518 = vpow2.f32 %v3429_v0  ;;  %v5255_v26 = vadd.f32 %v5120_v11, %v697_v21  ;;  %v4221_v28 = vpop.f32.mrb[22].mxu0  ;;  %v1230_v14 = vld [vmem:[#allocation2 + $0x38] sm:$0xff] }
 0x190   : > { %v4503_v30 = vpop.eup %4502  ;;  %1058 = vst [vmem:[#allocation2 + $0x69] sm:$0xff] %v5245_v17  ;;  %4520 = vrcp.f32 %v854_v20  ;;  %v855_v31 = vadd.f32 1.0, %v4501_v23  ;;  %v1228_v33 = vld [vmem:[#allocation2 + $0x20] sm:$0xff]  ;;  %v3434_v36 = vmul.f32 -1.442695, %v5248_v32  ;;  %v700_v37 = vpop.f32.mrb[23].mxu0  ;;  %v5262_v44 = vadd.f32 %v4221_v28, %v5120_v11 }
 0x191   : > { %1056 = vst [vmem:[#allocation2 + $0x51] sm:$0xff] %v5252_v35  ;;  %4522 = vrcp.f32 %v852_v24  ;;  %v853_v16 = vadd.f32 1.0, %v4503_v30  ;;  %v1259_v38 = vpack.c.bf16 %v1228_v33, %v1227_v25  ;;  %v3432_v19 = vmul.f32 -1.442695, %v5255_v26  ;;  %v1181_v63 = vld [vmem:[#allocation2 + $0x1a] sm:$0xff]  ;;  %v1182_v0 = vld [vmem:[#allocation2 + $0x22] sm:$0xff] }
 0x192   : > { %v4505_v22 = vpop.eup %4504  ;;  %4524 = vrcp.f32 %v855_v31  ;;  %v5265_v46 = vadd.f32 %v5120_v11, %v700_v37  ;;  %v5268_v52 = vpack.c.bf16 %v1230_v14, %v1229_v42  ;;  %v1166_v54 = vpack.c.bf16 %v5252_v35, %v5240_v7  ;;  %v4435_v37 = vld [vmem:[#allocation8 + $0x190] sm:$0xff]   ;;  %v4437_v42 = vld [vmem:[#allocation8 + $0x1d8] sm:$0xff]  }
 0x193   : > { %v4507_v48 = vpop.eup %4506  ;;  %v946_v51 = vmul.f32 %v4505_v22, %v5156_v45  ;;  %4526 = vrcp.f32 %v853_v16  ;;  %2292 = vmatprep.mubr.bf16.mxu0 %v1259_v38  ;;  %2140 = vmatmul.mubr.bf16.gmra.mrb[4].mxu1 %v1259_v38  ;;  %v3435_v59 = vmul.f32 -1.442695, %v5262_v44  ;;  %v5300_v28 = vpack.c.bf16 %v1182_v0, %v1181_v63  ;;  %v4439_v0 = vld [vmem:[#allocation8 + $0x198] sm:$0xff]  }
 0x194   : > { %v4509_v55 = vpop.eup %4508  ;;  %v944_v58 = vmul.f32 %v4507_v48, %v5159_v49  ;;  %2293 = vmatmul.mubr.bf16.vlgmr.msra.gmra.mrb[32].mxu0 %v1211_v34  ;;  %2147 = vmatprep.mubr.bf16.mxu1 %v1165_v1  ;;  %4528 = vpow2.f32 %v3434_v36  ;;  %v3433_v60 = vmul.f32 -1.442695, %v5265_v46  ;;  %v1167_v49 = vpack.c.bf16 %v5245_v17, %v5236_v4 }
 0x195   : > { %v4511_v61 = vpop.eup %4510  ;;  %v5276_v45 = vadd.f32 %v5190_v15, %v946_v51  ;;  %v947_v62 = vmul.f32 %v4509_v55, %v5163_v53  ;;  %2300 = vmatprep.mubr.bf16.mxu0 %v5268_v52  ;;  %4530 = vpow2.f32 %v3432_v19  ;;  %v4224_v1 = vpop.f32.mrb[24].mxu0  ;;  %4047 = vmatpush3.bf16.msra.mxu0 %v4427_v41 }
 0x196   : > { %v4513_v5 = vpop.eup %4512  ;;  %v5283_v27 = vadd.f32 %v5190_v15, %v944_v58  ;;  %v945_v29 = vmul.f32 %v4511_v61, %v5167_v56  ;;  %4532 = vpow2.f32 %v3435_v59  ;;  %v5287_v53 = vadd.f32 %v4224_v1, %v5120_v11  ;;  %v713_v8 = vpop.f32.mrb[25].mxu0  ;;  %4048 = vmatprep.subr.bf16.mxu0 %v4429_v47  ;;  %v1231_v19 = vld [vmem:[#allocation2 + $0x48] sm:$0xff] }
 0x197   : > { %v4515_v12 = vpop.eup %4514  ;;  %1061 = vst [vmem:[#allocation2 + $0x91] sm:$0xff] %v5276_v45  ;;  %v5291_v13 = vadd.f32 %v5190_v15, %v947_v62  ;;  %v858_v20 = vadd.f32 1.0, %v4513_v5  ;;  %4534 = vpow2.f32 %v3433_v60  ;;  %v5294_v21 = vadd.f32 %v5120_v11, %v713_v8  ;;  %v4225_v23 = vpop.f32.mrb[26].mxu0  ;;  %v4440_v5 = vld [vmem:[#allocation8 + $0x1e0] sm:$0xff]  }
 0x198   : > { %v4517_v56 = vpop.eup %4516  ;;  %1059 = vst [vmem:[#allocation2 + $0x79] sm:$0xff] %v5283_v27  ;;  %v5298_v24 = vadd.f32 %v5190_v15, %v945_v29  ;;  %v856_v25 = vadd.f32 1.0, %v4515_v12  ;;  %v1232_v30 = vld [vmem:[#allocation2 + $0x50] sm:$0xff]  ;;  %v716_v31 = vpop.f32.mrb[27].mxu0  ;;  %v3438_v14 = vmul.f32 -1.442695, %v5287_v53  ;;  %v5307_v41 = vadd.f32 %v4225_v23, %v5120_v11 }
 0x199   : > { %v4519_v33 = vpop.eup %4518  ;;  %1062 = vst [vmem:[#allocation2 + $0x99] sm:$0xff] %v5291_v13  ;;  %4536 = vrcp.f32 %v858_v20  ;;  %v859_v34 = vadd.f32 1.0, %v4517_v56  ;;  %v3436_v36 = vmul.f32 -1.442695, %v5294_v21  ;;  %4049 = vmatpush3.bf16.msra.mxu0 %v4431_v3  ;;  %v5310_v22 = vadd.f32 %v5120_v11, %v716_v31  ;;  %v1184_v12 = vld [vmem:[#allocation2 + $0x3a] sm:$0xff] }
 0x19a   : > { %v4521_v16 = vpop.eup %4520  ;;  %1060 = vst [vmem:[#allocation2 + $0x81] sm:$0xff] %v5298_v24  ;;  %4538 = vrcp.f32 %v856_v25  ;;  %v857_v38 = vadd.f32 1.0, %v4519_v33  ;;  %4050 = vmatprep.subr.bf16.mxu0 %v4433_v9  ;;  %v5314_v51 = vpack.c.bf16 %v1232_v30, %v1231_v19  ;;  %v1168_v55 = vpack.c.bf16 %v5298_v24, %v5283_v27  ;;  %v1183_v9 = vld [vmem:[#allocation2 + $0x32] sm:$0xff]  ;;  %v1234_v30 = vld [vmem:[#allocation2 + $0x68] sm:$0xff]  ;;  %v1233_v19 = vld [vmem:[#allocation2 + $0x60] sm:$0xff] }
 0x19b   : > { %v4523_v47 = vpop.eup %4522  ;;  %v950_v48 = vmul.f32 %v4521_v16, %v5181_v2  ;;  %4540 = vrcp.f32 %v859_v34  ;;  %2148 = vmatmul.mubr.bf16.gmra.mrb[8].mxu1 %v5268_v52  ;;  %v3439_v2 = vmul.f32 -1.442695, %v5307_v41  ;;  %v3437_v60 = vmul.f32 -1.442695, %v5310_v22  ;;  %v1187_v24 = vld [vmem:[#allocation2 + $0x62] sm:$0xff] }
 0x19c   : > { %v4525_v58 = vpop.eup %4524  ;;  %v948_v59 = vmul.f32 %v4523_v47, %v5184_v6  ;;  %4542 = vrcp.f32 %v857_v38  ;;  %2301 = vmatmul.mubr.bf16.gmra.mrb[36].mxu0 %v5300_v28  ;;  %2155 = vmatprep.mubr.bf16.mxu1 %v1166_v54  ;;  %v1169_v54 = vpack.c.bf16 %v5291_v13, %v5276_v45  ;;  %v5353_v38 = vpack.c.bf16 %v1184_v12, %v1183_v9  ;;  %v4442_v47 = vld [vmem:[#allocation8 + $0x1e8] sm:$0xff]  }
 0x19d   : > { %v4527_v61 = vpop.eup %4526  ;;  %v5326_v62 = vadd.f32 %v5190_v15, %v950_v48  ;;  %v951_v63 = vmul.f32 %v4525_v58, %v5188_v10  ;;  %2308 = vmatprep.mubr.bf16.mxu0 %v5314_v51  ;;  %4544 = vpow2.f32 %v3438_v14  ;;  %v4228_v6 = vpop.f32.mrb[28].mxu0  ;;  %4051 = vmatpush3.bf16.msra.mxu0 %v4435_v37  ;;  %v4441_v37 = vld [vmem:[#allocation8 + $0x1a0] sm:$0xff]   ;;  %v5357_v58 = vpack.c.bf16 %v1234_v30, %v1233_v19  ;;  %v4447_v19 = vld [vmem:[#allocation8 + $0x1f8] sm:$0xff]  }
 0x19e   : > { %v4529_v1 = vpop.eup %4528  ;;  %v5331_v7 = vadd.f32 %v5190_v15, %v948_v59  ;;  %v949_v35 = vmul.f32 %v4527_v61, %v5194_v18  ;;  %4546 = vpow2.f32 %v3436_v36  ;;  %v729_v3 = vpop.f32.mrb[29].mxu0  ;;  %4052 = vmatprep.subr.bf16.mxu0 %v4437_v42  ;;  %v5341_v20 = vadd.f32 %v4228_v6, %v5120_v11  ;;  %v1186_v9 = vld [vmem:[#allocation2 + $0x52] sm:$0xff] }
 0x19f   : > { %v4531_v10 = vpop.eup %4530  ;;  %1065 = vst [vmem:[#allocation2 + $0xc1] sm:$0xff] %v5326_v62  ;;  %v5338_v29 = vadd.f32 %v5190_v15, %v951_v63  ;;  %v862_v8 = vadd.f32 1.0, %v4529_v1  ;;  %4548 = vpow2.f32 %v3439_v2  ;;  %v4229_v18 = vpop.f32.mrb[30].mxu0  ;;  %v5348_v31 = vadd.f32 %v5120_v11, %v729_v3  ;;  %v4443_v1 = vld [vmem:[#allocation8 + $0x1a8] sm:$0xff]  }
 0x1a0   : > { %v4533_v23 = vpop.eup %4532  ;;  %1063 = vst [vmem:[#allocation2 + $0xa9] sm:$0xff] %v5331_v7  ;;  %v5345_v56 = vadd.f32 %v5190_v15, %v949_v35  ;;  %v860_v25 = vadd.f32 1.0, %v4531_v10  ;;  %4550 = vpow2.f32 %v3437_v60  ;;  %v732_v33 = vpop.f32.mrb[31].mxu0  ;;  %v3442_v36 = vmul.f32 -1.442695, %v5341_v20 }
 0x1a1   : > { %v4535_v34 = vpop.eup %4534  ;;  %1066 = vst [vmem:[#allocation2 + $0xc9] sm:$0xff] %v5338_v29  ;;  %4552 = vrcp.f32 %v862_v8  ;;  %v863_v14 = vadd.f32 1.0, %v4533_v23  ;;  %4053 = vmatpush3.bf16.msra.mxu0 %v4439_v0  ;;  %v3440_v42 = vmul.f32 -1.442695, %v5348_v31  ;;  %v5360_v59 = vadd.f32 %v4229_v18, %v5120_v11  ;;  %v1185_v8 = vld [vmem:[#allocation2 + $0x4a] sm:$0xff]  ;;  %v1236_v12 = vld [vmem:[#allocation2 + $0x80] sm:$0xff] }
 0x1a2   : > { %1064 = vst [vmem:[#allocation2 + $0xb1] sm:$0xff] %v5345_v56  ;;  %4554 = vrcp.f32 %v860_v25  ;;  %v861_v16 = vadd.f32 1.0, %v4535_v34  ;;  %4054 = vmatprep.subr.bf16.mxu0 %v4440_v5  ;;  %v5363_v2 = vadd.f32 %v5120_v11, %v732_v33  ;;  %v1170_v63 = vpack.c.bf16 %v5345_v56, %v5331_v7  ;;  %v4446_v34 = vld [vmem:[#allocation8 + $0x1b0] sm:$0xff]  }
 0x1a3   : > { %v4537_v48 = vpop.eup %4536  ;;  %4556 = vrcp.f32 %v863_v14  ;;  %2156 = vmatmul.mubr.bf16.gmra.mrb[12].mxu1 %v5314_v51  ;;  %v3443_v11 = vmul.f32 -1.442695, %v5360_v59  ;;  %v1171_v17 = vpack.c.bf16 %v5338_v29, %v5326_v62 }
 0x1a4   : > { %v4539_v60 = vpop.eup %4538  ;;  %v954_v61 = vmul.f32 %v4537_v48, %v5211_v39  ;;  %4558 = vrcp.f32 %v861_v16  ;;  %2309 = vmatmul.mubr.bf16.gmra.mrb[40].mxu0 %v5353_v38  ;;  %2163 = vmatprep.mubr.bf16.mxu1 %v1167_v49  ;;  %v3441_v39 = vmul.f32 -1.442695, %v5363_v2 }
 0x1a5   : > { %v4541_v6 = vpop.eup %4540  ;;  %v952_v0 = vmul.f32 %v4539_v60, %v5217_v43  ;;  %2316 = vmatprep.mubr.bf16.mxu0 %v5357_v58  ;;  %4560 = vpow2.f32 %v3442_v36  ;;  %4055 = vmatpush3.bf16.msra.mxu0 %v4441_v37  ;;  %v4445_v43 = vld [vmem:[#allocation8 + $0x1f0] sm:$0xff]   ;;  %v5395_v37 = vpack.c.bf16 %v1186_v9, %v1185_v8 }
 0x1a6   : > { %v4543_v35 = vpop.eup %4542  ;;  %v5377_v3 = vadd.f32 %v5190_v15, %v954_v61  ;;  %v955_v4 = vmul.f32 %v4541_v6, %v5222_v50  ;;  %4562 = vpow2.f32 %v3440_v42  ;;  %4056 = vmatprep.subr.bf16.mxu0 %v4442_v47 }
 0x1a7   : > { %v4545_v49 = vpop.eup %4544  ;;  %v5383_v5 = vadd.f32 %v5190_v15, %v952_v0  ;;  %v953_v10 = vmul.f32 %v4543_v35, %v5227_v57  ;;  %4564 = vpow2.f32 %v3443_v11  ;;  %v1235_v57 = vld [vmem:[#allocation2 + $0x78] sm:$0xff] }
 0x1a8   : > { %v4547_v18 = vpop.eup %4546  ;;  %1069 = vst [vmem:[#allocation2 + $0xf1] sm:$0xff] %v5377_v3  ;;  %v5388_v50 = vadd.f32 %v5190_v15, %v955_v4  ;;  %v866_v23 = vadd.f32 1.0, %v4545_v49  ;;  %4566 = vpow2.f32 %v3441_v39  ;;  %v5397_v16 = vpack.c.bf16 %v1236_v12, %v1235_v57  ;;  %v4448_v39 = vld [vmem:[#allocation8 + $0x1b8] sm:$0xff]  }
 0x1a9   : > { %v4549_v25 = vpop.eup %4548  ;;  %1067 = vst [vmem:[#allocation2 + $0xd9] sm:$0xff] %v5383_v5  ;;  %v5392_v30 = vadd.f32 %v5190_v15, %v953_v10  ;;  %v864_v33 = vadd.f32 1.0, %v4547_v18  ;;  %4057 = vmatpush3.bf16.msra.mxu0 %v4443_v1  ;;  %v1238_v10 = vld [vmem:[#allocation2 + $0x98] sm:$0xff]  ;;  %v1195_v62 = vld [vmem:[#allocation2 + $0xc2] sm:$0xff]  ;;  %v1196_v29 = vld [vmem:[#allocation2 + $0xca] sm:$0xff] }
 0x1aa   : > { %v4551_v14 = vpop.eup %4550  ;;  %1070 = vst [vmem:[#allocation2 + $0xf9] sm:$0xff] %v5388_v50  ;;  %4568 = vrcp.f32 %v866_v23  ;;  %v867_v36 = vadd.f32 1.0, %v4549_v25  ;;  %4058 = vmatprep.subr.bf16.mxu0 %v4445_v43  ;;  %v1173_v60 = vpack.c.bf16 %v5388_v50, %v5377_v3  ;;  %v1237_v23 = vld [vmem:[#allocation2 + $0x90] sm:$0xff]  ;;  %v3726_v3 = vpop.f32.mrb[0].mxu1 }
 0x1ab   : > { %v4553_v42 = vpop.eup %4552  ;;  %1068 = vst [vmem:[#allocation2 + $0xe1] sm:$0xff] %v5392_v30  ;;  %4570 = vrcp.f32 %v864_v33  ;;  %v865_v47 = vadd.f32 1.0, %v4551_v14  ;;  %2164 = vmatmul.mubr.bf16.gmra.mrb[16].mxu1 %v5357_v58  ;;  %v1172_v48 = vpack.c.bf16 %v5392_v30, %v5383_v5  ;;  %v5433_v33 = vpack.c.bf16 %v1238_v10, %v1237_v23  ;;  %v1191_v23 = vld [vmem:[#allocation2 + $0x92] sm:$0xff]  ;;  %v3727_v50 = vpop.f32.mrb[1].mxu1 }
 0x1ac   : > { %v4555_v61 = vpop.eup %4554  ;;  %v958_v6 = vmul.f32 %v4553_v42, %v5248_v32  ;;  %4572 = vrcp.f32 %v867_v36  ;;  %2317 = vmatmul.mubr.bf16.gmra.mrb[44].mxu0 %v5395_v37  ;;  %2171 = vmatprep.mubr.bf16.mxu1 %v1168_v55 }
 0x1ad   : > { %v4557_v0 = vpop.eup %4556  ;;  %v956_v11 = vmul.f32 %v4555_v61, %v5255_v26  ;;  %4574 = vrcp.f32 %v865_v47  ;;  %2324 = vmatprep.mubr.bf16.mxu0 %v5397_v16  ;;  %4059 = vmatpush3.bf16.msra.mxu0 %v4446_v34  ;;  %v1188_v26 = vld [vmem:[#allocation2 + $0x6a] sm:$0xff] }
 0x1ae   : > { %v4559_v1 = vpop.eup %4558  ;;  %v5413_v35 = vadd.f32 %v5190_v15, %v958_v6  ;;  %v959_v32 = vmul.f32 %v4557_v0, %v5262_v44  ;;  %4060 = vmatprep.subr.bf16.mxu0 %v4447_v19  ;;  %v1190_v0 = vld [vmem:[#allocation2 + $0x82] sm:$0xff] }
 0x1af   : > { %v4561_v4 = vpop.eup %4560  ;;  %v5417_v43 = vadd.f32 %v5190_v15, %v956_v11  ;;  %v957_v27 = vmul.f32 %v4559_v1, %v5265_v46  ;;  %v5429_v46 = vpack.c.bf16 %v1188_v26, %v1187_v24 }
 0x1b0   : > { %v4563_v55 = vpop.eup %4562  ;;  %1073 = vst [vmem:[#allocation2 + $0x121] sm:$0xff] %v5413_v35  ;;  %v5422_v49 = vadd.f32 %v5190_v15, %v959_v32  ;;  %v870_v8 = vadd.f32 1.0, %v4561_v4 }
 0x1b1   : > { %v4565_v9 = vpop.eup %4564  ;;  %1071 = vst [vmem:[#allocation2 + $0x109] sm:$0xff] %v5417_v43  ;;  %v5426_v44 = vadd.f32 %v5190_v15, %v957_v27  ;;  %v868_v12 = vadd.f32 1.0, %v4563_v55  ;;  %4061 = vmatpush3.bf16.msra.mxu0 %v4448_v39 }
 0x1b2   : > { %v4567_v18 = vpop.eup %4566  ;;  %1074 = vst [vmem:[#allocation2 + $0x129] sm:$0xff] %v5422_v49  ;;  %4576 = vrcp.f32 %v870_v8  ;;  %v871_v25 = vadd.f32 1.0, %v4565_v9  ;;  %v1175_v36 = vpack.c.bf16 %v5422_v49, %v5413_v35  ;;  %v1197_v5 = vld [vmem:[#allocation2 + $0xda] sm:$0xff]  ;;  %v1198_v30 = vld [vmem:[#allocation2 + $0xe2] sm:$0xff] }
 0x1b3   : > { %1072 = vst [vmem:[#allocation2 + $0x111] sm:$0xff] %v5426_v44  ;;  %2172 = vmatmul.mubr.bf16.gmra.mrb[20].mxu1 %v5397_v16  ;;  %4578 = vrcp.f32 %v868_v12  ;;  %v869_v57 = vadd.f32 1.0, %v4567_v18  ;;  %v1174_v14 = vpack.c.bf16 %v5426_v44, %v5417_v43 }
 0x1b4   : > { %v4569_v34 = vpop.eup %4568  ;;  %2325 = vmatmul.mubr.bf16.gmra.mrb[48].mxu0 %v5429_v46  ;;  %2179 = vmatprep.mubr.bf16.mxu1 %v1169_v54  ;;  %4580 = vrcp.f32 %v871_v25  ;;  %v1189_v54 = vld [vmem:[#allocation2 + $0x7a] sm:$0xff] }
 0x1b5   : > { %v4571_v19 = vpop.eup %4570  ;;  %v962_v42 = vmul.f32 %v4569_v34, %v5287_v53  ;;  %2332 = vmatprep.mubr.bf16.mxu0 %v5433_v33  ;;  %4582 = vrcp.f32 %v869_v57  ;;  %v1240_v53 = vld [vmem:[#allocation2 + $0xb0] sm:$0xff]  ;;  %v5462_v32 = vpack.c.bf16 %v1190_v0, %v1189_v54  ;;  %v1192_v25 = vld [vmem:[#allocation2 + $0x9a] sm:$0xff]  ;;  %v5514_v54 = vpack.c.bf16 %v1196_v29, %v1195_v62 }
 0x1b6   : > { %v4573_v47 = vpop.eup %4572  ;;  %v960_v61 = vmul.f32 %v4571_v19, %v5294_v21  ;;  %v5491_v57 = vpack.c.bf16 %v1192_v25, %v1191_v23  ;;  %v1241_v34 = vld [vmem:[#allocation2 + $0xc0] sm:$0xff]  ;;  %v1194_v19 = vld [vmem:[#allocation2 + $0xb2] sm:$0xff] }
 0x1b7   : > { %v4575_v6 = vpop.eup %4574  ;;  %v5447_v45 = vadd.f32 %v5190_v15, %v962_v42  ;;  %v963_v13 = vmul.f32 %v4573_v47, %v5307_v41  ;;  %v1239_v41 = vld [vmem:[#allocation2 + $0xa8] sm:$0xff]  ;;  %v1243_v42 = vld [vmem:[#allocation2 + $0xd8] sm:$0xff]  ;;  %v1244_v47 = vld [vmem:[#allocation2 + $0xe0] sm:$0xff] }
 0x1b8   : > { %v5451_v11 = vadd.f32 %v5190_v15, %v960_v61  ;;  %v961_v39 = vmul.f32 %v4575_v6, %v5310_v22  ;;  %v5466_v4 = vpack.c.bf16 %v1240_v53, %v1239_v41  ;;  %v5507_v6 = vpack.c.bf16 %v1244_v47, %v1243_v42 }
 0x1b9   : > { %1077 = vst [vmem:[#allocation2 + $0x151] sm:$0xff] %v5447_v45  ;;  %v5456_v1 = vadd.f32 %v5190_v15, %v963_v13  ;;  %v1246_v13 = vld [vmem:[#allocation2 + $0xf8] sm:$0xff]  ;;  %v5524_v53 = vpack.c.bf16 %v1198_v30, %v1197_v5  ;;  %v1203_v35 = vld [vmem:[#allocation2 + $0x122] sm:$0xff]  ;;  %v1204_v49 = vld [vmem:[#allocation2 + $0x12a] sm:$0xff] }
 0x1ba   : > { %1075 = vst [vmem:[#allocation2 + $0x139] sm:$0xff] %v5451_v11  ;;  %v5460_v21 = vadd.f32 %v5190_v15, %v961_v39  ;;  %v1248_v39 = vld [vmem:[#allocation2 + $0x110] sm:$0xff]  ;;  %v1421_v5 = vld [vmem:[#allocation2 + $0x39] sm:$0xff] }
 0x1bb   : > { %1078 = vst [vmem:[#allocation2 + $0x159] sm:$0xff] %v5456_v1  ;;  %2180 = vmatmul.mubr.bf16.gmra.mrb[24].mxu1 %v5433_v33  ;;  %v1177_v22 = vpack.c.bf16 %v5456_v1, %v5447_v45  ;;  %v1201_v44 = vld [vmem:[#allocation2 + $0x10a] sm:$0xff] }
 0x1bc   : > { %v4577_v27 = vpop.eup %4576  ;;  %1076 = vst [vmem:[#allocation2 + $0x141] sm:$0xff] %v5460_v21  ;;  %2333 = vmatmul.mubr.bf16.gmra.mrb[52].mxu0 %v5462_v32  ;;  %2187 = vmatprep.mubr.bf16.mxu1 %v1170_v63  ;;  %v1176_v24 = vpack.c.bf16 %v5460_v21, %v5451_v11  ;;  %v1242_v63 = vld [vmem:[#allocation2 + $0xc8] sm:$0xff] }
 0x1bd   : > { %v4579_v26 = vpop.eup %4578  ;;  %v966_v55 = vmul.f32 %v4577_v27, %v5341_v20  ;;  %2340 = vmatprep.mubr.bf16.mxu0 %v5466_v4  ;;  %v3729_v27 = vpop.f32.mrb[2].mxu1 }
 0x1be   : > { %v4581_v10 = vpop.eup %4580  ;;  %v964_v8 = vmul.f32 %v4579_v26, %v5348_v31  ;;  %v1199_v26 = vld [vmem:[#allocation2 + $0xf2] sm:$0xff] }
 0x1bf   : > { %v4583_v9 = vpop.eup %4582  ;;  %v1005_v12 = vadd.f32 %v5190_v15, %v966_v55  ;;  %v967_v18 = vmul.f32 %v4581_v10, %v5360_v59  ;;  %v5494_v59 = vpack.c.bf16 %v1242_v63, %v1241_v34  ;;  %v1200_v55 = vld [vmem:[#allocation2 + $0xfa] sm:$0xff]  ;;  %v3730_v10 = vpop.f32.mrb[3].mxu1  ;;  %v5558_v34 = vpack.c.bf16 %v1204_v49, %v1203_v35  ;;  %v1431_v49 = vld [vmem:[#allocation2 + $0xb1] sm:$0xff] }
 0x1c0   : > { %v5483_v7 = vadd.f32 %v5190_v15, %v964_v8  ;;  %v965_v56 = vmul.f32 %v4583_v9, %v5363_v2  ;;  %v1193_v2 = vld [vmem:[#allocation2 + $0xaa] sm:$0xff]  ;;  %v1249_v8 = vld [vmem:[#allocation2 + $0x120] sm:$0xff] }
 0x1c1   : > { %1081 = vst [vmem:[#allocation2 + $0x181] sm:$0xff] %v1005_v12  ;;  %v1006_v20 = vadd.f32 %v5190_v15, %v967_v18  ;;  %v5504_v61 = vpack.c.bf16 %v1194_v19, %v1193_v2  ;;  %v1250_v9 = vld [vmem:[#allocation2 + $0x128] sm:$0xff]  ;;  %v5536_v12 = vadd.f32 %v3730_v10, %v3729_v27  ;;  %v5538_v18 = vpack.c.bf16 %v1200_v55, %v1199_v26  ;;  %v1251_v23 = vld [vmem:[#allocation2 + $0x138] sm:$0xff] }
 0x1c2   : > { %1079 = vst [vmem:[#allocation2 + $0x169] sm:$0xff] %v5483_v7  ;;  %v5489_v31 = vadd.f32 %v5190_v15, %v965_v56  ;;  %v5541_v43 = vpack.c.bf16 %v1250_v9, %v1249_v8  ;;  %v1207_v45 = vld [vmem:[#allocation2 + $0x152] sm:$0xff]  ;;  %v1208_v1 = vld [vmem:[#allocation2 + $0x15a] sm:$0xff]  ;;  %v1422_v26 = vld [vmem:[#allocation2 + $0x49] sm:$0xff] }
 0x1c3   : > { %1082 = vst [vmem:[#allocation2 + $0x189] sm:$0xff] %v1006_v20  ;;  %2188 = vmatmul.mubr.bf16.gmra.mrb[28].mxu1 %v5466_v4  ;;  %v1252_v25 = vld [vmem:[#allocation2 + $0x140] sm:$0xff]  ;;  %v1254_v20 = vld [vmem:[#allocation2 + $0x158] sm:$0xff]  ;;  %v5578_v29 = vpack.c.bf16 %v1208_v1, %v1207_v45  ;;  %v4451_v55 = vld [vmem:[#allocation8 + $0x218] sm:$0xff]  }
 0x1c4   : > { %1080 = vst [vmem:[#allocation2 + $0x171] sm:$0xff] %v5489_v31  ;;  %2341 = vmatmul.mubr.bf16.gmra.mrb[56].mxu0 %v5491_v57  ;;  %2195 = vmatprep.mubr.bf16.mxu1 %v1171_v17  ;;  %v1178_v15 = vpack.c.bf16 %v5489_v31, %v5483_v7  ;;  %v1245_v17 = vld [vmem:[#allocation2 + $0xf0] sm:$0xff]  ;;  %v5551_v63 = vpack.c.bf16 %v1252_v25, %v1251_v23  ;;  %v1205_v11 = vld [vmem:[#allocation2 + $0x13a] sm:$0xff]  ;;  %v1206_v21 = vld [vmem:[#allocation2 + $0x142] sm:$0xff] }
 0x1c5   : > { %2348 = vmatprep.mubr.bf16.mxu0 %v5494_v59  ;;  %v5517_v0 = vpack.c.bf16 %v1246_v13, %v1245_v17  ;;  %v5568_v42 = vpack.c.bf16 %v1206_v21, %v1205_v11  ;;  %v1276_v7 = vld [vmem:[#allocation2 + $0x21] sm:$0xff]  ;;  %v1275_v13 = vld [vmem:[#allocation2 + $0x19] sm:$0xff]  ;;  %v1423_v27 = vld [vmem:[#allocation2 + $0x51] sm:$0xff] }
 0x1c6   : > { %v1307_v30 = vpack.c.bf16 %v1276_v7, %v1275_v13  ;;  %v1453_v10 = vpack.c.bf16 %v1423_v27, %v1422_v26  ;;  %v1425_v8 = vld [vmem:[#allocation2 + $0x69] sm:$0xff]  ;;  %v4453_v9 = vld [vmem:[#allocation8 + $0x228] sm:$0xff]  }
 0x1c7   : > { %v4455_v23 = vld [vmem:[#allocation8 + $0x238] sm:$0xff]  }
 0x1ca   : > { %v1258_v62 = vld [vmem:[#allocation2 + $0x188] sm:$0xff] }
 0x1cb   : > { %2196 = vmatmul.mubr.bf16.gmra.mrb[32].mxu1 %v5494_v59  ;;  %v1256_v19 = vld [vmem:[#allocation2 + $0x170] sm:$0xff] }
 0x1cc   : > { %2349 = vmatmul.mubr.bf16.gmra.mrb[60].mxu0 %v5504_v61  ;;  %2203 = vmatprep.mubr.bf16.mxu1 %v1172_v48  ;;  %v1247_v48 = vld [vmem:[#allocation2 + $0x108] sm:$0xff] }
 0x1cd   : > { %2356 = vmatprep.mubr.bf16.mxu0 %v5507_v6  ;;  %v5527_v41 = vpack.c.bf16 %v1248_v39, %v1247_v48  ;;  %v1209_v31 = vld [vmem:[#allocation2 + $0x16a] sm:$0xff] }
 0x1ce   : > { %v1420_v39 = vld [vmem:[#allocation2 + $0x31] sm:$0xff] }
 0x1d3   : > { %2204 = vmatmul.mubr.bf16.gmra.mrb[36].mxu1 %v5507_v6 }
 0x1d4   : > { %2357 = vmatmul.mubr.bf16.gmra.mrb[64].mxu0 %v5514_v54  ;;  %2211 = vmatprep.mubr.bf16.mxu1 %v1173_v60  ;;  %v5534_v60 = vadd.f32 %v3727_v50, %v3726_v3  ;;  %v4449_v3 = vld [vmem:[#allocation8 + $0x208] sm:$0xff]   ;;  %v1452_v50 = vpack.c.bf16 %v1421_v5, %v1420_v39 }
 0x1d5   : > { %2364 = vmatprep.mubr.bf16.mxu0 %v5517_v0 }
 0x1db   : > { %2212 = vmatmul.mubr.bf16.gmra.mrb[40].mxu1 %v5517_v0 }
 0x1dc   : > { %2365 = vmatmul.mubr.bf16.gmra.mrb[68].mxu0 %v5524_v53  ;;  %2219 = vmatprep.mubr.bf16.mxu1 %v1174_v14  ;;  %v1202_v14 = vld [vmem:[#allocation2 + $0x112] sm:$0xff] }
 0x1dd   : > { %2372 = vmatprep.mubr.bf16.mxu0 %v5527_v41  ;;  %v5548_v56 = vpack.c.bf16 %v1202_v14, %v1201_v44  ;;  %v1426_v14 = vld [vmem:[#allocation2 + $0x79] sm:$0xff] }
 0x1e3   : > { %2220 = vmatmul.mubr.bf16.gmra.mrb[44].mxu1 %v5527_v41 }
 0x1e4   : > { %2373 = vmatmul.mubr.bf16.gmra.mrb[72].mxu0 %v5538_v18  ;;  %2227 = vmatprep.mubr.bf16.mxu1 %v1175_v36  ;;  %v1253_v36 = vld [vmem:[#allocation2 + $0x150] sm:$0xff] }
 0x1e5   : > { %2380 = vmatprep.mubr.bf16.mxu0 %v5541_v43  ;;  %v5561_v2 = vpack.c.bf16 %v1254_v20, %v1253_v36  ;;  %v1430_v36 = vld [vmem:[#allocation2 + $0xa9] sm:$0xff] }
 0x1e6   : > { %v1457_v20 = vpack.c.bf16 %v1431_v49, %v1430_v36 }
 0x1eb   : > { %2228 = vmatmul.mubr.bf16.gmra.mrb[48].mxu1 %v5541_v43 }
 0x1ec   : > { %2381 = vmatmul.mubr.bf16.gmra.mrb[76].mxu0 %v5548_v56  ;;  %2235 = vmatprep.mubr.bf16.mxu1 %v1176_v24  ;;  %v1255_v24 = vld [vmem:[#allocation2 + $0x168] sm:$0xff] }
 0x1ed   : > { %2388 = vmatprep.mubr.bf16.mxu0 %v5551_v63  ;;  %v5571_v47 = vpack.c.bf16 %v1256_v19, %v1255_v24 }
 0x1f3   : > { %2236 = vmatmul.mubr.bf16.gmra.mrb[52].mxu1 %v5551_v63 }
 0x1f4   : > { %2389 = vmatmul.mubr.bf16.gmra.mrb[80].mxu0 %v5558_v34  ;;  %2243 = vmatprep.mubr.bf16.mxu1 %v1177_v22  ;;  %v1257_v22 = vld [vmem:[#allocation2 + $0x180] sm:$0xff] }
 0x1f5   : > { %2396 = vmatprep.mubr.bf16.mxu0 %v5561_v2  ;;  %v5581_v17 = vpack.c.bf16 %v1258_v62, %v1257_v22 }
 0x1fb   : > { %2244 = vmatmul.mubr.bf16.gmra.mrb[56].mxu1 %v5561_v2 }
 0x1fc   : > { %2397 = vmatmul.mubr.bf16.gmra.mrb[84].mxu0 %v5568_v42  ;;  %2251 = vmatprep.mubr.bf16.mxu1 %v1178_v15  ;;  %v1210_v15 = vld [vmem:[#allocation2 + $0x172] sm:$0xff] }
 0x1fd   : > { %2404 = vmatprep.mubr.bf16.mxu0 %v5571_v47  ;;  %v5586_v48 = vpack.c.bf16 %v1210_v15, %v1209_v31  ;;  %v1444_v31 = vld [vmem:[#allocation2 + $0x151] sm:$0xff]  ;;  %v1445_v15 = vld [vmem:[#allocation2 + $0x159] sm:$0xff] }
 0x1fe   : > { %v1464_v27 = vpack.c.bf16 %v1445_v15, %v1444_v31 }
 0x203   : > { %2252 = vmatmul.mubr.bf16.gmra.mrb[60].mxu1 %v5571_v47 }
 0x204   : > { %2405 = vmatmul.mubr.bf16.gmra.mrb[88].mxu0 %v5578_v29  ;;  %2453 = vmatprep.mubr.bf16.mxu1 %v5300_v28  ;;  %v4450_v28 = vld [vmem:[#allocation8 + $0x210] sm:$0xff]  }
 0x205   : > { %2412 = vmatprep.mubr.bf16.mxu0 %v5581_v17 }
 0x20b   : > { %2454 = vmatmul.mubr.bf16.vlgmr.msra.gmra.mrb[64].mxu1 %v1307_v30 }
 0x20c   : > { %2413 = vmatmul.mubr.bf16.gmra.mrb[92].mxu0 %v5586_v48  ;;  %4231 = vmatpush3.bf16.msra.mxu1 %v5213_v40  ;;  %v4452_v40 = vld [vmem:[#allocation8 + $0x220] sm:$0xff]  }
 0x20d   : > { %2461 = vmatprep.mubr.bf16.mxu1 %v5353_v38  ;;  %2614 = vmatprep.mubr.bf16.mxu0 %v1452_v50  ;;  %v1424_v38 = vld [vmem:[#allocation2 + $0x61] sm:$0xff] }
 0x20e   : > { %4232 = vmatprep.subr.bf16.mxu1 %v4449_v3  ;;  %v1454_v44 = vpack.c.bf16 %v1425_v8, %v1424_v38 }
 0x210   : > { %4233 = vmatpush3.bf16.msra.mxu1 %v4449_v3 }
 0x211   : > { %4234 = vmatprep.subr.bf16.mxu1 %v4450_v28 }
 0x213   : > { %2462 = vmatmul.mubr.bf16.gmra.mrb[68].mxu1 %v1452_v50 }
 0x214   : > { %2615 = vmatmul.mubr.bf16.vlgmr.msra.gmra.mrb[96].mxu0 %v5268_v52  ;;  %2469 = vmatprep.mubr.bf16.mxu1 %v5395_v37  ;;  %v4454_v52 = vld [vmem:[#allocation8 + $0x230] sm:$0xff]  }
 0x215   : > { %2622 = vmatprep.mubr.bf16.mxu0 %v1453_v10  ;;  %4235 = vmatpush3.bf16.msra.mxu1 %v4450_v28  ;;  %v1427_v37 = vld [vmem:[#allocation2 + $0x81] sm:$0xff] }
 0x216   : > { %4236 = vmatprep.subr.bf16.mxu1 %v4451_v55  ;;  %v1455_v25 = vpack.c.bf16 %v1427_v37, %v1426_v14 }
 0x219   : > { %4237 = vmatpush3.bf16.msra.mxu1 %v4451_v55 }
 0x21a   : > { %4238 = vmatprep.subr.bf16.mxu1 %v4452_v40 }
 0x21b   : > { %2470 = vmatmul.mubr.bf16.gmra.mrb[72].mxu1 %v1453_v10 }
 0x21c   : > { %2623 = vmatmul.mubr.bf16.gmra.mrb[100].mxu0 %v5314_v51  ;;  %2477 = vmatprep.mubr.bf16.mxu1 %v5429_v46  ;;  %v1429_v51 = vld [vmem:[#allocation2 + $0x99] sm:$0xff]  ;;  %v1428_v46 = vld [vmem:[#allocation2 + $0x91] sm:$0xff] }
 0x21d   : > { %2630 = vmatprep.mubr.bf16.mxu0 %v1454_v44  ;;  %4239 = vmatpush3.bf16.msra.mxu1 %v4452_v40  ;;  %v1456_v35 = vpack.c.bf16 %v1429_v51, %v1428_v46 }
 0x21e   : > { %4240 = vmatprep.subr.bf16.mxu1 %v4453_v9 }
 0x221   : > { %4241 = vmatpush3.bf16.msra.mxu1 %v4453_v9  ;;  %v1446_v9 = vld [vmem:[#allocation2 + $0x169] sm:$0xff] }
 0x222   : > { %4242 = vmatprep.subr.bf16.mxu1 %v4454_v52 }
 0x223   : > { %2478 = vmatmul.mubr.bf16.gmra.mrb[76].mxu1 %v1454_v44 }
 0x224   : > { %2631 = vmatmul.mubr.bf16.gmra.mrb[104].mxu0 %v5357_v58  ;;  %2485 = vmatprep.mubr.bf16.mxu1 %v5462_v32  ;;  %v1433_v58 = vld [vmem:[#allocation2 + $0xc9] sm:$0xff]  ;;  %v1432_v32 = vld [vmem:[#allocation2 + $0xc1] sm:$0xff] }
 0x225   : > { %2638 = vmatprep.mubr.bf16.mxu0 %v1455_v25  ;;  %4243 = vmatpush3.bf16.msra.mxu1 %v4454_v52  ;;  %v1458_v11 = vpack.c.bf16 %v1433_v58, %v1432_v32  ;;  %v1353_v58 = vld [vmem:[#allocation2 + $0x182] sm:$0xff]  ;;  %v1354_v32 = vld [vmem:[#allocation2 + $0x18a] sm:$0xff] }
 0x226   : > { %4244 = vmatprep.subr.bf16.mxu1 %v4455_v23 }
 0x229   : > { %4245 = vmatpush3.bf16.msra.mxu1 %v4455_v23 }
 0x22b   : > { %2486 = vmatmul.mubr.bf16.gmra.mrb[80].mxu1 %v1455_v25 }
 0x22c   : > { %2639 = vmatmul.mubr.bf16.gmra.mrb[108].mxu0 %v5397_v16  ;;  %2493 = vmatprep.mubr.bf16.mxu1 %v5491_v57  ;;  %v1434_v16 = vld [vmem:[#allocation2 + $0xd9] sm:$0xff]  ;;  %v1435_v57 = vld [vmem:[#allocation2 + $0xe1] sm:$0xff] }
 0x22d   : > { %2646 = vmatprep.mubr.bf16.mxu0 %v1456_v35  ;;  %v1459_v21 = vpack.c.bf16 %v1435_v57, %v1434_v16 }
 0x233   : > { %2494 = vmatmul.mubr.bf16.gmra.mrb[84].mxu1 %v1456_v35 }
 0x234   : > { %2647 = vmatmul.mubr.bf16.gmra.mrb[112].mxu0 %v5433_v33  ;;  %2501 = vmatprep.mubr.bf16.mxu1 %v5504_v61  ;;  %v1436_v33 = vld [vmem:[#allocation2 + $0xf1] sm:$0xff]  ;;  %v1437_v61 = vld [vmem:[#allocation2 + $0xf9] sm:$0xff] }
 0x235   : > { %2654 = vmatprep.mubr.bf16.mxu0 %v1457_v20  ;;  %v1460_v24 = vpack.c.bf16 %v1437_v61, %v1436_v33  ;;  %v1449_v33 = vld [vmem:[#allocation2 + $0x189] sm:$0xff] }
 0x23b   : > { %2502 = vmatmul.mubr.bf16.gmra.mrb[88].mxu1 %v1457_v20 }
 0x23c   : > { %2655 = vmatmul.mubr.bf16.gmra.mrb[116].mxu0 %v5466_v4  ;;  %2509 = vmatprep.mubr.bf16.mxu1 %v5514_v54  ;;  %v1438_v4 = vld [vmem:[#allocation2 + $0x109] sm:$0xff]  ;;  %v1439_v54 = vld [vmem:[#allocation2 + $0x111] sm:$0xff] }
 0x23d   : > { %2662 = vmatprep.mubr.bf16.mxu0 %v1458_v11  ;;  %v1461_v19 = vpack.c.bf16 %v1439_v54, %v1438_v4 }
 0x243   : > { %2510 = vmatmul.mubr.bf16.gmra.mrb[92].mxu1 %v1458_v11 }
 0x244   : > { %2663 = vmatmul.mubr.bf16.gmra.mrb[120].mxu0 %v5494_v59  ;;  %2517 = vmatprep.mubr.bf16.mxu1 %v5524_v53  ;;  %v1440_v59 = vld [vmem:[#allocation2 + $0x121] sm:$0xff]  ;;  %v1441_v53 = vld [vmem:[#allocation2 + $0x129] sm:$0xff] }
 0x245   : > { %2670 = vmatprep.mubr.bf16.mxu0 %v1459_v21  ;;  %v1462_v45 = vpack.c.bf16 %v1441_v53, %v1440_v59 }
 0x24b   : > { %2518 = vmatmul.mubr.bf16.gmra.mrb[96].mxu1 %v1459_v21  ;;  %v1448_v21 = vld [vmem:[#allocation2 + $0x181] sm:$0xff] }
 0x24c   : > { %2671 = vmatmul.mubr.bf16.gmra.mrb[124].mxu0 %v5507_v6  ;;  %2525 = vmatprep.mubr.bf16.mxu1 %v5538_v18  ;;  %v1442_v6 = vld [vmem:[#allocation2 + $0x139] sm:$0xff]  ;;  %v1443_v18 = vld [vmem:[#allocation2 + $0x141] sm:$0xff] }
 0x24d   : > { %2678 = vmatprep.mubr.bf16.mxu0 %v1460_v24  ;;  %v1463_v1 = vpack.c.bf16 %v1443_v18, %v1442_v6  ;;  %v1466_v6 = vpack.c.bf16 %v1449_v33, %v1448_v21 }
 0x253   : > { %2526 = vmatmul.mubr.bf16.gmra.mrb[100].mxu1 %v1460_v24 }
 0x254   : > { %2679 = vmatmul.mubr.bf16.gmra.mrb[128].mxu0 %v5517_v0  ;;  %2533 = vmatprep.mubr.bf16.mxu1 %v5548_v56  ;;  %v5616_v0 = vld [vmem:[%s6000_s5] ss:$0 sm:$0xff] }
 0x255   : > { %2686 = vmatprep.mubr.bf16.mxu0 %v1461_v19  ;;  %v2134_v13 = vadd.f32 %v5534_v60, %v5616_v0  ;;  %v2137_v3 = vadd.f32 %v5536_v12, %v5616_v0  ;;  %v1447_v12 = vld [vmem:[#allocation2 + $0x171] sm:$0xff] }
 0x256   : > { %v1465_v46 = vpack.c.bf16 %v1447_v12, %v1446_v9  ;;  %v1471_v9 = vld [vmem:[#allocation2 + $0x52] sm:$0xff] }
 0x25b   : > { %2534 = vmatmul.mubr.bf16.gmra.mrb[104].mxu1 %v1461_v19  ;;  %v5637_v19 = vpack.c.bf16 %v1354_v32, %v1353_v58 }
 0x25c   : > { %2687 = vmatmul.mubr.bf16.gmra.mrb[132].mxu0 %v5527_v41  ;;  %2541 = vmatprep.mubr.bf16.mxu1 %v5558_v34 }
 0x25d   : > { %2694 = vmatprep.mubr.bf16.mxu0 %v1462_v45 }
 0x263   : > { %2542 = vmatmul.mubr.bf16.gmra.mrb[108].mxu1 %v1462_v45 }
 0x264   : > { %2695 = vmatmul.mubr.bf16.gmra.mrb[136].mxu0 %v5541_v43  ;;  %2549 = vmatprep.mubr.bf16.mxu1 %v5568_v42 }
 0x265   : > { %2702 = vmatprep.mubr.bf16.mxu0 %v1463_v1 }
 0x266   : > { %v3732_v56 = vpop.f32.mrb[4].mxu1 }
 0x267   : > { %v3838_v22 = vpop.f32.mrb[32].mxu0  ;;  %v3733_v41 = vpop.f32.mrb[5].mxu1 }
 0x268   : > { %v3734_v62 = vadd.f32 %v3733_v41, %v3732_v56  ;;  %v3839_v34 = vpop.f32.mrb[33].mxu0  ;;  %v3735_v7 = vpop.f32.mrb[6].mxu1  ;;  %v1450_v56 = vld [vmem:[#allocation2 + $0x199] sm:$0xff] }
 0x269   : > { %v3840_v43 = vadd.f32 %v3839_v34, %v3838_v22  ;;  %v3841_v5 = vpop.f32.mrb[34].mxu0  ;;  %v3736_v42 = vpop.f32.mrb[7].mxu1  ;;  %v1451_v22 = vld [vmem:[#allocation2 + $0x1a1] sm:$0xff]  ;;  %v1468_v34 = vld [vmem:[#allocation2 + $0x32] sm:$0xff] }
 0x26a   : > { %v3737_v30 = vadd.f32 %v3736_v42, %v3735_v7  ;;  %v3842_v39 = vpop.f32.mrb[35].mxu0  ;;  %v2142_v44 = vadd.f32 %v3734_v62, %v5616_v0  ;;  %v1469_v7 = vld [vmem:[#allocation2 + $0x3a] sm:$0xff] }
 0x26b   : > { %v5622_v50 = vadd.f32 %v3840_v43, %v2134_v13  ;;  %v3843_v28 = vadd.f32 %v3842_v39, %v3841_v5  ;;  %2550 = vmatmul.mubr.bf16.gmra.mrb[112].mxu1 %v1463_v1 }
 0x26c   : > { %2703 = vmatmul.mubr.bf16.gmra.mrb[140].mxu0 %v5551_v63  ;;  %2557 = vmatprep.mubr.bf16.mxu1 %v5578_v29  ;;  %v2145_v29 = vadd.f32 %v3737_v30, %v5616_v0  ;;  %v1467_v30 = vpack.c.bf16 %v1451_v22, %v1450_v56 }
 0x26d   : > { %v5626_v26 = vadd.f32 %v3843_v28, %v2137_v3  ;;  %2710 = vmatprep.mubr.bf16.mxu0 %v1464_v27  ;;  %v1500_v28 = vpack.c.bf16 %v1469_v7, %v1468_v34 }
 0x26e   : > { %v3738_v60 = vpop.f32.mrb[8].mxu1 }
 0x26f   : > { %v3844_v55 = vpop.f32.mrb[36].mxu0  ;;  %v3739_v10 = vpop.f32.mrb[9].mxu1 }
 0x270   : > { %v3740_v40 = vadd.f32 %v3739_v10, %v3738_v60  ;;  %v3845_v8 = vpop.f32.mrb[37].mxu0  ;;  %v3741_v38 = vpop.f32.mrb[10].mxu1 }
 0x271   : > { %v3846_v52 = vadd.f32 %v3845_v8, %v3844_v55  ;;  %v3847_v37 = vpop.f32.mrb[38].mxu0  ;;  %v3742_v14 = vpop.f32.mrb[11].mxu1 }
 0x272   : > { %v3743_v23 = vadd.f32 %v3742_v14, %v3741_v38  ;;  %v3848_v63 = vpop.f32.mrb[39].mxu0  ;;  %v2150_v61 = vadd.f32 %v3740_v40, %v5616_v0  ;;  %v1402_v40 = vld [vmem:[#allocation2 + $0x198] sm:$0xff]  ;;  %v1470_v38 = vld [vmem:[#allocation2 + $0x4a] sm:$0xff] }
 0x273   : > { %v5630_v25 = vadd.f32 %v3846_v52, %v2142_v44  ;;  %v3849_v51 = vadd.f32 %v3848_v63, %v3847_v37  ;;  %2558 = vmatmul.mubr.bf16.gmra.mrb[116].mxu1 %v1464_v27  ;;  %v1472_v52 = vld [vmem:[#allocation2 + $0x62] sm:$0xff]  ;;  %v1473_v37 = vld [vmem:[#allocation2 + $0x6a] sm:$0xff] }
 0x274   : > { %2711 = vmatmul.mubr.bf16.gmra.mrb[144].mxu0 %v5561_v2  ;;  %2565 = vmatprep.mubr.bf16.mxu1 %v5586_v48  ;;  %v2153_v59 = vadd.f32 %v3743_v23, %v5616_v0 }
 0x275   : > { %v5634_v35 = vadd.f32 %v3849_v51, %v2145_v29  ;;  %2718 = vmatprep.mubr.bf16.mxu0 %v1465_v46  ;;  %v4584_v29 = vld [vmem:[#allocation2 + $0x8] sm:$0xff] }
 0x276   : > { %v3744_v49 = vpop.f32.mrb[12].mxu1  ;;  %v1419_v51 = vpack.c.bf16 %v4584_v29, %v1402_v40 }
 0x277   : > { %v3850_v36 = vpop.f32.mrb[40].mxu0  ;;  %v3745_v20 = vpop.f32.mrb[13].mxu1 }
 0x278   : > { %v3746_v11 = vadd.f32 %v3745_v20, %v3744_v49  ;;  %v3851_v16 = vpop.f32.mrb[41].mxu0  ;;  %v3747_v57 = vpop.f32.mrb[14].mxu1  ;;  %v1501_v20 = vpack.c.bf16 %v1471_v9, %v1470_v38 }
 0x279   : > { %v3852_v24 = vadd.f32 %v3851_v16, %v3850_v36  ;;  %v3853_v4 = vpop.f32.mrb[42].mxu0  ;;  %v3748_v2 = vpop.f32.mrb[15].mxu1 }
 0x27a   : > { %v3749_v54 = vadd.f32 %v3748_v2, %v3747_v57  ;;  %v3854_v48 = vpop.f32.mrb[43].mxu0  ;;  %v2158_v43 = vadd.f32 %v3746_v11, %v5616_v0  ;;  %v1502_v11 = vpack.c.bf16 %v1473_v37, %v1472_v52 }
 0x27b   : > { %v5640_v53 = vadd.f32 %v3852_v24, %v2150_v61  ;;  %v3855_v45 = vadd.f32 %v3854_v48, %v3853_v4  ;;  %2566 = vmatmul.mubr.bf16.gmra.mrb[120].mxu1 %v1465_v46  ;;  %v1474_v24 = vld [vmem:[#allocation2 + $0x7a] sm:$0xff]  ;;  %v1475_v4 = vld [vmem:[#allocation2 + $0x82] sm:$0xff]  ;;  %v1476_v48 = vld [vmem:[#allocation2 + $0x92] sm:$0xff] }
 0x27c   : > { %2719 = vmatmul.mubr.bf16.gmra.mrb[148].mxu0 %v5571_v47  ;;  %2573 = vmatprep.mubr.bf16.mxu1 %v5637_v19  ;;  %v2161_v27 = vadd.f32 %v3749_v54, %v5616_v0  ;;  %v1503_v34 = vpack.c.bf16 %v1475_v4, %v1474_v24 }
 0x27d   : > { %v5644_v18 = vadd.f32 %v3855_v45, %v2153_v59  ;;  %2726 = vmatprep.mubr.bf16.mxu0 %v1466_v6  ;;  %v1477_v59 = vld [vmem:[#allocation2 + $0x9a] sm:$0xff] }
 0x27e   : > { %v3750_v1 = vpop.f32.mrb[16].mxu1 }
 0x27f   : > { %v3856_v41 = vpop.f32.mrb[44].mxu0  ;;  %v3751_v62 = vpop.f32.mrb[17].mxu1 }
 0x280   : > { %v3752_v31 = vadd.f32 %v3751_v62, %v3750_v1  ;;  %v3857_v15 = vpop.f32.mrb[45].mxu0  ;;  %v3753_v13 = vpop.f32.mrb[18].mxu1 }
 0x281   : > { %v3858_v5 = vadd.f32 %v3857_v15, %v3856_v41  ;;  %v3859_v42 = vpop.f32.mrb[46].mxu0  ;;  %v3754_v47 = vpop.f32.mrb[19].mxu1  ;;  %v1504_v15 = vpack.c.bf16 %v1477_v59, %v1476_v48 }
 0x282   : > { %v3755_v39 = vadd.f32 %v3754_v47, %v3753_v13  ;;  %v3860_v3 = vpop.f32.mrb[47].mxu0  ;;  %v2166_v46 = vadd.f32 %v3752_v31, %v5616_v0 }
 0x283   : > { %v5648_v60 = vadd.f32 %v3858_v5, %v2158_v43  ;;  %v3861_v55 = vadd.f32 %v3860_v3, %v3859_v42  ;;  %2574 = vmatmul.mubr.bf16.gmra.mrb[124].mxu1 %v1466_v6 }
 0x284   : > { %2727 = vmatmul.mubr.bf16.gmra.mrb[152].mxu0 %v5581_v17  ;;  %4246 = vmatprep.mubr.bf16.mxu1 %v1500_v28  ;;  %v2169_v16 = vadd.f32 %v3755_v39, %v5616_v0  ;;  %v1479_v39 = vld [vmem:[#allocation2 + $0xb2] sm:$0xff] }
 0x285   : > { %v5651_v10 = vadd.f32 %v3861_v55, %v2161_v27  ;;  %2734 = vmatprep.mubr.bf16.mxu0 %v1467_v30  ;;  %v1478_v30 = vld [vmem:[#allocation2 + $0xaa] sm:$0xff]  ;;  %v1480_v27 = vld [vmem:[#allocation2 + $0xc2] sm:$0xff] }
 0x286   : > { %v3756_v8 = vpop.f32.mrb[20].mxu1  ;;  %v1481_v55 = vld [vmem:[#allocation2 + $0xca] sm:$0xff]  ;;  %v1505_v37 = vpack.c.bf16 %v1479_v39, %v1478_v30 }
 0x287   : > { %v3862_v12 = vpop.f32.mrb[48].mxu0  ;;  %v3757_v44 = vpop.f32.mrb[21].mxu1 }
 0x288   : > { %v3758_v14 = vadd.f32 %v3757_v44, %v3756_v8  ;;  %v3863_v23 = vpop.f32.mrb[49].mxu0  ;;  %v3759_v63 = vpop.f32.mrb[22].mxu1 }
 0x289   : > { %v3864_v17 = vadd.f32 %v3863_v23, %v3862_v12  ;;  %v3865_v49 = vpop.f32.mrb[50].mxu0  ;;  %v3760_v36 = vpop.f32.mrb[23].mxu1 }
 0x28a   : > { %v3761_v58 = vadd.f32 %v3760_v36, %v3759_v63  ;;  %v3866_v32 = vpop.f32.mrb[51].mxu0  ;;  %v2174_v56 = vadd.f32 %v3758_v14, %v5616_v0  ;;  %v1506_v63 = vpack.c.bf16 %v1481_v55, %v1480_v27  ;;  %v1482_v36 = vld [vmem:[#allocation2 + $0xda] sm:$0xff] }
 0x28b   : > { %v5655_v57 = vadd.f32 %v3864_v17, %v2166_v46  ;;  %v3867_v21 = vadd.f32 %v3866_v32, %v3865_v49  ;;  %4247 = vmatmul.mubr.bf16.vlgmr.msra.gmra.mrb[128].mxu1 %v1501_v20  ;;  %v1483_v20 = vld [vmem:[#allocation2 + $0xe2] sm:$0xff] }
 0x28c   : > { %2735 = vmatmul.mubr.bf16.gmra.mrb[156].mxu0 %v1419_v51  ;;  %4250 = vmatprep.mubr.bf16.mxu1 %v1502_v11  ;;  %v2177_v13 = vadd.f32 %v3761_v58, %v5616_v0  ;;  %v1484_v11 = vld [vmem:[#allocation2 + $0xf2] sm:$0xff]  ;;  %v1507_v59 = vpack.c.bf16 %v1483_v20, %v1482_v36  ;;  %v1493_v20 = vld [vmem:[#allocation2 + $0x15a] sm:$0xff] }
 0x28d   : > { %v5657_v33 = vadd.f32 %v3867_v21, %v2169_v16  ;;  %v1485_v16 = vld [vmem:[#allocation2 + $0xfa] sm:$0xff]  ;;  %v1492_v36 = vld [vmem:[#allocation2 + $0x152] sm:$0xff] }
 0x28e   : > { %v3762_v61 = vpop.f32.mrb[24].mxu1 }
 0x28f   : > { %v3868_v2 = vpop.f32.mrb[52].mxu0  ;;  %v3763_v54 = vpop.f32.mrb[25].mxu1 }
 0x290   : > { %v3764_v45 = vadd.f32 %v3763_v54, %v3762_v61  ;;  %v3869_v6 = vpop.f32.mrb[53].mxu0  ;;  %v3765_v1 = vpop.f32.mrb[26].mxu1 }
 0x291   : > { %v3870_v22 = vadd.f32 %v3869_v6, %v3868_v2  ;;  %v3871_v41 = vpop.f32.mrb[54].mxu0  ;;  %v3766_v62 = vpop.f32.mrb[27].mxu1 }
 0x292   : > { %v3767_v7 = vadd.f32 %v3766_v62, %v3765_v1  ;;  %v3872_v31 = vpop.f32.mrb[55].mxu0  ;;  %v2182_v9 = vadd.f32 %v3764_v45, %v5616_v0  ;;  %v1508_v1 = vpack.c.bf16 %v1485_v16, %v1484_v11 }
 0x293   : > { %v5661_v43 = vadd.f32 %v3870_v22, %v2174_v56  ;;  %v3873_v5 = vadd.f32 %v3872_v31, %v3871_v41  ;;  %4251 = vmatmul.mubr.bf16.gmra.mrb[132].mxu1 %v1503_v34  ;;  %v1487_v31 = vld [vmem:[#allocation2 + $0x112] sm:$0xff] }
 0x294   : > { %4254 = vmatprep.mubr.bf16.mxu1 %v1504_v15  ;;  %v2185_v29 = vadd.f32 %v3767_v7, %v5616_v0  ;;  %v1486_v7 = vld [vmem:[#allocation2 + $0x10a] sm:$0xff] }
 0x295   : > { %v5663_v42 = vadd.f32 %v3873_v5, %v2177_v13  ;;  %v1488_v5 = vld [vmem:[#allocation2 + $0x122] sm:$0xff] }
 0x296   : > { %v3768_v47 = vpop.f32.mrb[28].mxu1 }
 0x297   : > { %v3874_v3 = vpop.f32.mrb[56].mxu0  ;;  %v3769_v28 = vpop.f32.mrb[29].mxu1 }
 0x298   : > { %v3770_v40 = vadd.f32 %v3769_v28, %v3768_v47  ;;  %v3875_v8 = vpop.f32.mrb[57].mxu0  ;;  %v3771_v38 = vpop.f32.mrb[30].mxu1  ;;  %v1489_v47 = vld [vmem:[#allocation2 + $0x12a] sm:$0xff] }
 0x299   : > { %v3876_v12 = vadd.f32 %v3875_v8, %v3874_v3  ;;  %v3877_v44 = vpop.f32.mrb[58].mxu0  ;;  %v3772_v52 = vpop.f32.mrb[31].mxu1  ;;  %v1509_v8 = vpack.c.bf16 %v1487_v31, %v1486_v7 }
 0x29a   : > { %v3773_v14 = vadd.f32 %v3772_v52, %v3771_v38  ;;  %v3878_v23 = vpop.f32.mrb[59].mxu0  ;;  %v2190_v4 = vadd.f32 %v3770_v40, %v5616_v0 }
 0x29b   : > { %v5667_v51 = vadd.f32 %v3876_v12, %v2182_v9  ;;  %v3879_v46 = vadd.f32 %v3878_v23, %v3877_v44  ;;  %4255 = vmatmul.mubr.bf16.gmra.mrb[136].mxu1 %v1505_v37  ;;  %v1510_v12 = vpack.c.bf16 %v1489_v47, %v1488_v5 }
 0x29c   : > { %4258 = vmatprep.mubr.bf16.mxu1 %v1506_v63  ;;  %v2193_v56 = vadd.f32 %v3773_v14, %v5616_v0  ;;  %v1490_v63 = vld [vmem:[#allocation2 + $0x13a] sm:$0xff] }
 0x29d   : > { %v5669_v17 = vadd.f32 %v3879_v46, %v2185_v29  ;;  %v1491_v29 = vld [vmem:[#allocation2 + $0x142] sm:$0xff] }
 0x29e   : > { %v3774_v49 = vpop.f32.mrb[32].mxu1 }
 0x29f   : > { %v3880_v58 = vpop.f32.mrb[60].mxu0  ;;  %v3775_v32 = vpop.f32.mrb[33].mxu1 }
 0x2a0   : > { %v3776_v21 = vadd.f32 %v3775_v32, %v3774_v49  ;;  %v3881_v61 = vpop.f32.mrb[61].mxu0  ;;  %v3777_v24 = vpop.f32.mrb[34].mxu1 }
 0x2a1   : > { %v3882_v2 = vadd.f32 %v3881_v61, %v3880_v58  ;;  %v3883_v54 = vpop.f32.mrb[62].mxu0  ;;  %v3778_v48 = vpop.f32.mrb[35].mxu1 }
 0x2a2   : > { %v3779_v45 = vadd.f32 %v3778_v48, %v3777_v24  ;;  %v3884_v6 = vpop.f32.mrb[63].mxu0  ;;  %v2198_v28 = vadd.f32 %v3776_v21, %v5616_v0  ;;  %v1512_v48 = vpack.c.bf16 %v1493_v20, %v1492_v36 }
 0x2a3   : > { %v5673_v22 = vadd.f32 %v3882_v2, %v2190_v4  ;;  %v3885_v41 = vadd.f32 %v3884_v6, %v3883_v54  ;;  %4259 = vmatmul.mubr.bf16.gmra.mrb[140].mxu1 %v1507_v59  ;;  %v1511_v4 = vpack.c.bf16 %v1491_v29, %v1490_v63 }
 0x2a4   : > { %4262 = vmatprep.mubr.bf16.mxu1 %v1508_v1  ;;  %v2201_v44 = vadd.f32 %v3779_v45, %v5616_v0 }
 0x2a5   : > { %v5675_v62 = vadd.f32 %v3885_v41, %v2193_v56  ;;  %v1494_v41 = vld [vmem:[#allocation2 + $0x16a] sm:$0xff] }
 0x2a6   : > { %v3780_v34 = vpop.f32.mrb[36].mxu1 }
 0x2a7   : > { %v3886_v15 = vpop.f32.mrb[64].mxu0  ;;  %v3781_v13 = vpop.f32.mrb[37].mxu1 }
 0x2a8   : > { %v3782_v30 = vadd.f32 %v3781_v13, %v3780_v34  ;;  %v3887_v39 = vpop.f32.mrb[65].mxu0  ;;  %v3783_v3 = vpop.f32.mrb[38].mxu1  ;;  %v1495_v34 = vld [vmem:[#allocation2 + $0x172] sm:$0xff] }
 0x2a9   : > { %v3888_v27 = vadd.f32 %v3887_v39, %v3886_v15  ;;  %v3889_v55 = vpop.f32.mrb[66].mxu0  ;;  %v3784_v40 = vpop.f32.mrb[39].mxu1 }
 0x2aa   : > { %v3785_v38 = vadd.f32 %v3784_v40, %v3783_v3  ;;  %v3890_v9 = vpop.f32.mrb[67].mxu0  ;;  %v2206_v16 = vadd.f32 %v3782_v30, %v5616_v0 }
 0x2ab   : > { %v5679_v52 = vadd.f32 %v3888_v27, %v2198_v28  ;;  %v3891_v37 = vadd.f32 %v3890_v9, %v3889_v55  ;;  %4263 = vmatmul.mubr.bf16.gmra.mrb[144].mxu1 %v1509_v8  ;;  %v1513_v28 = vpack.c.bf16 %v1495_v34, %v1494_v41  ;;  %v1498_v9 = vld [vmem:[#allocation2 + $0x19a] sm:$0xff] }
 0x2ac   : > { %4266 = vmatprep.mubr.bf16.mxu1 %v1510_v12  ;;  %v2209_v59 = vadd.f32 %v3785_v38, %v5616_v0  ;;  %v1499_v12 = vld [vmem:[#allocation2 + $0x1a2] sm:$0xff] }
 0x2ad   : > { %v5681_v14 = vadd.f32 %v3891_v37, %v2201_v44  ;;  %v1515_v29 = vpack.c.bf16 %v1499_v12, %v1498_v9 }
 0x2ae   : > { %v3786_v23 = vpop.f32.mrb[40].mxu1 }
 0x2af   : > { %v3892_v46 = vpop.f32.mrb[68].mxu0  ;;  %v3787_v49 = vpop.f32.mrb[41].mxu1 }
 0x2b0   : > { %v3788_v58 = vadd.f32 %v3787_v49, %v3786_v23  ;;  %v3893_v32 = vpop.f32.mrb[69].mxu0  ;;  %v3789_v11 = vpop.f32.mrb[42].mxu1 }
 0x2b1   : > { %v3894_v21 = vadd.f32 %v3893_v32, %v3892_v46  ;;  %v3895_v61 = vpop.f32.mrb[70].mxu0  ;;  %v3790_v24 = vpop.f32.mrb[43].mxu1 }
 0x2b2   : > { %v3791_v2 = vadd.f32 %v3790_v24, %v3789_v11  ;;  %v3896_v54 = vpop.f32.mrb[71].mxu0  ;;  %v2214_v47 = vadd.f32 %v3788_v58, %v5616_v0 }
 0x2b3   : > { %v5685_v45 = vadd.f32 %v3894_v21, %v2206_v16  ;;  %v3897_v6 = vadd.f32 %v3896_v54, %v3895_v61  ;;  %4267 = vmatmul.mubr.bf16.gmra.mrb[148].mxu1 %v1511_v4 }
 0x2b4   : > { %4270 = vmatprep.mubr.bf16.mxu1 %v1512_v48  ;;  %v2217_v40 = vadd.f32 %v3791_v2, %v5616_v0 }
 0x2b5   : > { %v5687_v1 = vadd.f32 %v3897_v6, %v2209_v59 }
 0x2b6   : > { %v3792_v56 = vpop.f32.mrb[44].mxu1 }
 0x2b7   : > { %v3898_v7 = vpop.f32.mrb[72].mxu0  ;;  %v3793_v31 = vpop.f32.mrb[45].mxu1 }
 0x2b8   : > { %v3794_v15 = vadd.f32 %v3793_v31, %v3792_v56  ;;  %v3899_v13 = vpop.f32.mrb[73].mxu0  ;;  %v3795_v5 = vpop.f32.mrb[46].mxu1 }
 0x2b9   : > { %v3900_v30 = vadd.f32 %v3899_v13, %v3898_v7  ;;  %v3901_v39 = vpop.f32.mrb[74].mxu0  ;;  %v3796_v3 = vpop.f32.mrb[47].mxu1 }
 0x2ba   : > { %v3797_v27 = vadd.f32 %v3796_v3, %v3795_v5  ;;  %v3902_v55 = vpop.f32.mrb[75].mxu0  ;;  %v2222_v20 = vadd.f32 %v3794_v15, %v5616_v0 }
 0x2bb   : > { %v5691_v8 = vadd.f32 %v3900_v30, %v2214_v47  ;;  %v3903_v38 = vadd.f32 %v3902_v55, %v3901_v39  ;;  %4271 = vmatmul.mubr.bf16.gmra.mrb[152].mxu1 %v1513_v28 }
 0x2bc   : > { %4274 = vmatprep.mubr.bf16.mxu1 %v5637_v19  ;;  %v2225_v19 = vadd.f32 %v3797_v27, %v5616_v0 }
 0x2bd   : > { %v5694_v44 = vadd.f32 %v3903_v38, %v2217_v40 }
 0x2be   : > { %v3798_v37 = vpop.f32.mrb[48].mxu1 }
 0x2bf   : > { %v3904_v23 = vpop.f32.mrb[76].mxu0  ;;  %v3799_v63 = vpop.f32.mrb[49].mxu1 }
 0x2c0   : > { %v3800_v46 = vadd.f32 %v3799_v63, %v3798_v37  ;;  %v3905_v49 = vpop.f32.mrb[77].mxu0  ;;  %v3801_v36 = vpop.f32.mrb[50].mxu1 }
 0x2c1   : > { %v3906_v58 = vadd.f32 %v3905_v49, %v3904_v23  ;;  %v3907_v32 = vpop.f32.mrb[78].mxu0  ;;  %v3802_v11 = vpop.f32.mrb[51].mxu1 }
 0x2c2   : > { %v3803_v16 = vadd.f32 %v3802_v11, %v3801_v36  ;;  %v3908_v21 = vpop.f32.mrb[79].mxu0  ;;  %v2230_v41 = vadd.f32 %v3800_v46, %v5616_v0 }
 0x2c3   : > { %v5698_v61 = vadd.f32 %v3906_v58, %v2222_v20  ;;  %v3909_v24 = vadd.f32 %v3908_v21, %v3907_v32  ;;  %4275 = vmatmul.mubr.bf16.gmra.mrb[156].mxu1 %v1515_v29 }
 0x2c4   : > { %v2233_v5 = vadd.f32 %v3803_v16, %v5616_v0 }
 0x2c5   : > { %v5700_v4 = vadd.f32 %v3909_v24, %v2225_v19 }
 0x2c6   : > { %v3804_v2 = vpop.f32.mrb[52].mxu1 }
 0x2c7   : > { %v3910_v54 = vpop.f32.mrb[80].mxu0  ;;  %v3805_v48 = vpop.f32.mrb[53].mxu1 }
 0x2c8   : > { %v3806_v59 = vadd.f32 %v3805_v48, %v3804_v2  ;;  %v3911_v6 = vpop.f32.mrb[81].mxu0  ;;  %v3807_v56 = vpop.f32.mrb[54].mxu1 }
 0x2c9   : > { %v3912_v34 = vadd.f32 %v3911_v6, %v3910_v54  ;;  %v3913_v7 = vpop.f32.mrb[82].mxu0  ;;  %v3808_v31 = vpop.f32.mrb[55].mxu1 }
 0x2ca   : > { %v3809_v15 = vadd.f32 %v3808_v31, %v3807_v56  ;;  %v3914_v13 = vpop.f32.mrb[83].mxu0  ;;  %v2238_v9 = vadd.f32 %v3806_v59, %v5616_v0 }
 0x2cb   : > { %v5704_v47 = vadd.f32 %v3912_v34, %v2230_v41  ;;  %v3915_v30 = vadd.f32 %v3914_v13, %v3913_v7 }
 0x2cc   : > { %v2241_v46 = vadd.f32 %v3809_v15, %v5616_v0 }
 0x2cd   : > { %v5706_v39 = vadd.f32 %v3915_v30, %v2233_v5 }
 0x2ce   : > { %v3810_v3 = vpop.f32.mrb[56].mxu1 }
 0x2cf   : > { %v3916_v28 = vpop.f32.mrb[84].mxu0  ;;  %v3811_v27 = vpop.f32.mrb[57].mxu1 }
 0x2d0   : > { %v3812_v55 = vadd.f32 %v3811_v27, %v3810_v3  ;;  %v3917_v40 = vpop.f32.mrb[85].mxu0  ;;  %v3813_v38 = vpop.f32.mrb[58].mxu1 }
 0x2d1   : > { %v3918_v12 = vadd.f32 %v3917_v40, %v3916_v28  ;;  %v3919_v37 = vpop.f32.mrb[86].mxu0  ;;  %v3814_v23 = vpop.f32.mrb[59].mxu1 }
 0x2d2   : > { %v3815_v63 = vadd.f32 %v3814_v23, %v3813_v38  ;;  %v3920_v29 = vpop.f32.mrb[87].mxu0  ;;  %v2246_v24 = vadd.f32 %v3812_v55, %v5616_v0 }
 0x2d3   : > { %v5710_v49 = vadd.f32 %v3918_v12, %v2238_v9  ;;  %v3921_v36 = vadd.f32 %v3920_v29, %v3919_v37 }
 0x2d4   : > { %v2249_v56 = vadd.f32 %v3815_v63, %v5616_v0 }
 0x2d5   : > { %v5712_v20 = vadd.f32 %v3921_v36, %v2241_v46 }
 0x2d6   : > { %v3816_v58 = vpop.f32.mrb[60].mxu1 }
 0x2d7   : > { %v3922_v32 = vpop.f32.mrb[88].mxu0  ;;  %v3817_v11 = vpop.f32.mrb[61].mxu1 }
 0x2d8   : > { %v3818_v16 = vadd.f32 %v3817_v11, %v3816_v58  ;;  %v3923_v21 = vpop.f32.mrb[89].mxu0  ;;  %v3819_v19 = vpop.f32.mrb[62].mxu1 }
 0x2d9   : > { %v3924_v2 = vadd.f32 %v3923_v21, %v3922_v32  ;;  %v3925_v54 = vpop.f32.mrb[90].mxu0  ;;  %v3820_v48 = vpop.f32.mrb[63].mxu1 }
 0x2da   : > { %v3821_v59 = vadd.f32 %v3820_v48, %v3819_v19  ;;  %v3926_v6 = vpop.f32.mrb[91].mxu0  ;;  %v2254_v28 = vadd.f32 %v3818_v16, %v5616_v0 }
 0x2db   : > { %v5716_v41 = vadd.f32 %v3924_v2, %v2246_v24  ;;  %v3927_v34 = vadd.f32 %v3926_v6, %v3925_v54 }
 0x2dc   : > { %v2257_v37 = vadd.f32 %v3821_v59, %v5616_v0 }
 0x2dd   : > { %v5718_v7 = vadd.f32 %v3927_v34, %v2249_v56 }
 0x2de   : > { %v3950_v31 = vpop.f32.mrb[64].mxu1 }
 0x2df   : > { %v3928_v15 = vpop.f32.mrb[92].mxu0  ;;  %v3951_v13 = vpop.f32.mrb[65].mxu1 }
 0x2e0   : > { %v3929_v5 = vpop.f32.mrb[93].mxu0  ;;  %v3952_v30 = vadd.f32 %v3951_v13, %v3950_v31  ;;  %v3953_v3 = vpop.f32.mrb[66].mxu1 }
 0x2e1   : > { %v3930_v27 = vadd.f32 %v3929_v5, %v3928_v15  ;;  %v3931_v55 = vpop.f32.mrb[94].mxu0  ;;  %v3954_v40 = vpop.f32.mrb[67].mxu1 }
 0x2e2   : > { %v2456_v38 = vadd.f32 %v3952_v30, %v5622_v50  ;;  %v3932_v9 = vpop.f32.mrb[95].mxu0  ;;  %v3955_v12 = vadd.f32 %v3954_v40, %v3953_v3 }
 0x2e3   : > { %v5723_v23 = vadd.f32 %v3930_v27, %v2254_v28  ;;  %v3933_v63 = vadd.f32 %v3932_v9, %v3931_v55 }
 0x2e4   : > { %v2459_v29 = vadd.f32 %v3955_v12, %v5626_v26 }
 0x2e5   : > { %v5726_v46 = vadd.f32 %v3933_v63, %v2257_v37 }
 0x2e6   : > { %v3956_v36 = vpop.f32.mrb[68].mxu1 }
 0x2e7   : > { %v4062_v58 = vpop.f32.mrb[96].mxu0  ;;  %v3957_v32 = vpop.f32.mrb[69].mxu1 }
 0x2e8   : > { %v3958_v11 = vadd.f32 %v3957_v32, %v3956_v36  ;;  %v4063_v16 = vpop.f32.mrb[97].mxu0  ;;  %v3959_v21 = vpop.f32.mrb[70].mxu1 }
 0x2e9   : > { %v4064_v19 = vadd.f32 %v4063_v16, %v4062_v58  ;;  %v4065_v24 = vpop.f32.mrb[98].mxu0  ;;  %v3960_v50 = vpop.f32.mrb[71].mxu1 }
 0x2ea   : > { %v2464_v2 = vadd.f32 %v3958_v11, %v5630_v25  ;;  %v3961_v54 = vadd.f32 %v3960_v50, %v3959_v21  ;;  %v4066_v0 = vpop.f32.mrb[99].mxu0 }
 0x2eb   : > { %v4067_v48 = vadd.f32 %v4066_v0, %v4065_v24  ;;  %v5729_v59 = vadd.f32 %v4064_v19, %v2456_v38 }
 0x2ec   : > { %v2467_v26 = vadd.f32 %v3961_v54, %v5634_v35 }
 0x2ed   : > { %v5732_v6 = vadd.f32 %v4067_v48, %v2459_v29 }
 0x2ee   : > { %v3962_v56 = vpop.f32.mrb[72].mxu1 }
 0x2ef   : > { %v4068_v34 = vpop.f32.mrb[100].mxu0  ;;  %v3963_v31 = vpop.f32.mrb[73].mxu1 }
 0x2f0   : > { %v3964_v15 = vadd.f32 %v3963_v31, %v3962_v56  ;;  %v4069_v13 = vpop.f32.mrb[101].mxu0  ;;  %v3965_v5 = vpop.f32.mrb[74].mxu1 }
 0x2f1   : > { %v4070_v30 = vadd.f32 %v4069_v13, %v4068_v34  ;;  %v4071_v3 = vpop.f32.mrb[102].mxu0  ;;  %v3966_v28 = vpop.f32.mrb[75].mxu1 }
 0x2f2   : > { %v2472_v25 = vadd.f32 %v3964_v15, %v5640_v53  ;;  %v3967_v27 = vadd.f32 %v3966_v28, %v3965_v5  ;;  %v4072_v55 = vpop.f32.mrb[103].mxu0 }
 0x2f3   : > { %v4073_v40 = vadd.f32 %v4072_v55, %v4071_v3  ;;  %v5735_v38 = vadd.f32 %v4070_v30, %v2464_v2 }
 0x2f4   : > { %v2475_v35 = vadd.f32 %v3967_v27, %v5644_v18 }
 0x2f5   : > { %v5738_v9 = vadd.f32 %v4073_v40, %v2467_v26 }
 0x2f6   : > { %v3968_v12 = vpop.f32.mrb[76].mxu1 }
 0x2f7   : > { %v4074_v37 = vpop.f32.mrb[104].mxu0  ;;  %v3969_v63 = vpop.f32.mrb[77].mxu1 }
 0x2f8   : > { %v3970_v29 = vadd.f32 %v3969_v63, %v3968_v12  ;;  %v4075_v36 = vpop.f32.mrb[105].mxu0  ;;  %v3971_v58 = vpop.f32.mrb[78].mxu1 }
 0x2f9   : > { %v4076_v32 = vadd.f32 %v4075_v36, %v4074_v37  ;;  %v4077_v11 = vpop.f32.mrb[106].mxu0  ;;  %v3972_v16 = vpop.f32.mrb[79].mxu1 }
 0x2fa   : > { %v2480_v53 = vadd.f32 %v3970_v29, %v5648_v60  ;;  %v3973_v21 = vadd.f32 %v3972_v16, %v3971_v58  ;;  %v4078_v19 = vpop.f32.mrb[107].mxu0 }
 0x2fb   : > { %v4079_v24 = vadd.f32 %v4078_v19, %v4077_v11  ;;  %v5741_v50 = vadd.f32 %v4076_v32, %v2472_v25 }
 0x2fc   : > { %v2483_v18 = vadd.f32 %v3973_v21, %v5651_v10 }
 0x2fd   : > { %v5744_v2 = vadd.f32 %v4079_v24, %v2475_v35 }
 0x2fe   : > { %v3974_v54 = vpop.f32.mrb[80].mxu1 }
 0x2ff   : > { %v4080_v0 = vpop.f32.mrb[108].mxu0  ;;  %v3975_v48 = vpop.f32.mrb[81].mxu1 }
 0x300   : > { %v3976_v26 = vadd.f32 %v3975_v48, %v3974_v54  ;;  %v4081_v56 = vpop.f32.mrb[109].mxu0  ;;  %v3977_v34 = vpop.f32.mrb[82].mxu1 }
 0x301   : > { %v4082_v31 = vadd.f32 %v4081_v56, %v4080_v0  ;;  %v4083_v15 = vpop.f32.mrb[110].mxu0  ;;  %v3978_v13 = vpop.f32.mrb[83].mxu1 }
 0x302   : > { %v2488_v60 = vadd.f32 %v3976_v26, %v5655_v57  ;;  %v3979_v5 = vadd.f32 %v3978_v13, %v3977_v34  ;;  %v4084_v30 = vpop.f32.mrb[111].mxu0 }
 0x303   : > { %v4085_v3 = vadd.f32 %v4084_v30, %v4083_v15  ;;  %v5747_v28 = vadd.f32 %v4082_v31, %v2480_v53 }
 0x304   : > { %v2491_v10 = vadd.f32 %v3979_v5, %v5657_v33 }
 0x305   : > { %v5750_v25 = vadd.f32 %v4085_v3, %v2483_v18 }
 0x306   : > { %v3980_v27 = vpop.f32.mrb[84].mxu1 }
 0x307   : > { %v4086_v55 = vpop.f32.mrb[112].mxu0  ;;  %v3981_v40 = vpop.f32.mrb[85].mxu1 }
 0x308   : > { %v3982_v35 = vadd.f32 %v3981_v40, %v3980_v27  ;;  %v4087_v12 = vpop.f32.mrb[113].mxu0  ;;  %v3983_v37 = vpop.f32.mrb[86].mxu1 }
 0x309   : > { %v4088_v63 = vadd.f32 %v4087_v12, %v4086_v55  ;;  %v4089_v29 = vpop.f32.mrb[114].mxu0  ;;  %v3984_v36 = vpop.f32.mrb[87].mxu1 }
 0x30a   : > { %v2496_v57 = vadd.f32 %v3982_v35, %v5661_v43  ;;  %v3985_v58 = vadd.f32 %v3984_v36, %v3983_v37  ;;  %v4090_v32 = vpop.f32.mrb[115].mxu0 }
 0x30b   : > { %v4091_v11 = vadd.f32 %v4090_v32, %v4089_v29  ;;  %v5753_v16 = vadd.f32 %v4088_v63, %v2488_v60 }
 0x30c   : > { %v2499_v33 = vadd.f32 %v3985_v58, %v5663_v42 }
 0x30d   : > { %v5756_v53 = vadd.f32 %v4091_v11, %v2491_v10 }
 0x30e   : > { %v3986_v21 = vpop.f32.mrb[88].mxu1 }
 0x30f   : > { %v4092_v19 = vpop.f32.mrb[116].mxu0  ;;  %v3987_v24 = vpop.f32.mrb[89].mxu1 }
 0x310   : > { %v3988_v18 = vadd.f32 %v3987_v24, %v3986_v21  ;;  %v4093_v54 = vpop.f32.mrb[117].mxu0  ;;  %v3989_v0 = vpop.f32.mrb[90].mxu1 }
 0x311   : > { %v4094_v48 = vadd.f32 %v4093_v54, %v4092_v19  ;;  %v4095_v26 = vpop.f32.mrb[118].mxu0  ;;  %v3990_v56 = vpop.f32.mrb[91].mxu1 }
 0x312   : > { %v2504_v43 = vadd.f32 %v3988_v18, %v5667_v51  ;;  %v3991_v34 = vadd.f32 %v3990_v56, %v3989_v0  ;;  %v4096_v31 = vpop.f32.mrb[119].mxu0 }
 0x313   : > { %v4097_v15 = vadd.f32 %v4096_v31, %v4095_v26  ;;  %v5759_v13 = vadd.f32 %v4094_v48, %v2496_v57 }
 0x314   : > { %v2507_v42 = vadd.f32 %v3991_v34, %v5669_v17 }
 0x315   : > { %v5762_v60 = vadd.f32 %v4097_v15, %v2499_v33 }
 0x316   : > { %v3992_v5 = vpop.f32.mrb[92].mxu1 }
 0x317   : > { %v4098_v30 = vpop.f32.mrb[120].mxu0  ;;  %v3993_v3 = vpop.f32.mrb[93].mxu1 }
 0x318   : > { %v3994_v10 = vadd.f32 %v3993_v3, %v3992_v5  ;;  %v4099_v27 = vpop.f32.mrb[121].mxu0  ;;  %v3995_v55 = vpop.f32.mrb[94].mxu1 }
 0x319   : > { %v4100_v40 = vadd.f32 %v4099_v27, %v4098_v30  ;;  %v4101_v35 = vpop.f32.mrb[122].mxu0  ;;  %v3996_v12 = vpop.f32.mrb[95].mxu1 }
 0x31a   : > { %v2512_v51 = vadd.f32 %v3994_v10, %v5673_v22  ;;  %v3997_v37 = vadd.f32 %v3996_v12, %v3995_v55  ;;  %v4102_v63 = vpop.f32.mrb[123].mxu0 }
 0x31b   : > { %v4103_v29 = vadd.f32 %v4102_v63, %v4101_v35  ;;  %v5765_v36 = vadd.f32 %v4100_v40, %v2504_v43 }
 0x31c   : > { %v2515_v17 = vadd.f32 %v3997_v37, %v5675_v62 }
 0x31d   : > { %v5768_v57 = vadd.f32 %v4103_v29, %v2507_v42 }
 0x31e   : > { %v3998_v58 = vpop.f32.mrb[96].mxu1 }
 0x31f   : > { %v4104_v32 = vpop.f32.mrb[124].mxu0  ;;  %v3999_v11 = vpop.f32.mrb[97].mxu1 }
 0x320   : > { %v4000_v33 = vadd.f32 %v3999_v11, %v3998_v58  ;;  %v4105_v21 = vpop.f32.mrb[125].mxu0  ;;  %v4001_v19 = vpop.f32.mrb[98].mxu1 }
 0x321   : > { %v4106_v24 = vadd.f32 %v4105_v21, %v4104_v32  ;;  %v4107_v18 = vpop.f32.mrb[126].mxu0  ;;  %v4002_v54 = vpop.f32.mrb[99].mxu1 }
 0x322   : > { %v2520_v22 = vadd.f32 %v4000_v33, %v5679_v52  ;;  %v4003_v0 = vadd.f32 %v4002_v54, %v4001_v19  ;;  %v4108_v48 = vpop.f32.mrb[127].mxu0 }
 0x323   : > { %v4109_v26 = vadd.f32 %v4108_v48, %v4107_v18  ;;  %v5771_v56 = vadd.f32 %v4106_v24, %v2512_v51 }
 0x324   : > { %v2523_v62 = vadd.f32 %v4003_v0, %v5681_v14 }
 0x325   : > { %v5774_v43 = vadd.f32 %v4109_v26, %v2515_v17 }
 0x326   : > { %v4004_v34 = vpop.f32.mrb[100].mxu1 }
 0x327   : > { %v4110_v31 = vpop.f32.mrb[128].mxu0  ;;  %v4005_v15 = vpop.f32.mrb[101].mxu1 }
 0x328   : > { %v4006_v42 = vadd.f32 %v4005_v15, %v4004_v34  ;;  %v4111_v5 = vpop.f32.mrb[129].mxu0  ;;  %v4007_v30 = vpop.f32.mrb[102].mxu1 }
 0x329   : > { %v4112_v3 = vadd.f32 %v4111_v5, %v4110_v31  ;;  %v4113_v10 = vpop.f32.mrb[130].mxu0  ;;  %v4008_v27 = vpop.f32.mrb[103].mxu1 }
 0x32a   : > { %v2528_v52 = vadd.f32 %v4006_v42, %v5685_v45  ;;  %v4009_v55 = vadd.f32 %v4008_v27, %v4007_v30  ;;  %v4114_v40 = vpop.f32.mrb[131].mxu0 }
 0x32b   : > { %v4115_v35 = vadd.f32 %v4114_v40, %v4113_v10  ;;  %v5777_v12 = vadd.f32 %v4112_v3, %v2520_v22 }
 0x32c   : > { %v2531_v14 = vadd.f32 %v4009_v55, %v5687_v1 }
 0x32d   : > { %v5780_v51 = vadd.f32 %v4115_v35, %v2523_v62 }
 0x32e   : > { %v4010_v37 = vpop.f32.mrb[104].mxu1 }
 0x32f   : > { %v4116_v63 = vpop.f32.mrb[132].mxu0  ;;  %v4011_v29 = vpop.f32.mrb[105].mxu1 }
 0x330   : > { %v4012_v17 = vadd.f32 %v4011_v29, %v4010_v37  ;;  %v4117_v58 = vpop.f32.mrb[133].mxu0  ;;  %v4013_v32 = vpop.f32.mrb[106].mxu1 }
 0x331   : > { %v4118_v11 = vadd.f32 %v4117_v58, %v4116_v63  ;;  %v4119_v33 = vpop.f32.mrb[134].mxu0  ;;  %v4014_v21 = vpop.f32.mrb[107].mxu1 }
 0x332   : > { %v2536_v45 = vadd.f32 %v4012_v17, %v5691_v8  ;;  %v4015_v19 = vadd.f32 %v4014_v21, %v4013_v32  ;;  %v4120_v24 = vpop.f32.mrb[135].mxu0 }
 0x333   : > { %v4121_v18 = vadd.f32 %v4120_v24, %v4119_v33  ;;  %v5783_v54 = vadd.f32 %v4118_v11, %v2528_v52 }
 0x334   : > { %v2539_v1 = vadd.f32 %v4015_v19, %v5694_v44 }
 0x335   : > { %v5786_v22 = vadd.f32 %v4121_v18, %v2531_v14 }
 0x336   : > { %v4016_v0 = vpop.f32.mrb[108].mxu1 }
 0x337   : > { %v4122_v48 = vpop.f32.mrb[136].mxu0  ;;  %v4017_v26 = vpop.f32.mrb[109].mxu1 }
 0x338   : > { %v4018_v62 = vadd.f32 %v4017_v26, %v4016_v0  ;;  %v4123_v34 = vpop.f32.mrb[137].mxu0  ;;  %v4019_v31 = vpop.f32.mrb[110].mxu1 }
 0x339   : > { %v4124_v15 = vadd.f32 %v4123_v34, %v4122_v48  ;;  %v4125_v42 = vpop.f32.mrb[138].mxu0  ;;  %v4020_v5 = vpop.f32.mrb[111].mxu1 }
 0x33a   : > { %v2544_v8 = vadd.f32 %v4018_v62, %v5698_v61  ;;  %v4021_v30 = vadd.f32 %v4020_v5, %v4019_v31  ;;  %v4126_v3 = vpop.f32.mrb[139].mxu0 }
 0x33b   : > { %v4127_v10 = vadd.f32 %v4126_v3, %v4125_v42  ;;  %v5789_v27 = vadd.f32 %v4124_v15, %v2536_v45 }
 0x33c   : > { %v2547_v44 = vadd.f32 %v4021_v30, %v5700_v4 }
 0x33d   : > { %v5792_v52 = vadd.f32 %v4127_v10, %v2539_v1 }
 0x33e   : > { %v4022_v55 = vpop.f32.mrb[112].mxu1 }
 0x33f   : > { %v4128_v40 = vpop.f32.mrb[140].mxu0  ;;  %v4023_v35 = vpop.f32.mrb[113].mxu1 }
 0x340   : > { %v4024_v14 = vadd.f32 %v4023_v35, %v4022_v55  ;;  %v4129_v37 = vpop.f32.mrb[141].mxu0  ;;  %v4025_v63 = vpop.f32.mrb[114].mxu1 }
 0x341   : > { %v4130_v29 = vadd.f32 %v4129_v37, %v4128_v40  ;;  %v4131_v17 = vpop.f32.mrb[142].mxu0  ;;  %v4026_v58 = vpop.f32.mrb[115].mxu1 }
 0x342   : > { %v2552_v61 = vadd.f32 %v4024_v14, %v5704_v47  ;;  %v4027_v32 = vadd.f32 %v4026_v58, %v4025_v63  ;;  %v4132_v11 = vpop.f32.mrb[143].mxu0 }
 0x343   : > { %v4133_v33 = vadd.f32 %v4132_v11, %v4131_v17  ;;  %v5795_v21 = vadd.f32 %v4130_v29, %v2544_v8 }
 0x344   : > { %v2555_v4 = vadd.f32 %v4027_v32, %v5706_v39 }
 0x345   : > { %v5798_v45 = vadd.f32 %v4133_v33, %v2547_v44 }
 0x346   : > { %v4028_v19 = vpop.f32.mrb[116].mxu1 }
 0x347   : > { %v4134_v24 = vpop.f32.mrb[144].mxu0  ;;  %v4029_v18 = vpop.f32.mrb[117].mxu1 }
 0x348   : > { %v4030_v1 = vadd.f32 %v4029_v18, %v4028_v19  ;;  %v4135_v0 = vpop.f32.mrb[145].mxu0  ;;  %v4031_v48 = vpop.f32.mrb[118].mxu1 }
 0x349   : > { %v4136_v26 = vadd.f32 %v4135_v0, %v4134_v24  ;;  %v4137_v62 = vpop.f32.mrb[146].mxu0  ;;  %v4032_v34 = vpop.f32.mrb[119].mxu1 }
 0x34a   : > { %v2560_v47 = vadd.f32 %v4030_v1, %v5710_v49  ;;  %v4033_v31 = vadd.f32 %v4032_v34, %v4031_v48  ;;  %v4138_v15 = vpop.f32.mrb[147].mxu0 }
 0x34b   : > { %v4139_v42 = vadd.f32 %v4138_v15, %v4137_v62  ;;  %v5801_v5 = vadd.f32 %v4136_v26, %v2552_v61 }
 0x34c   : > { %v2563_v39 = vadd.f32 %v4033_v31, %v5712_v20 }
 0x34d   : > { %v5804_v8 = vadd.f32 %v4139_v42, %v2555_v4 }
 0x34e   : > { %v4034_v30 = vpop.f32.mrb[120].mxu1 }
 0x34f   : > { %v4140_v3 = vpop.f32.mrb[148].mxu0  ;;  %v4035_v10 = vpop.f32.mrb[121].mxu1 }
 0x350   : > { %v4036_v44 = vadd.f32 %v4035_v10, %v4034_v30  ;;  %v4141_v55 = vpop.f32.mrb[149].mxu0  ;;  %v4037_v40 = vpop.f32.mrb[122].mxu1 }
 0x351   : > { %v4142_v35 = vadd.f32 %v4141_v55, %v4140_v3  ;;  %v4143_v14 = vpop.f32.mrb[150].mxu0  ;;  %v4038_v37 = vpop.f32.mrb[123].mxu1 }
 0x352   : > { %v2568_v49 = vadd.f32 %v4036_v44, %v5716_v41  ;;  %v4039_v63 = vadd.f32 %v4038_v37, %v4037_v40  ;;  %v4144_v29 = vpop.f32.mrb[151].mxu0 }
 0x353   : > { %v4145_v17 = vadd.f32 %v4144_v29, %v4143_v14  ;;  %v5807_v58 = vadd.f32 %v4142_v35, %v2560_v47 }
 0x354   : > { %v2571_v20 = vadd.f32 %v4039_v63, %v5718_v7 }
 0x355   : > { %v5810_v61 = vadd.f32 %v4145_v17, %v2563_v39 }
 0x356   : > { %v4040_v32 = vpop.f32.mrb[124].mxu1 }
 0x357   : > { %v4146_v11 = vpop.f32.mrb[152].mxu0  ;;  %v4041_v33 = vpop.f32.mrb[125].mxu1 }
 0x358   : > { %v4042_v4 = vadd.f32 %v4041_v33, %v4040_v32  ;;  %v4147_v19 = vpop.f32.mrb[153].mxu0  ;;  %v4043_v24 = vpop.f32.mrb[126].mxu1 }
 0x359   : > { %v4148_v18 = vadd.f32 %v4147_v19, %v4146_v11  ;;  %v4149_v1 = vpop.f32.mrb[154].mxu0  ;;  %v4044_v0 = vpop.f32.mrb[127].mxu1 }
 0x35a   : > { %v2576_v41 = vadd.f32 %v4042_v4, %v5723_v23  ;;  %v4045_v48 = vadd.f32 %v4044_v0, %v4043_v24  ;;  %v4150_v26 = vpop.f32.mrb[155].mxu0 }
 0x35b   : > { %v4151_v62 = vadd.f32 %v4150_v26, %v4149_v1  ;;  %v5813_v34 = vadd.f32 %v4148_v18, %v2568_v49 }
 0x35c   : > { %v2579_v7 = vadd.f32 %v4045_v48, %v5726_v46 }
 0x35d   : > { %v5816_v47 = vadd.f32 %v4151_v62, %v2571_v20 }
 0x35e   : > { %v4248_v31 = vpop.f32.mrb[128].mxu1 }
 0x35f   : > { %v4152_v15 = vpop.f32.mrb[156].mxu0  ;;  %v2786_v42 = vadd.f32 %v4248_v31, %v5735_v38  ;;  %v2777_v39 = vpop.f32.mrb[129].mxu1 }
 0x360   : > { %v4153_v30 = vpop.f32.mrb[157].mxu0  ;;  %v2778_v3 = vadd.f32 %v2777_v39, %v5729_v59  ;;  %v4249_v10 = vpop.f32.mrb[130].mxu1 }
 0x361   : > { %v4154_v23 = vadd.f32 %v4153_v30, %v4152_v15  ;;  %v4155_v44 = vpop.f32.mrb[158].mxu0  ;;  %v2789_v55 = vadd.f32 %v4249_v10, %v5738_v9  ;;  %v2780_v40 = vpop.f32.mrb[131].mxu1  ;;  %v3104_v9 = vmul.f32 %v2786_v42, %v2786_v42 }
 0x362   : > { %v4156_v35 = vpop.f32.mrb[159].mxu0  ;;  %v2781_v46 = vadd.f32 %v2780_v40, %v5732_v6  ;;  %v3102_v63 = vmul.f32 %v2778_v3, %v2778_v3 }
 0x363   : > { %v3599_v14 = vpack.c.bf16 %v2789_v55, %v2786_v42  ;;  %v4157_v37 = vadd.f32 %v4156_v35, %v4155_v44  ;;  %v5822_v49 = vadd.f32 %v4154_v23, %v2576_v41  ;;  %v3105_v4 = vmul.f32 %v2789_v55, %v2789_v55 }
 0x364   : > { %v3594_v38 = vpack.c.bf16 %v2781_v46, %v2778_v3  ;;  %v3064_v29 = vadd.f32 %v2781_v46, %v2778_v3  ;;  %v3103_v17 = vmul.f32 %v2781_v46, %v2781_v46 }
 0x365   : > { %3671 = vst [vmem:[%s5826_s26 + $0x8] sm:$0xff] %v3599_v14   ;;  %v5829_v59 = vadd.f32 %v4157_v37, %v2579_v7 }
 0x366   : > { %3595 = vst [vmem:[%s5826_s26] sm:$0xff] %v3594_v38   ;;  %v3065_v20 = vadd.f32 %v3064_v29, %v2786_v42  ;;  %v3134_v6 = vadd.f32 %v3103_v17, %v3102_v63  ;;  %v4252_v32 = vpop.f32.mrb[132].mxu1 }
 0x367   : > { %v2802_v11 = vadd.f32 %v4252_v32, %v5747_v28  ;;  %v2793_v33 = vpop.f32.mrb[133].mxu1 }
 0x368   : > { %v3135_v19 = vadd.f32 %v3134_v6, %v3104_v9  ;;  %v2794_v24 = vadd.f32 %v2793_v33, %v5741_v50  ;;  %v3066_v18 = vadd.f32 %v3065_v20, %v2789_v55  ;;  %v4253_v1 = vpop.f32.mrb[134].mxu1 }
 0x369   : > { %v2805_v0 = vadd.f32 %v4253_v1, %v5750_v25  ;;  %v2796_v41 = vpop.f32.mrb[135].mxu1  ;;  %v3108_v30 = vmul.f32 %v2802_v11, %v2802_v11 }
 0x36a   : > { %v3067_v48 = vadd.f32 %v3066_v18, %v2794_v24  ;;  %v3106_v26 = vmul.f32 %v2794_v24, %v2794_v24  ;;  %v3136_v62 = vadd.f32 %v3135_v19, %v3105_v4  ;;  %v2797_v7 = vadd.f32 %v2796_v41, %v5744_v2 }
 0x36b   : > { %v3609_v31 = vpack.c.bf16 %v2805_v0, %v2802_v11  ;;  %v3109_v44 = vmul.f32 %v2805_v0, %v2805_v0 }
 0x36c   : > { %v3137_v15 = vadd.f32 %v3136_v62, %v3106_v26  ;;  %v3604_v28 = vpack.c.bf16 %v2797_v7, %v2794_v24  ;;  %v3068_v42 = vadd.f32 %v3067_v48, %v2797_v7  ;;  %v3107_v39 = vmul.f32 %v2797_v7, %v2797_v7 }
 0x36d   : > { %3673 = vst [vmem:[%s5826_s26 + $0x18] sm:$0xff] %v3609_v31  }
 0x36e   : > { %3672 = vst [vmem:[%s5826_s26 + $0x10] sm:$0xff] %v3604_v28   ;;  %v3069_v50 = vadd.f32 %v3068_v42, %v2802_v11  ;;  %v3138_v3 = vadd.f32 %v3137_v15, %v3107_v39  ;;  %v4256_v10 = vpop.f32.mrb[136].mxu1 }
 0x36f   : > { %v2818_v23 = vadd.f32 %v4256_v10, %v5759_v13  ;;  %v2809_v25 = vpop.f32.mrb[137].mxu1 }
 0x370   : > { %v3139_v55 = vadd.f32 %v3138_v3, %v3108_v30  ;;  %v2810_v40 = vadd.f32 %v2809_v25, %v5753_v16  ;;  %v3070_v2 = vadd.f32 %v3069_v50, %v2805_v0  ;;  %v4257_v35 = vpop.f32.mrb[138].mxu1 }
 0x371   : > { %v2821_v46 = vadd.f32 %v4257_v35, %v5762_v60  ;;  %v2812_v14 = vpop.f32.mrb[139].mxu1  ;;  %v3112_v32 = vmul.f32 %v2818_v23, %v2818_v23 }
 0x372   : > { %v3071_v37 = vadd.f32 %v3070_v2, %v2810_v40  ;;  %v3110_v63 = vmul.f32 %v2810_v40, %v2810_v40  ;;  %v3140_v38 = vadd.f32 %v3139_v55, %v3109_v44  ;;  %v2813_v29 = vadd.f32 %v2812_v14, %v5756_v53 }
 0x373   : > { %v3619_v17 = vpack.c.bf16 %v2821_v46, %v2818_v23  ;;  %v3113_v19 = vmul.f32 %v2821_v46, %v2821_v46 }
 0x374   : > { %v3141_v9 = vadd.f32 %v3140_v38, %v3110_v63  ;;  %v3614_v13 = vpack.c.bf16 %v2813_v29, %v2810_v40  ;;  %v3072_v20 = vadd.f32 %v3071_v37, %v2813_v29  ;;  %v3111_v6 = vmul.f32 %v2813_v29, %v2813_v29 }
 0x375   : > { %3675 = vst [vmem:[%s5826_s26 + $0x28] sm:$0xff] %v3619_v17  }
 0x376   : > { %3674 = vst [vmem:[%s5826_s26 + $0x20] sm:$0xff] %v3614_v13   ;;  %v3073_v16 = vadd.f32 %v3072_v20, %v2818_v23  ;;  %v3142_v11 = vadd.f32 %v3141_v9, %v3111_v6  ;;  %v4260_v33 = vpop.f32.mrb[140].mxu1 }
 0x377   : > { %v2834_v4 = vadd.f32 %v4260_v33, %v5771_v56  ;;  %v2825_v60 = vpop.f32.mrb[141].mxu1 }
 0x378   : > { %v3143_v24 = vadd.f32 %v3142_v11, %v3112_v32  ;;  %v2826_v18 = vadd.f32 %v2825_v60, %v5765_v36  ;;  %v3074_v53 = vadd.f32 %v3073_v16, %v2821_v46  ;;  %v4261_v1 = vpop.f32.mrb[142].mxu1 }
 0x379   : > { %v2837_v0 = vadd.f32 %v4261_v1, %v5774_v43  ;;  %v2828_v41 = vpop.f32.mrb[143].mxu1  ;;  %v3116_v39 = vmul.f32 %v2834_v4, %v2834_v4 }
 0x37a   : > { %v3075_v48 = vadd.f32 %v3074_v53, %v2826_v18  ;;  %v3114_v26 = vmul.f32 %v2826_v18, %v2826_v18  ;;  %v3144_v62 = vadd.f32 %v3143_v24, %v3113_v19  ;;  %v2829_v7 = vadd.f32 %v2828_v41, %v5768_v57 }
 0x37b   : > { %v3629_v31 = vpack.c.bf16 %v2837_v0, %v2834_v4  ;;  %v3117_v10 = vmul.f32 %v2837_v0, %v2837_v0 }
 0x37c   : > { %v3145_v15 = vadd.f32 %v3144_v62, %v3114_v26  ;;  %v3624_v56 = vpack.c.bf16 %v2829_v7, %v2826_v18  ;;  %v3076_v28 = vadd.f32 %v3075_v48, %v2829_v7  ;;  %v3115_v42 = vmul.f32 %v2829_v7, %v2829_v7 }
 0x37d   : > { %3677 = vst [vmem:[%s5826_s26 + $0x38] sm:$0xff] %v3629_v31  }
 0x37e   : > { %3676 = vst [vmem:[%s5826_s26 + $0x30] sm:$0xff] %v3624_v56   ;;  %v3077_v36 = vadd.f32 %v3076_v28, %v2834_v4  ;;  %v3146_v30 = vadd.f32 %v3145_v15, %v3115_v42  ;;  %v4264_v50 = vpop.f32.mrb[144].mxu1 }
 0x37f   : > { %v2850_v3 = vadd.f32 %v4264_v50, %v5783_v54  ;;  %v2841_v43 = vpop.f32.mrb[145].mxu1 }
 0x380   : > { %v3147_v23 = vadd.f32 %v3146_v30, %v3116_v39  ;;  %v2842_v25 = vadd.f32 %v2841_v43, %v5777_v12  ;;  %v3078_v57 = vadd.f32 %v3077_v36, %v2837_v0  ;;  %v4265_v44 = vpop.f32.mrb[146].mxu1 }
 0x381   : > { %v2853_v55 = vadd.f32 %v4265_v44, %v5786_v22  ;;  %v2844_v40 = vpop.f32.mrb[147].mxu1  ;;  %v3120_v17 = vmul.f32 %v2850_v3, %v2850_v3 }
 0x382   : > { %v3079_v2 = vadd.f32 %v3078_v57, %v2842_v25  ;;  %v3118_v35 = vmul.f32 %v2842_v25, %v2842_v25  ;;  %v3148_v46 = vadd.f32 %v3147_v23, %v3117_v10  ;;  %v2845_v14 = vadd.f32 %v2844_v40, %v5780_v51 }
 0x383   : > { %v3639_v37 = vpack.c.bf16 %v2853_v55, %v2850_v3  ;;  %v3121_v6 = vmul.f32 %v2853_v55, %v2853_v55 }
 0x384   : > { %v3149_v63 = vadd.f32 %v3148_v46, %v3118_v35  ;;  %v3634_v54 = vpack.c.bf16 %v2845_v14, %v2842_v25  ;;  %v3080_v38 = vadd.f32 %v3079_v2, %v2845_v14  ;;  %v3119_v29 = vmul.f32 %v2845_v14, %v2845_v14 }
 0x385   : > { %3679 = vst [vmem:[%s5826_s26 + $0x48] sm:$0xff] %v3639_v37  }
 0x386   : > { %3678 = vst [vmem:[%s5826_s26 + $0x40] sm:$0xff] %v3634_v54   ;;  %v3081_v12 = vadd.f32 %v3080_v38, %v2850_v3  ;;  %v3150_v9 = vadd.f32 %v3149_v63, %v3119_v29  ;;  %v4268_v13 = vpop.f32.mrb[148].mxu1 }
 0x387   : > { %v2866_v20 = vadd.f32 %v4268_v13, %v5795_v21  ;;  %v2857_v22 = vpop.f32.mrb[149].mxu1 }
 0x388   : > { %v3151_v32 = vadd.f32 %v3150_v9, %v3120_v17  ;;  %v2858_v16 = vadd.f32 %v2857_v22, %v5789_v27  ;;  %v3082_v51 = vadd.f32 %v3081_v12, %v2853_v55  ;;  %v4269_v11 = vpop.f32.mrb[150].mxu1 }
 0x389   : > { %v2869_v33 = vadd.f32 %v4269_v11, %v5798_v45  ;;  %v2860_v4 = vpop.f32.mrb[151].mxu1  ;;  %v3124_v48 = vmul.f32 %v2866_v20, %v2866_v20 }
 0x38a   : > { %v3083_v60 = vadd.f32 %v3082_v51, %v2858_v16  ;;  %v3122_v19 = vmul.f32 %v2858_v16, %v2858_v16  ;;  %v3152_v24 = vadd.f32 %v3151_v32, %v3121_v6  ;;  %v2861_v18 = vadd.f32 %v2860_v4, %v5792_v52 }
 0x38b   : > { %v3649_v53 = vpack.c.bf16 %v2869_v33, %v2866_v20  ;;  %v3125_v31 = vmul.f32 %v2869_v33, %v2869_v33 }
 0x38c   : > { %v3153_v1 = vadd.f32 %v3152_v24, %v3122_v19  ;;  %v3644_v21 = vpack.c.bf16 %v2861_v18, %v2858_v16  ;;  %v3084_v0 = vadd.f32 %v3083_v60, %v2861_v18  ;;  %v3123_v41 = vmul.f32 %v2861_v18, %v2861_v18 }
 0x38d   : > { %3681 = vst [vmem:[%s5826_s26 + $0x58] sm:$0xff] %v3649_v53  }
 0x38e   : > { %3680 = vst [vmem:[%s5826_s26 + $0x50] sm:$0xff] %v3644_v21   ;;  %v3085_v27 = vadd.f32 %v3084_v0, %v2866_v20  ;;  %v3154_v26 = vadd.f32 %v3153_v1, %v3123_v41  ;;  %v4272_v62 = vpop.f32.mrb[152].mxu1 }
 0x38f   : > { %v2882_v7 = vadd.f32 %v4272_v62, %v5807_v58  ;;  %v2873_v45 = vpop.f32.mrb[153].mxu1 }
 0x390   : > { %v3155_v15 = vadd.f32 %v3154_v26, %v3124_v48  ;;  %v2874_v56 = vadd.f32 %v2873_v45, %v5801_v5  ;;  %v3086_v52 = vadd.f32 %v3085_v27, %v2869_v33  ;;  %v4273_v28 = vpop.f32.mrb[154].mxu1 }
 0x391   : > { %v2885_v42 = vadd.f32 %v4273_v28, %v5810_v61  ;;  %v2876_v39 = vpop.f32.mrb[155].mxu1  ;;  %v3128_v5 = vmul.f32 %v2882_v7, %v2882_v7 }
 0x392   : > { %v3087_v36 = vadd.f32 %v3086_v52, %v2874_v56  ;;  %v3126_v30 = vmul.f32 %v2874_v56, %v2874_v56  ;;  %v3156_v50 = vadd.f32 %v3155_v15, %v3125_v31  ;;  %v2877_v3 = vadd.f32 %v2876_v39, %v5804_v8 }
 0x393   : > { %v3659_v43 = vpack.c.bf16 %v2885_v42, %v2882_v7  ;;  %v3129_v2 = vmul.f32 %v2885_v42, %v2885_v42 }
 0x394   : > { %v3157_v10 = vadd.f32 %v3156_v50, %v3126_v30  ;;  %v3654_v58 = vpack.c.bf16 %v2877_v3, %v2874_v56  ;;  %v3088_v23 = vadd.f32 %v3087_v36, %v2877_v3  ;;  %v3127_v25 = vmul.f32 %v2877_v3, %v2877_v3 }
 0x395   : > { %3683 = vst [vmem:[%s5826_s26 + $0x68] sm:$0xff] %v3659_v43  }
 0x396   : > { %3682 = vst [vmem:[%s5826_s26 + $0x60] sm:$0xff] %v3654_v58   ;;  %v3089_v57 = vadd.f32 %v3088_v23, %v2882_v7  ;;  %v3158_v44 = vadd.f32 %v3157_v10, %v3127_v25  ;;  %v4276_v55 = vpop.f32.mrb[156].mxu1 }
 0x397   : > { %v2898_v61 = vadd.f32 %v4276_v55, %v5822_v49  ;;  %v2889_v40 = vpop.f32.mrb[157].mxu1 }
 0x398   : > { %v3159_v35 = vadd.f32 %v3158_v44, %v3128_v5  ;;  %v2890_v8 = vadd.f32 %v2889_v40, %v5813_v34  ;;  %v3090_v46 = vadd.f32 %v3089_v57, %v2885_v42  ;;  %v4277_v14 = vpop.f32.mrb[158].mxu1 }
 0x399   : > { %v2901_v37 = vadd.f32 %v4277_v14, %v5829_v59  ;;  %v2892_v63 = vpop.f32.mrb[159].mxu1  ;;  %v3132_v13 = vmul.f32 %v2898_v61, %v2898_v61 }
 0x39a   : > { %v3091_v54 = vadd.f32 %v3090_v46, %v2890_v8  ;;  %v3130_v38 = vmul.f32 %v2890_v8, %v2890_v8  ;;  %v3160_v29 = vadd.f32 %v3159_v35, %v3129_v2  ;;  %v2893_v49 = vadd.f32 %v2892_v63, %v5816_v47 }
 0x39b   : > { %v3669_v17 = vpack.c.bf16 %v2901_v37, %v2898_v61 }
 0x39c   : > { %v3161_v34 = vadd.f32 %v3160_v29, %v3130_v38  ;;  %v3664_v59 = vpack.c.bf16 %v2893_v49, %v2890_v8  ;;  %v3092_v12 = vadd.f32 %v3091_v54, %v2893_v49  ;;  %v3131_v9 = vmul.f32 %v2893_v49, %v2893_v49 }
 0x39d   : > { %3685 = vst [vmem:[%s5826_s26 + $0x78] sm:$0xff] %v3669_v17  }
 0x39e   : > { %3684 = vst [vmem:[%s5826_s26 + $0x70] sm:$0xff] %v3664_v59   ;;  %v3093_v47 = vadd.f32 %v3092_v12, %v2898_v61  ;;  %v3162_v20 = vadd.f32 %v3161_v34, %v3131_v9 }
 0x39f   : > { %4684 = shalt.err (!%p4681_p13)
}
 0x3a0   : > { %s4685_s17 = scalar_lea.hbm %s5877_s13, 2048  ;;  %s4689_s20 = scalar_lea.hbm %s6001_s6, 4096 }
 0x3a1   : > { %p4686_p6 = scmp.ne.s32.totalorder %s5877_s13, %s4685_s17  ;;  %p4690_p5 = scmp.lt.u32.totalorder %s5877_s13, %s6001_s6 }
 0x3a2   : > { %p4691_p8 = scmp.lt.u32.totalorder %s4689_s20, %s4685_s17  ;;  %p4693_p0 = scmp.lt.u32.totalorder %s4685_s17, %s5877_s13 }
 0x3a3   : > { %p4687_p10 = pnand %p4686_p6, %p6025_p2 }
 0x3a4   : > { %p4692_p11 = por %p4691_p8, %p4690_p5 }
 0x3a5   : > { %p4688_p4 = pneg %p4687_p10 }
 0x3a6   : > { %p4694_p3 = por %p4693_p0, %p4692_p11 }
 0x3a8   : > { %p4695_p7 = pnand %p4694_p3, %p4688_p4 }
 0x3aa   : > { %4698 = shalt.err (!%p4695_p7)
}
 0x3ab   : > { %s4810_s10 = smov 64   ;;  %s4811_s18 = smov 4   ;;  %v3133_v22 = vmul.f32 %v2901_v37, %v2901_v37  ;;  %v3094_v6 = vadd.f32 %v3093_v47, %v2901_v37  ;;  %v3163_v32 = vadd.f32 %v3162_v20, %v3132_v13 }
 0x3ac   : > { %4288 = dma.vmem_to_hbm [thread:$0]  (%p6025_p2), %s5879_s25, 2048, %s5877_s13, %s3173_s14, %s4810_s10, %s4810_s10, %s4811_s18  }
 0x3ad   : > { %v3095_v16 = vrot.slane %v3094_v6, 4  ;;  %v3164_v51 = vadd.f32 %v3163_v32, %v3133_v22  ;;  %s3177_s15 = sand.u32 1, %s4880_s9   ;;  %s3553_s17 = sshll.u32 %s4880_s9, 4 }
 0x3ae   : > { %s373_s26 = scalar_lea.vmem [#allocation10], %s5042_s19  ;;  %s6010_s25 = scalar_lea.vmem [#allocation12], %s5042_s19 }
 0x3af   : > { %v3096_v11 = vadd.f32 %v3095_v16, %v3094_v6  ;;  %v3165_v33 = vrot.slane %v3164_v51, 4  ;;  %s3210_s24 = sshll.u32 %s373_s26, 4  ;;  %s3223_s13 = sshll.u32 %s6010_s25, 4  ;;  %s5918_s24 = int_to_ptr.vmem [resolvable:$true] %s3210_s24  ;;  %s5925_s13 = int_to_ptr.vmem [resolvable:$true] %s3223_s13 }
 0x3b0   : > { %s5916_s11 = scalar_lea.hbm %s6002_s7, %s3553_s17  ;;  %s5923_s10 = scalar_lea.hbm %s6003_s8, %s3553_s17 }
 0x3b1   : > { %v3097_v4 = vrot.slane %v3096_v11, 2  ;;  %v3166_v60 = vadd.f32 %v3165_v33, %v3164_v51  ;;  %s5927_s18 = scalar_lea.sflag [#allocation11], %s3177_s15  ;;  %s4699_s14 = scalar_lea.vmem %s5918_s24, 16 }
 0x3b2   : > { %p4700_p9 = scmp.ne.s32.totalorder %s5918_s24, %s4699_s14  ;;  %s4812_s20 = smov [#allocation10]  }
 0x3b3   : > { %v3167_v19 = vrot.slane %v3166_v60, 2  ;;  %v3098_v24 = vadd.f32 %v3097_v4, %v3096_v11  ;;  %s4703_s25 = sshll.u32 %s4812_s20, 4  ;;  %s4704_s25 = int_to_ptr.vmem [resolvable:$false] %s4703_s25 }
 0x3b4   : > { %p4701_p12 = pnand %p4700_p9, %p6025_p2  ;;  %s4705_s0 = scalar_lea.vmem %s4704_s25, 32 }
 0x3b5   : > { %v3099_v18 = vrot.slane %v3098_v24, 1  ;;  %v3168_v53 = vadd.f32 %v3167_v19, %v3166_v60  ;;  %p4706_p13 = scmp.lt.s32.totalorder %s5918_s24, %s4704_s25  ;;  %p4707_p6 = scmp.lt.s32.totalorder %s4705_s0, %s4699_s14 }
 0x3b6   : > { %p4702_p1 = pneg %p4701_p12 }
 0x3b7   : > { %v3100_v1 = vadd.f32 %v3099_v18, %v3098_v24  ;;  %v3169_v21 = vrot.slane %v3168_v53, 1  ;;  %p4708_p10 = por %p4707_p6, %p4706_p13 }
 0x3b9   : > { %3101 = vst [vmem:[%s373_s26] sm:$0x1] %v3100_v1  ;;  %v3170_v0 = vadd.f32 %v3169_v21, %v3168_v53  ;;  %p4709_p4 = pnand %p4708_p10, %p4702_p1 }
 0x3bb   : > { %4712 = shalt.err (!%p4709_p4)
}
 0x3bc   : > { %s4713_s15 = scalar_lea.hbm %s5916_s11, 16  ;;  %s4717_s9 = scalar_lea.hbm %s6002_s7, 32 }
 0x3bd   : > { %p4714_p5 = scmp.ne.s32.totalorder %s5916_s11, %s4713_s15  ;;  %p4718_p0 = scmp.lt.u32.totalorder %s5916_s11, %s6002_s7 }
 0x3be   : > { %p4719_p3 = scmp.lt.u32.totalorder %s4717_s9, %s4713_s15  ;;  %p4721_p9 = scmp.lt.u32.totalorder %s4713_s15, %s5916_s11 }
 0x3bf   : > { %p4715_p8 = pnand %p4714_p5, %p6025_p2 }
 0x3c0   : > { %p4720_p7 = por %p4719_p3, %p4718_p0 }
 0x3c1   : > { %p4716_p11 = pneg %p4715_p8 }
 0x3c2   : > { %p4722_p12 = por %p4721_p9, %p4720_p7 }
 0x3c4   : > { %p4723_p1 = pnand %p4722_p12, %p4716_p11 }
 0x3c6   : > { %4726 = shalt.err (!%p4723_p1)
}
 0x3c7   : > { %4289 = dma.vmem_to_hbm [thread:$0]  (%p6025_p2), %s5918_s24, 16, %s5916_s11, %s5927_s18  }
 0x3c8   : > { %s6026_s0 = scalar_lea.vmem [#allocation12], %s5042_s19  ;;  %s4727_s14 = scalar_lea.vmem %s5925_s13, 16 }
 0x3c9   : > { %3171 = vst [vmem:[%s6026_s0] sm:$0x1] %v3170_v0  ;;  %p4728_p13 = scmp.ne.s32.totalorder %s5925_s13, %s4727_s14  ;;  %s4813_s20 = smov [#allocation12]  }
 0x3ca   : > { %s4731_s15 = sshll.u32 %s4813_s20, 4  ;;  %s4732_s15 = int_to_ptr.vmem [resolvable:$false] %s4731_s15 }
 0x3cb   : > { %p4729_p6 = pnand %p4728_p13, %p6025_p2  ;;  %s4733_s17 = scalar_lea.vmem %s4732_s15, 32 }
 0x3cc   : > { %p4734_p4 = scmp.lt.s32.totalorder %s5925_s13, %s4732_s15  ;;  %p4735_p5 = scmp.lt.s32.totalorder %s4733_s17, %s4727_s14 }
 0x3cd   : > { %p4730_p10 = pneg %p4729_p6 }
 0x3ce   : > { %p4736_p8 = por %p4735_p5, %p4734_p4 }
 0x3d0   : > { %p4737_p11 = pnand %p4736_p8, %p4730_p10 }
 0x3d2   : > { %4740 = shalt.err (!%p4737_p11)
}
 0x3d3   : > { %s4741_s19 = scalar_lea.hbm %s5923_s10, 16  ;;  %s4745_s26 = scalar_lea.hbm %s6003_s8, 32 }
 0x3d4   : > { %p4742_p0 = scmp.ne.s32.totalorder %s5923_s10, %s4741_s19  ;;  %p4746_p9 = scmp.lt.u32.totalorder %s5923_s10, %s6003_s8 }
 0x3d5   : > { %p4747_p12 = scmp.lt.u32.totalorder %s4745_s26, %s4741_s19  ;;  %p4749_p13 = scmp.lt.u32.totalorder %s4741_s19, %s5923_s10 }
 0x3d6   : > { %p4743_p3 = pnand %p4742_p0, %p6025_p2 }
 0x3d7   : > { %p4748_p1 = por %p4747_p12, %p4746_p9 }
 0x3d8   : > { %p4744_p7 = pneg %p4743_p3 }
 0x3d9   : > { %p4750_p6 = por %p4749_p13, %p4748_p1 }
 0x3db   : > { %p4751_p10 = pnand %p4750_p6, %p4744_p7 }
 0x3dd   : > { %4754 = shalt.err (!%p4751_p10)
}
 0x3de   : > { %4290 = dma.vmem_to_hbm [thread:$0]  (%p6025_p2), %s5925_s13, 16, %s5923_s10, %s5927_s18  }
 0x3df PF: > { %s3235_s25 = sand.u32 1, %s4789_s27   ;;  %p6027_p4 = scmp.ne.s32.totalorder %s6013_s12, 0 }
 0x3e0   : > { %p6028_p5 = scmp.ge.s32.totalorder %s4801_s30, 2  ;;  %s3236_s0 = scalar_lea.sflag [#allocation5], %s3235_s25 }
 0x3e2   : > { %p4306_p8 = pnand %p6028_p5, %p6027_p4 }
 0x3e4   : > { %4780 = dma.done.wait (!%p4306_p8), %s3236_s0, 2048  }
 0x3e5   : > { %4782 = vsyncadd (!%p4306_p8), %s3236_s0, 4294965248  ;;  %s6029_s14 = sadd.s32 4294967294, %s4801_s30  }
 0x3e6   : > { %s3244_s20 = sand.u32 1, %s6029_s14  }
 0x3e7   : > { %s3245_s15 = scalar_lea.sflag [#allocation11], %s3244_s20 }
 0x3e8   : > { %4784 = dma.done.wait (!%p4306_p8), %s3245_s15, 32  }
 0x3e9   : > { %4786 = vsyncadd (!%p4306_p8), %s3245_s15, 4294967264  ;;  %p26_p2 = scmp.ge.s32.totalorder %s4977_s16, 4   ;;  %s6030_s27 = smov %s4793_s28 }
 0x3ea   : > { %s6031_s28 = smov %s4797_s29  ;;  %s6032_s29 = smov %s4993_s23 }
 0x3eb   : > { %s6033_s30 = smov %s4977_s16  ;;  %28 = sbr.rel (!%p26_p2) target bundleno = 10 (0xa), region = 135 }
 0x3f2   :  { %3257 = vsyncpa [#allocation4], 1 }
 0x3f3   :  { %3259 = vsyncpa [#allocation4 + $0x1], 1 }
 0x3f4   :  { %3260 = vsyncpa [#allocation7], 1 }
 0x3f5   :  { %3261 = vsyncpa [#allocation5], 1 }
 0x3f6   :  { %3263 = vsyncpa [#allocation5 + $0x1], 1 }
 0x3f7   :  { %3264 = vsyncpa [#allocation11], 1 }
 0x3f8   :  { %3266 = vsyncpa [#allocation11 + $0x1], 1 }

// kernel: tpu_custom_call.1
= control target key start
LH: loop header
LB: loop body
LE: loop exit
PB: predicated region body
PF: predicated region fallthrough
CT: control target
= control target key end

     0   :  { %s5995_s0 = inlined_call_operand.hbm [shape: bf16[2,256,128], index: 0, kind: input, shape index: {}]   ;;  %s5996_s1 = inlined_call_operand.hbm [shape: bf16[128,128], index: 1, kind: input, shape index: {}]   ;;  %s5997_s2 = inlined_call_operand.vmem [shape: f32[1,128], index: 2, kind: input, shape index: {}]   ;;  %s5998_s3 = inlined_call_operand.vmem [shape: f32[2,1,128], index: 3, kind: input, shape index: {}]   ;;  %s5999_s4 = inlined_call_operand.hbm [shape: bf16[1152,128], index: 4, kind: input, shape index: {}]   ;;  %s6000_s5 = inlined_call_operand.vmem [shape: f32[1,128], index: 5, kind: input, shape index: {}]   ;;  %s6001_s6 = inlined_call_operand.hbm [shape: bf16[2,16,16,128], index: 6, kind: output, shape index: {0}]   ;;  %s6002_s7 = inlined_call_operand.hbm [shape: f32[2,1,128], index: 7, kind: output, shape index: {1}]   ;;  %s6003_s8 = inlined_call_operand.hbm [shape: f32[2,1,128], index: 8, kind: output, shape index: {2}]  }
   0x1   :  { %6011 = sst [smem:[#allocation17_spill]] %s5995_s0 }
   0x2   :  { %14 = vsyncpa [#allocation4], 0 }
   0x3   :  { %16 = vsyncpa [#allocation4 + $0x1], 0 }
   0x4   :  { %17 = vsyncpa [#allocation7], 0 }
   0x5   :  { %18 = vsyncpa [#allocation5], 0 }
   0x6   :  { %20 = vsyncpa [#allocation5 + $0x1], 0 }
   0x7   :  { %21 = vsyncpa [#allocation11], 0 }
   0x8   :  { %23 = vsyncpa [#allocation11 + $0x1], 0  ;;  %s4859_s27 = smov 0   ;;  %s4861_s28 = smov 0  }
   0x9   :  { %s4863_s29 = smov 0   ;;  %s4865_s30 = smov 0  }
   0xa LB: > { %s4880_s9 = sadd.s32 4294967295, %s4801_s30   ;;  %s6005_s10 = sadd.s32 4294967294, %s4801_s30   ;;  %s4801_s30 = sphi %s4865_s30, %s6033_s30   ;;  %s4797_s29 = sphi %s4863_s29, %s6032_s29   ;;  %s4793_s28 = sphi %s4861_s28, %s6031_s28   ;;  %s4789_s27 = sphi %s4859_s27, %s6030_s27  }
   0xb   : > { %p49_p0 = scmp.ne.s32.totalorder %s4793_s28, %s4789_s27  ;;  %p6004_p1 = scmp.eq.s32.totalorder %s4880_s9, 0 }
   0xc   : > { %p189_p3 = scmp.eq.s32.totalorder %s6005_s10, 1  ;;  %p3375_p5 = scmp.ge.s32.totalorder %s4801_s30, 1 }
   0xd   : > { %p4891_p4 = por %p6004_p1, %p49_p0  ;;  %p248_p7 = scmp.lt.s32.totalorder %s4801_s30, 3 }
   0xe   : > { %p4896_p6 = por %p189_p3, %p49_p0  ;;  %s4803_s14 = smov [#allocation6]  }
   0xf   : > { %s6012_s11 = scalar_select %p4891_p4, 1, 0 }
  0x10   : > { %s6013_s12 = scalar_select %p4896_p6, 1, 0 }
  0x11   : > { %p4901_p8 = pnand %p3375_p5, %p248_p7  ;;  %s260_s15 = sshll.u32 %s4803_s14, 4  ;;  %s4905_s15 = int_to_ptr.vmem [resolvable:$true] %s260_s15 }
  0x12   : > { %s4804_s17 = smov [#allocation8]   ;;  %s4585_s21 = scalar_lea.hbm %s5996_s1, 1024 }
  0x13   : > { %p4294_p9 = pneg %p4901_p8  ;;  %s276_s18 = sshll.u32 %s4804_s17, 4  ;;  %s4916_s18 = int_to_ptr.vmem [resolvable:$true] %s276_s18 }
  0x14   : > { %p4586_p12 = scmp.ne.s32.totalorder %s5996_s1, %s4585_s21  ;;  %p4592_p5 = scmp.lt.u32.totalorder %s4585_s21, %s5996_s1 }
  0x15   : > { %p4912_p11 = pnand %p4294_p9, %p6004_p1 }
  0x17   : > { %p4587_p13 = pneg %p4912_p11 }
  0x19   : > { %p4588_p0 = pnand %p4587_p13, %p4586_p12 }
  0x1b   : > { %p4589_p3 = pneg %p4588_p0 }
  0x1d   : > { %p4594_p7 = pnand %p4592_p5, %p4589_p3 }
  0x1f   : > { %4597 = shalt.err (!%p4594_p7)
}
  0x20   : > { %s4598_s26 = scalar_lea.vmem %s4905_s15, 1024  ;;  %p4606_p2 = scmp.lt.s32.totalorder %s4905_s15, %s4905_s15 }
  0x21   : > { %p4599_p9 = scmp.ne.s32.totalorder %s4905_s15, %s4598_s26  ;;  %p4607_p12 = scmp.lt.s32.totalorder %s4598_s26, %s4598_s26 }
  0x23   : > { %p4601_p10 = pnand %p4599_p9, %p4587_p13  ;;  %p4608_p0 = por %p4607_p12, %p4606_p2 }
  0x25   : > { %p4602_p1 = pneg %p4601_p10 }
  0x27   : > { %p4609_p6 = pnand %p4608_p0, %p4602_p1 }
  0x29   : > { %4612 = shalt.err (!%p4609_p6)
}
  0x2a   : > { %s6006_s14 = smov 64   ;;  %s6007_s17 = smov 4  }
  0x2b   : > { %4297 = dma.hbm_to_vmem [thread:$0]  (!%p4912_p11), %s5996_s1, 1024, %s4905_s15, [#allocation7], %s6006_s14, %s6006_s14, %s6007_s17  }
  0x2c   : > { %s4613_s23 = scalar_lea.hbm %s5999_s4, 9216 }
  0x2d   : > { %p4614_p1 = scmp.ne.s32.totalorder %s5999_s4, %s4613_s23  ;;  %p4620_p10 = scmp.lt.u32.totalorder %s4613_s23, %s5999_s4 }
  0x2f   : > { %p4616_p2 = pnand %p4614_p1, %p4587_p13 }
  0x31   : > { %p4617_p6 = pneg %p4616_p2 }
  0x33   : > { %p4622_p3 = pnand %p4620_p10, %p4617_p6 }
  0x35   : > { %4625 = shalt.err (!%p4622_p3)
}
  0x36   : > { %s4626_s15 = scalar_lea.vmem %s4916_s18, 9216  ;;  %p4634_p12 = scmp.lt.s32.totalorder %s4916_s18, %s4916_s18 }
  0x37   : > { %p4627_p5 = scmp.ne.s32.totalorder %s4916_s18, %s4626_s15  ;;  %p4635_p0 = scmp.lt.s32.totalorder %s4626_s15, %s4626_s15 }
  0x39   : > { %p4629_p7 = pnand %p4627_p5, %p4587_p13  ;;  %p4636_p1 = por %p4635_p0, %p4634_p12 }
  0x3b   : > { %p4630_p9 = pneg %p4629_p7 }
  0x3d   : > { %p4637_p2 = pnand %p4636_p1, %p4630_p9 }
  0x3f   : > { %4640 = shalt.err (!%p4637_p2)
}
  0x40   : > { %4300 = dma.hbm_to_vmem [thread:$0]  (!%p4912_p11), %s5999_s4, 9216, %s4916_s18, [#allocation7], %s6006_s14, %s6006_s14, %s6007_s17  }
  0x41   : > { %s4977_s16 = sadd.s32 1, %s4801_s30   ;;  %s36_s20 = sadd.s32 1, %s4797_s29 }
  0x42   : > { %s33_s21 = ssub.s32 %s4801_s30, %s4977_s16  ;;  %p43_p13 = scmp.ne.s32.totalorder %s4797_s29, %s4793_s28 }
  0x43   : > { %p34_p6 = scmp.eq.s32.totalorder %s33_s21, 0  ;;  %p44_p10 = scmp.eq.s32.totalorder %s4801_s30, 0 }
  0x44   : > { %p6016_p3 = scmp.eq.s32.totalorder %s4880_s9, 1  ;;  %p4317_p7 = scmp.lt.s32.totalorder %s4801_s30, 2 }
  0x45   : > { %s4993_s23 = scalar_select %p34_p6, %s4797_s29, %s36_s20  }
  0x46   : > { %p4987_p5 = por %p6016_p3, %p43_p13  ;;  %p45_p9 = por %p44_p10, %p43_p13 }
  0x47   : > { %s293_s24 = sand.u32 1, %s4797_s29   ;;  %s3557_s18 = sshll.u32 %s4801_s30, 11 }
  0x48   : > { %s6017_s22 = scalar_select %p4987_p5, 1, 0 }
  0x49   : > { %s3379_s25 = sshll.u32 %s293_s24, 7  ;;  %s6018_s0 = sld [smem:[#allocation17_spill]] }
  0x4a   : > { %s297_s19 = scalar_lea.vmem [#allocation3], %s3379_s25  ;;  %p5004_p11 = pnand %p4317_p7, %p45_p9 }
  0x4b   : > { %s304_s21 = sshll.u32 %s297_s19, 4  ;;  %s5008_s14 = scalar_lea.sflag [#allocation4], %s293_s24  ;;  %s5002_s21 = int_to_ptr.vmem [resolvable:$true] %s304_s21 }
  0x4c   : > { %p4643_p0 = pneg %p5004_p11 }
  0x4f   : > { %s5000_s10 = scalar_lea.hbm %s6018_s0, %s3557_s18  ;;  %s4646_s26 = scalar_lea.hbm %s6018_s0, 4096 }
  0x50   : > { %s4641_s17 = scalar_lea.hbm %s5000_s10, 2048  ;;  %p4647_p13 = scmp.lt.u32.totalorder %s5000_s10, %s6018_s0 }
  0x51   : > { %p4642_p12 = scmp.ne.s32.totalorder %s5000_s10, %s4641_s17  ;;  %p4648_p6 = scmp.lt.u32.totalorder %s4646_s26, %s4641_s17 }
  0x52   : > { %p4650_p3 = scmp.lt.u32.totalorder %s4641_s17, %s5000_s10 }
  0x53   : > { %p4644_p1 = pnand %p4643_p0, %p4642_p12  ;;  %p4649_p10 = por %p4648_p6, %p4647_p13 }
  0x55   : > { %p4645_p2 = pneg %p4644_p1  ;;  %p4651_p7 = por %p4650_p3, %p4649_p10 }
  0x57   : > { %p4652_p9 = pnand %p4651_p7, %p4645_p2 }
  0x59   : > { %4655 = shalt.err (!%p4652_p9)
}
  0x5a   : > { %s4656_s24 = scalar_lea.vmem %s5002_s21, 2048  ;;  %s4807_s25 = smov [#allocation3]  }
  0x5b   : > { %p4657_p12 = scmp.ne.s32.totalorder %s5002_s21, %s4656_s24  ;;  %s4661_s18 = sshll.u32 %s4807_s25, 4  ;;  %s4662_s18 = int_to_ptr.vmem [resolvable:$false] %s4661_s18 }
  0x5c   : > { %s4663_s15 = scalar_lea.vmem %s4662_s18, 4096  ;;  %p4664_p4 = scmp.lt.s32.totalorder %s5002_s21, %s4662_s18 }
  0x5d   : > { %p4659_p1 = pnand %p4657_p12, %p4643_p0  ;;  %p4665_p13 = scmp.lt.s32.totalorder %s4663_s15, %s4656_s24 }
  0x5f   : > { %p4660_p5 = pneg %p4659_p1  ;;  %p4666_p6 = por %p4665_p13, %p4664_p4 }
  0x61   : > { %p4667_p10 = pnand %p4666_p6, %p4660_p5 }
  0x63   : > { %4670 = shalt.err (!%p4667_p10)
}
  0x64   : > { %s6020_s17 = smov 4   ;;  %s6021_s26 = smov 64  }
  0x65   : > { %4304 = dma.hbm_to_vmem [thread:$0]  (!%p5004_p11), %s5000_s10, 2048, %s5002_s21, %s5008_s14, %s6021_s26, %s6021_s26, %s6020_s17  }
  0x66   : > { %322 = sbr.rel (%p4901_p8) target bundleno = 991 (0x3df), region = 44  ;;  %s5042_s19 = sand.u32 (!%p4901_p8), 1, %s4793_s28  }
  0x67   : > { %s3383_s24 = sshll.u32 (!%p4901_p8), %s5042_s19, 7  ;;  %s325_s25 = scalar_lea.sflag (!%p4901_p8), [#allocation4], %s5042_s19 }
  0x68   : > { %s5048_s20 = scalar_lea.vmem (!%p4901_p8), [#allocation3], %s3383_s24  ;;  %p6022_p4 = scmp.ne.s32.totalorder (!%p4901_p8), %s6012_s11, 0 }
  0x6d   : > { %4772 = dma.done.wait (%p6022_p4), %s325_s25, 2048  }
  0x6e   : > { %4774 = vsyncadd (%p6022_p4), %s325_s25, 4294965248  ;;  %p6023_p5 = scmp.eq.s32.totalorder %s4880_s9, 0 }
  0x70   : > { %4776 = dma.done.wait (%p6023_p5), [#allocation7], 10240   ;;  %p6024_p8 = pmov %p6023_p5 }
  0x71   : > { %v4360_v0 = vld [vmem:[#allocation6] sm:$0xff]   ;;  %v4361_v1 = vld [vmem:[#allocation6 + $0x8] sm:$0xff]   ;;  %v4362_v2 = vld [vmem:[#allocation6 + $0x10] sm:$0xff]   ;;  %v4808_v42 = vmov 0.0   ;;  %p380_p11 = scmp.lt.s32.totalorder %s4880_s9, 1  ;;  %s5826_s26 = scalar_lea.vmem [#allocation9], %s3383_s24 }
  0x72   : > { %4778 = vsyncadd (%p6024_p8), [#allocation7], 4294957056  ;;  %4182 = vmatprep.subr.bf16.mxu0 %v4360_v0  ;;  %v4363_v3 = vld [vmem:[#allocation6 + $0x18] sm:$0xff]   ;;  %v4368_v4 = vld [vmem:[%s5048_s20] sm:$0xff]   ;;  %1007 = vst [vmem:[#allocation2] sm:$0xff] %v4808_v42  ;;  %s3590_s24 = sshll.u32 %s4880_s9, 11 }
  0x73   : > { %4183 = vmatpush3.bf16.msra.mxu0 %v4360_v0  ;;  %4198 = vmatprep.mubr.bf16.mxu0 %v4368_v4  ;;  %v4364_v5 = vld [vmem:[#allocation6 + $0x20] sm:$0xff]   ;;  %v4365_v6 = vld [vmem:[#allocation6 + $0x28] sm:$0xff]   ;;  %v4366_v7 = vld [vmem:[#allocation6 + $0x30] sm:$0xff]   ;;  %1008 = vst [vmem:[#allocation2 + $0x8] sm:$0xff] %v4808_v42  ;;  %s5172_s14 = scalar_select %p380_p11, %s4880_s9, 1 }
  0x74   : > { %4184 = vmatprep.subr.bf16.mxu0 %v4361_v1  ;;  %v4367_v8 = vld [vmem:[#allocation6 + $0x38] sm:$0xff]   ;;  %v4369_v9 = vld [vmem:[%s5048_s20 + $0x8] sm:$0xff]   ;;  %v4370_v10 = vld [vmem:[%s5048_s20 + $0x10] sm:$0xff]   ;;  %1009 = vst [vmem:[#allocation2 + $0x10] sm:$0x3] %v4808_v42  ;;  %s3194_s25 = sshll.u32 %s5826_s26, 4  ;;  %s5877_s13 = scalar_lea.hbm %s6001_s6, %s3590_s24  ;;  %s5879_s25 = int_to_ptr.vmem [resolvable:$true] %s3194_s25 }
  0x75   : > { %v4371_v11 = vld [vmem:[%s5048_s20 + $0x18] sm:$0xff]   ;;  %v4372_v12 = vld [vmem:[%s5048_s20 + $0x20] sm:$0xff]   ;;  %v4373_v13 = vld [vmem:[%s5048_s20 + $0x28] sm:$0xff]   ;;  %1011 = vst [vmem:[#allocation2 + $0x198] sm:$0xff] %v4808_v42  ;;  %s382_s18 = scalar_lea.vmem %s5998_s3, %s5172_s14  ;;  %s3173_s14 = scalar_lea.sflag [#allocation5], %s5042_s19 }
  0x76   : > { %v4374_v14 = vld [vmem:[%s5048_s20 + $0x30] sm:$0xff]   ;;  %v4375_v15 = vld [vmem:[%s5048_s20 + $0x38] sm:$0xff]   ;;  %v4376_v16 = vld [vmem:[%s5048_s20 + $0x40] sm:$0xff]   ;;  %1012 = vst [vmem:[#allocation2 + $0x1a0] sm:$0xff] %v4808_v42  ;;  %s4671_s10 = scalar_lea.vmem %s5879_s25, 2048  ;;  %p6025_p2 = scmp.ne.s32.totalorder %s6017_s22, 0 }
  0x77   : > { %4185 = vmatpush3.bf16.msra.mxu0 %v4361_v1  ;;  %v4377_v17 = vld [vmem:[%s5048_s20 + $0x48] sm:$0xff]   ;;  %v4378_v18 = vld [vmem:[%s5048_s20 + $0x50] sm:$0xff]   ;;  %v4379_v19 = vld [vmem:[%s5048_s20 + $0x58] sm:$0xff]   ;;  %1013 = vst [vmem:[#allocation2 + $0x1a8] sm:$0x3] %v4808_v42  ;;  %p4672_p0 = scmp.ne.s32.totalorder %s5879_s25, %s4671_s10  ;;  %s4809_s21 = smov [#allocation9]  }
  0x78   : > { %4186 = vmatprep.subr.bf16.mxu0 %v4362_v2  ;;  %v4380_v20 = vld [vmem:[%s5048_s20 + $0x60] sm:$0xff]   ;;  %v4381_v21 = vld [vmem:[%s5048_s20 + $0x68] sm:$0xff]   ;;  %v4382_v22 = vld [vmem:[%s5048_s20 + $0x70] sm:$0xff]   ;;  %1015 = vst [vmem:[#allocation2 + $0x18] sm:$0x1] %v4808_v42 }
  0x79   : > { %v4383_v23 = vld [vmem:[%s5048_s20 + $0x78] sm:$0xff]   ;;  %v4384_v24 = vld [vmem:[#allocation8 + $0x40] sm:$0xff]   ;;  %v4386_v26 = vld [vmem:[#allocation8 + $0x48] sm:$0xff]   ;;  %1016 = vst [vmem:[#allocation2 + $0x30] sm:$0x1] %v4808_v42  ;;  %p4673_p3 = pnand %p4672_p0, %p6025_p2 }
  0x7a   : > { %v4385_v25 = vld [vmem:[#allocation8] sm:$0xff]   ;;  %3710 = vmatprep.subr.bf16.mxu1 %v4384_v24  ;;  %v4387_v27 = vld [vmem:[#allocation8 + $0x8] sm:$0xff]   ;;  %v4388_v28 = vld [vmem:[#allocation8 + $0x50] sm:$0xff]   ;;  %1017 = vst [vmem:[#allocation2 + $0x48] sm:$0x1] %v4808_v42 }
  0x7b   : > { %4187 = vmatpush3.bf16.msra.mxu0 %v4362_v2  ;;  %3711 = vmatpush3.bf16.msra.mxu1 %v4385_v25  ;;  %v4389_v29 = vld [vmem:[#allocation8 + $0x10] sm:$0xff]   ;;  %v4390_v30 = vld [vmem:[#allocation8 + $0xc0] sm:$0xff]   ;;  %v4391_v31 = vld [vmem:[#allocation8 + $0x58] sm:$0xff]   ;;  %1018 = vst [vmem:[#allocation2 + $0x60] sm:$0x1] %v4808_v42  ;;  %p4674_p7 = pneg %p4673_p3 }
  0x7c   : > { %4188 = vmatprep.subr.bf16.mxu0 %v4363_v3  ;;  %3712 = vmatprep.subr.bf16.mxu1 %v4386_v26  ;;  %v4392_v32 = vld [vmem:[#allocation8 + $0x80] sm:$0xff]   ;;  %v4393_v33 = vld [vmem:[#allocation8 + $0x18] sm:$0xff]   ;;  %v4394_v34 = vld [vmem:[#allocation8 + $0xc8] sm:$0xff]   ;;  %1019 = vst [vmem:[#allocation2 + $0x78] sm:$0x1] %v4808_v42 }
  0x7d   : > { %v4395_v35 = vld [vmem:[#allocation8 + $0x60] sm:$0xff]   ;;  %v4396_v36 = vld [vmem:[#allocation8 + $0x88] sm:$0xff]   ;;  %v4398_v38 = vld [vmem:[#allocation8 + $0xd0] sm:$0xff]   ;;  %1020 = vst [vmem:[#allocation2 + $0x90] sm:$0x1] %v4808_v42 }
  0x7e   : > { %v4397_v37 = vld [vmem:[#allocation8 + $0x20] sm:$0xff]   ;;  %v4399_v39 = vld [vmem:[#allocation8 + $0x68] sm:$0xff]   ;;  %v4400_v40 = vld [vmem:[#allocation8 + $0x90] sm:$0xff]   ;;  %1021 = vst [vmem:[#allocation2 + $0xa8] sm:$0x1] %v4808_v42 }
  0x7f   : > { %4189 = vmatpush3.bf16.msra.mxu0 %v4363_v3  ;;  %3713 = vmatpush3.bf16.msra.mxu1 %v4387_v27  ;;  %v4401_v41 = vld [vmem:[#allocation8 + $0x28] sm:$0xff]   ;;  %1022 = vst [vmem:[#allocation2 + $0xc0] sm:$0x1] %v4808_v42  ;;  %1023 = vst [vmem:[#allocation2 + $0xd8] sm:$0x1] %v4808_v42  ;;  %v4402_v43 = vld [vmem:[#allocation8 + $0xd8] sm:$0xff]  }
  0x80   : > { %4190 = vmatprep.subr.bf16.mxu0 %v4364_v5  ;;  %3714 = vmatprep.subr.bf16.mxu1 %v4388_v28  ;;  %1024 = vst [vmem:[#allocation2 + $0xf0] sm:$0x1] %v4808_v42  ;;  %1025 = vst [vmem:[#allocation2 + $0x108] sm:$0x1] %v4808_v42  ;;  %v4403_v44 = vld [vmem:[#allocation8 + $0x70] sm:$0xff]   ;;  %v4404_v45 = vld [vmem:[#allocation8 + $0x98] sm:$0xff]  }
  0x81   : > { %1026 = vst [vmem:[#allocation2 + $0x120] sm:$0x1] %v4808_v42  ;;  %1027 = vst [vmem:[#allocation2 + $0x138] sm:$0x1] %v4808_v42  ;;  %v4405_v46 = vld [vmem:[#allocation8 + $0x30] sm:$0xff]   ;;  %v4406_v47 = vld [vmem:[#allocation8 + $0xe0] sm:$0xff]  }
  0x82   : > { %1028 = vst [vmem:[#allocation2 + $0x150] sm:$0x1] %v4808_v42  ;;  %1029 = vst [vmem:[#allocation2 + $0x168] sm:$0x1] %v4808_v42  ;;  %v4407_v48 = vld [vmem:[#allocation8 + $0x78] sm:$0xff]   ;;  %v4408_v49 = vld [vmem:[#allocation8 + $0xa0] sm:$0xff]  }
  0x83   : > { %4191 = vmatpush3.bf16.msra.mxu0 %v4364_v5  ;;  %3715 = vmatpush3.bf16.msra.mxu1 %v4389_v29  ;;  %1030 = vst [vmem:[#allocation2 + $0x180] sm:$0x1] %v4808_v42  ;;  %1033 = vst [vmem:[#allocation2 + $0x29] sm:$0x1] %v4808_v42  ;;  %v4409_v50 = vld [vmem:[#allocation8 + $0x38] sm:$0xff]   ;;  %v4410_v55 = vld [vmem:[#allocation8 + $0xe8] sm:$0xff]  }
  0x84   : > { %4192 = vmatprep.subr.bf16.mxu0 %v4365_v6  ;;  %3716 = vmatprep.subr.bf16.mxu1 %v4391_v31  ;;  %1034 = vst [vmem:[#allocation2 + $0x41] sm:$0x1] %v4808_v42  ;;  %1035 = vst [vmem:[#allocation2 + $0x59] sm:$0x1] %v4808_v42  ;;  %v1131_v51 = vld [vmem:[#allocation2 + $0x1] sm:$0xff]  ;;  %v1132_v52 = vld [vmem:[#allocation2 + $0x9] sm:$0xff] }
  0x85   : > { %1036 = vst [vmem:[#allocation2 + $0x71] sm:$0x1] %v4808_v42  ;;  %1037 = vst [vmem:[#allocation2 + $0x89] sm:$0x1] %v4808_v42  ;;  %v1163_v53 = vpack.c.bf16 %v1132_v52, %v1131_v51  ;;  %v4411_v57 = vld [vmem:[#allocation8 + $0xa8] sm:$0xff]   ;;  %v4413_v58 = vld [vmem:[#allocation8 + $0xf0] sm:$0xff]  }
  0x86   : > { %1038 = vst [vmem:[#allocation2 + $0xa1] sm:$0x1] %v4808_v42  ;;  %1039 = vst [vmem:[#allocation2 + $0xb9] sm:$0x1] %v4808_v42  ;;  %v4415_v59 = vld [vmem:[#allocation8 + $0xb0] sm:$0xff]   ;;  %v4416_v60 = vld [vmem:[#allocation8 + $0xf8] sm:$0xff]  }
  0x87   : > { %4193 = vmatpush3.bf16.msra.mxu0 %v4365_v6  ;;  %3717 = vmatpush3.bf16.msra.mxu1 %v4393_v33  ;;  %1040 = vst [vmem:[#allocation2 + $0xd1] sm:$0x1] %v4808_v42  ;;  %1041 = vst [vmem:[#allocation2 + $0xe9] sm:$0x1] %v4808_v42  ;;  %v4417_v61 = vld [vmem:[#allocation8 + $0xb8] sm:$0xff]   ;;  %v4412_v62 = vld [vmem:[#allocation8 + $0x140] sm:$0xff]  }
  0x88   : > { %4194 = vmatprep.subr.bf16.mxu0 %v4366_v7  ;;  %3718 = vmatprep.subr.bf16.mxu1 %v4395_v35  ;;  %1042 = vst [vmem:[#allocation2 + $0x101] sm:$0x1] %v4808_v42  ;;  %1043 = vst [vmem:[#allocation2 + $0x119] sm:$0x1] %v4808_v42  ;;  %v4414_v63 = vld [vmem:[#allocation8 + $0x100] sm:$0xff]   ;;  %v4418_v0 = vld [vmem:[#allocation8 + $0x148] sm:$0xff]  }
  0x89   : > { %1044 = vst [vmem:[#allocation2 + $0x131] sm:$0x1] %v4808_v42  ;;  %1045 = vst [vmem:[#allocation2 + $0x149] sm:$0x1] %v4808_v42  ;;  %2131 = vmatprep.mubr.bf16.mxu1 %v1163_v53  ;;  %v4419_v1 = vld [vmem:[#allocation8 + $0x108] sm:$0xff]   ;;  %v4420_v2 = vld [vmem:[#allocation8 + $0x150] sm:$0xff]  }
  0x8a   : > { %1046 = vst [vmem:[#allocation2 + $0x161] sm:$0x1] %v4808_v42  ;;  %1047 = vst [vmem:[#allocation2 + $0x179] sm:$0x1] %v4808_v42  ;;  %v4421_v3 = vld [vmem:[#allocation8 + $0x110] sm:$0xff]   ;;  %v4422_v4 = vld [vmem:[#allocation8 + $0x158] sm:$0xff]  }
  0x8b   : > { %4195 = vmatpush3.bf16.msra.mxu0 %v4366_v7  ;;  %3719 = vmatpush3.bf16.msra.mxu1 %v4397_v37  ;;  %1048 = vst [vmem:[#allocation2 + $0x191] sm:$0x1] %v4808_v42  ;;  %1032 = vst [vmem:[#allocation2 + $0x11] sm:$0x1] %v4808_v42  ;;  %v4423_v5 = vld [vmem:[#allocation8 + $0x118] sm:$0xff]   ;;  %v4424_v6 = vld [vmem:[#allocation8 + $0x160] sm:$0xff]  }
  0x8c   : > { %4196 = vmatprep.subr.bf16.mxu0 %v4367_v8  ;;  %3720 = vmatprep.subr.bf16.mxu1 %v4399_v39  ;;  %1014 = vst [vmem:[#allocation2] sm:$0x1] %v4808_v42  ;;  %1031 = vst [vmem:[#allocation2 + $0x198] sm:$0x1] %v4808_v42  ;;  %v4425_v7 = vld [vmem:[#allocation8 + $0x1c0] sm:$0xff]   ;;  %v4434_v25 = vld [vmem:[#allocation8 + $0x130] sm:$0xff]  }
  0x8d   : > { %1049 = vst [vmem:[#allocation2 + $0x1a9] sm:$0x1] %v4808_v42 }
  0x8f   : > { %4197 = vmatpush3.bf16.msra.mxu0 %v4367_v8  ;;  %3721 = vmatpush3.bf16.msra.mxu1 %v4401_v41  ;;  %v4426_v8 = vld [vmem:[#allocation8 + $0x120] sm:$0xff]  }
  0x90   : > { %3822 = vmatprep.subr.bf16.mxu0 %v4390_v30  ;;  %3722 = vmatprep.subr.bf16.mxu1 %v4403_v44 }
  0x92   : > { %4199 = vmatmul.mubr.bf16.vlgmr.msra.gmra.mrb[0].mxu0 %v4369_v9  ;;  %v4428_v9 = vld [vmem:[#allocation8 + $0x168] sm:$0xff]  }
  0x93   : > { %4202 = vmatprep.mubr.bf16.mxu0 %v4370_v10  ;;  %3823 = vmatpush3.bf16.msra.mxu0 %v4392_v32  ;;  %v1083_v54 = vld [vmem:[#allocation2] sm:$0xff]  ;;  %v4430_v10 = vld [vmem:[#allocation8 + $0x128] sm:$0xff]  }
  0x94   : > { %3824 = vmatprep.subr.bf16.mxu0 %v4394_v34  ;;  %3723 = vmatpush3.bf16.msra.mxu1 %v4405_v46  ;;  %v1115_v56 = vpack.c.bf16 %v4808_v42, %v1083_v54  ;;  %v4436_v42 = vld [vmem:[#allocation8 + $0x178] sm:$0xff]  }
  0x95   : > { %3724 = vmatprep.subr.bf16.mxu1 %v4407_v48 }
  0x97   : > { %3825 = vmatpush3.bf16.msra.mxu0 %v4396_v36 }
  0x98   : > { %3826 = vmatprep.subr.bf16.mxu0 %v4398_v38  ;;  %3725 = vmatpush3.bf16.msra.mxu1 %v4409_v50 }
  0x99   : > { %3934 = vmatprep.subr.bf16.mxu1 %v4412_v62 }
  0x9a   : > { %4203 = vmatmul.mubr.bf16.gmra.mrb[4].mxu0 %v4371_v11  ;;  %v5120_v11 = vld [vmem:[%s5997_s2] ss:$0 sm:$0xff] }
  0x9b   : > { %4206 = vmatprep.mubr.bf16.mxu0 %v4372_v12  ;;  %3827 = vmatpush3.bf16.msra.mxu0 %v4400_v40 }
  0x9c   : > { %3828 = vmatprep.subr.bf16.mxu0 %v4402_v43  ;;  %2132 = vmatmul.mubr.bf16.vlgmr.msra.gmra.mrb[0].mxu1 %v1115_v56 }
  0x9d   : > { %3935 = vmatpush3.bf16.msra.mxu1 %v4414_v63 }
  0x9e   : > { %3936 = vmatprep.subr.bf16.mxu1 %v4418_v0 }
  0x9f   : > { %3829 = vmatpush3.bf16.msra.mxu0 %v4404_v45 }
  0xa0   : > { %3830 = vmatprep.subr.bf16.mxu0 %v4406_v47 }
  0xa1   : > { %3937 = vmatpush3.bf16.msra.mxu1 %v4419_v1 }
  0xa2   : > { %4207 = vmatmul.mubr.bf16.gmra.mrb[8].mxu0 %v4373_v13  ;;  %3938 = vmatprep.subr.bf16.mxu1 %v4420_v2  ;;  %v4432_v13 = vld [vmem:[#allocation8 + $0x170] sm:$0xff]  }
  0xa3   : > { %4210 = vmatprep.mubr.bf16.mxu0 %v4374_v14  ;;  %3831 = vmatpush3.bf16.msra.mxu0 %v4408_v49 }
  0xa4   : > { %3832 = vmatprep.subr.bf16.mxu0 %v4410_v55 }
  0xa5   : > { %3939 = vmatpush3.bf16.msra.mxu1 %v4421_v3 }
  0xa6   : > { %3940 = vmatprep.subr.bf16.mxu1 %v4422_v4 }
  0xa7   : > { %3833 = vmatpush3.bf16.msra.mxu0 %v4411_v57 }
  0xa8   : > { %3834 = vmatprep.subr.bf16.mxu0 %v4413_v58 }
  0xa9   : > { %3941 = vmatpush3.bf16.msra.mxu1 %v4423_v5 }
  0xaa   : > { %4211 = vmatmul.mubr.bf16.gmra.mrb[12].mxu0 %v4375_v15  ;;  %3942 = vmatprep.subr.bf16.mxu1 %v4424_v6 }
  0xab   : > { %4214 = vmatprep.mubr.bf16.mxu0 %v4376_v16  ;;  %3835 = vmatpush3.bf16.msra.mxu0 %v4415_v59 }
  0xac   : > { %3836 = vmatprep.subr.bf16.mxu0 %v4416_v60  ;;  %v4438_v60 = vld [vmem:[#allocation8 + $0x138] sm:$0xff]  }
  0xad   : > { %3943 = vmatpush3.bf16.msra.mxu1 %v4426_v8 }
  0xae   : > { %3944 = vmatprep.subr.bf16.mxu1 %v4428_v9 }
  0xaf   : > { %3837 = vmatpush3.bf16.msra.mxu0 %v4417_v61 }
  0xb0   : > { %4046 = vmatprep.subr.bf16.mxu0 %v4425_v7 }
  0xb1   : > { %3945 = vmatpush3.bf16.msra.mxu1 %v4430_v10 }
  0xb2   : > { %4215 = vmatmul.mubr.bf16.gmra.mrb[16].mxu0 %v4377_v17  ;;  %3946 = vmatprep.subr.bf16.mxu1 %v4432_v13 }
  0xb3   : > { %4218 = vmatprep.mubr.bf16.mxu0 %v4378_v18 }
  0xb5   : > { %3947 = vmatpush3.bf16.msra.mxu1 %v4434_v25 }
  0xb6   : > { %3948 = vmatprep.subr.bf16.mxu1 %v4436_v42 }
  0xb9   : > { %3949 = vmatpush3.bf16.msra.mxu1 %v4438_v60 }
  0xba   : > { %4219 = vmatmul.mubr.bf16.gmra.mrb[20].mxu0 %v4379_v19 }
  0xbb   : > { %4222 = vmatprep.mubr.bf16.mxu0 %v4380_v20 }
  0xc2   : > { %4223 = vmatmul.mubr.bf16.gmra.mrb[24].mxu0 %v4381_v21 }
  0xc3   : > { %4226 = vmatprep.mubr.bf16.mxu0 %v4382_v22 }
  0xca   : > { %4227 = vmatmul.mubr.bf16.gmra.mrb[28].mxu0 %v4383_v23 }
 0x165   : > { %v4200_v12 = vpop.f32.mrb[0].mxu0 }
 0x166   : > { %v5123_v14 = vadd.f32 %v4200_v12, %v5120_v11  ;;  %v617_v15 = vpop.f32.mrb[1].mxu0 }
 0x167   : > { %v5126_v16 = vadd.f32 %v5120_v11, %v617_v15  ;;  %v4201_v17 = vpop.f32.mrb[2].mxu0  ;;  %v5190_v15 = vld [vmem:[%s382_s18] ss:$0 sm:$0xff]  ;;  %s4675_s18 = sshll.u32 %s4809_s21, 4  ;;  %s4676_s18 = int_to_ptr.vmem [resolvable:$false] %s4675_s18 }
 0x168   : > { %v3414_v18 = vmul.f32 -1.442695, %v5123_v14  ;;  %v5130_v19 = vadd.f32 %v4201_v17, %v5120_v11  ;;  %v620_v20 = vpop.f32.mrb[3].mxu0  ;;  %s4677_s15 = scalar_lea.vmem %s4676_s18, 4096  ;;  %p4678_p9 = scmp.lt.s32.totalorder %s5879_s25, %s4676_s18 }
 0x169   : > { %v3412_v21 = vmul.f32 -1.442695, %v5126_v16  ;;  %v5134_v22 = vadd.f32 %v5120_v11, %v620_v20  ;;  %p4679_p12 = scmp.lt.s32.totalorder %s4677_s15, %s4671_s10 }
 0x16a   : > { %4456 = vpow2.f32 %v3414_v18  ;;  %v3415_v23 = vmul.f32 -1.442695, %v5130_v19 }
 0x16b   : > { %4458 = vpow2.f32 %v3412_v21  ;;  %v3413_v24 = vmul.f32 -1.442695, %v5134_v22  ;;  %p4680_p1 = por %p4679_p12, %p4678_p9 }
 0x16c   : > { %4460 = vpow2.f32 %v3415_v23 }
 0x16d   : > { %4462 = vpow2.f32 %v3413_v24  ;;  %v4204_v26 = vpop.f32.mrb[4].mxu0  ;;  %p4681_p13 = pnand %p4680_p1, %p4674_p7 }
 0x16e   : > { %v5139_v27 = vadd.f32 %v4204_v26, %v5120_v11  ;;  %v633_v28 = vpop.f32.mrb[5].mxu0 }
 0x16f   : > { %v5142_v29 = vadd.f32 %v5120_v11, %v633_v28  ;;  %v4205_v30 = vpop.f32.mrb[6].mxu0 }
 0x170   : > { %v3418_v31 = vmul.f32 -1.442695, %v5139_v27  ;;  %v5146_v32 = vadd.f32 %v4205_v30, %v5120_v11  ;;  %v636_v33 = vpop.f32.mrb[7].mxu0 }
 0x171   : > { %v3416_v34 = vmul.f32 -1.442695, %v5142_v29  ;;  %v5150_v35 = vadd.f32 %v5120_v11, %v636_v33 }
 0x172   : > { %4464 = vpow2.f32 %v3418_v31  ;;  %v3419_v36 = vmul.f32 -1.442695, %v5146_v32 }
 0x173   : > { %4466 = vpow2.f32 %v3416_v34  ;;  %v3417_v37 = vmul.f32 -1.442695, %v5150_v35 }
 0x174   : > { %v4457_v38 = vpop.eup %4456  ;;  %4468 = vpow2.f32 %v3419_v36 }
 0x175   : > { %v4459_v39 = vpop.eup %4458  ;;  %v842_v40 = vadd.f32 1.0, %v4457_v38  ;;  %4470 = vpow2.f32 %v3417_v37  ;;  %v4208_v41 = vpop.f32.mrb[8].mxu0 }
 0x176   : > { %v4461_v43 = vpop.eup %4460  ;;  %v840_v44 = vadd.f32 1.0, %v4459_v39  ;;  %v5156_v45 = vadd.f32 %v4208_v41, %v5120_v11  ;;  %v649_v46 = vpop.f32.mrb[9].mxu0 }
 0x177   : > { %v4463_v47 = vpop.eup %4462  ;;  %4472 = vrcp.f32 %v842_v40  ;;  %v843_v48 = vadd.f32 1.0, %v4461_v43  ;;  %v5159_v49 = vadd.f32 %v5120_v11, %v649_v46  ;;  %v4209_v50 = vpop.f32.mrb[10].mxu0  ;;  %v5213_v40 = vld [vmem:[#allocation8 + $0x200] sm:$0xff]  }
 0x178   : > { %4474 = vrcp.f32 %v840_v44  ;;  %v841_v51 = vadd.f32 1.0, %v4463_v47  ;;  %v3422_v52 = vmul.f32 -1.442695, %v5156_v45  ;;  %v5163_v53 = vadd.f32 %v4209_v50, %v5120_v11  ;;  %v652_v54 = vpop.f32.mrb[11].mxu0  ;;  %4230 = vmatprep.subr.bf16.mxu1 %v5213_v40 }
 0x179   : > { %4476 = vrcp.f32 %v843_v48  ;;  %v3420_v55 = vmul.f32 -1.442695, %v5159_v49  ;;  %v5167_v56 = vadd.f32 %v5120_v11, %v652_v54 }
 0x17a   : > { %4478 = vrcp.f32 %v841_v51  ;;  %v3423_v57 = vmul.f32 -1.442695, %v5163_v53 }
 0x17b   : > { %4480 = vpow2.f32 %v3422_v52  ;;  %v3421_v58 = vmul.f32 -1.442695, %v5167_v56 }
 0x17c   : > { %v4465_v59 = vpop.eup %4464  ;;  %4482 = vpow2.f32 %v3420_v55 }
 0x17d   : > { %v4467_v61 = vpop.eup %4466  ;;  %v846_v62 = vadd.f32 1.0, %v4465_v59  ;;  %4484 = vpow2.f32 %v3423_v57  ;;  %v4212_v63 = vpop.f32.mrb[12].mxu0 }
 0x17e   : > { %v4469_v0 = vpop.eup %4468  ;;  %v844_v1 = vadd.f32 1.0, %v4467_v61  ;;  %4486 = vpow2.f32 %v3421_v58  ;;  %v5181_v2 = vadd.f32 %v4212_v63, %v5120_v11  ;;  %v665_v3 = vpop.f32.mrb[13].mxu0 }
 0x17f   : > { %v4471_v4 = vpop.eup %4470  ;;  %4488 = vrcp.f32 %v846_v62  ;;  %v847_v5 = vadd.f32 1.0, %v4469_v0  ;;  %v5184_v6 = vadd.f32 %v5120_v11, %v665_v3  ;;  %v4213_v7 = vpop.f32.mrb[14].mxu0 }
 0x180   : > { %4490 = vrcp.f32 %v844_v1  ;;  %v845_v8 = vadd.f32 1.0, %v4471_v4  ;;  %v3426_v9 = vmul.f32 -1.442695, %v5181_v2  ;;  %v5188_v10 = vadd.f32 %v4213_v7, %v5120_v11  ;;  %v668_v12 = vpop.f32.mrb[15].mxu0 }
 0x181   : > { %v4473_v13 = vpop.eup %4472  ;;  %4492 = vrcp.f32 %v847_v5  ;;  %v3424_v17 = vmul.f32 -1.442695, %v5184_v6  ;;  %v5194_v18 = vadd.f32 %v5120_v11, %v668_v12 }
 0x182   : > { %v4475_v20 = vpop.eup %4474  ;;  %v938_v21 = vmul.f32 %v4473_v13, %v5123_v14  ;;  %4494 = vrcp.f32 %v845_v8  ;;  %v3427_v23 = vmul.f32 -1.442695, %v5188_v10  ;;  %v1179_v8 = vld [vmem:[#allocation2 + $0x2] sm:$0xff] }
 0x183   : > { %v4477_v24 = vpop.eup %4476  ;;  %v936_v25 = vmul.f32 %v4475_v20, %v5126_v16  ;;  %4496 = vpow2.f32 %v3426_v9  ;;  %v3425_v26 = vmul.f32 -1.442695, %v5194_v18  ;;  %v1180_v9 = vld [vmem:[#allocation2 + $0xa] sm:$0xff] }
 0x184   : > { %v4479_v28 = vpop.eup %4478  ;;  %v5201_v30 = vadd.f32 %v5190_v15, %v938_v21  ;;  %v939_v31 = vmul.f32 %v4477_v24, %v5130_v19  ;;  %4498 = vpow2.f32 %v3424_v17 }
 0x185   : > { %v4481_v33 = vpop.eup %4480  ;;  %v975_v34 = vadd.f32 %v5190_v15, %v936_v25  ;;  %v937_v14 = vmul.f32 %v4479_v28, %v5134_v22  ;;  %4500 = vpow2.f32 %v3427_v23  ;;  %v4216_v36 = vpop.f32.mrb[16].mxu0 }
 0x186   : > { %v4483_v37 = vpop.eup %4482  ;;  %1053 = vst [vmem:[#allocation2 + $0x31] sm:$0xff] %v5201_v30  ;;  %v5208_v16 = vadd.f32 %v5190_v15, %v939_v31  ;;  %v850_v38 = vadd.f32 1.0, %v4481_v33  ;;  %4502 = vpow2.f32 %v3425_v26  ;;  %v5211_v39 = vadd.f32 %v4216_v36, %v5120_v11  ;;  %v681_v19 = vpop.f32.mrb[17].mxu0 }
 0x187   : > { %v4485_v41 = vpop.eup %4484  ;;  %1051 = vst [vmem:[#allocation2 + $0x19] sm:$0xff] %v975_v34  ;;  %v976_v22 = vadd.f32 %v5190_v15, %v937_v14  ;;  %v848_v42 = vadd.f32 1.0, %v4483_v37  ;;  %v5217_v43 = vadd.f32 %v5120_v11, %v681_v19  ;;  %v4217_v44 = vpop.f32.mrb[18].mxu0 }
 0x188   : > { %v4487_v46 = vpop.eup %4486  ;;  %1054 = vst [vmem:[#allocation2 + $0x39] sm:$0xff] %v5208_v16  ;;  %4504 = vrcp.f32 %v850_v38  ;;  %v851_v47 = vadd.f32 1.0, %v4485_v41  ;;  %v3430_v48 = vmul.f32 -1.442695, %v5211_v39  ;;  %v5222_v50 = vadd.f32 %v4217_v44, %v5120_v11  ;;  %v684_v51 = vpop.f32.mrb[19].mxu0  ;;  %v4427_v41 = vld [vmem:[#allocation8 + $0x180] sm:$0xff]  }
 0x189   : > { %v4489_v52 = vpop.eup %4488  ;;  %1052 = vst [vmem:[#allocation2 + $0x21] sm:$0xff] %v976_v22  ;;  %4506 = vrcp.f32 %v848_v42  ;;  %v849_v54 = vadd.f32 1.0, %v4487_v46  ;;  %v3428_v55 = vmul.f32 -1.442695, %v5217_v43  ;;  %v5227_v57 = vadd.f32 %v5120_v11, %v684_v51 }
 0x18a   : > { %v4491_v58 = vpop.eup %4490  ;;  %v942_v59 = vmul.f32 %v4489_v52, %v5139_v27  ;;  %4508 = vrcp.f32 %v851_v47  ;;  %v3431_v60 = vmul.f32 -1.442695, %v5222_v50  ;;  %v1164_v61 = vpack.c.bf16 %v976_v22, %v975_v34  ;;  %v4429_v47 = vld [vmem:[#allocation8 + $0x1c8] sm:$0xff]  }
 0x18b   : > { %v4493_v62 = vpop.eup %4492  ;;  %v940_v63 = vmul.f32 %v4491_v58, %v5142_v29  ;;  %4510 = vrcp.f32 %v849_v54  ;;  %v3429_v0 = vmul.f32 -1.442695, %v5227_v57  ;;  %v1165_v1 = vpack.c.bf16 %v5208_v16, %v5201_v30 }
 0x18c   : > { %v4495_v3 = vpop.eup %4494  ;;  %v5236_v4 = vadd.f32 %v5190_v15, %v942_v59  ;;  %v943_v5 = vmul.f32 %v4493_v62, %v5146_v32  ;;  %4512 = vpow2.f32 %v3430_v48  ;;  %2139 = vmatprep.mubr.bf16.mxu1 %v1164_v61  ;;  %v1211_v34 = vpack.c.bf16 %v1180_v9, %v1179_v8  ;;  %v4433_v9 = vld [vmem:[#allocation8 + $0x1d0] sm:$0xff]  }
 0x18d   : > { %v4497_v27 = vpop.eup %4496  ;;  %v5240_v7 = vadd.f32 %v5190_v15, %v940_v63  ;;  %v941_v29 = vmul.f32 %v4495_v3, %v5150_v35  ;;  %4514 = vpow2.f32 %v3428_v55  ;;  %v4220_v12 = vpop.f32.mrb[20].mxu0  ;;  %v1229_v42 = vld [vmem:[#allocation2 + $0x30] sm:$0xff]  ;;  %v4431_v3 = vld [vmem:[#allocation8 + $0x188] sm:$0xff]  }
 0x18e   : > { %v4499_v13 = vpop.eup %4498  ;;  %1057 = vst [vmem:[#allocation2 + $0x61] sm:$0xff] %v5236_v4  ;;  %v5245_v17 = vadd.f32 %v5190_v15, %v943_v5  ;;  %v854_v20 = vadd.f32 1.0, %v4497_v27  ;;  %4516 = vpow2.f32 %v3431_v60  ;;  %v5248_v32 = vadd.f32 %v4220_v12, %v5120_v11  ;;  %v697_v21 = vpop.f32.mrb[21].mxu0  ;;  %v1227_v25 = vld [vmem:[#allocation2 + $0x18] sm:$0xff] }
 0x18f   : > { %v4501_v23 = vpop.eup %4500  ;;  %1055 = vst [vmem:[#allocation2 + $0x49] sm:$0xff] %v5240_v7  ;;  %v5252_v35 = vadd.f32 %v5190_v15, %v941_v29  ;;  %v852_v24 = vadd.f32 1.0, %v4499_v13  ;;  %4518 = vpow2.f32 %v3429_v0  ;;  %v5255_v26 = vadd.f32 %v5120_v11, %v697_v21  ;;  %v4221_v28 = vpop.f32.mrb[22].mxu0  ;;  %v1230_v14 = vld [vmem:[#allocation2 + $0x38] sm:$0xff] }
 0x190   : > { %v4503_v30 = vpop.eup %4502  ;;  %1058 = vst [vmem:[#allocation2 + $0x69] sm:$0xff] %v5245_v17  ;;  %4520 = vrcp.f32 %v854_v20  ;;  %v855_v31 = vadd.f32 1.0, %v4501_v23  ;;  %v1228_v33 = vld [vmem:[#allocation2 + $0x20] sm:$0xff]  ;;  %v3434_v36 = vmul.f32 -1.442695, %v5248_v32  ;;  %v700_v37 = vpop.f32.mrb[23].mxu0  ;;  %v5262_v44 = vadd.f32 %v4221_v28, %v5120_v11 }
 0x191   : > { %1056 = vst [vmem:[#allocation2 + $0x51] sm:$0xff] %v5252_v35  ;;  %4522 = vrcp.f32 %v852_v24  ;;  %v853_v16 = vadd.f32 1.0, %v4503_v30  ;;  %v1259_v38 = vpack.c.bf16 %v1228_v33, %v1227_v25  ;;  %v3432_v19 = vmul.f32 -1.442695, %v5255_v26  ;;  %v1181_v63 = vld [vmem:[#allocation2 + $0x1a] sm:$0xff]  ;;  %v1182_v0 = vld [vmem:[#allocation2 + $0x22] sm:$0xff] }
 0x192   : > { %v4505_v22 = vpop.eup %4504  ;;  %4524 = vrcp.f32 %v855_v31  ;;  %v5265_v46 = vadd.f32 %v5120_v11, %v700_v37  ;;  %v5268_v52 = vpack.c.bf16 %v1230_v14, %v1229_v42  ;;  %v1166_v54 = vpack.c.bf16 %v5252_v35, %v5240_v7  ;;  %v4435_v37 = vld [vmem:[#allocation8 + $0x190] sm:$0xff]   ;;  %v4437_v42 = vld [vmem:[#allocation8 + $0x1d8] sm:$0xff]  }
 0x193   : > { %v4507_v48 = vpop.eup %4506  ;;  %v946_v51 = vmul.f32 %v4505_v22, %v5156_v45  ;;  %4526 = vrcp.f32 %v853_v16  ;;  %2292 = vmatprep.mubr.bf16.mxu0 %v1259_v38  ;;  %2140 = vmatmul.mubr.bf16.gmra.mrb[4].mxu1 %v1259_v38  ;;  %v3435_v59 = vmul.f32 -1.442695, %v5262_v44  ;;  %v5300_v28 = vpack.c.bf16 %v1182_v0, %v1181_v63  ;;  %v4439_v0 = vld [vmem:[#allocation8 + $0x198] sm:$0xff]  }
 0x194   : > { %v4509_v55 = vpop.eup %4508  ;;  %v944_v58 = vmul.f32 %v4507_v48, %v5159_v49  ;;  %2293 = vmatmul.mubr.bf16.vlgmr.msra.gmra.mrb[32].mxu0 %v1211_v34  ;;  %2147 = vmatprep.mubr.bf16.mxu1 %v1165_v1  ;;  %4528 = vpow2.f32 %v3434_v36  ;;  %v3433_v60 = vmul.f32 -1.442695, %v5265_v46  ;;  %v1167_v49 = vpack.c.bf16 %v5245_v17, %v5236_v4 }
 0x195   : > { %v4511_v61 = vpop.eup %4510  ;;  %v5276_v45 = vadd.f32 %v5190_v15, %v946_v51  ;;  %v947_v62 = vmul.f32 %v4509_v55, %v5163_v53  ;;  %2300 = vmatprep.mubr.bf16.mxu0 %v5268_v52  ;;  %4530 = vpow2.f32 %v3432_v19  ;;  %v4224_v1 = vpop.f32.mrb[24].mxu0  ;;  %4047 = vmatpush3.bf16.msra.mxu0 %v4427_v41 }
 0x196   : > { %v4513_v5 = vpop.eup %4512  ;;  %v5283_v27 = vadd.f32 %v5190_v15, %v944_v58  ;;  %v945_v29 = vmul.f32 %v4511_v61, %v5167_v56  ;;  %4532 = vpow2.f32 %v3435_v59  ;;  %v5287_v53 = vadd.f32 %v4224_v1, %v5120_v11  ;;  %v713_v8 = vpop.f32.mrb[25].mxu0  ;;  %4048 = vmatprep.subr.bf16.mxu0 %v4429_v47  ;;  %v1231_v19 = vld [vmem:[#allocation2 + $0x48] sm:$0xff] }
 0x197   : > { %v4515_v12 = vpop.eup %4514  ;;  %1061 = vst [vmem:[#allocation2 + $0x91] sm:$0xff] %v5276_v45  ;;  %v5291_v13 = vadd.f32 %v5190_v15, %v947_v62  ;;  %v858_v20 = vadd.f32 1.0, %v4513_v5  ;;  %4534 = vpow2.f32 %v3433_v60  ;;  %v5294_v21 = vadd.f32 %v5120_v11, %v713_v8  ;;  %v4225_v23 = vpop.f32.mrb[26].mxu0  ;;  %v4440_v5 = vld [vmem:[#allocation8 + $0x1e0] sm:$0xff]  }
 0x198   : > { %v4517_v56 = vpop.eup %4516  ;;  %1059 = vst [vmem:[#allocation2 + $0x79] sm:$0xff] %v5283_v27  ;;  %v5298_v24 = vadd.f32 %v5190_v15, %v945_v29  ;;  %v856_v25 = vadd.f32 1.0, %v4515_v12  ;;  %v1232_v30 = vld [vmem:[#allocation2 + $0x50] sm:$0xff]  ;;  %v716_v31 = vpop.f32.mrb[27].mxu0  ;;  %v3438_v14 = vmul.f32 -1.442695, %v5287_v53  ;;  %v5307_v41 = vadd.f32 %v4225_v23, %v5120_v11 }
 0x199   : > { %v4519_v33 = vpop.eup %4518  ;;  %1062 = vst [vmem:[#allocation2 + $0x99] sm:$0xff] %v5291_v13  ;;  %4536 = vrcp.f32 %v858_v20  ;;  %v859_v34 = vadd.f32 1.0, %v4517_v56  ;;  %v3436_v36 = vmul.f32 -1.442695, %v5294_v21  ;;  %4049 = vmatpush3.bf16.msra.mxu0 %v4431_v3  ;;  %v5310_v22 = vadd.f32 %v5120_v11, %v716_v31  ;;  %v1184_v12 = vld [vmem:[#allocation2 + $0x3a] sm:$0xff] }
 0x19a   : > { %v4521_v16 = vpop.eup %4520  ;;  %1060 = vst [vmem:[#allocation2 + $0x81] sm:$0xff] %v5298_v24  ;;  %4538 = vrcp.f32 %v856_v25  ;;  %v857_v38 = vadd.f32 1.0, %v4519_v33  ;;  %4050 = vmatprep.subr.bf16.mxu0 %v4433_v9  ;;  %v5314_v51 = vpack.c.bf16 %v1232_v30, %v1231_v19  ;;  %v1168_v55 = vpack.c.bf16 %v5298_v24, %v5283_v27  ;;  %v1183_v9 = vld [vmem:[#allocation2 + $0x32] sm:$0xff]  ;;  %v1234_v30 = vld [vmem:[#allocation2 + $0x68] sm:$0xff]  ;;  %v1233_v19 = vld [vmem:[#allocation2 + $0x60] sm:$0xff] }
 0x19b   : > { %v4523_v47 = vpop.eup %4522  ;;  %v950_v48 = vmul.f32 %v4521_v16, %v5181_v2  ;;  %4540 = vrcp.f32 %v859_v34  ;;  %2148 = vmatmul.mubr.bf16.gmra.mrb[8].mxu1 %v5268_v52  ;;  %v3439_v2 = vmul.f32 -1.442695, %v5307_v41  ;;  %v3437_v60 = vmul.f32 -1.442695, %v5310_v22  ;;  %v1187_v24 = vld [vmem:[#allocation2 + $0x62] sm:$0xff] }
 0x19c   : > { %v4525_v58 = vpop.eup %4524  ;;  %v948_v59 = vmul.f32 %v4523_v47, %v5184_v6  ;;  %4542 = vrcp.f32 %v857_v38  ;;  %2301 = vmatmul.mubr.bf16.gmra.mrb[36].mxu0 %v5300_v28  ;;  %2155 = vmatprep.mubr.bf16.mxu1 %v1166_v54  ;;  %v1169_v54 = vpack.c.bf16 %v5291_v13, %v5276_v45  ;;  %v5353_v38 = vpack.c.bf16 %v1184_v12, %v1183_v9  ;;  %v4442_v47 = vld [vmem:[#allocation8 + $0x1e8] sm:$0xff]  }
 0x19d   : > { %v4527_v61 = vpop.eup %4526  ;;  %v5326_v62 = vadd.f32 %v5190_v15, %v950_v48  ;;  %v951_v63 = vmul.f32 %v4525_v58, %v5188_v10  ;;  %2308 = vmatprep.mubr.bf16.mxu0 %v5314_v51  ;;  %4544 = vpow2.f32 %v3438_v14  ;;  %v4228_v6 = vpop.f32.mrb[28].mxu0  ;;  %4051 = vmatpush3.bf16.msra.mxu0 %v4435_v37  ;;  %v4441_v37 = vld [vmem:[#allocation8 + $0x1a0] sm:$0xff]   ;;  %v5357_v58 = vpack.c.bf16 %v1234_v30, %v1233_v19  ;;  %v4447_v19 = vld [vmem:[#allocation8 + $0x1f8] sm:$0xff]  }
 0x19e   : > { %v4529_v1 = vpop.eup %4528  ;;  %v5331_v7 = vadd.f32 %v5190_v15, %v948_v59  ;;  %v949_v35 = vmul.f32 %v4527_v61, %v5194_v18  ;;  %4546 = vpow2.f32 %v3436_v36  ;;  %v729_v3 = vpop.f32.mrb[29].mxu0  ;;  %4052 = vmatprep.subr.bf16.mxu0 %v4437_v42  ;;  %v5341_v20 = vadd.f32 %v4228_v6, %v5120_v11  ;;  %v1186_v9 = vld [vmem:[#allocation2 + $0x52] sm:$0xff] }
 0x19f   : > { %v4531_v10 = vpop.eup %4530  ;;  %1065 = vst [vmem:[#allocation2 + $0xc1] sm:$0xff] %v5326_v62  ;;  %v5338_v29 = vadd.f32 %v5190_v15, %v951_v63  ;;  %v862_v8 = vadd.f32 1.0, %v4529_v1  ;;  %4548 = vpow2.f32 %v3439_v2  ;;  %v4229_v18 = vpop.f32.mrb[30].mxu0  ;;  %v5348_v31 = vadd.f32 %v5120_v11, %v729_v3  ;;  %v4443_v1 = vld [vmem:[#allocation8 + $0x1a8] sm:$0xff]  }
 0x1a0   : > { %v4533_v23 = vpop.eup %4532  ;;  %1063 = vst [vmem:[#allocation2 + $0xa9] sm:$0xff] %v5331_v7  ;;  %v5345_v56 = vadd.f32 %v5190_v15, %v949_v35  ;;  %v860_v25 = vadd.f32 1.0, %v4531_v10  ;;  %4550 = vpow2.f32 %v3437_v60  ;;  %v732_v33 = vpop.f32.mrb[31].mxu0  ;;  %v3442_v36 = vmul.f32 -1.442695, %v5341_v20 }
 0x1a1   : > { %v4535_v34 = vpop.eup %4534  ;;  %1066 = vst [vmem:[#allocation2 + $0xc9] sm:$0xff] %v5338_v29  ;;  %4552 = vrcp.f32 %v862_v8  ;;  %v863_v14 = vadd.f32 1.0, %v4533_v23  ;;  %4053 = vmatpush3.bf16.msra.mxu0 %v4439_v0  ;;  %v3440_v42 = vmul.f32 -1.442695, %v5348_v31  ;;  %v5360_v59 = vadd.f32 %v4229_v18, %v5120_v11  ;;  %v1185_v8 = vld [vmem:[#allocation2 + $0x4a] sm:$0xff]  ;;  %v1236_v12 = vld [vmem:[#allocation2 + $0x80] sm:$0xff] }
 0x1a2   : > { %1064 = vst [vmem:[#allocation2 + $0xb1] sm:$0xff] %v5345_v56  ;;  %4554 = vrcp.f32 %v860_v25  ;;  %v861_v16 = vadd.f32 1.0, %v4535_v34  ;;  %4054 = vmatprep.subr.bf16.mxu0 %v4440_v5  ;;  %v5363_v2 = vadd.f32 %v5120_v11, %v732_v33  ;;  %v1170_v63 = vpack.c.bf16 %v5345_v56, %v5331_v7  ;;  %v4446_v34 = vld [vmem:[#allocation8 + $0x1b0] sm:$0xff]  }
 0x1a3   : > { %v4537_v48 = vpop.eup %4536  ;;  %4556 = vrcp.f32 %v863_v14  ;;  %2156 = vmatmul.mubr.bf16.gmra.mrb[12].mxu1 %v5314_v51  ;;  %v3443_v11 = vmul.f32 -1.442695, %v5360_v59  ;;  %v1171_v17 = vpack.c.bf16 %v5338_v29, %v5326_v62 }
 0x1a4   : > { %v4539_v60 = vpop.eup %4538  ;;  %v954_v61 = vmul.f32 %v4537_v48, %v5211_v39  ;;  %4558 = vrcp.f32 %v861_v16  ;;  %2309 = vmatmul.mubr.bf16.gmra.mrb[40].mxu0 %v5353_v38  ;;  %2163 = vmatprep.mubr.bf16.mxu1 %v1167_v49  ;;  %v3441_v39 = vmul.f32 -1.442695, %v5363_v2 }
 0x1a5   : > { %v4541_v6 = vpop.eup %4540  ;;  %v952_v0 = vmul.f32 %v4539_v60, %v5217_v43  ;;  %2316 = vmatprep.mubr.bf16.mxu0 %v5357_v58  ;;  %4560 = vpow2.f32 %v3442_v36  ;;  %4055 = vmatpush3.bf16.msra.mxu0 %v4441_v37  ;;  %v4445_v43 = vld [vmem:[#allocation8 + $0x1f0] sm:$0xff]   ;;  %v5395_v37 = vpack.c.bf16 %v1186_v9, %v1185_v8 }
 0x1a6   : > { %v4543_v35 = vpop.eup %4542  ;;  %v5377_v3 = vadd.f32 %v5190_v15, %v954_v61  ;;  %v955_v4 = vmul.f32 %v4541_v6, %v5222_v50  ;;  %4562 = vpow2.f32 %v3440_v42  ;;  %4056 = vmatprep.subr.bf16.mxu0 %v4442_v47 }
 0x1a7   : > { %v4545_v49 = vpop.eup %4544  ;;  %v5383_v5 = vadd.f32 %v5190_v15, %v952_v0  ;;  %v953_v10 = vmul.f32 %v4543_v35, %v5227_v57  ;;  %4564 = vpow2.f32 %v3443_v11  ;;  %v1235_v57 = vld [vmem:[#allocation2 + $0x78] sm:$0xff] }
 0x1a8   : > { %v4547_v18 = vpop.eup %4546  ;;  %1069 = vst [vmem:[#allocation2 + $0xf1] sm:$0xff] %v5377_v3  ;;  %v5388_v50 = vadd.f32 %v5190_v15, %v955_v4  ;;  %v866_v23 = vadd.f32 1.0, %v4545_v49  ;;  %4566 = vpow2.f32 %v3441_v39  ;;  %v5397_v16 = vpack.c.bf16 %v1236_v12, %v1235_v57  ;;  %v4448_v39 = vld [vmem:[#allocation8 + $0x1b8] sm:$0xff]  }
 0x1a9   : > { %v4549_v25 = vpop.eup %4548  ;;  %1067 = vst [vmem:[#allocation2 + $0xd9] sm:$0xff] %v5383_v5  ;;  %v5392_v30 = vadd.f32 %v5190_v15, %v953_v10  ;;  %v864_v33 = vadd.f32 1.0, %v4547_v18  ;;  %4057 = vmatpush3.bf16.msra.mxu0 %v4443_v1  ;;  %v1238_v10 = vld [vmem:[#allocation2 + $0x98] sm:$0xff]  ;;  %v1195_v62 = vld [vmem:[#allocation2 + $0xc2] sm:$0xff]  ;;  %v1196_v29 = vld [vmem:[#allocation2 + $0xca] sm:$0xff] }
 0x1aa   : > { %v4551_v14 = vpop.eup %4550  ;;  %1070 = vst [vmem:[#allocation2 + $0xf9] sm:$0xff] %v5388_v50  ;;  %4568 = vrcp.f32 %v866_v23  ;;  %v867_v36 = vadd.f32 1.0, %v4549_v25  ;;  %4058 = vmatprep.subr.bf16.mxu0 %v4445_v43  ;;  %v1173_v60 = vpack.c.bf16 %v5388_v50, %v5377_v3  ;;  %v1237_v23 = vld [vmem:[#allocation2 + $0x90] sm:$0xff]  ;;  %v3726_v3 = vpop.f32.mrb[0].mxu1 }
 0x1ab   : > { %v4553_v42 = vpop.eup %4552  ;;  %1068 = vst [vmem:[#allocation2 + $0xe1] sm:$0xff] %v5392_v30  ;;  %4570 = vrcp.f32 %v864_v33  ;;  %v865_v47 = vadd.f32 1.0, %v4551_v14  ;;  %2164 = vmatmul.mubr.bf16.gmra.mrb[16].mxu1 %v5357_v58  ;;  %v1172_v48 = vpack.c.bf16 %v5392_v30, %v5383_v5  ;;  %v5433_v33 = vpack.c.bf16 %v1238_v10, %v1237_v23  ;;  %v1191_v23 = vld [vmem:[#allocation2 + $0x92] sm:$0xff]  ;;  %v3727_v50 = vpop.f32.mrb[1].mxu1 }
 0x1ac   : > { %v4555_v61 = vpop.eup %4554  ;;  %v958_v6 = vmul.f32 %v4553_v42, %v5248_v32  ;;  %4572 = vrcp.f32 %v867_v36  ;;  %2317 = vmatmul.mubr.bf16.gmra.mrb[44].mxu0 %v5395_v37  ;;  %2171 = vmatprep.mubr.bf16.mxu1 %v1168_v55 }
 0x1ad   : > { %v4557_v0 = vpop.eup %4556  ;;  %v956_v11 = vmul.f32 %v4555_v61, %v5255_v26  ;;  %4574 = vrcp.f32 %v865_v47  ;;  %2324 = vmatprep.mubr.bf16.mxu0 %v5397_v16  ;;  %4059 = vmatpush3.bf16.msra.mxu0 %v4446_v34  ;;  %v1188_v26 = vld [vmem:[#allocation2 + $0x6a] sm:$0xff] }
 0x1ae   : > { %v4559_v1 = vpop.eup %4558  ;;  %v5413_v35 = vadd.f32 %v5190_v15, %v958_v6  ;;  %v959_v32 = vmul.f32 %v4557_v0, %v5262_v44  ;;  %4060 = vmatprep.subr.bf16.mxu0 %v4447_v19  ;;  %v1190_v0 = vld [vmem:[#allocation2 + $0x82] sm:$0xff] }
 0x1af   : > { %v4561_v4 = vpop.eup %4560  ;;  %v5417_v43 = vadd.f32 %v5190_v15, %v956_v11  ;;  %v957_v27 = vmul.f32 %v4559_v1, %v5265_v46  ;;  %v5429_v46 = vpack.c.bf16 %v1188_v26, %v1187_v24 }
 0x1b0   : > { %v4563_v55 = vpop.eup %4562  ;;  %1073 = vst [vmem:[#allocation2 + $0x121] sm:$0xff] %v5413_v35  ;;  %v5422_v49 = vadd.f32 %v5190_v15, %v959_v32  ;;  %v870_v8 = vadd.f32 1.0, %v4561_v4 }
 0x1b1   : > { %v4565_v9 = vpop.eup %4564  ;;  %1071 = vst [vmem:[#allocation2 + $0x109] sm:$0xff] %v5417_v43  ;;  %v5426_v44 = vadd.f32 %v5190_v15, %v957_v27  ;;  %v868_v12 = vadd.f32 1.0, %v4563_v55  ;;  %4061 = vmatpush3.bf16.msra.mxu0 %v4448_v39 }
 0x1b2   : > { %v4567_v18 = vpop.eup %4566  ;;  %1074 = vst [vmem:[#allocation2 + $0x129] sm:$0xff] %v5422_v49  ;;  %4576 = vrcp.f32 %v870_v8  ;;  %v871_v25 = vadd.f32 1.0, %v4565_v9  ;;  %v1175_v36 = vpack.c.bf16 %v5422_v49, %v5413_v35  ;;  %v1197_v5 = vld [vmem:[#allocation2 + $0xda] sm:$0xff]  ;;  %v1198_v30 = vld [vmem:[#allocation2 + $0xe2] sm:$0xff] }
 0x1b3   : > { %1072 = vst [vmem:[#allocation2 + $0x111] sm:$0xff] %v5426_v44  ;;  %2172 = vmatmul.mubr.bf16.gmra.mrb[20].mxu1 %v5397_v16  ;;  %4578 = vrcp.f32 %v868_v12  ;;  %v869_v57 = vadd.f32 1.0, %v4567_v18  ;;  %v1174_v14 = vpack.c.bf16 %v5426_v44, %v5417_v43 }
 0x1b4   : > { %v4569_v34 = vpop.eup %4568  ;;  %2325 = vmatmul.mubr.bf16.gmra.mrb[48].mxu0 %v5429_v46  ;;  %2179 = vmatprep.mubr.bf16.mxu1 %v1169_v54  ;;  %4580 = vrcp.f32 %v871_v25  ;;  %v1189_v54 = vld [vmem:[#allocation2 + $0x7a] sm:$0xff] }
 0x1b5   : > { %v4571_v19 = vpop.eup %4570  ;;  %v962_v42 = vmul.f32 %v4569_v34, %v5287_v53  ;;  %2332 = vmatprep.mubr.bf16.mxu0 %v5433_v33  ;;  %4582 = vrcp.f32 %v869_v57  ;;  %v1240_v53 = vld [vmem:[#allocation2 + $0xb0] sm:$0xff]  ;;  %v5462_v32 = vpack.c.bf16 %v1190_v0, %v1189_v54  ;;  %v1192_v25 = vld [vmem:[#allocation2 + $0x9a] sm:$0xff]  ;;  %v5514_v54 = vpack.c.bf16 %v1196_v29, %v1195_v62 }
 0x1b6   : > { %v4573_v47 = vpop.eup %4572  ;;  %v960_v61 = vmul.f32 %v4571_v19, %v5294_v21  ;;  %v5491_v57 = vpack.c.bf16 %v1192_v25, %v1191_v23  ;;  %v1241_v34 = vld [vmem:[#allocation2 + $0xc0] sm:$0xff]  ;;  %v1194_v19 = vld [vmem:[#allocation2 + $0xb2] sm:$0xff] }
 0x1b7   : > { %v4575_v6 = vpop.eup %4574  ;;  %v5447_v45 = vadd.f32 %v5190_v15, %v962_v42  ;;  %v963_v13 = vmul.f32 %v4573_v47, %v5307_v41  ;;  %v1239_v41 = vld [vmem:[#allocation2 + $0xa8] sm:$0xff]  ;;  %v1243_v42 = vld [vmem:[#allocation2 + $0xd8] sm:$0xff]  ;;  %v1244_v47 = vld [vmem:[#allocation2 + $0xe0] sm:$0xff] }
 0x1b8   : > { %v5451_v11 = vadd.f32 %v5190_v15, %v960_v61  ;;  %v961_v39 = vmul.f32 %v4575_v6, %v5310_v22  ;;  %v5466_v4 = vpack.c.bf16 %v1240_v53, %v1239_v41  ;;  %v5507_v6 = vpack.c.bf16 %v1244_v47, %v1243_v42 }
 0x1b9   : > { %1077 = vst [vmem:[#allocation2 + $0x151] sm:$0xff] %v5447_v45  ;;  %v5456_v1 = vadd.f32 %v5190_v15, %v963_v13  ;;  %v1246_v13 = vld [vmem:[#allocation2 + $0xf8] sm:$0xff]  ;;  %v5524_v53 = vpack.c.bf16 %v1198_v30, %v1197_v5  ;;  %v1203_v35 = vld [vmem:[#allocation2 + $0x122] sm:$0xff]  ;;  %v1204_v49 = vld [vmem:[#allocation2 + $0x12a] sm:$0xff] }
 0x1ba   : > { %1075 = vst [vmem:[#allocation2 + $0x139] sm:$0xff] %v5451_v11  ;;  %v5460_v21 = vadd.f32 %v5190_v15, %v961_v39  ;;  %v1248_v39 = vld [vmem:[#allocation2 + $0x110] sm:$0xff]  ;;  %v1421_v5 = vld [vmem:[#allocation2 + $0x39] sm:$0xff] }
 0x1bb   : > { %1078 = vst [vmem:[#allocation2 + $0x159] sm:$0xff] %v5456_v1  ;;  %2180 = vmatmul.mubr.bf16.gmra.mrb[24].mxu1 %v5433_v33  ;;  %v1177_v22 = vpack.c.bf16 %v5456_v1, %v5447_v45  ;;  %v1201_v44 = vld [vmem:[#allocation2 + $0x10a] sm:$0xff] }
 0x1bc   : > { %v4577_v27 = vpop.eup %4576  ;;  %1076 = vst [vmem:[#allocation2 + $0x141] sm:$0xff] %v5460_v21  ;;  %2333 = vmatmul.mubr.bf16.gmra.mrb[52].mxu0 %v5462_v32  ;;  %2187 = vmatprep.mubr.bf16.mxu1 %v1170_v63  ;;  %v1176_v24 = vpack.c.bf16 %v5460_v21, %v5451_v11  ;;  %v1242_v63 = vld [vmem:[#allocation2 + $0xc8] sm:$0xff] }
 0x1bd   : > { %v4579_v26 = vpop.eup %4578  ;;  %v966_v55 = vmul.f32 %v4577_v27, %v5341_v20  ;;  %2340 = vmatprep.mubr.bf16.mxu0 %v5466_v4  ;;  %v3729_v27 = vpop.f32.mrb[2].mxu1 }
 0x1be   : > { %v4581_v10 = vpop.eup %4580  ;;  %v964_v8 = vmul.f32 %v4579_v26, %v5348_v31  ;;  %v1199_v26 = vld [vmem:[#allocation2 + $0xf2] sm:$0xff] }
 0x1bf   : > { %v4583_v9 = vpop.eup %4582  ;;  %v1005_v12 = vadd.f32 %v5190_v15, %v966_v55  ;;  %v967_v18 = vmul.f32 %v4581_v10, %v5360_v59  ;;  %v5494_v59 = vpack.c.bf16 %v1242_v63, %v1241_v34  ;;  %v1200_v55 = vld [vmem:[#allocation2 + $0xfa] sm:$0xff]  ;;  %v3730_v10 = vpop.f32.mrb[3].mxu1  ;;  %v5558_v34 = vpack.c.bf16 %v1204_v49, %v1203_v35  ;;  %v1431_v49 = vld [vmem:[#allocation2 + $0xb1] sm:$0xff] }
 0x1c0   : > { %v5483_v7 = vadd.f32 %v5190_v15, %v964_v8  ;;  %v965_v56 = vmul.f32 %v4583_v9, %v5363_v2  ;;  %v1193_v2 = vld [vmem:[#allocation2 + $0xaa] sm:$0xff]  ;;  %v1249_v8 = vld [vmem:[#allocation2 + $0x120] sm:$0xff] }
 0x1c1   : > { %1081 = vst [vmem:[#allocation2 + $0x181] sm:$0xff] %v1005_v12  ;;  %v1006_v20 = vadd.f32 %v5190_v15, %v967_v18  ;;  %v5504_v61 = vpack.c.bf16 %v1194_v19, %v1193_v2  ;;  %v1250_v9 = vld [vmem:[#allocation2 + $0x128] sm:$0xff]  ;;  %v5536_v12 = vadd.f32 %v3730_v10, %v3729_v27  ;;  %v5538_v18 = vpack.c.bf16 %v1200_v55, %v1199_v26  ;;  %v1251_v23 = vld [vmem:[#allocation2 + $0x138] sm:$0xff] }
 0x1c2   : > { %1079 = vst [vmem:[#allocation2 + $0x169] sm:$0xff] %v5483_v7  ;;  %v5489_v31 = vadd.f32 %v5190_v15, %v965_v56  ;;  %v5541_v43 = vpack.c.bf16 %v1250_v9, %v1249_v8  ;;  %v1207_v45 = vld [vmem:[#allocation2 + $0x152] sm:$0xff]  ;;  %v1208_v1 = vld [vmem:[#allocation2 + $0x15a] sm:$0xff]  ;;  %v1422_v26 = vld [vmem:[#allocation2 + $0x49] sm:$0xff] }
 0x1c3   : > { %1082 = vst [vmem:[#allocation2 + $0x189] sm:$0xff] %v1006_v20  ;;  %2188 = vmatmul.mubr.bf16.gmra.mrb[28].mxu1 %v5466_v4  ;;  %v1252_v25 = vld [vmem:[#allocation2 + $0x140] sm:$0xff]  ;;  %v1254_v20 = vld [vmem:[#allocation2 + $0x158] sm:$0xff]  ;;  %v5578_v29 = vpack.c.bf16 %v1208_v1, %v1207_v45  ;;  %v4451_v55 = vld [vmem:[#allocation8 + $0x218] sm:$0xff]  }
 0x1c4   : > { %1080 = vst [vmem:[#allocation2 + $0x171] sm:$0xff] %v5489_v31  ;;  %2341 = vmatmul.mubr.bf16.gmra.mrb[56].mxu0 %v5491_v57  ;;  %2195 = vmatprep.mubr.bf16.mxu1 %v1171_v17  ;;  %v1178_v15 = vpack.c.bf16 %v5489_v31, %v5483_v7  ;;  %v1245_v17 = vld [vmem:[#allocation2 + $0xf0] sm:$0xff]  ;;  %v5551_v63 = vpack.c.bf16 %v1252_v25, %v1251_v23  ;;  %v1205_v11 = vld [vmem:[#allocation2 + $0x13a] sm:$0xff]  ;;  %v1206_v21 = vld [vmem:[#allocation2 + $0x142] sm:$0xff] }
 0x1c5   : > { %2348 = vmatprep.mubr.bf16.mxu0 %v5494_v59  ;;  %v5517_v0 = vpack.c.bf16 %v1246_v13, %v1245_v17  ;;  %v5568_v42 = vpack.c.bf16 %v1206_v21, %v1205_v11  ;;  %v1276_v7 = vld [vmem:[#allocation2 + $0x21] sm:$0xff]  ;;  %v1275_v13 = vld [vmem:[#allocation2 + $0x19] sm:$0xff]  ;;  %v1423_v27 = vld [vmem:[#allocation2 + $0x51] sm:$0xff] }
 0x1c6   : > { %v1307_v30 = vpack.c.bf16 %v1276_v7, %v1275_v13  ;;  %v1453_v10 = vpack.c.bf16 %v1423_v27, %v1422_v26  ;;  %v1425_v8 = vld [vmem:[#allocation2 + $0x69] sm:$0xff]  ;;  %v4453_v9 = vld [vmem:[#allocation8 + $0x228] sm:$0xff]  }
 0x1c7   : > { %v4455_v23 = vld [vmem:[#allocation8 + $0x238] sm:$0xff]  }
 0x1ca   : > { %v1258_v62 = vld [vmem:[#allocation2 + $0x188] sm:$0xff] }
 0x1cb   : > { %2196 = vmatmul.mubr.bf16.gmra.mrb[32].mxu1 %v5494_v59  ;;  %v1256_v19 = vld [vmem:[#allocation2 + $0x170] sm:$0xff] }
 0x1cc   : > { %2349 = vmatmul.mubr.bf16.gmra.mrb[60].mxu0 %v5504_v61  ;;  %2203 = vmatprep.mubr.bf16.mxu1 %v1172_v48  ;;  %v1247_v48 = vld [vmem:[#allocation2 + $0x108] sm:$0xff] }
 0x1cd   : > { %2356 = vmatprep.mubr.bf16.mxu0 %v5507_v6  ;;  %v5527_v41 = vpack.c.bf16 %v1248_v39, %v1247_v48  ;;  %v1209_v31 = vld [vmem:[#allocation2 + $0x16a] sm:$0xff] }
 0x1ce   : > { %v1420_v39 = vld [vmem:[#allocation2 + $0x31] sm:$0xff] }
 0x1d3   : > { %2204 = vmatmul.mubr.bf16.gmra.mrb[36].mxu1 %v5507_v6 }
 0x1d4   : > { %2357 = vmatmul.mubr.bf16.gmra.mrb[64].mxu0 %v5514_v54  ;;  %2211 = vmatprep.mubr.bf16.mxu1 %v1173_v60  ;;  %v5534_v60 = vadd.f32 %v3727_v50, %v3726_v3  ;;  %v4449_v3 = vld [vmem:[#allocation8 + $0x208] sm:$0xff]   ;;  %v1452_v50 = vpack.c.bf16 %v1421_v5, %v1420_v39 }
 0x1d5   : > { %2364 = vmatprep.mubr.bf16.mxu0 %v5517_v0 }
 0x1db   : > { %2212 = vmatmul.mubr.bf16.gmra.mrb[40].mxu1 %v5517_v0 }
 0x1dc   : > { %2365 = vmatmul.mubr.bf16.gmra.mrb[68].mxu0 %v5524_v53  ;;  %2219 = vmatprep.mubr.bf16.mxu1 %v1174_v14  ;;  %v1202_v14 = vld [vmem:[#allocation2 + $0x112] sm:$0xff] }
 0x1dd   : > { %2372 = vmatprep.mubr.bf16.mxu0 %v5527_v41  ;;  %v5548_v56 = vpack.c.bf16 %v1202_v14, %v1201_v44  ;;  %v1426_v14 = vld [vmem:[#allocation2 + $0x79] sm:$0xff] }
 0x1e3   : > { %2220 = vmatmul.mubr.bf16.gmra.mrb[44].mxu1 %v5527_v41 }
 0x1e4   : > { %2373 = vmatmul.mubr.bf16.gmra.mrb[72].mxu0 %v5538_v18  ;;  %2227 = vmatprep.mubr.bf16.mxu1 %v1175_v36  ;;  %v1253_v36 = vld [vmem:[#allocation2 + $0x150] sm:$0xff] }
 0x1e5   : > { %2380 = vmatprep.mubr.bf16.mxu0 %v5541_v43  ;;  %v5561_v2 = vpack.c.bf16 %v1254_v20, %v1253_v36  ;;  %v1430_v36 = vld [vmem:[#allocation2 + $0xa9] sm:$0xff] }
 0x1e6   : > { %v1457_v20 = vpack.c.bf16 %v1431_v49, %v1430_v36 }
 0x1eb   : > { %2228 = vmatmul.mubr.bf16.gmra.mrb[48].mxu1 %v5541_v43 }
 0x1ec   : > { %2381 = vmatmul.mubr.bf16.gmra.mrb[76].mxu0 %v5548_v56  ;;  %2235 = vmatprep.mubr.bf16.mxu1 %v1176_v24  ;;  %v1255_v24 = vld [vmem:[#allocation2 + $0x168] sm:$0xff] }
 0x1ed   : > { %2388 = vmatprep.mubr.bf16.mxu0 %v5551_v63  ;;  %v5571_v47 = vpack.c.bf16 %v1256_v19, %v1255_v24 }
 0x1f3   : > { %2236 = vmatmul.mubr.bf16.gmra.mrb[52].mxu1 %v5551_v63 }
 0x1f4   : > { %2389 = vmatmul.mubr.bf16.gmra.mrb[80].mxu0 %v5558_v34  ;;  %2243 = vmatprep.mubr.bf16.mxu1 %v1177_v22  ;;  %v1257_v22 = vld [vmem:[#allocation2 + $0x180] sm:$0xff] }
 0x1f5   : > { %2396 = vmatprep.mubr.bf16.mxu0 %v5561_v2  ;;  %v5581_v17 = vpack.c.bf16 %v1258_v62, %v1257_v22 }
 0x1fb   : > { %2244 = vmatmul.mubr.bf16.gmra.mrb[56].mxu1 %v5561_v2 }
 0x1fc   : > { %2397 = vmatmul.mubr.bf16.gmra.mrb[84].mxu0 %v5568_v42  ;;  %2251 = vmatprep.mubr.bf16.mxu1 %v1178_v15  ;;  %v1210_v15 = vld [vmem:[#allocation2 + $0x172] sm:$0xff] }
 0x1fd   : > { %2404 = vmatprep.mubr.bf16.mxu0 %v5571_v47  ;;  %v5586_v48 = vpack.c.bf16 %v1210_v15, %v1209_v31  ;;  %v1444_v31 = vld [vmem:[#allocation2 + $0x151] sm:$0xff]  ;;  %v1445_v15 = vld [vmem:[#allocation2 + $0x159] sm:$0xff] }
 0x1fe   : > { %v1464_v27 = vpack.c.bf16 %v1445_v15, %v1444_v31 }
 0x203   : > { %2252 = vmatmul.mubr.bf16.gmra.mrb[60].mxu1 %v5571_v47 }
 0x204   : > { %2405 = vmatmul.mubr.bf16.gmra.mrb[88].mxu0 %v5578_v29  ;;  %2453 = vmatprep.mubr.bf16.mxu1 %v5300_v28  ;;  %v4450_v28 = vld [vmem:[#allocation8 + $0x210] sm:$0xff]  }
 0x205   : > { %2412 = vmatprep.mubr.bf16.mxu0 %v5581_v17 }
 0x20b   : > { %2454 = vmatmul.mubr.bf16.vlgmr.msra.gmra.mrb[64].mxu1 %v1307_v30 }
 0x20c   : > { %2413 = vmatmul.mubr.bf16.gmra.mrb[92].mxu0 %v5586_v48  ;;  %4231 = vmatpush3.bf16.msra.mxu1 %v5213_v40  ;;  %v4452_v40 = vld [vmem:[#allocation8 + $0x220] sm:$0xff]  }
 0x20d   : > { %2461 = vmatprep.mubr.bf16.mxu1 %v5353_v38  ;;  %2614 = vmatprep.mubr.bf16.mxu0 %v1452_v50  ;;  %v1424_v38 = vld [vmem:[#allocation2 + $0x61] sm:$0xff] }
 0x20e   : > { %4232 = vmatprep.subr.bf16.mxu1 %v4449_v3  ;;  %v1454_v44 = vpack.c.bf16 %v1425_v8, %v1424_v38 }
 0x210   : > { %4233 = vmatpush3.bf16.msra.mxu1 %v4449_v3 }
 0x211   : > { %4234 = vmatprep.subr.bf16.mxu1 %v4450_v28 }
 0x213   : > { %2462 = vmatmul.mubr.bf16.gmra.mrb[68].mxu1 %v1452_v50 }
 0x214   : > { %2615 = vmatmul.mubr.bf16.vlgmr.msra.gmra.mrb[96].mxu0 %v5268_v52  ;;  %2469 = vmatprep.mubr.bf16.mxu1 %v5395_v37  ;;  %v4454_v52 = vld [vmem:[#allocation8 + $0x230] sm:$0xff]  }
 0x215   : > { %2622 = vmatprep.mubr.bf16.mxu0 %v1453_v10  ;;  %4235 = vmatpush3.bf16.msra.mxu1 %v4450_v28  ;;  %v1427_v37 = vld [vmem:[#allocation2 + $0x81] sm:$0xff] }
 0x216   : > { %4236 = vmatprep.subr.bf16.mxu1 %v4451_v55  ;;  %v1455_v25 = vpack.c.bf16 %v1427_v37, %v1426_v14 }
 0x219   : > { %4237 = vmatpush3.bf16.msra.mxu1 %v4451_v55 }
 0x21a   : > { %4238 = vmatprep.subr.bf16.mxu1 %v4452_v40 }
 0x21b   : > { %2470 = vmatmul.mubr.bf16.gmra.mrb[72].mxu1 %v1453_v10 }
 0x21c   : > { %2623 = vmatmul.mubr.bf16.gmra.mrb[100].mxu0 %v5314_v51  ;;  %2477 = vmatprep.mubr.bf16.mxu1 %v5429_v46  ;;  %v1429_v51 = vld [vmem:[#allocation2 + $0x99] sm:$0xff]  ;;  %v1428_v46 = vld [vmem:[#allocation2 + $0x91] sm:$0xff] }
 0x21d   : > { %2630 = vmatprep.mubr.bf16.mxu0 %v1454_v44  ;;  %4239 = vmatpush3.bf16.msra.mxu1 %v4452_v40  ;;  %v1456_v35 = vpack.c.bf16 %v1429_v51, %v1428_v46 }
 0x21e   : > { %4240 = vmatprep.subr.bf16.mxu1 %v4453_v9 }
 0x221   : > { %4241 = vmatpush3.bf16.msra.mxu1 %v4453_v9  ;;  %v1446_v9 = vld [vmem:[#allocation2 + $0x169] sm:$0xff] }
 0x222   : > { %4242 = vmatprep.subr.bf16.mxu1 %v4454_v52 }
 0x223   : > { %2478 = vmatmul.mubr.bf16.gmra.mrb[76].mxu1 %v1454_v44 }
 0x224   : > { %2631 = vmatmul.mubr.bf16.gmra.mrb[104].mxu0 %v5357_v58  ;;  %2485 = vmatprep.mubr.bf16.mxu1 %v5462_v32  ;;  %v1433_v58 = vld [vmem:[#allocation2 + $0xc9] sm:$0xff]  ;;  %v1432_v32 = vld [vmem:[#allocation2 + $0xc1] sm:$0xff] }
 0x225   : > { %2638 = vmatprep.mubr.bf16.mxu0 %v1455_v25  ;;  %4243 = vmatpush3.bf16.msra.mxu1 %v4454_v52  ;;  %v1458_v11 = vpack.c.bf16 %v1433_v58, %v1432_v32  ;;  %v1353_v58 = vld [vmem:[#allocation2 + $0x182] sm:$0xff]  ;;  %v1354_v32 = vld [vmem:[#allocation2 + $0x18a] sm:$0xff] }
 0x226   : > { %4244 = vmatprep.subr.bf16.mxu1 %v4455_v23 }
 0x229   : > { %4245 = vmatpush3.bf16.msra.mxu1 %v4455_v23 }
 0x22b   : > { %2486 = vmatmul.mubr.bf16.gmra.mrb[80].mxu1 %v1455_v25 }
 0x22c   : > { %2639 = vmatmul.mubr.bf16.gmra.mrb[108].mxu0 %v5397_v16  ;;  %2493 = vmatprep.mubr.bf16.mxu1 %v5491_v57  ;;  %v1434_v16 = vld [vmem:[#allocation2 + $0xd9] sm:$0xff]  ;;  %v1435_v57 = vld [vmem:[#allocation2 + $0xe1] sm:$0xff] }
 0x22d   : > { %2646 = vmatprep.mubr.bf16.mxu0 %v1456_v35  ;;  %v1459_v21 = vpack.c.bf16 %v1435_v57, %v1434_v16 }
 0x233   : > { %2494 = vmatmul.mubr.bf16.gmra.mrb[84].mxu1 %v1456_v35 }
 0x234   : > { %2647 = vmatmul.mubr.bf16.gmra.mrb[112].mxu0 %v5433_v33  ;;  %2501 = vmatprep.mubr.bf16.mxu1 %v5504_v61  ;;  %v1436_v33 = vld [vmem:[#allocation2 + $0xf1] sm:$0xff]  ;;  %v1437_v61 = vld [vmem:[#allocation2 + $0xf9] sm:$0xff] }
 0x235   : > { %2654 = vmatprep.mubr.bf16.mxu0 %v1457_v20  ;;  %v1460_v24 = vpack.c.bf16 %v1437_v61, %v1436_v33  ;;  %v1449_v33 = vld [vmem:[#allocation2 + $0x189] sm:$0xff] }
 0x23b   : > { %2502 = vmatmul.mubr.bf16.gmra.mrb[88].mxu1 %v1457_v20 }
 0x23c   : > { %2655 = vmatmul.mubr.bf16.gmra.mrb[116].mxu0 %v5466_v4  ;;  %2509 = vmatprep.mubr.bf16.mxu1 %v5514_v54  ;;  %v1438_v4 = vld [vmem:[#allocation2 + $0x109] sm:$0xff]  ;;  %v1439_v54 = vld [vmem:[#allocation2 + $0x111] sm:$0xff] }
 0x23d   : > { %2662 = vmatprep.mubr.bf16.mxu0 %v1458_v11  ;;  %v1461_v19 = vpack.c.bf16 %v1439_v54, %v1438_v4 }
 0x243   : > { %2510 = vmatmul.mubr.bf16.gmra.mrb[92].mxu1 %v1458_v11 }
 0x244   : > { %2663 = vmatmul.mubr.bf16.gmra.mrb[120].mxu0 %v5494_v59  ;;  %2517 = vmatprep.mubr.bf16.mxu1 %v5524_v53  ;;  %v1440_v59 = vld [vmem:[#allocation2 + $0x121] sm:$0xff]  ;;  %v1441_v53 = vld [vmem:[#allocation2 + $0x129] sm:$0xff] }
 0x245   : > { %2670 = vmatprep.mubr.bf16.mxu0 %v1459_v21  ;;  %v1462_v45 = vpack.c.bf16 %v1441_v53, %v1440_v59 }
 0x24b   : > { %2518 = vmatmul.mubr.bf16.gmra.mrb[96].mxu1 %v1459_v21  ;;  %v1448_v21 = vld [vmem:[#allocation2 + $0x181] sm:$0xff] }
 0x24c   : > { %2671 = vmatmul.mubr.bf16.gmra.mrb[124].mxu0 %v5507_v6  ;;  %2525 = vmatprep.mubr.bf16.mxu1 %v5538_v18  ;;  %v1442_v6 = vld [vmem:[#allocation2 + $0x139] sm:$0xff]  ;;  %v1443_v18 = vld [vmem:[#allocation2 + $0x141] sm:$0xff] }
 0x24d   : > { %2678 = vmatprep.mubr.bf16.mxu0 %v1460_v24  ;;  %v1463_v1 = vpack.c.bf16 %v1443_v18, %v1442_v6  ;;  %v1466_v6 = vpack.c.bf16 %v1449_v33, %v1448_v21 }
 0x253   : > { %2526 = vmatmul.mubr.bf16.gmra.mrb[100].mxu1 %v1460_v24 }
 0x254   : > { %2679 = vmatmul.mubr.bf16.gmra.mrb[128].mxu0 %v5517_v0  ;;  %2533 = vmatprep.mubr.bf16.mxu1 %v5548_v56  ;;  %v5616_v0 = vld [vmem:[%s6000_s5] ss:$0 sm:$0xff] }
 0x255   : > { %2686 = vmatprep.mubr.bf16.mxu0 %v1461_v19  ;;  %v2134_v13 = vadd.f32 %v5534_v60, %v5616_v0  ;;  %v2137_v3 = vadd.f32 %v5536_v12, %v5616_v0  ;;  %v1447_v12 = vld [vmem:[#allocation2 + $0x171] sm:$0xff] }
 0x256   : > { %v1465_v46 = vpack.c.bf16 %v1447_v12, %v1446_v9  ;;  %v1471_v9 = vld [vmem:[#allocation2 + $0x52] sm:$0xff] }
 0x25b   : > { %2534 = vmatmul.mubr.bf16.gmra.mrb[104].mxu1 %v1461_v19  ;;  %v5637_v19 = vpack.c.bf16 %v1354_v32, %v1353_v58 }
 0x25c   : > { %2687 = vmatmul.mubr.bf16.gmra.mrb[132].mxu0 %v5527_v41  ;;  %2541 = vmatprep.mubr.bf16.mxu1 %v5558_v34 }
 0x25d   : > { %2694 = vmatprep.mubr.bf16.mxu0 %v1462_v45 }
 0x263   : > { %2542 = vmatmul.mubr.bf16.gmra.mrb[108].mxu1 %v1462_v45 }
 0x264   : > { %2695 = vmatmul.mubr.bf16.gmra.mrb[136].mxu0 %v5541_v43  ;;  %2549 = vmatprep.mubr.bf16.mxu1 %v5568_v42 }
 0x265   : > { %2702 = vmatprep.mubr.bf16.mxu0 %v1463_v1 }
 0x266   : > { %v3732_v56 = vpop.f32.mrb[4].mxu1 }
 0x267   : > { %v3838_v22 = vpop.f32.mrb[32].mxu0  ;;  %v3733_v41 = vpop.f32.mrb[5].mxu1 }
 0x268   : > { %v3734_v62 = vadd.f32 %v3733_v41, %v3732_v56  ;;  %v3839_v34 = vpop.f32.mrb[33].mxu0  ;;  %v3735_v7 = vpop.f32.mrb[6].mxu1  ;;  %v1450_v56 = vld [vmem:[#allocation2 + $0x199] sm:$0xff] }
 0x269   : > { %v3840_v43 = vadd.f32 %v3839_v34, %v3838_v22  ;;  %v3841_v5 = vpop.f32.mrb[34].mxu0  ;;  %v3736_v42 = vpop.f32.mrb[7].mxu1  ;;  %v1451_v22 = vld [vmem:[#allocation2 + $0x1a1] sm:$0xff]  ;;  %v1468_v34 = vld [vmem:[#allocation2 + $0x32] sm:$0xff] }
 0x26a   : > { %v3737_v30 = vadd.f32 %v3736_v42, %v3735_v7  ;;  %v3842_v39 = vpop.f32.mrb[35].mxu0  ;;  %v2142_v44 = vadd.f32 %v3734_v62, %v5616_v0  ;;  %v1469_v7 = vld [vmem:[#allocation2 + $0x3a] sm:$0xff] }
 0x26b   : > { %v5622_v50 = vadd.f32 %v3840_v43, %v2134_v13  ;;  %v3843_v28 = vadd.f32 %v3842_v39, %v3841_v5  ;;  %2550 = vmatmul.mubr.bf16.gmra.mrb[112].mxu1 %v1463_v1 }
 0x26c   : > { %2703 = vmatmul.mubr.bf16.gmra.mrb[140].mxu0 %v5551_v63  ;;  %2557 = vmatprep.mubr.bf16.mxu1 %v5578_v29  ;;  %v2145_v29 = vadd.f32 %v3737_v30, %v5616_v0  ;;  %v1467_v30 = vpack.c.bf16 %v1451_v22, %v1450_v56 }
 0x26d   : > { %v5626_v26 = vadd.f32 %v3843_v28, %v2137_v3  ;;  %2710 = vmatprep.mubr.bf16.mxu0 %v1464_v27  ;;  %v1500_v28 = vpack.c.bf16 %v1469_v7, %v1468_v34 }
 0x26e   : > { %v3738_v60 = vpop.f32.mrb[8].mxu1 }
 0x26f   : > { %v3844_v55 = vpop.f32.mrb[36].mxu0  ;;  %v3739_v10 = vpop.f32.mrb[9].mxu1 }
 0x270   : > { %v3740_v40 = vadd.f32 %v3739_v10, %v3738_v60  ;;  %v3845_v8 = vpop.f32.mrb[37].mxu0  ;;  %v3741_v38 = vpop.f32.mrb[10].mxu1 }
 0x271   : > { %v3846_v52 = vadd.f32 %v3845_v8, %v3844_v55  ;;  %v3847_v37 = vpop.f32.mrb[38].mxu0  ;;  %v3742_v14 = vpop.f32.mrb[11].mxu1 }
 0x272   : > { %v3743_v23 = vadd.f32 %v3742_v14, %v3741_v38  ;;  %v3848_v63 = vpop.f32.mrb[39].mxu0  ;;  %v2150_v61 = vadd.f32 %v3740_v40, %v5616_v0  ;;  %v1402_v40 = vld [vmem:[#allocation2 + $0x198] sm:$0xff]  ;;  %v1470_v38 = vld [vmem:[#allocation2 + $0x4a] sm:$0xff] }
 0x273   : > { %v5630_v25 = vadd.f32 %v3846_v52, %v2142_v44  ;;  %v3849_v51 = vadd.f32 %v3848_v63, %v3847_v37  ;;  %2558 = vmatmul.mubr.bf16.gmra.mrb[116].mxu1 %v1464_v27  ;;  %v1472_v52 = vld [vmem:[#allocation2 + $0x62] sm:$0xff]  ;;  %v1473_v37 = vld [vmem:[#allocation2 + $0x6a] sm:$0xff] }
 0x274   : > { %2711 = vmatmul.mubr.bf16.gmra.mrb[144].mxu0 %v5561_v2  ;;  %2565 = vmatprep.mubr.bf16.mxu1 %v5586_v48  ;;  %v2153_v59 = vadd.f32 %v3743_v23, %v5616_v0 }
 0x275   : > { %v5634_v35 = vadd.f32 %v3849_v51, %v2145_v29  ;;  %2718 = vmatprep.mubr.bf16.mxu0 %v1465_v46  ;;  %v4584_v29 = vld [vmem:[#allocation2 + $0x8] sm:$0xff] }
 0x276   : > { %v3744_v49 = vpop.f32.mrb[12].mxu1  ;;  %v1419_v51 = vpack.c.bf16 %v4584_v29, %v1402_v40 }
 0x277   : > { %v3850_v36 = vpop.f32.mrb[40].mxu0  ;;  %v3745_v20 = vpop.f32.mrb[13].mxu1 }
 0x278   : > { %v3746_v11 = vadd.f32 %v3745_v20, %v3744_v49  ;;  %v3851_v16 = vpop.f32.mrb[41].mxu0  ;;  %v3747_v57 = vpop.f32.mrb[14].mxu1  ;;  %v1501_v20 = vpack.c.bf16 %v1471_v9, %v1470_v38 }
 0x279   : > { %v3852_v24 = vadd.f32 %v3851_v16, %v3850_v36  ;;  %v3853_v4 = vpop.f32.mrb[42].mxu0  ;;  %v3748_v2 = vpop.f32.mrb[15].mxu1 }
 0x27a   : > { %v3749_v54 = vadd.f32 %v3748_v2, %v3747_v57  ;;  %v3854_v48 = vpop.f32.mrb[43].mxu0  ;;  %v2158_v43 = vadd.f32 %v3746_v11, %v5616_v0  ;;  %v1502_v11 = vpack.c.bf16 %v1473_v37, %v1472_v52 }
 0x27b   : > { %v5640_v53 = vadd.f32 %v3852_v24, %v2150_v61  ;;  %v3855_v45 = vadd.f32 %v3854_v48, %v3853_v4  ;;  %2566 = vmatmul.mubr.bf16.gmra.mrb[120].mxu1 %v1465_v46  ;;  %v1474_v24 = vld [vmem:[#allocation2 + $0x7a] sm:$0xff]  ;;  %v1475_v4 = vld [vmem:[#allocation2 + $0x82] sm:$0xff]  ;;  %v1476_v48 = vld [vmem:[#allocation2 + $0x92] sm:$0xff] }
 0x27c   : > { %2719 = vmatmul.mubr.bf16.gmra.mrb[148].mxu0 %v5571_v47  ;;  %2573 = vmatprep.mubr.bf16.mxu1 %v5637_v19  ;;  %v2161_v27 = vadd.f32 %v3749_v54, %v5616_v0  ;;  %v1503_v34 = vpack.c.bf16 %v1475_v4, %v1474_v24 }
 0x27d   : > { %v5644_v18 = vadd.f32 %v3855_v45, %v2153_v59  ;;  %2726 = vmatprep.mubr.bf16.mxu0 %v1466_v6  ;;  %v1477_v59 = vld [vmem:[#allocation2 + $0x9a] sm:$0xff] }
 0x27e   : > { %v3750_v1 = vpop.f32.mrb[16].mxu1 }
 0x27f   : > { %v3856_v41 = vpop.f32.mrb[44].mxu0  ;;  %v3751_v62 = vpop.f32.mrb[17].mxu1 }
 0x280   : > { %v3752_v31 = vadd.f32 %v3751_v62, %v3750_v1  ;;  %v3857_v15 = vpop.f32.mrb[45].mxu0  ;;  %v3753_v13 = vpop.f32.mrb[18].mxu1 }
 0x281   : > { %v3858_v5 = vadd.f32 %v3857_v15, %v3856_v41  ;;  %v3859_v42 = vpop.f32.mrb[46].mxu0  ;;  %v3754_v47 = vpop.f32.mrb[19].mxu1  ;;  %v1504_v15 = vpack.c.bf16 %v1477_v59, %v1476_v48 }
 0x282   : > { %v3755_v39 = vadd.f32 %v3754_v47, %v3753_v13  ;;  %v3860_v3 = vpop.f32.mrb[47].mxu0  ;;  %v2166_v46 = vadd.f32 %v3752_v31, %v5616_v0 }
 0x283   : > { %v5648_v60 = vadd.f32 %v3858_v5, %v2158_v43  ;;  %v3861_v55 = vadd.f32 %v3860_v3, %v3859_v42  ;;  %2574 = vmatmul.mubr.bf16.gmra.mrb[124].mxu1 %v1466_v6 }
 0x284   : > { %2727 = vmatmul.mubr.bf16.gmra.mrb[152].mxu0 %v5581_v17  ;;  %4246 = vmatprep.mubr.bf16.mxu1 %v1500_v28  ;;  %v2169_v16 = vadd.f32 %v3755_v39, %v5616_v0  ;;  %v1479_v39 = vld [vmem:[#allocation2 + $0xb2] sm:$0xff] }
 0x285   : > { %v5651_v10 = vadd.f32 %v3861_v55, %v2161_v27  ;;  %2734 = vmatprep.mubr.bf16.mxu0 %v1467_v30  ;;  %v1478_v30 = vld [vmem:[#allocation2 + $0xaa] sm:$0xff]  ;;  %v1480_v27 = vld [vmem:[#allocation2 + $0xc2] sm:$0xff] }
 0x286   : > { %v3756_v8 = vpop.f32.mrb[20].mxu1  ;;  %v1481_v55 = vld [vmem:[#allocation2 + $0xca] sm:$0xff]  ;;  %v1505_v37 = vpack.c.bf16 %v1479_v39, %v1478_v30 }
 0x287   : > { %v3862_v12 = vpop.f32.mrb[48].mxu0  ;;  %v3757_v44 = vpop.f32.mrb[21].mxu1 }
 0x288   : > { %v3758_v14 = vadd.f32 %v3757_v44, %v3756_v8  ;;  %v3863_v23 = vpop.f32.mrb[49].mxu0  ;;  %v3759_v63 = vpop.f32.mrb[22].mxu1 }
 0x289   : > { %v3864_v17 = vadd.f32 %v3863_v23, %v3862_v12  ;;  %v3865_v49 = vpop.f32.mrb[50].mxu0  ;;  %v3760_v36 = vpop.f32.mrb[23].mxu1 }
 0x28a   : > { %v3761_v58 = vadd.f32 %v3760_v36, %v3759_v63  ;;  %v3866_v32 = vpop.f32.mrb[51].mxu0  ;;  %v2174_v56 = vadd.f32 %v3758_v14, %v5616_v0  ;;  %v1506_v63 = vpack.c.bf16 %v1481_v55, %v1480_v27  ;;  %v1482_v36 = vld [vmem:[#allocation2 + $0xda] sm:$0xff] }
 0x28b   : > { %v5655_v57 = vadd.f32 %v3864_v17, %v2166_v46  ;;  %v3867_v21 = vadd.f32 %v3866_v32, %v3865_v49  ;;  %4247 = vmatmul.mubr.bf16.vlgmr.msra.gmra.mrb[128].mxu1 %v1501_v20  ;;  %v1483_v20 = vld [vmem:[#allocation2 + $0xe2] sm:$0xff] }
 0x28c   : > { %2735 = vmatmul.mubr.bf16.gmra.mrb[156].mxu0 %v1419_v51  ;;  %4250 = vmatprep.mubr.bf16.mxu1 %v1502_v11  ;;  %v2177_v13 = vadd.f32 %v3761_v58, %v5616_v0  ;;  %v1484_v11 = vld [vmem:[#allocation2 + $0xf2] sm:$0xff]  ;;  %v1507_v59 = vpack.c.bf16 %v1483_v20, %v1482_v36  ;;  %v1493_v20 = vld [vmem:[#allocation2 + $0x15a] sm:$0xff] }
 0x28d   : > { %v5657_v33 = vadd.f32 %v3867_v21, %v2169_v16  ;;  %v1485_v16 = vld [vmem:[#allocation2 + $0xfa] sm:$0xff]  ;;  %v1492_v36 = vld [vmem:[#allocation2 + $0x152] sm:$0xff] }
 0x28e   : > { %v3762_v61 = vpop.f32.mrb[24].mxu1 }
 0x28f   : > { %v3868_v2 = vpop.f32.mrb[52].mxu0  ;;  %v3763_v54 = vpop.f32.mrb[25].mxu1 }
 0x290   : > { %v3764_v45 = vadd.f32 %v3763_v54, %v3762_v61  ;;  %v3869_v6 = vpop.f32.mrb[53].mxu0  ;;  %v3765_v1 = vpop.f32.mrb[26].mxu1 }
 0x291   : > { %v3870_v22 = vadd.f32 %v3869_v6, %v3868_v2  ;;  %v3871_v41 = vpop.f32.mrb[54].mxu0  ;;  %v3766_v62 = vpop.f32.mrb[27].mxu1 }
 0x292   : > { %v3767_v7 = vadd.f32 %v3766_v62, %v3765_v1  ;;  %v3872_v31 = vpop.f32.mrb[55].mxu0  ;;  %v2182_v9 = vadd.f32 %v3764_v45, %v5616_v0  ;;  %v1508_v1 = vpack.c.bf16 %v1485_v16, %v1484_v11 }
 0x293   : > { %v5661_v43 = vadd.f32 %v3870_v22, %v2174_v56  ;;  %v3873_v5 = vadd.f32 %v3872_v31, %v3871_v41  ;;  %4251 = vmatmul.mubr.bf16.gmra.mrb[132].mxu1 %v1503_v34  ;;  %v1487_v31 = vld [vmem:[#allocation2 + $0x112] sm:$0xff] }
 0x294   : > { %4254 = vmatprep.mubr.bf16.mxu1 %v1504_v15  ;;  %v2185_v29 = vadd.f32 %v3767_v7, %v5616_v0  ;;  %v1486_v7 = vld [vmem:[#allocation2 + $0x10a] sm:$0xff] }
 0x295   : > { %v5663_v42 = vadd.f32 %v3873_v5, %v2177_v13  ;;  %v1488_v5 = vld [vmem:[#allocation2 + $0x122] sm:$0xff] }
 0x296   : > { %v3768_v47 = vpop.f32.mrb[28].mxu1 }
 0x297   : > { %v3874_v3 = vpop.f32.mrb[56].mxu0  ;;  %v3769_v28 = vpop.f32.mrb[29].mxu1 }
 0x298   : > { %v3770_v40 = vadd.f32 %v3769_v28, %v3768_v47  ;;  %v3875_v8 = vpop.f32.mrb[57].mxu0  ;;  %v3771_v38 = vpop.f32.mrb[30].mxu1  ;;  %v1489_v47 = vld [vmem:[#allocation2 + $0x12a] sm:$0xff] }
 0x299   : > { %v3876_v12 = vadd.f32 %v3875_v8, %v3874_v3  ;;  %v3877_v44 = vpop.f32.mrb[58].mxu0  ;;  %v3772_v52 = vpop.f32.mrb[31].mxu1  ;;  %v1509_v8 = vpack.c.bf16 %v1487_v31, %v1486_v7 }
 0x29a   : > { %v3773_v14 = vadd.f32 %v3772_v52, %v3771_v38  ;;  %v3878_v23 = vpop.f32.mrb[59].mxu0  ;;  %v2190_v4 = vadd.f32 %v3770_v40, %v5616_v0 }
 0x29b   : > { %v5667_v51 = vadd.f32 %v3876_v12, %v2182_v9  ;;  %v3879_v46 = vadd.f32 %v3878_v23, %v3877_v44  ;;  %4255 = vmatmul.mubr.bf16.gmra.mrb[136].mxu1 %v1505_v37  ;;  %v1510_v12 = vpack.c.bf16 %v1489_v47, %v1488_v5 }
 0x29c   : > { %4258 = vmatprep.mubr.bf16.mxu1 %v1506_v63  ;;  %v2193_v56 = vadd.f32 %v3773_v14, %v5616_v0  ;;  %v1490_v63 = vld [vmem:[#allocation2 + $0x13a] sm:$0xff] }
 0x29d   : > { %v5669_v17 = vadd.f32 %v3879_v46, %v2185_v29  ;;  %v1491_v29 = vld [vmem:[#allocation2 + $0x142] sm:$0xff] }
 0x29e   : > { %v3774_v49 = vpop.f32.mrb[32].mxu1 }
 0x29f   : > { %v3880_v58 = vpop.f32.mrb[60].mxu0  ;;  %v3775_v32 = vpop.f32.mrb[33].mxu1 }
 0x2a0   : > { %v3776_v21 = vadd.f32 %v3775_v32, %v3774_v49  ;;  %v3881_v61 = vpop.f32.mrb[61].mxu0  ;;  %v3777_v24 = vpop.f32.mrb[34].mxu1 }
 0x2a1   : > { %v3882_v2 = vadd.f32 %v3881_v61, %v3880_v58  ;;  %v3883_v54 = vpop.f32.mrb[62].mxu0  ;;  %v3778_v48 = vpop.f32.mrb[35].mxu1 }
 0x2a2   : > { %v3779_v45 = vadd.f32 %v3778_v48, %v3777_v24  ;;  %v3884_v6 = vpop.f32.mrb[63].mxu0  ;;  %v2198_v28 = vadd.f32 %v3776_v21, %v5616_v0  ;;  %v1512_v48 = vpack.c.bf16 %v1493_v20, %v1492_v36 }
 0x2a3   : > { %v5673_v22 = vadd.f32 %v3882_v2, %v2190_v4  ;;  %v3885_v41 = vadd.f32 %v3884_v6, %v3883_v54  ;;  %4259 = vmatmul.mubr.bf16.gmra.mrb[140].mxu1 %v1507_v59  ;;  %v1511_v4 = vpack.c.bf16 %v1491_v29, %v1490_v63 }
 0x2a4   : > { %4262 = vmatprep.mubr.bf16.mxu1 %v1508_v1  ;;  %v2201_v44 = vadd.f32 %v3779_v45, %v5616_v0 }
 0x2a5   : > { %v5675_v62 = vadd.f32 %v3885_v41, %v2193_v56  ;;  %v1494_v41 = vld [vmem:[#allocation2 + $0x16a] sm:$0xff] }
 0x2a6   : > { %v3780_v34 = vpop.f32.mrb[36].mxu1 }
 0x2a7   : > { %v3886_v15 = vpop.f32.mrb[64].mxu0  ;;  %v3781_v13 = vpop.f32.mrb[37].mxu1 }
 0x2a8   : > { %v3782_v30 = vadd.f32 %v3781_v13, %v3780_v34  ;;  %v3887_v39 = vpop.f32.mrb[65].mxu0  ;;  %v3783_v3 = vpop.f32.mrb[38].mxu1  ;;  %v1495_v34 = vld [vmem:[#allocation2 + $0x172] sm:$0xff] }
 0x2a9   : > { %v3888_v27 = vadd.f32 %v3887_v39, %v3886_v15  ;;  %v3889_v55 = vpop.f32.mrb[66].mxu0  ;;  %v3784_v40 = vpop.f32.mrb[39].mxu1 }
 0x2aa   : > { %v3785_v38 = vadd.f32 %v3784_v40, %v3783_v3  ;;  %v3890_v9 = vpop.f32.mrb[67].mxu0  ;;  %v2206_v16 = vadd.f32 %v3782_v30, %v5616_v0 }
 0x2ab   : > { %v5679_v52 = vadd.f32 %v3888_v27, %v2198_v28  ;;  %v3891_v37 = vadd.f32 %v3890_v9, %v3889_v55  ;;  %4263 = vmatmul.mubr.bf16.gmra.mrb[144].mxu1 %v1509_v8  ;;  %v1513_v28 = vpack.c.bf16 %v1495_v34, %v1494_v41  ;;  %v1498_v9 = vld [vmem:[#allocation2 + $0x19a] sm:$0xff] }
 0x2ac   : > { %4266 = vmatprep.mubr.bf16.mxu1 %v1510_v12  ;;  %v2209_v59 = vadd.f32 %v3785_v38, %v5616_v0  ;;  %v1499_v12 = vld [vmem:[#allocation2 + $0x1a2] sm:$0xff] }
 0x2ad   : > { %v5681_v14 = vadd.f32 %v3891_v37, %v2201_v44  ;;  %v1515_v29 = vpack.c.bf16 %v1499_v12, %v1498_v9 }
 0x2ae   : > { %v3786_v23 = vpop.f32.mrb[40].mxu1 }
 0x2af   : > { %v3892_v46 = vpop.f32.mrb[68].mxu0  ;;  %v3787_v49 = vpop.f32.mrb[41].mxu1 }
 0x2b0   : > { %v3788_v58 = vadd.f32 %v3787_v49, %v3786_v23  ;;  %v3893_v32 = vpop.f32.mrb[69].mxu0  ;;  %v3789_v11 = vpop.f32.mrb[42].mxu1 }
 0x2b1   : > { %v3894_v21 = vadd.f32 %v3893_v32, %v3892_v46  ;;  %v3895_v61 = vpop.f32.mrb[70].mxu0  ;;  %v3790_v24 = vpop.f32.mrb[43].mxu1 }
 0x2b2   : > { %v3791_v2 = vadd.f32 %v3790_v24, %v3789_v11  ;;  %v3896_v54 = vpop.f32.mrb[71].mxu0  ;;  %v2214_v47 = vadd.f32 %v3788_v58, %v5616_v0 }
 0x2b3   : > { %v5685_v45 = vadd.f32 %v3894_v21, %v2206_v16  ;;  %v3897_v6 = vadd.f32 %v3896_v54, %v3895_v61  ;;  %4267 = vmatmul.mubr.bf16.gmra.mrb[148].mxu1 %v1511_v4 }
 0x2b4   : > { %4270 = vmatprep.mubr.bf16.mxu1 %v1512_v48  ;;  %v2217_v40 = vadd.f32 %v3791_v2, %v5616_v0 }
 0x2b5   : > { %v5687_v1 = vadd.f32 %v3897_v6, %v2209_v59 }
 0x2b6   : > { %v3792_v56 = vpop.f32.mrb[44].mxu1 }
 0x2b7   : > { %v3898_v7 = vpop.f32.mrb[72].mxu0  ;;  %v3793_v31 = vpop.f32.mrb[45].mxu1 }
 0x2b8   : > { %v3794_v15 = vadd.f32 %v3793_v31, %v3792_v56  ;;  %v3899_v13 = vpop.f32.mrb[73].mxu0  ;;  %v3795_v5 = vpop.f32.mrb[46].mxu1 }
 0x2b9   : > { %v3900_v30 = vadd.f32 %v3899_v13, %v3898_v7  ;;  %v3901_v39 = vpop.f32.mrb[74].mxu0  ;;  %v3796_v3 = vpop.f32.mrb[47].mxu1 }
 0x2ba   : > { %v3797_v27 = vadd.f32 %v3796_v3, %v3795_v5  ;;  %v3902_v55 = vpop.f32.mrb[75].mxu0  ;;  %v2222_v20 = vadd.f32 %v3794_v15, %v5616_v0 }
 0x2bb   : > { %v5691_v8 = vadd.f32 %v3900_v30, %v2214_v47  ;;  %v3903_v38 = vadd.f32 %v3902_v55, %v3901_v39  ;;  %4271 = vmatmul.mubr.bf16.gmra.mrb[152].mxu1 %v1513_v28 }
 0x2bc   : > { %4274 = vmatprep.mubr.bf16.mxu1 %v5637_v19  ;;  %v2225_v19 = vadd.f32 %v3797_v27, %v5616_v0 }
 0x2bd   : > { %v5694_v44 = vadd.f32 %v3903_v38, %v2217_v40 }
 0x2be   : > { %v3798_v37 = vpop.f32.mrb[48].mxu1 }
 0x2bf   : > { %v3904_v23 = vpop.f32.mrb[76].mxu0  ;;  %v3799_v63 = vpop.f32.mrb[49].mxu1 }
 0x2c0   : > { %v3800_v46 = vadd.f32 %v3799_v63, %v3798_v37  ;;  %v3905_v49 = vpop.f32.mrb[77].mxu0  ;;  %v3801_v36 = vpop.f32.mrb[50].mxu1 }
 0x2c1   : > { %v3906_v58 = vadd.f32 %v3905_v49, %v3904_v23  ;;  %v3907_v32 = vpop.f32.mrb[78].mxu0  ;;  %v3802_v11 = vpop.f32.mrb[51].mxu1 }
 0x2c2   : > { %v3803_v16 = vadd.f32 %v3802_v11, %v3801_v36  ;;  %v3908_v21 = vpop.f32.mrb[79].mxu0  ;;  %v2230_v41 = vadd.f32 %v3800_v46, %v5616_v0 }
 0x2c3   : > { %v5698_v61 = vadd.f32 %v3906_v58, %v2222_v20  ;;  %v3909_v24 = vadd.f32 %v3908_v21, %v3907_v32  ;;  %4275 = vmatmul.mubr.bf16.gmra.mrb[156].mxu1 %v1515_v29 }
 0x2c4   : > { %v2233_v5 = vadd.f32 %v3803_v16, %v5616_v0 }
 0x2c5   : > { %v5700_v4 = vadd.f32 %v3909_v24, %v2225_v19 }
 0x2c6   : > { %v3804_v2 = vpop.f32.mrb[52].mxu1 }
 0x2c7   : > { %v3910_v54 = vpop.f32.mrb[80].mxu0  ;;  %v3805_v48 = vpop.f32.mrb[53].mxu1 }
 0x2c8   : > { %v3806_v59 = vadd.f32 %v3805_v48, %v3804_v2  ;;  %v3911_v6 = vpop.f32.mrb[81].mxu0  ;;  %v3807_v56 = vpop.f32.mrb[54].mxu1 }
 0x2c9   : > { %v3912_v34 = vadd.f32 %v3911_v6, %v3910_v54  ;;  %v3913_v7 = vpop.f32.mrb[82].mxu0  ;;  %v3808_v31 = vpop.f32.mrb[55].mxu1 }
 0x2ca   : > { %v3809_v15 = vadd.f32 %v3808_v31, %v3807_v56  ;;  %v3914_v13 = vpop.f32.mrb[83].mxu0  ;;  %v2238_v9 = vadd.f32 %v3806_v59, %v5616_v0 }
 0x2cb   : > { %v5704_v47 = vadd.f32 %v3912_v34, %v2230_v41  ;;  %v3915_v30 = vadd.f32 %v3914_v13, %v3913_v7 }
 0x2cc   : > { %v2241_v46 = vadd.f32 %v3809_v15, %v5616_v0 }
 0x2cd   : > { %v5706_v39 = vadd.f32 %v3915_v30, %v2233_v5 }
 0x2ce   : > { %v3810_v3 = vpop.f32.mrb[56].mxu1 }
 0x2cf   : > { %v3916_v28 = vpop.f32.mrb[84].mxu0  ;;  %v3811_v27 = vpop.f32.mrb[57].mxu1 }
 0x2d0   : > { %v3812_v55 = vadd.f32 %v3811_v27, %v3810_v3  ;;  %v3917_v40 = vpop.f32.mrb[85].mxu0  ;;  %v3813_v38 = vpop.f32.mrb[58].mxu1 }
 0x2d1   : > { %v3918_v12 = vadd.f32 %v3917_v40, %v3916_v28  ;;  %v3919_v37 = vpop.f32.mrb[86].mxu0  ;;  %v3814_v23 = vpop.f32.mrb[59].mxu1 }
 0x2d2   : > { %v3815_v63 = vadd.f32 %v3814_v23, %v3813_v38  ;;  %v3920_v29 = vpop.f32.mrb[87].mxu0  ;;  %v2246_v24 = vadd.f32 %v3812_v55, %v5616_v0 }
 0x2d3   : > { %v5710_v49 = vadd.f32 %v3918_v12, %v2238_v9  ;;  %v3921_v36 = vadd.f32 %v3920_v29, %v3919_v37 }
 0x2d4   : > { %v2249_v56 = vadd.f32 %v3815_v63, %v5616_v0 }
 0x2d5   : > { %v5712_v20 = vadd.f32 %v3921_v36, %v2241_v46 }
 0x2d6   : > { %v3816_v58 = vpop.f32.mrb[60].mxu1 }
 0x2d7   : > { %v3922_v32 = vpop.f32.mrb[88].mxu0  ;;  %v3817_v11 = vpop.f32.mrb[61].mxu1 }
 0x2d8   : > { %v3818_v16 = vadd.f32 %v3817_v11, %v3816_v58  ;;  %v3923_v21 = vpop.f32.mrb[89].mxu0  ;;  %v3819_v19 = vpop.f32.mrb[62].mxu1 }
 0x2d9   : > { %v3924_v2 = vadd.f32 %v3923_v21, %v3922_v32  ;;  %v3925_v54 = vpop.f32.mrb[90].mxu0  ;;  %v3820_v48 = vpop.f32.mrb[63].mxu1 }
 0x2da   : > { %v3821_v59 = vadd.f32 %v3820_v48, %v3819_v19  ;;  %v3926_v6 = vpop.f32.mrb[91].mxu0  ;;  %v2254_v28 = vadd.f32 %v3818_v16, %v5616_v0 }
 0x2db   : > { %v5716_v41 = vadd.f32 %v3924_v2, %v2246_v24  ;;  %v3927_v34 = vadd.f32 %v3926_v6, %v3925_v54 }
 0x2dc   : > { %v2257_v37 = vadd.f32 %v3821_v59, %v5616_v0 }
 0x2dd   : > { %v5718_v7 = vadd.f32 %v3927_v34, %v2249_v56 }
 0x2de   : > { %v3950_v31 = vpop.f32.mrb[64].mxu1 }
 0x2df   : > { %v3928_v15 = vpop.f32.mrb[92].mxu0  ;;  %v3951_v13 = vpop.f32.mrb[65].mxu1 }
 0x2e0   : > { %v3929_v5 = vpop.f32.mrb[93].mxu0  ;;  %v3952_v30 = vadd.f32 %v3951_v13, %v3950_v31  ;;  %v3953_v3 = vpop.f32.mrb[66].mxu1 }
 0x2e1   : > { %v3930_v27 = vadd.f32 %v3929_v5, %v3928_v15  ;;  %v3931_v55 = vpop.f32.mrb[94].mxu0  ;;  %v3954_v40 = vpop.f32.mrb[67].mxu1 }
 0x2e2   : > { %v2456_v38 = vadd.f32 %v3952_v30, %v5622_v50  ;;  %v3932_v9 = vpop.f32.mrb[95].mxu0  ;;  %v3955_v12 = vadd.f32 %v3954_v40, %v3953_v3 }
 0x2e3   : > { %v5723_v23 = vadd.f32 %v3930_v27, %v2254_v28  ;;  %v3933_v63 = vadd.f32 %v3932_v9, %v3931_v55 }
 0x2e4   : > { %v2459_v29 = vadd.f32 %v3955_v12, %v5626_v26 }
 0x2e5   : > { %v5726_v46 = vadd.f32 %v3933_v63, %v2257_v37 }
 0x2e6   : > { %v3956_v36 = vpop.f32.mrb[68].mxu1 }
 0x2e7   : > { %v4062_v58 = vpop.f32.mrb[96].mxu0  ;;  %v3957_v32 = vpop.f32.mrb[69].mxu1 }
 0x2e8   : > { %v3958_v11 = vadd.f32 %v3957_v32, %v3956_v36  ;;  %v4063_v16 = vpop.f32.mrb[97].mxu0  ;;  %v3959_v21 = vpop.f32.mrb[70].mxu1 }
 0x2e9   : > { %v4064_v19 = vadd.f32 %v4063_v16, %v4062_v58  ;;  %v4065_v24 = vpop.f32.mrb[98].mxu0  ;;  %v3960_v50 = vpop.f32.mrb[71].mxu1 }
 0x2ea   : > { %v2464_v2 = vadd.f32 %v3958_v11, %v5630_v25  ;;  %v3961_v54 = vadd.f32 %v3960_v50, %v3959_v21  ;;  %v4066_v0 = vpop.f32.mrb[99].mxu0 }
 0x2eb   : > { %v4067_v48 = vadd.f32 %v4066_v0, %v4065_v24  ;;  %v5729_v59 = vadd.f32 %v4064_v19, %v2456_v38 }
 0x2ec   : > { %v2467_v26 = vadd.f32 %v3961_v54, %v5634_v35 }
 0x2ed   : > { %v5732_v6 = vadd.f32 %v4067_v48, %v2459_v29 }
 0x2ee   : > { %v3962_v56 = vpop.f32.mrb[72].mxu1 }
 0x2ef   : > { %v4068_v34 = vpop.f32.mrb[100].mxu0  ;;  %v3963_v31 = vpop.f32.mrb[73].mxu1 }
 0x2f0   : > { %v3964_v15 = vadd.f32 %v3963_v31, %v3962_v56  ;;  %v4069_v13 = vpop.f32.mrb[101].mxu0  ;;  %v3965_v5 = vpop.f32.mrb[74].mxu1 }
 0x2f1   : > { %v4070_v30 = vadd.f32 %v4069_v13, %v4068_v34  ;;  %v4071_v3 = vpop.f32.mrb[102].mxu0  ;;  %v3966_v28 = vpop.f32.mrb[75].mxu1 }
 0x2f2   : > { %v2472_v25 = vadd.f32 %v3964_v15, %v5640_v53  ;;  %v3967_v27 = vadd.f32 %v3966_v28, %v3965_v5  ;;  %v4072_v55 = vpop.f32.mrb[103].mxu0 }
 0x2f3   : > { %v4073_v40 = vadd.f32 %v4072_v55, %v4071_v3  ;;  %v5735_v38 = vadd.f32 %v4070_v30, %v2464_v2 }
 0x2f4   : > { %v2475_v35 = vadd.f32 %v3967_v27, %v5644_v18 }
 0x2f5   : > { %v5738_v9 = vadd.f32 %v4073_v40, %v2467_v26 }
 0x2f6   : > { %v3968_v12 = vpop.f32.mrb[76].mxu1 }
 0x2f7   : > { %v4074_v37 = vpop.f32.mrb[104].mxu0  ;;  %v3969_v63 = vpop.f32.mrb[77].mxu1 }
 0x2f8   : > { %v3970_v29 = vadd.f32 %v3969_v63, %v3968_v12  ;;  %v4075_v36 = vpop.f32.mrb[105].mxu0  ;;  %v3971_v58 = vpop.f32.mrb[78].mxu1 }
 0x2f9   : > { %v4076_v32 = vadd.f32 %v4075_v36, %v4074_v37  ;;  %v4077_v11 = vpop.f32.mrb[106].mxu0  ;;  %v3972_v16 = vpop.f32.mrb[79].mxu1 }
 0x2fa   : > { %v2480_v53 = vadd.f32 %v3970_v29, %v5648_v60  ;;  %v3973_v21 = vadd.f32 %v3972_v16, %v3971_v58  ;;  %v4078_v19 = vpop.f32.mrb[107].mxu0 }
 0x2fb   : > { %v4079_v24 = vadd.f32 %v4078_v19, %v4077_v11  ;;  %v5741_v50 = vadd.f32 %v4076_v32, %v2472_v25 }
 0x2fc   : > { %v2483_v18 = vadd.f32 %v3973_v21, %v5651_v10 }
 0x2fd   : > { %v5744_v2 = vadd.f32 %v4079_v24, %v2475_v35 }
 0x2fe   : > { %v3974_v54 = vpop.f32.mrb[80].mxu1 }
 0x2ff   : > { %v4080_v0 = vpop.f32.mrb[108].mxu0  ;;  %v3975_v48 = vpop.f32.mrb[81].mxu1 }
 0x300   : > { %v3976_v26 = vadd.f32 %v3975_v48, %v3974_v54  ;;  %v4081_v56 = vpop.f32.mrb[109].mxu0  ;;  %v3977_v34 = vpop.f32.mrb[82].mxu1 }
 0x301   : > { %v4082_v31 = vadd.f32 %v4081_v56, %v4080_v0  ;;  %v4083_v15 = vpop.f32.mrb[110].mxu0  ;;  %v3978_v13 = vpop.f32.mrb[83].mxu1 }
 0x302   : > { %v2488_v60 = vadd.f32 %v3976_v26, %v5655_v57  ;;  %v3979_v5 = vadd.f32 %v3978_v13, %v3977_v34  ;;  %v4084_v30 = vpop.f32.mrb[111].mxu0 }
 0x303   : > { %v4085_v3 = vadd.f32 %v4084_v30, %v4083_v15  ;;  %v5747_v28 = vadd.f32 %v4082_v31, %v2480_v53 }
 0x304   : > { %v2491_v10 = vadd.f32 %v3979_v5, %v5657_v33 }
 0x305   : > { %v5750_v25 = vadd.f32 %v4085_v3, %v2483_v18 }
 0x306   : > { %v3980_v27 = vpop.f32.mrb[84].mxu1 }
 0x307   : > { %v4086_v55 = vpop.f32.mrb[112].mxu0  ;;  %v3981_v40 = vpop.f32.mrb[85].mxu1 }
 0x308   : > { %v3982_v35 = vadd.f32 %v3981_v40, %v3980_v27  ;;  %v4087_v12 = vpop.f32.mrb[113].mxu0  ;;  %v3983_v37 = vpop.f32.mrb[86].mxu1 }
 0x309   : > { %v4088_v63 = vadd.f32 %v4087_v12, %v4086_v55  ;;  %v4089_v29 = vpop.f32.mrb[114].mxu0  ;;  %v3984_v36 = vpop.f32.mrb[87].mxu1 }
 0x30a   : > { %v2496_v57 = vadd.f32 %v3982_v35, %v5661_v43  ;;  %v3985_v58 = vadd.f32 %v3984_v36, %v3983_v37  ;;  %v4090_v32 = vpop.f32.mrb[115].mxu0 }
 0x30b   : > { %v4091_v11 = vadd.f32 %v4090_v32, %v4089_v29  ;;  %v5753_v16 = vadd.f32 %v4088_v63, %v2488_v60 }
 0x30c   : > { %v2499_v33 = vadd.f32 %v3985_v58, %v5663_v42 }
 0x30d   : > { %v5756_v53 = vadd.f32 %v4091_v11, %v2491_v10 }
 0x30e   : > { %v3986_v21 = vpop.f32.mrb[88].mxu1 }
 0x30f   : > { %v4092_v19 = vpop.f32.mrb[116].mxu0  ;;  %v3987_v24 = vpop.f32.mrb[89].mxu1 }
 0x310   : > { %v3988_v18 = vadd.f32 %v3987_v24, %v3986_v21  ;;  %v4093_v54 = vpop.f32.mrb[117].mxu0  ;;  %v3989_v0 = vpop.f32.mrb[90].mxu1 }
 0x311   : > { %v4094_v48 = vadd.f32 %v4093_v54, %v4092_v19  ;;  %v4095_v26 = vpop.f32.mrb[118].mxu0  ;;  %v3990_v56 = vpop.f32.mrb[91].mxu1 }
 0x312   : > { %v2504_v43 = vadd.f32 %v3988_v18, %v5667_v51  ;;  %v3991_v34 = vadd.f32 %v3990_v56, %v3989_v0  ;;  %v4096_v31 = vpop.f32.mrb[119].mxu0 }
 0x313   : > { %v4097_v15 = vadd.f32 %v4096_v31, %v4095_v26  ;;  %v5759_v13 = vadd.f32 %v4094_v48, %v2496_v57 }
 0x314   : > { %v2507_v42 = vadd.f32 %v3991_v34, %v5669_v17 }
 0x315   : > { %v5762_v60 = vadd.f32 %v4097_v15, %v2499_v33 }
 0x316   : > { %v3992_v5 = vpop.f32.mrb[92].mxu1 }
 0x317   : > { %v4098_v30 = vpop.f32.mrb[120].mxu0  ;;  %v3993_v3 = vpop.f32.mrb[93].mxu1 }
 0x318   : > { %v3994_v10 = vadd.f32 %v3993_v3, %v3992_v5  ;;  %v4099_v27 = vpop.f32.mrb[121].mxu0  ;;  %v3995_v55 = vpop.f32.mrb[94].mxu1 }
 0x319   : > { %v4100_v40 = vadd.f32 %v4099_v27, %v4098_v30  ;;  %v4101_v35 = vpop.f32.mrb[122].mxu0  ;;  %v3996_v12 = vpop.f32.mrb[95].mxu1 }
 0x31a   : > { %v2512_v51 = vadd.f32 %v3994_v10, %v5673_v22  ;;  %v3997_v37 = vadd.f32 %v3996_v12, %v3995_v55  ;;  %v4102_v63 = vpop.f32.mrb[123].mxu0 }
 0x31b   : > { %v4103_v29 = vadd.f32 %v4102_v63, %v4101_v35  ;;  %v5765_v36 = vadd.f32 %v4100_v40, %v2504_v43 }
 0x31c   : > { %v2515_v17 = vadd.f32 %v3997_v37, %v5675_v62 }
 0x31d   : > { %v5768_v57 = vadd.f32 %v4103_v29, %v2507_v42 }
 0x31e   : > { %v3998_v58 = vpop.f32.mrb[96].mxu1 }
 0x31f   : > { %v4104_v32 = vpop.f32.mrb[124].mxu0  ;;  %v3999_v11 = vpop.f32.mrb[97].mxu1 }
 0x320   : > { %v4000_v33 = vadd.f32 %v3999_v11, %v3998_v58  ;;  %v4105_v21 = vpop.f32.mrb[125].mxu0  ;;  %v4001_v19 = vpop.f32.mrb[98].mxu1 }
 0x321   : > { %v4106_v24 = vadd.f32 %v4105_v21, %v4104_v32  ;;  %v4107_v18 = vpop.f32.mrb[126].mxu0  ;;  %v4002_v54 = vpop.f32.mrb[99].mxu1 }
 0x322   : > { %v2520_v22 = vadd.f32 %v4000_v33, %v5679_v52  ;;  %v4003_v0 = vadd.f32 %v4002_v54, %v4001_v19  ;;  %v4108_v48 = vpop.f32.mrb[127].mxu0 }
 0x323   : > { %v4109_v26 = vadd.f32 %v4108_v48, %v4107_v18  ;;  %v5771_v56 = vadd.f32 %v4106_v24, %v2512_v51 }
 0x324   : > { %v2523_v62 = vadd.f32 %v4003_v0, %v5681_v14 }
 0x325   : > { %v5774_v43 = vadd.f32 %v4109_v26, %v2515_v17 }
 0x326   : > { %v4004_v34 = vpop.f32.mrb[100].mxu1 }
 0x327   : > { %v4110_v31 = vpop.f32.mrb[128].mxu0  ;;  %v4005_v15 = vpop.f32.mrb[101].mxu1 }
 0x328   : > { %v4006_v42 = vadd.f32 %v4005_v15, %v4004_v34  ;;  %v4111_v5 = vpop.f32.mrb[129].mxu0  ;;  %v4007_v30 = vpop.f32.mrb[102].mxu1 }
 0x329   : > { %v4112_v3 = vadd.f32 %v4111_v5, %v4110_v31  ;;  %v4113_v10 = vpop.f32.mrb[130].mxu0  ;;  %v4008_v27 = vpop.f32.mrb[103].mxu1 }
 0x32a   : > { %v2528_v52 = vadd.f32 %v4006_v42, %v5685_v45  ;;  %v4009_v55 = vadd.f32 %v4008_v27, %v4007_v30  ;;  %v4114_v40 = vpop.f32.mrb[131].mxu0 }
 0x32b   : > { %v4115_v35 = vadd.f32 %v4114_v40, %v4113_v10  ;;  %v5777_v12 = vadd.f32 %v4112_v3, %v2520_v22 }
 0x32c   : > { %v2531_v14 = vadd.f32 %v4009_v55, %v5687_v1 }
 0x32d   : > { %v5780_v51 = vadd.f32 %v4115_v35, %v2523_v62 }
 0x32e   : > { %v4010_v37 = vpop.f32.mrb[104].mxu1 }
 0x32f   : > { %v4116_v63 = vpop.f32.mrb[132].mxu0  ;;  %v4011_v29 = vpop.f32.mrb[105].mxu1 }
 0x330   : > { %v4012_v17 = vadd.f32 %v4011_v29, %v4010_v37  ;;  %v4117_v58 = vpop.f32.mrb[133].mxu0  ;;  %v4013_v32 = vpop.f32.mrb[106].mxu1 }
 0x331   : > { %v4118_v11 = vadd.f32 %v4117_v58, %v4116_v63  ;;  %v4119_v33 = vpop.f32.mrb[134].mxu0  ;;  %v4014_v21 = vpop.f32.mrb[107].mxu1 }
 0x332   : > { %v2536_v45 = vadd.f32 %v4012_v17, %v5691_v8  ;;  %v4015_v19 = vadd.f32 %v4014_v21, %v4013_v32  ;;  %v4120_v24 = vpop.f32.mrb[135].mxu0 }
 0x333   : > { %v4121_v18 = vadd.f32 %v4120_v24, %v4119_v33  ;;  %v5783_v54 = vadd.f32 %v4118_v11, %v2528_v52 }
 0x334   : > { %v2539_v1 = vadd.f32 %v4015_v19, %v5694_v44 }
 0x335   : > { %v5786_v22 = vadd.f32 %v4121_v18, %v2531_v14 }
 0x336   : > { %v4016_v0 = vpop.f32.mrb[108].mxu1 }
 0x337   : > { %v4122_v48 = vpop.f32.mrb[136].mxu0  ;;  %v4017_v26 = vpop.f32.mrb[109].mxu1 }
 0x338   : > { %v4018_v62 = vadd.f32 %v4017_v26, %v4016_v0  ;;  %v4123_v34 = vpop.f32.mrb[137].mxu0  ;;  %v4019_v31 = vpop.f32.mrb[110].mxu1 }
 0x339   : > { %v4124_v15 = vadd.f32 %v4123_v34, %v4122_v48  ;;  %v4125_v42 = vpop.f32.mrb[138].mxu0  ;;  %v4020_v5 = vpop.f32.mrb[111].mxu1 }
 0x33a   : > { %v2544_v8 = vadd.f32 %v4018_v62, %v5698_v61  ;;  %v4021_v30 = vadd.f32 %v4020_v5, %v4019_v31  ;;  %v4126_v3 = vpop.f32.mrb[139].mxu0 }
 0x33b   : > { %v4127_v10 = vadd.f32 %v4126_v3, %v4125_v42  ;;  %v5789_v27 = vadd.f32 %v4124_v15, %v2536_v45 }
 0x33c   : > { %v2547_v44 = vadd.f32 %v4021_v30, %v5700_v4 }
 0x33d   : > { %v5792_v52 = vadd.f32 %v4127_v10, %v2539_v1 }
 0x33e   : > { %v4022_v55 = vpop.f32.mrb[112].mxu1 }
 0x33f   : > { %v4128_v40 = vpop.f32.mrb[140].mxu0  ;;  %v4023_v35 = vpop.f32.mrb[113].mxu1 }
 0x340   : > { %v4024_v14 = vadd.f32 %v4023_v35, %v4022_v55  ;;  %v4129_v37 = vpop.f32.mrb[141].mxu0  ;;  %v4025_v63 = vpop.f32.mrb[114].mxu1 }
 0x341   : > { %v4130_v29 = vadd.f32 %v4129_v37, %v4128_v40  ;;  %v4131_v17 = vpop.f32.mrb[142].mxu0  ;;  %v4026_v58 = vpop.f32.mrb[115].mxu1 }
 0x342   : > { %v2552_v61 = vadd.f32 %v4024_v14, %v5704_v47  ;;  %v4027_v32 = vadd.f32 %v4026_v58, %v4025_v63  ;;  %v4132_v11 = vpop.f32.mrb[143].mxu0 }
 0x343   : > { %v4133_v33 = vadd.f32 %v4132_v11, %v4131_v17  ;;  %v5795_v21 = vadd.f32 %v4130_v29, %v2544_v8 }
 0x344   : > { %v2555_v4 = vadd.f32 %v4027_v32, %v5706_v39 }
 0x345   : > { %v5798_v45 = vadd.f32 %v4133_v33, %v2547_v44 }
 0x346   : > { %v4028_v19 = vpop.f32.mrb[116].mxu1 }
 0x347   : > { %v4134_v24 = vpop.f32.mrb[144].mxu0  ;;  %v4029_v18 = vpop.f32.mrb[117].mxu1 }
 0x348   : > { %v4030_v1 = vadd.f32 %v4029_v18, %v4028_v19  ;;  %v4135_v0 = vpop.f32.mrb[145].mxu0  ;;  %v4031_v48 = vpop.f32.mrb[118].mxu1 }
 0x349   : > { %v4136_v26 = vadd.f32 %v4135_v0, %v4134_v24  ;;  %v4137_v62 = vpop.f32.mrb[146].mxu0  ;;  %v4032_v34 = vpop.f32.mrb[119].mxu1 }
 0x34a   : > { %v2560_v47 = vadd.f32 %v4030_v1, %v5710_v49  ;;  %v4033_v31 = vadd.f32 %v4032_v34, %v4031_v48  ;;  %v4138_v15 = vpop.f32.mrb[147].mxu0 }
 0x34b   : > { %v4139_v42 = vadd.f32 %v4138_v15, %v4137_v62  ;;  %v5801_v5 = vadd.f32 %v4136_v26, %v2552_v61 }
 0x34c   : > { %v2563_v39 = vadd.f32 %v4033_v31, %v5712_v20 }
 0x34d   : > { %v5804_v8 = vadd.f32 %v4139_v42, %v2555_v4 }
 0x34e   : > { %v4034_v30 = vpop.f32.mrb[120].mxu1 }
 0x34f   : > { %v4140_v3 = vpop.f32.mrb[148].mxu0  ;;  %v4035_v10 = vpop.f32.mrb[121].mxu1 }
 0x350   : > { %v4036_v44 = vadd.f32 %v4035_v10, %v4034_v30  ;;  %v4141_v55 = vpop.f32.mrb[149].mxu0  ;;  %v4037_v40 = vpop.f32.mrb[122].mxu1 }
 0x351   : > { %v4142_v35 = vadd.f32 %v4141_v55, %v4140_v3  ;;  %v4143_v14 = vpop.f32.mrb[150].mxu0  ;;  %v4038_v37 = vpop.f32.mrb[123].mxu1 }
 0x352   : > { %v2568_v49 = vadd.f32 %v4036_v44, %v5716_v41  ;;  %v4039_v63 = vadd.f32 %v4038_v37, %v4037_v40  ;;  %v4144_v29 = vpop.f32.mrb[151].mxu0 }
 0x353   : > { %v4145_v17 = vadd.f32 %v4144_v29, %v4143_v14  ;;  %v5807_v58 = vadd.f32 %v4142_v35, %v2560_v47 }
 0x354   : > { %v2571_v20 = vadd.f32 %v4039_v63, %v5718_v7 }
 0x355   : > { %v5810_v61 = vadd.f32 %v4145_v17, %v2563_v39 }
 0x356   : > { %v4040_v32 = vpop.f32.mrb[124].mxu1 }
 0x357   : > { %v4146_v11 = vpop.f32.mrb[152].mxu0  ;;  %v4041_v33 = vpop.f32.mrb[125].mxu1 }
 0x358   : > { %v4042_v4 = vadd.f32 %v4041_v33, %v4040_v32  ;;  %v4147_v19 = vpop.f32.mrb[153].mxu0  ;;  %v4043_v24 = vpop.f32.mrb[126].mxu1 }
 0x359   : > { %v4148_v18 = vadd.f32 %v4147_v19, %v4146_v11  ;;  %v4149_v1 = vpop.f32.mrb[154].mxu0  ;;  %v4044_v0 = vpop.f32.mrb[127].mxu1 }
 0x35a   : > { %v2576_v41 = vadd.f32 %v4042_v4, %v5723_v23  ;;  %v4045_v48 = vadd.f32 %v4044_v0, %v4043_v24  ;;  %v4150_v26 = vpop.f32.mrb[155].mxu0 }
 0x35b   : > { %v4151_v62 = vadd.f32 %v4150_v26, %v4149_v1  ;;  %v5813_v34 = vadd.f32 %v4148_v18, %v2568_v49 }
 0x35c   : > { %v2579_v7 = vadd.f32 %v4045_v48, %v5726_v46 }
 0x35d   : > { %v5816_v47 = vadd.f32 %v4151_v62, %v2571_v20 }
 0x35e   : > { %v4248_v31 = vpop.f32.mrb[128].mxu1 }
 0x35f   : > { %v4152_v15 = vpop.f32.mrb[156].mxu0  ;;  %v2786_v42 = vadd.f32 %v4248_v31, %v5735_v38  ;;  %v2777_v39 = vpop.f32.mrb[129].mxu1 }
 0x360   : > { %v4153_v30 = vpop.f32.mrb[157].mxu0  ;;  %v2778_v3 = vadd.f32 %v2777_v39, %v5729_v59  ;;  %v4249_v10 = vpop.f32.mrb[130].mxu1 }
 0x361   : > { %v4154_v23 = vadd.f32 %v4153_v30, %v4152_v15  ;;  %v4155_v44 = vpop.f32.mrb[158].mxu0  ;;  %v2789_v55 = vadd.f32 %v4249_v10, %v5738_v9  ;;  %v2780_v40 = vpop.f32.mrb[131].mxu1  ;;  %v3104_v9 = vmul.f32 %v2786_v42, %v2786_v42 }
 0x362   : > { %v4156_v35 = vpop.f32.mrb[159].mxu0  ;;  %v2781_v46 = vadd.f32 %v2780_v40, %v5732_v6  ;;  %v3102_v63 = vmul.f32 %v2778_v3, %v2778_v3 }
 0x363   : > { %v3599_v14 = vpack.c.bf16 %v2789_v55, %v2786_v42  ;;  %v4157_v37 = vadd.f32 %v4156_v35, %v4155_v44  ;;  %v5822_v49 = vadd.f32 %v4154_v23, %v2576_v41  ;;  %v3105_v4 = vmul.f32 %v2789_v55, %v2789_v55 }
 0x364   : > { %v3594_v38 = vpack.c.bf16 %v2781_v46, %v2778_v3  ;;  %v3064_v29 = vadd.f32 %v2781_v46, %v2778_v3  ;;  %v3103_v17 = vmul.f32 %v2781_v46, %v2781_v46 }
 0x365   : > { %3671 = vst [vmem:[%s5826_s26 + $0x8] sm:$0xff] %v3599_v14   ;;  %v5829_v59 = vadd.f32 %v4157_v37, %v2579_v7 }
 0x366   : > { %3595 = vst [vmem:[%s5826_s26] sm:$0xff] %v3594_v38   ;;  %v3065_v20 = vadd.f32 %v3064_v29, %v2786_v42  ;;  %v3134_v6 = vadd.f32 %v3103_v17, %v3102_v63  ;;  %v4252_v32 = vpop.f32.mrb[132].mxu1 }
 0x367   : > { %v2802_v11 = vadd.f32 %v4252_v32, %v5747_v28  ;;  %v2793_v33 = vpop.f32.mrb[133].mxu1 }
 0x368   : > { %v3135_v19 = vadd.f32 %v3134_v6, %v3104_v9  ;;  %v2794_v24 = vadd.f32 %v2793_v33, %v5741_v50  ;;  %v3066_v18 = vadd.f32 %v3065_v20, %v2789_v55  ;;  %v4253_v1 = vpop.f32.mrb[134].mxu1 }
 0x369   : > { %v2805_v0 = vadd.f32 %v4253_v1, %v5750_v25  ;;  %v2796_v41 = vpop.f32.mrb[135].mxu1  ;;  %v3108_v30 = vmul.f32 %v2802_v11, %v2802_v11 }
 0x36a   : > { %v3067_v48 = vadd.f32 %v3066_v18, %v2794_v24  ;;  %v3106_v26 = vmul.f32 %v2794_v24, %v2794_v24  ;;  %v3136_v62 = vadd.f32 %v3135_v19, %v3105_v4  ;;  %v2797_v7 = vadd.f32 %v2796_v41, %v5744_v2 }
 0x36b   : > { %v3609_v31 = vpack.c.bf16 %v2805_v0, %v2802_v11  ;;  %v3109_v44 = vmul.f32 %v2805_v0, %v2805_v0 }
 0x36c   : > { %v3137_v15 = vadd.f32 %v3136_v62, %v3106_v26  ;;  %v3604_v28 = vpack.c.bf16 %v2797_v7, %v2794_v24  ;;  %v3068_v42 = vadd.f32 %v3067_v48, %v2797_v7  ;;  %v3107_v39 = vmul.f32 %v2797_v7, %v2797_v7 }
 0x36d   : > { %3673 = vst [vmem:[%s5826_s26 + $0x18] sm:$0xff] %v3609_v31  }
 0x36e   : > { %3672 = vst [vmem:[%s5826_s26 + $0x10] sm:$0xff] %v3604_v28   ;;  %v3069_v50 = vadd.f32 %v3068_v42, %v2802_v11  ;;  %v3138_v3 = vadd.f32 %v3137_v15, %v3107_v39  ;;  %v4256_v10 = vpop.f32.mrb[136].mxu1 }
 0x36f   : > { %v2818_v23 = vadd.f32 %v4256_v10, %v5759_v13  ;;  %v2809_v25 = vpop.f32.mrb[137].mxu1 }
 0x370   : > { %v3139_v55 = vadd.f32 %v3138_v3, %v3108_v30  ;;  %v2810_v40 = vadd.f32 %v2809_v25, %v5753_v16  ;;  %v3070_v2 = vadd.f32 %v3069_v50, %v2805_v0  ;;  %v4257_v35 = vpop.f32.mrb[138].mxu1 }
 0x371   : > { %v2821_v46 = vadd.f32 %v4257_v35, %v5762_v60  ;;  %v2812_v14 = vpop.f32.mrb[139].mxu1  ;;  %v3112_v32 = vmul.f32 %v2818_v23, %v2818_v23 }
 0x372   : > { %v3071_v37 = vadd.f32 %v3070_v2, %v2810_v40  ;;  %v3110_v63 = vmul.f32 %v2810_v40, %v2810_v40  ;;  %v3140_v38 = vadd.f32 %v3139_v55, %v3109_v44  ;;  %v2813_v29 = vadd.f32 %v2812_v14, %v5756_v53 }
 0x373   : > { %v3619_v17 = vpack.c.bf16 %v2821_v46, %v2818_v23  ;;  %v3113_v19 = vmul.f32 %v2821_v46, %v2821_v46 }
 0x374   : > { %v3141_v9 = vadd.f32 %v3140_v38, %v3110_v63  ;;  %v3614_v13 = vpack.c.bf16 %v2813_v29, %v2810_v40  ;;  %v3072_v20 = vadd.f32 %v3071_v37, %v2813_v29  ;;  %v3111_v6 = vmul.f32 %v2813_v29, %v2813_v29 }
 0x375   : > { %3675 = vst [vmem:[%s5826_s26 + $0x28] sm:$0xff] %v3619_v17  }
 0x376   : > { %3674 = vst [vmem:[%s5826_s26 + $0x20] sm:$0xff] %v3614_v13   ;;  %v3073_v16 = vadd.f32 %v3072_v20, %v2818_v23  ;;  %v3142_v11 = vadd.f32 %v3141_v9, %v3111_v6  ;;  %v4260_v33 = vpop.f32.mrb[140].mxu1 }
 0x377   : > { %v2834_v4 = vadd.f32 %v4260_v33, %v5771_v56  ;;  %v2825_v60 = vpop.f32.mrb[141].mxu1 }
 0x378   : > { %v3143_v24 = vadd.f32 %v3142_v11, %v3112_v32  ;;  %v2826_v18 = vadd.f32 %v2825_v60, %v5765_v36  ;;  %v3074_v53 = vadd.f32 %v3073_v16, %v2821_v46  ;;  %v4261_v1 = vpop.f32.mrb[142].mxu1 }
 0x379   : > { %v2837_v0 = vadd.f32 %v4261_v1, %v5774_v43  ;;  %v2828_v41 = vpop.f32.mrb[143].mxu1  ;;  %v3116_v39 = vmul.f32 %v2834_v4, %v2834_v4 }
 0x37a   : > { %v3075_v48 = vadd.f32 %v3074_v53, %v2826_v18  ;;  %v3114_v26 = vmul.f32 %v2826_v18, %v2826_v18  ;;  %v3144_v62 = vadd.f32 %v3143_v24, %v3113_v19  ;;  %v2829_v7 = vadd.f32 %v2828_v41, %v5768_v57 }
 0x37b   : > { %v3629_v31 = vpack.c.bf16 %v2837_v0, %v2834_v4  ;;  %v3117_v10 = vmul.f32 %v2837_v0, %v2837_v0 }
 0x37c   : > { %v3145_v15 = vadd.f32 %v3144_v62, %v3114_v26  ;;  %v3624_v56 = vpack.c.bf16 %v2829_v7, %v2826_v18  ;;  %v3076_v28 = vadd.f32 %v3075_v48, %v2829_v7  ;;  %v3115_v42 = vmul.f32 %v2829_v7, %v2829_v7 }
 0x37d   : > { %3677 = vst [vmem:[%s5826_s26 + $0x38] sm:$0xff] %v3629_v31  }
 0x37e   : > { %3676 = vst [vmem:[%s5826_s26 + $0x30] sm:$0xff] %v3624_v56   ;;  %v3077_v36 = vadd.f32 %v3076_v28, %v2834_v4  ;;  %v3146_v30 = vadd.f32 %v3145_v15, %v3115_v42  ;;  %v4264_v50 = vpop.f32.mrb[144].mxu1 }
 0x37f   : > { %v2850_v3 = vadd.f32 %v4264_v50, %v5783_v54  ;;  %v2841_v43 = vpop.f32.mrb[145].mxu1 }
 0x380   : > { %v3147_v23 = vadd.f32 %v3146_v30, %v3116_v39  ;;  %v2842_v25 = vadd.f32 %v2841_v43, %v5777_v12  ;;  %v3078_v57 = vadd.f32 %v3077_v36, %v2837_v0  ;;  %v4265_v44 = vpop.f32.mrb[146].mxu1 }
 0x381   : > { %v2853_v55 = vadd.f32 %v4265_v44, %v5786_v22  ;;  %v2844_v40 = vpop.f32.mrb[147].mxu1  ;;  %v3120_v17 = vmul.f32 %v2850_v3, %v2850_v3 }
 0x382   : > { %v3079_v2 = vadd.f32 %v3078_v57, %v2842_v25  ;;  %v3118_v35 = vmul.f32 %v2842_v25, %v2842_v25  ;;  %v3148_v46 = vadd.f32 %v3147_v23, %v3117_v10  ;;  %v2845_v14 = vadd.f32 %v2844_v40, %v5780_v51 }
 0x383   : > { %v3639_v37 = vpack.c.bf16 %v2853_v55, %v2850_v3  ;;  %v3121_v6 = vmul.f32 %v2853_v55, %v2853_v55 }
 0x384   : > { %v3149_v63 = vadd.f32 %v3148_v46, %v3118_v35  ;;  %v3634_v54 = vpack.c.bf16 %v2845_v14, %v2842_v25  ;;  %v3080_v38 = vadd.f32 %v3079_v2, %v2845_v14  ;;  %v3119_v29 = vmul.f32 %v2845_v14, %v2845_v14 }
 0x385   : > { %3679 = vst [vmem:[%s5826_s26 + $0x48] sm:$0xff] %v3639_v37  }
 0x386   : > { %3678 = vst [vmem:[%s5826_s26 + $0x40] sm:$0xff] %v3634_v54   ;;  %v3081_v12 = vadd.f32 %v3080_v38, %v2850_v3  ;;  %v3150_v9 = vadd.f32 %v3149_v63, %v3119_v29  ;;  %v4268_v13 = vpop.f32.mrb[148].mxu1 }
 0x387   : > { %v2866_v20 = vadd.f32 %v4268_v13, %v5795_v21  ;;  %v2857_v22 = vpop.f32.mrb[149].mxu1 }
 0x388   : > { %v3151_v32 = vadd.f32 %v3150_v9, %v3120_v17  ;;  %v2858_v16 = vadd.f32 %v2857_v22, %v5789_v27  ;;  %v3082_v51 = vadd.f32 %v3081_v12, %v2853_v55  ;;  %v4269_v11 = vpop.f32.mrb[150].mxu1 }
 0x389   : > { %v2869_v33 = vadd.f32 %v4269_v11, %v5798_v45  ;;  %v2860_v4 = vpop.f32.mrb[151].mxu1  ;;  %v3124_v48 = vmul.f32 %v2866_v20, %v2866_v20 }
 0x38a   : > { %v3083_v60 = vadd.f32 %v3082_v51, %v2858_v16  ;;  %v3122_v19 = vmul.f32 %v2858_v16, %v2858_v16  ;;  %v3152_v24 = vadd.f32 %v3151_v32, %v3121_v6  ;;  %v2861_v18 = vadd.f32 %v2860_v4, %v5792_v52 }
 0x38b   : > { %v3649_v53 = vpack.c.bf16 %v2869_v33, %v2866_v20  ;;  %v3125_v31 = vmul.f32 %v2869_v33, %v2869_v33 }
 0x38c   : > { %v3153_v1 = vadd.f32 %v3152_v24, %v3122_v19  ;;  %v3644_v21 = vpack.c.bf16 %v2861_v18, %v2858_v16  ;;  %v3084_v0 = vadd.f32 %v3083_v60, %v2861_v18  ;;  %v3123_v41 = vmul.f32 %v2861_v18, %v2861_v18 }
 0x38d   : > { %3681 = vst [vmem:[%s5826_s26 + $0x58] sm:$0xff] %v3649_v53  }
 0x38e   : > { %3680 = vst [vmem:[%s5826_s26 + $0x50] sm:$0xff] %v3644_v21   ;;  %v3085_v27 = vadd.f32 %v3084_v0, %v2866_v20  ;;  %v3154_v26 = vadd.f32 %v3153_v1, %v3123_v41  ;;  %v4272_v62 = vpop.f32.mrb[152].mxu1 }
 0x38f   : > { %v2882_v7 = vadd.f32 %v4272_v62, %v5807_v58  ;;  %v2873_v45 = vpop.f32.mrb[153].mxu1 }
 0x390   : > { %v3155_v15 = vadd.f32 %v3154_v26, %v3124_v48  ;;  %v2874_v56 = vadd.f32 %v2873_v45, %v5801_v5  ;;  %v3086_v52 = vadd.f32 %v3085_v27, %v2869_v33  ;;  %v4273_v28 = vpop.f32.mrb[154].mxu1 }
 0x391   : > { %v2885_v42 = vadd.f32 %v4273_v28, %v5810_v61  ;;  %v2876_v39 = vpop.f32.mrb[155].mxu1  ;;  %v3128_v5 = vmul.f32 %v2882_v7, %v2882_v7 }
 0x392   : > { %v3087_v36 = vadd.f32 %v3086_v52, %v2874_v56  ;;  %v3126_v30 = vmul.f32 %v2874_v56, %v2874_v56  ;;  %v3156_v50 = vadd.f32 %v3155_v15, %v3125_v31  ;;  %v2877_v3 = vadd.f32 %v2876_v39, %v5804_v8 }
 0x393   : > { %v3659_v43 = vpack.c.bf16 %v2885_v42, %v2882_v7  ;;  %v3129_v2 = vmul.f32 %v2885_v42, %v2885_v42 }
 0x394   : > { %v3157_v10 = vadd.f32 %v3156_v50, %v3126_v30  ;;  %v3654_v58 = vpack.c.bf16 %v2877_v3, %v2874_v56  ;;  %v3088_v23 = vadd.f32 %v3087_v36, %v2877_v3  ;;  %v3127_v25 = vmul.f32 %v2877_v3, %v2877_v3 }
 0x395   : > { %3683 = vst [vmem:[%s5826_s26 + $0x68] sm:$0xff] %v3659_v43  }
 0x396   : > { %3682 = vst [vmem:[%s5826_s26 + $0x60] sm:$0xff] %v3654_v58   ;;  %v3089_v57 = vadd.f32 %v3088_v23, %v2882_v7  ;;  %v3158_v44 = vadd.f32 %v3157_v10, %v3127_v25  ;;  %v4276_v55 = vpop.f32.mrb[156].mxu1 }
 0x397   : > { %v2898_v61 = vadd.f32 %v4276_v55, %v5822_v49  ;;  %v2889_v40 = vpop.f32.mrb[157].mxu1 }
 0x398   : > { %v3159_v35 = vadd.f32 %v3158_v44, %v3128_v5  ;;  %v2890_v8 = vadd.f32 %v2889_v40, %v5813_v34  ;;  %v3090_v46 = vadd.f32 %v3089_v57, %v2885_v42  ;;  %v4277_v14 = vpop.f32.mrb[158].mxu1 }
 0x399   : > { %v2901_v37 = vadd.f32 %v4277_v14, %v5829_v59  ;;  %v2892_v63 = vpop.f32.mrb[159].mxu1  ;;  %v3132_v13 = vmul.f32 %v2898_v61, %v2898_v61 }
 0x39a   : > { %v3091_v54 = vadd.f32 %v3090_v46, %v2890_v8  ;;  %v3130_v38 = vmul.f32 %v2890_v8, %v2890_v8  ;;  %v3160_v29 = vadd.f32 %v3159_v35, %v3129_v2  ;;  %v2893_v49 = vadd.f32 %v2892_v63, %v5816_v47 }
 0x39b   : > { %v3669_v17 = vpack.c.bf16 %v2901_v37, %v2898_v61 }
 0x39c   : > { %v3161_v34 = vadd.f32 %v3160_v29, %v3130_v38  ;;  %v3664_v59 = vpack.c.bf16 %v2893_v49, %v2890_v8  ;;  %v3092_v12 = vadd.f32 %v3091_v54, %v2893_v49  ;;  %v3131_v9 = vmul.f32 %v2893_v49, %v2893_v49 }
 0x39d   : > { %3685 = vst [vmem:[%s5826_s26 + $0x78] sm:$0xff] %v3669_v17  }
 0x39e   : > { %3684 = vst [vmem:[%s5826_s26 + $0x70] sm:$0xff] %v3664_v59   ;;  %v3093_v47 = vadd.f32 %v3092_v12, %v2898_v61  ;;  %v3162_v20 = vadd.f32 %v3161_v34, %v3131_v9 }
 0x39f   : > { %4684 = shalt.err (!%p4681_p13)
}
 0x3a0   : > { %s4685_s17 = scalar_lea.hbm %s5877_s13, 2048  ;;  %s4689_s20 = scalar_lea.hbm %s6001_s6, 4096 }
 0x3a1   : > { %p4686_p6 = scmp.ne.s32.totalorder %s5877_s13, %s4685_s17  ;;  %p4690_p5 = scmp.lt.u32.totalorder %s5877_s13, %s6001_s6 }
 0x3a2   : > { %p4691_p8 = scmp.lt.u32.totalorder %s4689_s20, %s4685_s17  ;;  %p4693_p0 = scmp.lt.u32.totalorder %s4685_s17, %s5877_s13 }
 0x3a3   : > { %p4687_p10 = pnand %p4686_p6, %p6025_p2 }
 0x3a4   : > { %p4692_p11 = por %p4691_p8, %p4690_p5 }
 0x3a5   : > { %p4688_p4 = pneg %p4687_p10 }
 0x3a6   : > { %p4694_p3 = por %p4693_p0, %p4692_p11 }
 0x3a8   : > { %p4695_p7 = pnand %p4694_p3, %p4688_p4 }
 0x3aa   : > { %4698 = shalt.err (!%p4695_p7)
}
 0x3ab   : > { %s4810_s10 = smov 64   ;;  %s4811_s18 = smov 4   ;;  %v3133_v22 = vmul.f32 %v2901_v37, %v2901_v37  ;;  %v3094_v6 = vadd.f32 %v3093_v47, %v2901_v37  ;;  %v3163_v32 = vadd.f32 %v3162_v20, %v3132_v13 }
 0x3ac   : > { %4288 = dma.vmem_to_hbm [thread:$0]  (%p6025_p2), %s5879_s25, 2048, %s5877_s13, %s3173_s14, %s4810_s10, %s4810_s10, %s4811_s18  }
 0x3ad   : > { %v3095_v16 = vrot.slane %v3094_v6, 4  ;;  %v3164_v51 = vadd.f32 %v3163_v32, %v3133_v22  ;;  %s3177_s15 = sand.u32 1, %s4880_s9   ;;  %s3553_s17 = sshll.u32 %s4880_s9, 4 }
 0x3ae   : > { %s373_s26 = scalar_lea.vmem [#allocation10], %s5042_s19  ;;  %s6010_s25 = scalar_lea.vmem [#allocation12], %s5042_s19 }
 0x3af   : > { %v3096_v11 = vadd.f32 %v3095_v16, %v3094_v6  ;;  %v3165_v33 = vrot.slane %v3164_v51, 4  ;;  %s3210_s24 = sshll.u32 %s373_s26, 4  ;;  %s3223_s13 = sshll.u32 %s6010_s25, 4  ;;  %s5918_s24 = int_to_ptr.vmem [resolvable:$true] %s3210_s24  ;;  %s5925_s13 = int_to_ptr.vmem [resolvable:$true] %s3223_s13 }
 0x3b0   : > { %s5916_s11 = scalar_lea.hbm %s6002_s7, %s3553_s17  ;;  %s5923_s10 = scalar_lea.hbm %s6003_s8, %s3553_s17 }
 0x3b1   : > { %v3097_v4 = vrot.slane %v3096_v11, 2  ;;  %v3166_v60 = vadd.f32 %v3165_v33, %v3164_v51  ;;  %s5927_s18 = scalar_lea.sflag [#allocation11], %s3177_s15  ;;  %s4699_s14 = scalar_lea.vmem %s5918_s24, 16 }
 0x3b2   : > { %p4700_p9 = scmp.ne.s32.totalorder %s5918_s24, %s4699_s14  ;;  %s4812_s20 = smov [#allocation10]  }
 0x3b3   : > { %v3167_v19 = vrot.slane %v3166_v60, 2  ;;  %v3098_v24 = vadd.f32 %v3097_v4, %v3096_v11  ;;  %s4703_s25 = sshll.u32 %s4812_s20, 4  ;;  %s4704_s25 = int_to_ptr.vmem [resolvable:$false] %s4703_s25 }
 0x3b4   : > { %p4701_p12 = pnand %p4700_p9, %p6025_p2  ;;  %s4705_s0 = scalar_lea.vmem %s4704_s25, 32 }
 0x3b5   : > { %v3099_v18 = vrot.slane %v3098_v24, 1  ;;  %v3168_v53 = vadd.f32 %v3167_v19, %v3166_v60  ;;  %p4706_p13 = scmp.lt.s32.totalorder %s5918_s24, %s4704_s25  ;;  %p4707_p6 = scmp.lt.s32.totalorder %s4705_s0, %s4699_s14 }
 0x3b6   : > { %p4702_p1 = pneg %p4701_p12 }
 0x3b7   : > { %v3100_v1 = vadd.f32 %v3099_v18, %v3098_v24  ;;  %v3169_v21 = vrot.slane %v3168_v53, 1  ;;  %p4708_p10 = por %p4707_p6, %p4706_p13 }
 0x3b9   : > { %3101 = vst [vmem:[%s373_s26] sm:$0x1] %v3100_v1  ;;  %v3170_v0 = vadd.f32 %v3169_v21, %v3168_v53  ;;  %p4709_p4 = pnand %p4708_p10, %p4702_p1 }
 0x3bb   : > { %4712 = shalt.err (!%p4709_p4)
}
 0x3bc   : > { %s4713_s15 = scalar_lea.hbm %s5916_s11, 16  ;;  %s4717_s9 = scalar_lea.hbm %s6002_s7, 32 }
 0x3bd   : > { %p4714_p5 = scmp.ne.s32.totalorder %s5916_s11, %s4713_s15  ;;  %p4718_p0 = scmp.lt.u32.totalorder %s5916_s11, %s6002_s7 }
 0x3be   : > { %p4719_p3 = scmp.lt.u32.totalorder %s4717_s9, %s4713_s15  ;;  %p4721_p9 = scmp.lt.u32.totalorder %s4713_s15, %s5916_s11 }
 0x3bf   : > { %p4715_p8 = pnand %p4714_p5, %p6025_p2 }
 0x3c0   : > { %p4720_p7 = por %p4719_p3, %p4718_p0 }
 0x3c1   : > { %p4716_p11 = pneg %p4715_p8 }
 0x3c2   : > { %p4722_p12 = por %p4721_p9, %p4720_p7 }
 0x3c4   : > { %p4723_p1 = pnand %p4722_p12, %p4716_p11 }
 0x3c6   : > { %4726 = shalt.err (!%p4723_p1)
}
 0x3c7   : > { %4289 = dma.vmem_to_hbm [thread:$0]  (%p6025_p2), %s5918_s24, 16, %s5916_s11, %s5927_s18  }
 0x3c8   : > { %s6026_s0 = scalar_lea.vmem [#allocation12], %s5042_s19  ;;  %s4727_s14 = scalar_lea.vmem %s5925_s13, 16 }
 0x3c9   : > { %3171 = vst [vmem:[%s6026_s0] sm:$0x1] %v3170_v0  ;;  %p4728_p13 = scmp.ne.s32.totalorder %s5925_s13, %s4727_s14  ;;  %s4813_s20 = smov [#allocation12]  }
 0x3ca   : > { %s4731_s15 = sshll.u32 %s4813_s20, 4  ;;  %s4732_s15 = int_to_ptr.vmem [resolvable:$false] %s4731_s15 }
 0x3cb   : > { %p4729_p6 = pnand %p4728_p13, %p6025_p2  ;;  %s4733_s17 = scalar_lea.vmem %s4732_s15, 32 }
 0x3cc   : > { %p4734_p4 = scmp.lt.s32.totalorder %s5925_s13, %s4732_s15  ;;  %p4735_p5 = scmp.lt.s32.totalorder %s4733_s17, %s4727_s14 }
 0x3cd   : > { %p4730_p10 = pneg %p4729_p6 }
 0x3ce   : > { %p4736_p8 = por %p4735_p5, %p4734_p4 }
 0x3d0   : > { %p4737_p11 = pnand %p4736_p8, %p4730_p10 }
 0x3d2   : > { %4740 = shalt.err (!%p4737_p11)
}
 0x3d3   : > { %s4741_s19 = scalar_lea.hbm %s5923_s10, 16  ;;  %s4745_s26 = scalar_lea.hbm %s6003_s8, 32 }
 0x3d4   : > { %p4742_p0 = scmp.ne.s32.totalorder %s5923_s10, %s4741_s19  ;;  %p4746_p9 = scmp.lt.u32.totalorder %s5923_s10, %s6003_s8 }
 0x3d5   : > { %p4747_p12 = scmp.lt.u32.totalorder %s4745_s26, %s4741_s19  ;;  %p4749_p13 = scmp.lt.u32.totalorder %s4741_s19, %s5923_s10 }
 0x3d6   : > { %p4743_p3 = pnand %p4742_p0, %p6025_p2 }
 0x3d7   : > { %p4748_p1 = por %p4747_p12, %p4746_p9 }
 0x3d8   : > { %p4744_p7 = pneg %p4743_p3 }
 0x3d9   : > { %p4750_p6 = por %p4749_p13, %p4748_p1 }
 0x3db   : > { %p4751_p10 = pnand %p4750_p6, %p4744_p7 }
 0x3dd   : > { %4754 = shalt.err (!%p4751_p10)
}
 0x3de   : > { %4290 = dma.vmem_to_hbm [thread:$0]  (%p6025_p2), %s5925_s13, 16, %s5923_s10, %s5927_s18  }
 0x3df PF: > { %s3235_s25 = sand.u32 1, %s4789_s27   ;;  %p6027_p4 = scmp.ne.s32.totalorder %s6013_s12, 0 }
 0x3e0   : > { %p6028_p5 = scmp.ge.s32.totalorder %s4801_s30, 2  ;;  %s3236_s0 = scalar_lea.sflag [#allocation5], %s3235_s25 }
 0x3e2   : > { %p4306_p8 = pnand %p6028_p5, %p6027_p4 }
 0x3e4   : > { %4780 = dma.done.wait (!%p4306_p8), %s3236_s0, 2048  }
 0x3e5   : > { %4782 = vsyncadd (!%p4306_p8), %s3236_s0, 4294965248  ;;  %s6029_s14 = sadd.s32 4294967294, %s4801_s30  }
 0x3e6   : > { %s3244_s20 = sand.u32 1, %s6029_s14  }
 0x3e7   : > { %s3245_s15 = scalar_lea.sflag [#allocation11], %s3244_s20 }
 0x3e8   : > { %4784 = dma.done.wait (!%p4306_p8), %s3245_s15, 32  }
 0x3e9   : > { %4786 = vsyncadd (!%p4306_p8), %s3245_s15, 4294967264  ;;  %p26_p2 = scmp.ge.s32.totalorder %s4977_s16, 4   ;;  %s6030_s27 = smov %s4793_s28 }
 0x3ea   : > { %s6031_s28 = smov %s4797_s29  ;;  %s6032_s29 = smov %s4993_s23 }
 0x3eb   : > { %s6033_s30 = smov %s4977_s16  ;;  %28 = sbr.rel (!%p26_p2) target bundleno = 10 (0xa), region = 135 }
 0x3f2   :  { %3257 = vsyncpa [#allocation4], 1 }
 0x3f3   :  { %3259 = vsyncpa [#allocation4 + $0x1], 1 }
 0x3f4   :  { %3260 = vsyncpa [#allocation7], 1 }
 0x3f5   :  { %3261 = vsyncpa [#allocation5], 1 }
 0x3f6   :  { %3263 = vsyncpa [#allocation5 + $0x1], 1 }
 0x3f7   :  { %3264 = vsyncpa [#allocation11], 1 }
 0x3f8   :  { %3266 = vsyncpa [#allocation11 + $0x1], 1 }

</bundles_post_ra>
